<compile_context>
chip_gen: v5e
topology: v5e:2x2
jax: 0.10.0
libtpu: 0.0.40
codegen_flags: <defaults>
</compile_context>

<pallas_src>
import functools

import jax
import jax.numpy as jnp
from jax import lax
from jax.experimental import pallas as pl
from jax.experimental.pallas import tpu as pltpu


# ---------------------------------------------------------------------------
# Kernel 1: one propagation layer (tiled, single pass over adj, bf16 MXU)
# ---------------------------------------------------------------------------
def _propagate_kernel(adj_ref, eu_ref, ei_ref, umuls_ref, vmuls_ref,
                      ut_ref, vt_ref,
                      eu_acc_in, gu_acc_in, ei_acc_in, gi_acc_in,
                      zu_out, eu_acc_out, gu_acc_out,
                      zi_out, ei_acc_out, gi_acc_out,
                      zu_scr, zi_scr, vt_ei_scr, ut_eu_scr):
    i = pl.program_id(0)
    j = pl.program_id(1)
    num_i = pl.num_programs(0)
    num_j = pl.num_programs(1)
    tk = adj_ref.shape[1]

    adj = adj_ref[...]          # (tm, tk) bf16
    eu = eu_ref[...]            # (tm, d)  bf16  (previous layer E_u)
    ei = ei_ref[...]            # (tk, d)  bf16  (previous layer E_i)

    @pl.when((i == 0) & (j == 0))
    def _init():
        zi_scr[...] = jnp.zeros_like(zi_scr)
        vt_ei_scr[...] = jnp.zeros_like(vt_ei_scr)
        ut_eu_scr[...] = jnp.zeros_like(ut_eu_scr)

    @pl.when(j == 0)
    def _row_start():
        zu_scr[...] = jnp.zeros_like(zu_scr)
        # ut @ E_u : (q, d), accumulated once over the n_u tiles.
        ut_eu_scr[...] += jnp.dot(ut_ref[...], eu,
                                  preferred_element_type=jnp.float32)

    @pl.when(i == 0)
    def _col_first_row():
        # vt @ E_i : (q, d), accumulated once over the n_i tiles.
        vt_ei_scr[...] += jnp.dot(vt_ref[...], ei,
                                  preferred_element_type=jnp.float32)

    # Single read of the adj tile drives BOTH Z_u and Z_i partial sums.
    zu_scr[...] += jnp.dot(adj, ei, preferred_element_type=jnp.float32)
    zi_part = lax.dot_general(adj, eu, (((0,), (0,)), ((), ())),
                              preferred_element_type=jnp.float32)
    r0 = pl.multiple_of(j * tk, tk)
    zi_scr[pl.ds(r0, tk), :] = zi_scr[pl.ds(r0, tk), :] + zi_part

    # Row tile i finished: emit Z_u tile (bf16 next-layer input) and update the
    # E_u / G_u running layer sums (aliased accumulators).
    @pl.when(j == num_j - 1)
    def _finish_row():
        zu = zu_scr[...]
        zu_out[...] = zu.astype(zu_out.dtype)
        eu_acc_out[...] = eu_acc_in[...] + zu
        g_u = jnp.dot(umuls_ref[...], vt_ei_scr[...].astype(jnp.bfloat16),
                      preferred_element_type=jnp.float32)
        gu_acc_out[...] = gu_acc_in[...] + g_u

    # Whole grid finished: emit Z_i and update E_i / G_i running sums.
    @pl.when((i == num_i - 1) & (j == num_j - 1))
    def _finish_all():
        zi = zi_scr[...]
        zi_out[...] = zi.astype(zi_out.dtype)
        ei_acc_out[...] = ei_acc_in[...] + zi
        g_i = jnp.dot(vmuls_ref[...], ut_eu_scr[...].astype(jnp.bfloat16),
                      preferred_element_type=jnp.float32)
        gi_acc_out[...] = gi_acc_in[...] + g_i


def propagate_layer(adj_b, umuls_b, vmuls_b, ut_b, vt_b,
                    eu_b, ei_b, eu_acc, gu_acc, ei_acc, gi_acc, *, tm, tk):
    n_u, n_i = adj_b.shape
    d = eu_b.shape[1]
    q = umuls_b.shape[1]
    assert n_u % tm == 0 and n_i % tk == 0, "pad n_u/n_i to tile multiples"
    grid = (n_u // tm, n_i // tk)

    out_shape = (
        jax.ShapeDtypeStruct((n_u, d), jnp.bfloat16),   # Z_u (next layer in)
        jax.ShapeDtypeStruct((n_u, d), jnp.float32),    # E_u running sum
        jax.ShapeDtypeStruct((n_u, d), jnp.float32),    # G_u running sum
        jax.ShapeDtypeStruct((n_i, d), jnp.bfloat16),   # Z_i (next layer in)
        jax.ShapeDtypeStruct((n_i, d), jnp.float32),    # E_i running sum
        jax.ShapeDtypeStruct((n_i, d), jnp.float32),    # G_i running sum
    )
    in_specs = [
        pl.BlockSpec((tm, tk), lambda i, j: (i, j)),    # adj tile (bf16)
        pl.BlockSpec((tm, d), lambda i, j: (i, 0)),     # E_u tile (bf16)
        pl.BlockSpec((tk, d), lambda i, j: (j, 0)),     # E_i tile (bf16)
        pl.BlockSpec((tm, q), lambda i, j: (i, 0)),     # u_mul_s tile
        pl.BlockSpec((n_i, q), lambda i, j: (0, 0)),    # v_mul_s (resident)
        pl.BlockSpec((q, tm), lambda i, j: (0, i)),     # ut tile
        pl.BlockSpec((q, tk), lambda i, j: (0, j)),     # vt tile
        pl.BlockSpec((tm, d), lambda i, j: (i, 0)),     # E_u acc (aliased)
        pl.BlockSpec((tm, d), lambda i, j: (i, 0)),     # G_u acc (aliased)
        pl.BlockSpec((n_i, d), lambda i, j: (0, 0)),    # E_i acc (aliased)
        pl.BlockSpec((n_i, d), lambda i, j: (0, 0)),    # G_i acc (aliased)
    ]
    out_specs = (
        pl.BlockSpec((tm, d), lambda i, j: (i, 0)),
        pl.BlockSpec((tm, d), lambda i, j: (i, 0)),
        pl.BlockSpec((tm, d), lambda i, j: (i, 0)),
        pl.BlockSpec((n_i, d), lambda i, j: (0, 0)),
        pl.BlockSpec((n_i, d), lambda i, j: (0, 0)),
        pl.BlockSpec((n_i, d), lambda i, j: (0, 0)),
    )
    scratch_shapes = [
        pltpu.VMEM((tm, d), jnp.float32),   # Z_u row-tile accumulator
        pltpu.VMEM((n_i, d), jnp.float32),  # Z_i accumulator (resident)
        pltpu.VMEM((q, d), jnp.float32),    # vt @ E_i
        pltpu.VMEM((q, d), jnp.float32),    # ut @ E_u
    ]
    return pl.pallas_call(
        _propagate_kernel,
        out_shape=out_shape,
        grid=grid,
        in_specs=in_specs,
        out_specs=out_specs,
        scratch_shapes=scratch_shapes,
        input_output_aliases={7: 1, 8: 2, 9: 4, 10: 5},
        compiler_params=pltpu.CompilerParams(
            # Both grid axes carry reductions into resident state (Z_i / SVD
            # intermediates), so they must be "arbitrary".
            dimension_semantics=("arbitrary", "arbitrary"),
            vmem_limit_bytes=64 * 1024 * 1024),
    )(adj_b, eu_b, ei_b, umuls_b, vmuls_b, ut_b, vt_b,
      eu_acc, gu_acc, ei_acc, gi_acc)


# ---------------------------------------------------------------------------
# Kernel 2: fused SSL (InfoNCE) + BPR, streaming log-sum-exp over node tiles
# ---------------------------------------------------------------------------
def _ssl_bpr_kernel(eu_all_ref, ei_all_ref, gu_ref, gi_ref,
                    eus_ref, eis_ref, pose_ref, nege_ref,
                    negu_ref, negi_ref, posu_ref, posi_ref, bpr_ref,
                    m_u, s_u, m_i, s_i, *, inv_temp, nu_tiles, ni_tiles):
    t = pl.program_id(0)

    @pl.when(t == 0)
    def _init():
        m_u[...] = jnp.full(m_u.shape, -jnp.inf, dtype=jnp.float32)
        s_u[...] = jnp.zeros_like(s_u)
        m_i[...] = jnp.full(m_i.shape, -jnp.inf, dtype=jnp.float32)
        s_i[...] = jnp.zeros_like(s_i)

    @pl.when(t < nu_tiles)
    def _user_tile():
        # 1/temp folded into the small (b, d) operand, not the (b, tile) scores.
        g = gu_ref[...] * inv_temp
        sc = lax.dot_general(g, eu_all_ref[...], (((1,), (1,)), ((), ())),
                             preferred_element_type=jnp.float32)
        m_new = jnp.maximum(m_u[...], jnp.max(sc, axis=1, keepdims=True))
        s_u[...] = (s_u[...] * jnp.exp(m_u[...] - m_new)
                    + jnp.sum(jnp.exp(sc - m_new), axis=1, keepdims=True))
        m_u[...] = m_new

    @pl.when(t >= nu_tiles)
    def _item_tile():
        g = gi_ref[...] * inv_temp
        sc = lax.dot_general(g, ei_all_ref[...], (((1,), (1,)), ((), ())),
                             preferred_element_type=jnp.float32)
        m_new = jnp.maximum(m_i[...], jnp.max(sc, axis=1, keepdims=True))
        s_i[...] = (s_i[...] * jnp.exp(m_i[...] - m_new)
                    + jnp.sum(jnp.exp(sc - m_new), axis=1, keepdims=True))
        m_i[...] = m_new

    @pl.when(t == nu_tiles + ni_tiles - 1)
    def _finalize():
        log_eps = jnp.float32(-18.420680743952367)   # log(1e-8)

        def lse_plus_eps(m, s):
            # stable log(sum(exp(scores)) + 1e-8)
            lse = m + jnp.log(s)
            hi = jnp.maximum(lse, log_eps)
            lo = jnp.minimum(lse, log_eps)
            return hi + jnp.log(1.0 + jnp.exp(lo - hi))

        negu_ref[...] = jnp.sum(lse_plus_eps(m_u[...], s_u[...]), keepdims=True)
        negi_ref[...] = jnp.sum(lse_plus_eps(m_i[...], s_i[...]), keepdims=True)

        eus = eus_ref[...]
        eis = eis_ref[...]
        pos_u = jnp.clip(jnp.sum(gu_ref[...] * eus, axis=1, keepdims=True)
                         * inv_temp, -5.0, 5.0)
        pos_i = jnp.clip(jnp.sum(gi_ref[...] * eis, axis=1, keepdims=True)
                         * inv_temp, -5.0, 5.0)
        posu_ref[...] = jnp.sum(pos_u, keepdims=True)
        posi_ref[...] = jnp.sum(pos_i, keepdims=True)

        # BPR: stable log-sigmoid of (pos - neg) scores.
        ps = jnp.sum(eus * pose_ref[...], axis=1, keepdims=True)
        ns = jnp.sum(eus * nege_ref[...], axis=1, keepdims=True)
        diff = ps - ns
        log_sig = (jnp.minimum(diff, 0.0)
                   - jnp.log(1.0 + jnp.exp(-jnp.abs(diff))))
        bpr_ref[...] = jnp.sum(log_sig, keepdims=True)


def ssl_bpr(eu_all, ei_all, gu_sel, gi_sel, eu_sel, ei_sel, pos_emb, neg_emb,
            temp, *, tn):
    n_u, d = eu_all.shape
    n_i = ei_all.shape[0]
    b = gu_sel.shape[0]
    assert n_u % tn == 0 and n_i % tn == 0, "pad n_u/n_i to tile multiples"
    nu_tiles = n_u // tn
    ni_tiles = n_i // tn
    grid = (nu_tiles + ni_tiles,)

    sel_spec = pl.BlockSpec((b, d), lambda t: (0, 0))
    in_specs = [
        pl.BlockSpec((tn, d), lambda t: (jnp.minimum(t, nu_tiles - 1), 0)),
        pl.BlockSpec((tn, d), lambda t: (jnp.maximum(t - nu_tiles, 0), 0)),
        sel_spec, sel_spec, sel_spec, sel_spec, sel_spec, sel_spec,
    ]
    scalar = jax.ShapeDtypeStruct((1, 1), jnp.float32)
    scalar_spec = pl.BlockSpec((1, 1), lambda t: (0, 0))
    out_shape = (scalar,) * 5
    out_specs = (scalar_spec,) * 5
    scratch_shapes = [pltpu.VMEM((b, 1), jnp.float32) for _ in range(4)]

    kern = functools.partial(_ssl_bpr_kernel, inv_temp=float(1.0 / temp),
                             nu_tiles=nu_tiles, ni_tiles=ni_tiles)
    return pl.pallas_call(
        kern,
        out_shape=out_shape,
        grid=grid,
        in_specs=in_specs,
        out_specs=out_specs,
        scratch_shapes=scratch_shapes,
        compiler_params=pltpu.CompilerParams(
            dimension_semantics=("arbitrary",),
            vmem_limit_bytes=64 * 1024 * 1024),
    )(eu_all, ei_all, gu_sel, gi_sel, eu_sel, ei_sel, pos_emb, neg_emb)


# ---------------------------------------------------------------------------
# LightGCL forward (training path)
# ---------------------------------------------------------------------------
def lightgcl_forward(E_u_0, E_i_0, adj, u_mul_s, v_mul_s, ut, vt,
                     uids, iids, pos, neg,
                     l, temp, lambda_1, lambda_2,
                     tm=128, tk=128, tn=128):
    bf16 = jnp.bfloat16
    adj_b = adj.astype(bf16)
    umuls_b = u_mul_s.astype(bf16)
    vmuls_b = v_mul_s.astype(bf16)
    ut_b = ut.astype(bf16)
    vt_b = vt.astype(bf16)

    # Layer-0 contributions initialize the running sums; subsequent layers are
    # accumulated inside the propagate kernel (aliased outputs).
    eu_b = E_u_0.astype(bf16)
    ei_b = E_i_0.astype(bf16)
    eu_acc = E_u_0 * 1.0
    gu_acc = E_u_0 * 1.0
    ei_acc = E_i_0 * 1.0
    gi_acc = E_i_0 * 1.0

    for _ in range(l):
        (eu_b, eu_acc, gu_acc,
         ei_b, ei_acc, gi_acc) = propagate_layer(
            adj_b, umuls_b, vmuls_b, ut_b, vt_b,
            eu_b, ei_b, eu_acc, gu_acc, ei_acc, gi_acc, tm=tm, tk=tk)

    E_u, E_i, G_u, G_i = eu_acc, ei_acc, gu_acc, gi_acc

    # gathers (glue)
    gu_sel = jnp.take(G_u, uids, axis=0)
    eu_sel = jnp.take(E_u, uids, axis=0)
    gi_sel = jnp.take(G_i, iids, axis=0)
    ei_sel = jnp.take(E_i, iids, axis=0)
    pos_emb = jnp.take(E_i, pos, axis=0)
    neg_emb = jnp.take(E_i, neg, axis=0)

    negu, negi, posu, posi, bpr = ssl_bpr(
        E_u, E_i, gu_sel, gi_sel, eu_sel, ei_sel, pos_emb, neg_emb,
        temp, tn=tn)

    b = uids.shape[0]
    neg_score = (negu[0, 0] + negi[0, 0]) / b
    pos_score = (posu[0, 0] + posi[0, 0]) / b
    loss_s = -pos_score + neg_score
    loss_r = -bpr[0, 0] / b

    # L2 regularizer over parameters (E_u_0, E_i_0) -- glue
    loss_reg = lambda_2 * (jnp.sum(E_u_0 * E_u_0) + jnp.sum(E_i_0 * E_i_0))

    loss = loss_r + lambda_1 * loss_s + loss_reg
    return loss, loss_r, lambda_1 * loss_s


# ---------------------------------------------------------------------------
if __name__ == "__main__":
    n_u, n_i, d, q_svd = 256, 384, 64, 32
    batch, n_layers = 128, 2
    temp, lambda_1, lambda_2 = 0.2, 0.2, 1e-7

    key = jax.random.PRNGKey(0)
    keys = jax.random.split(key, 8)

    # xavier_uniform init (deterministic)
    bu = (6.0 / (n_u + d)) ** 0.5
    bi = (6.0 / (n_i + d)) ** 0.5
    E_u_0 = jax.random.uniform(keys[0], (n_u, d), jnp.float32, -bu, bu)
    E_i_0 = jax.random.uniform(keys[1], (n_i, d), jnp.float32, -bi, bi)

    # synthetic normalized interaction matrix (dense stand-in for adj_norm)
    raw = jax.random.uniform(keys[2], (n_u, n_i), jnp.float32)
    mask = (jax.random.uniform(keys[3], (n_u, n_i)) < 0.15).astype(jnp.float32)
    inter = raw * mask
    deg_u = inter.sum(axis=1, keepdims=True) + 1.0
    deg_i = inter.sum(axis=0, keepdims=True) + 1.0
    adj_norm = inter / jnp.sqrt(deg_u * deg_i)

    # truncated SVD factors (as LightGCL precomputes them)
    u_full, s_full, vt_full = jnp.linalg.svd(adj_norm, full_matrices=False)
    u_q = u_full[:, :q_svd]
    v_q = vt_full[:q_svd, :].T
    s_q = s_full[:q_svd]
    u_mul_s = u_q * s_q[None, :]          # (n_u, q)
    v_mul_s = v_q * s_q[None, :]          # (n_i, q)
    ut = u_q.T                            # (q, n_u)
    vt = v_q.T                            # (q, n_i)

    uids = jax.random.randint(keys[4], (batch,), 0, n_u)
    iids = jax.random.randint(keys[5], (batch,), 0, n_i)
    pos = jax.random.randint(keys[6], (batch,), 0, n_i)
    neg = jax.random.randint(keys[7], (batch,), 0, n_i)

    fwd = jax.jit(functools.partial(
        lightgcl_forward, l=n_layers, temp=temp,
        lambda_1=lambda_1, lambda_2=lambda_2, tm=128, tk=128, tn=128))

    loss, loss_r, loss_s_scaled = fwd(E_u_0, E_i_0, adj_norm,
                                      u_mul_s, v_mul_s, ut, vt,
                                      uids, iids, pos, neg)
    jax.block_until_ready((loss, loss_r, loss_s_scaled))
    print("KERNEL_OK")
</pallas_src>

<mosaic_0001>
module attributes {stable_mosaic.version = 11 : i64} {
  func.func @_propagate_kernel(%arg0: i32, %arg1: i32, %arg2: memref<128x128xbf16, #tpu.memory_space<vmem>>, %arg3: memref<128x64xbf16, #tpu.memory_space<vmem>>, %arg4: memref<128x64xbf16, #tpu.memory_space<vmem>>, %arg5: memref<128x32xbf16, #tpu.memory_space<vmem>>, %arg6: memref<384x32xbf16, #tpu.memory_space<vmem>>, %arg7: memref<32x128xbf16, #tpu.memory_space<vmem>>, %arg8: memref<32x128xbf16, #tpu.memory_space<vmem>>, %arg9: memref<128x64xf32, #tpu.memory_space<vmem>>, %arg10: memref<128x64xf32, #tpu.memory_space<vmem>>, %arg11: memref<384x64xf32, #tpu.memory_space<vmem>>, %arg12: memref<384x64xf32, #tpu.memory_space<vmem>>, %arg13: memref<128x64xbf16, #tpu.memory_space<vmem>>, %arg14: memref<128x64xf32, #tpu.memory_space<vmem>>, %arg15: memref<128x64xf32, #tpu.memory_space<vmem>>, %arg16: memref<384x64xbf16, #tpu.memory_space<vmem>>, %arg17: memref<384x64xf32, #tpu.memory_space<vmem>>, %arg18: memref<384x64xf32, #tpu.memory_space<vmem>>, %arg19: memref<128x64xf32, #tpu.memory_space<vmem>>, %arg20: memref<384x64xf32, #tpu.memory_space<vmem>>, %arg21: memref<32x64xf32, #tpu.memory_space<vmem>>, %arg22: memref<32x64xf32, #tpu.memory_space<vmem>>) attributes {dimension_semantics = [#tpu.dimension_semantics<arbitrary>, #tpu.dimension_semantics<arbitrary>], iteration_bounds = array<i64: 2, 3>, scalar_prefetch = 0 : i64, scratch_operands = 4 : i64, tpu.core_type = #tpu.core_type<tc>, window_params = [{transform_indices = @transform_0, window_bounds = array<i64: 128, 128>}, {transform_indices = @transform_1, window_bounds = array<i64: 128, 64>}, {transform_indices = @transform_2, window_bounds = array<i64: 128, 64>}, {transform_indices = @transform_3, window_bounds = array<i64: 128, 32>}, {pipeline_mode = #tpu.pipeline_mode<synchronous>, transform_indices = @transform_4, window_bounds = array<i64: 384, 32>}, {transform_indices = @transform_5, window_bounds = array<i64: 32, 128>}, {transform_indices = @transform_6, window_bounds = array<i64: 32, 128>}, {transform_indices = @transform_7, window_bounds = array<i64: 128, 64>}, {transform_indices = @transform_8, window_bounds = array<i64: 128, 64>}, {pipeline_mode = #tpu.pipeline_mode<synchronous>, transform_indices = @transform_9, window_bounds = array<i64: 384, 64>}, {pipeline_mode = #tpu.pipeline_mode<synchronous>, transform_indices = @transform_10, window_bounds = array<i64: 384, 64>}, {transform_indices = @transform_11, window_bounds = array<i64: 128, 64>}, {transform_indices = @transform_12, window_bounds = array<i64: 128, 64>}, {transform_indices = @transform_13, window_bounds = array<i64: 128, 64>}, {pipeline_mode = #tpu.pipeline_mode<synchronous>, transform_indices = @transform_14, window_bounds = array<i64: 384, 64>}, {pipeline_mode = #tpu.pipeline_mode<synchronous>, transform_indices = @transform_15, window_bounds = array<i64: 384, 64>}, {pipeline_mode = #tpu.pipeline_mode<synchronous>, transform_indices = @transform_16, window_bounds = array<i64: 384, 64>}]} {
    %c0 = arith.constant 0 : index
    %c0_0 = arith.constant 0 : index
    %0 = vector.load %arg2[%c0, %c0_0] : memref<128x128xbf16, #tpu.memory_space<vmem>>, vector<128x128xbf16>
    %c0_1 = arith.constant 0 : index
    %c0_2 = arith.constant 0 : index
    %1 = vector.load %arg3[%c0_1, %c0_2] : memref<128x64xbf16, #tpu.memory_space<vmem>>, vector<128x64xbf16>
    %c0_3 = arith.constant 0 : index
    %c0_4 = arith.constant 0 : index
    %2 = vector.load %arg4[%c0_3, %c0_4] : memref<128x64xbf16, #tpu.memory_space<vmem>>, vector<128x64xbf16>
    %c0_i32 = arith.constant 0 : i32
    %3 = arith.cmpi eq, %arg0, %c0_i32 : i32
    %c0_i32_5 = arith.constant 0 : i32
    %4 = arith.cmpi eq, %arg1, %c0_i32_5 : i32
    %5 = arith.andi %3, %4 : i1
    %6 = arith.extui %5 : i1 to i32
    %c0_i32_6 = arith.constant 0 : i32
    %7 = arith.cmpi ne, %6, %c0_i32_6 : i32
    scf.if %7 {
      %cst_21 = arith.constant 0.000000e+00 : f32
      %34 = vector.broadcast %cst_21 : f32 to vector<384x64xf32>
      %c0_22 = arith.constant 0 : index
      %c0_23 = arith.constant 0 : index
      %35 = vector.load %arg20[%c0_22, %c0_23] : memref<384x64xf32, #tpu.memory_space<vmem>>, vector<384x64xf32>
      tpu.vector_store %arg20[%c0_22, %c0_23], %34 {strides = array<i32>} : memref<384x64xf32, #tpu.memory_space<vmem>>, vector<384x64xf32>,
      %cst_24 = arith.constant 0.000000e+00 : f32
      %36 = vector.broadcast %cst_24 : f32 to vector<32x64xf32>
      %c0_25 = arith.constant 0 : index
      %c0_26 = arith.constant 0 : index
      %37 = vector.load %arg21[%c0_25, %c0_26] : memref<32x64xf32, #tpu.memory_space<vmem>>, vector<32x64xf32>
      tpu.vector_store %arg21[%c0_25, %c0_26], %36 {strides = array<i32>} : memref<32x64xf32, #tpu.memory_space<vmem>>, vector<32x64xf32>,
      %cst_27 = arith.constant 0.000000e+00 : f32
      %38 = vector.broadcast %cst_27 : f32 to vector<32x64xf32>
      %c0_28 = arith.constant 0 : index
      %c0_29 = arith.constant 0 : index
      %39 = vector.load %arg22[%c0_28, %c0_29] : memref<32x64xf32, #tpu.memory_space<vmem>>, vector<32x64xf32>
      tpu.vector_store %arg22[%c0_28, %c0_29], %38 {strides = array<i32>} : memref<32x64xf32, #tpu.memory_space<vmem>>, vector<32x64xf32>,
    } else {
    }
    %c0_i32_7 = arith.constant 0 : i32
    %8 = arith.cmpi eq, %arg1, %c0_i32_7 : i32
    %9 = arith.extui %8 : i1 to i32
    %c0_i32_8 = arith.constant 0 : i32
    %10 = arith.cmpi ne, %9, %c0_i32_8 : i32
    scf.if %10 {
      %cst_21 = arith.constant 0.000000e+00 : f32
      %34 = vector.broadcast %cst_21 : f32 to vector<128x64xf32>
      %c0_22 = arith.constant 0 : index
      %c0_23 = arith.constant 0 : index
      %35 = vector.load %arg19[%c0_22, %c0_23] : memref<128x64xf32, #tpu.memory_space<vmem>>, vector<128x64xf32>
      tpu.vector_store %arg19[%c0_22, %c0_23], %34 {strides = array<i32>} : memref<128x64xf32, #tpu.memory_space<vmem>>, vector<128x64xf32>,
      %c0_24 = arith.constant 0 : index
      %c0_25 = arith.constant 0 : index
      %36 = vector.load %arg22[%c0_24, %c0_25] : memref<32x64xf32, #tpu.memory_space<vmem>>, vector<32x64xf32>
      %c0_26 = arith.constant 0 : index
      %c0_27 = arith.constant 0 : index
      %37 = vector.load %arg7[%c0_26, %c0_27] : memref<32x128xbf16, #tpu.memory_space<vmem>>, vector<32x128xbf16>
      %cst_28 = arith.constant dense<0.000000e+00> : vector<32x64xf32>
      %38 = tpu.matmul %37, %1, %cst_28 {dimension_numbers = #tpu.dot_dimension_numbers<[1], [0], [0], [1], [0, 0, 1, 1], [], []>} : vector<32x128xbf16>, vector<128x64xbf16>, vector<32x64xf32> -> vector<32x64xf32>
      %39 = arith.addf %36, %38 : vector<32x64xf32>
      %c0_29 = arith.constant 0 : index
      %c0_30 = arith.constant 0 : index
      %40 = vector.load %arg22[%c0_29, %c0_30] : memref<32x64xf32, #tpu.memory_space<vmem>>, vector<32x64xf32>
      tpu.vector_store %arg22[%c0_29, %c0_30], %39 {strides = array<i32>} : memref<32x64xf32, #tpu.memory_space<vmem>>, vector<32x64xf32>,
    } else {
    }
    %c0_i32_9 = arith.constant 0 : i32
    %11 = arith.cmpi eq, %arg0, %c0_i32_9 : i32
    %12 = arith.extui %11 : i1 to i32
    %c0_i32_10 = arith.constant 0 : i32
    %13 = arith.cmpi ne, %12, %c0_i32_10 : i32
    scf.if %13 {
      %c0_21 = arith.constant 0 : index
      %c0_22 = arith.constant 0 : index
      %34 = vector.load %arg21[%c0_21, %c0_22] : memref<32x64xf32, #tpu.memory_space<vmem>>, vector<32x64xf32>
      %c0_23 = arith.constant 0 : index
      %c0_24 = arith.constant 0 : index
      %35 = vector.load %arg8[%c0_23, %c0_24] : memref<32x128xbf16, #tpu.memory_space<vmem>>, vector<32x128xbf16>
      %cst_25 = arith.constant dense<0.000000e+00> : vector<32x64xf32>
      %36 = tpu.matmul %35, %2, %cst_25 {dimension_numbers = #tpu.dot_dimension_numbers<[1], [0], [0], [1], [0, 0, 1, 1], [], []>} : vector<32x128xbf16>, vector<128x64xbf16>, vector<32x64xf32> -> vector<32x64xf32>
      %37 = arith.addf %34, %36 : vector<32x64xf32>
      %c0_26 = arith.constant 0 : index
      %c0_27 = arith.constant 0 : index
      %38 = vector.load %arg21[%c0_26, %c0_27] : memref<32x64xf32, #tpu.memory_space<vmem>>, vector<32x64xf32>
      tpu.vector_store %arg21[%c0_26, %c0_27], %37 {strides = array<i32>} : memref<32x64xf32, #tpu.memory_space<vmem>>, vector<32x64xf32>,
    } else {
    }
    %c0_11 = arith.constant 0 : index
    %c0_12 = arith.constant 0 : index
    %14 = vector.load %arg19[%c0_11, %c0_12] : memref<128x64xf32, #tpu.memory_space<vmem>>, vector<128x64xf32>
    %cst = arith.constant dense<0.000000e+00> : vector<128x64xf32>
    %15 = tpu.matmul %0, %2, %cst {dimension_numbers = #tpu.dot_dimension_numbers<[1], [0], [0], [1], [0, 0, 1, 1], [], []>} : vector<128x128xbf16>, vector<128x64xbf16>, vector<128x64xf32> -> vector<128x64xf32>
    %16 = arith.addf %14, %15 : vector<128x64xf32>
    %c0_13 = arith.constant 0 : index
    %c0_14 = arith.constant 0 : index
    %17 = vector.load %arg19[%c0_13, %c0_14] : memref<128x64xf32, #tpu.memory_space<vmem>>, vector<128x64xf32>
    tpu.vector_store %arg19[%c0_13, %c0_14], %16 {strides = array<i32>} : memref<128x64xf32, #tpu.memory_space<vmem>>, vector<128x64xf32>,
    %cst_15 = arith.constant dense<0.000000e+00> : vector<128x64xf32>
    %18 = tpu.matmul %0, %1, %cst_15 {dimension_numbers = #tpu.dot_dimension_numbers<[0], [0], [1], [1], [0, 1, 1, 1], [], []>} : vector<128x128xbf16>, vector<128x64xbf16>, vector<128x64xf32> -> vector<128x64xf32>
    %c128_i32 = arith.constant 128 : i32
    %19 = arith.muli %arg1, %c128_i32 : i32
    %20 = tpu.assume_multiple %19, 128 : i32
    %21 = arith.index_cast %20 : i32 to index
    %c0_16 = arith.constant 0 : index
    %22 = vector.load %arg20[%21, %c0_16] : memref<384x64xf32, #tpu.memory_space<vmem>>, vector<128x64xf32>
    %23 = arith.addf %22, %18 : vector<128x64xf32>
    %24 = arith.index_cast %20 : i32 to index
    %c0_17 = arith.constant 0 : index
    %25 = vector.load %arg20[%24, %c0_17] : memref<384x64xf32, #tpu.memory_space<vmem>>, vector<128x64xf32>
    tpu.vector_store %arg20[%24, %c0_17], %23 {strides = array<i32>} : memref<384x64xf32, #tpu.memory_space<vmem>>, vector<128x64xf32>,
    %c2_i32 = arith.constant 2 : i32
    %26 = arith.cmpi eq, %arg1, %c2_i32 : i32
    %27 = arith.extui %26 : i1 to i32
    %c0_i32_18 = arith.constant 0 : i32
    %28 = arith.cmpi ne, %27, %c0_i32_18 : i32
    scf.if %28 {
      %c0_21 = arith.constant 0 : index
      %c0_22 = arith.constant 0 : index
      %34 = vector.load %arg19[%c0_21, %c0_22] : memref<128x64xf32, #tpu.memory_space<vmem>>, vector<128x64xf32>
      %35 = arith.truncf %34 : vector<128x64xf32> to vector<128x64xbf16>
      %c0_23 = arith.constant 0 : index
      %c0_24 = arith.constant 0 : index
      %36 = vector.load %arg13[%c0_23, %c0_24] : memref<128x64xbf16, #tpu.memory_space<vmem>>, vector<128x64xbf16>
      tpu.vector_store %arg13[%c0_23, %c0_24], %35 {strides = array<i32>} : memref<128x64xbf16, #tpu.memory_space<vmem>>, vector<128x64xbf16>,
      %c0_25 = arith.constant 0 : index
      %c0_26 = arith.constant 0 : index
      %37 = vector.load %arg9[%c0_25, %c0_26] : memref<128x64xf32, #tpu.memory_space<vmem>>, vector<128x64xf32>
      %38 = arith.addf %37, %34 : vector<128x64xf32>
      %c0_27 = arith.constant 0 : index
      %c0_28 = arith.constant 0 : index
      %39 = vector.load %arg14[%c0_27, %c0_28] : memref<128x64xf32, #tpu.memory_space<vmem>>, vector<128x64xf32>
      tpu.vector_store %arg14[%c0_27, %c0_28], %38 {strides = array<i32>} : memref<128x64xf32, #tpu.memory_space<vmem>>, vector<128x64xf32>,
      %c0_29 = arith.constant 0 : index
      %c0_30 = arith.constant 0 : index
      %40 = vector.load %arg5[%c0_29, %c0_30] : memref<128x32xbf16, #tpu.memory_space<vmem>>, vector<128x32xbf16>
      %c0_31 = arith.constant 0 : index
      %c0_32 = arith.constant 0 : index
      %41 = vector.load %arg21[%c0_31, %c0_32] : memref<32x64xf32, #tpu.memory_space<vmem>>, vector<32x64xf32>
      %42 = arith.truncf %41 : vector<32x64xf32> to vector<32x64xbf16>
      %cst_33 = arith.constant dense<0.000000e+00> : vector<128x64xf32>
      %43 = tpu.matmul %40, %42, %cst_33 {dimension_numbers = #tpu.dot_dimension_numbers<[1], [0], [0], [1], [0, 0, 1, 1], [], []>} : vector<128x32xbf16>, vector<32x64xbf16>, vector<128x64xf32> -> vector<128x64xf32>
      %c0_34 = arith.constant 0 : index
      %c0_35 = arith.constant 0 : index
      %44 = vector.load %arg10[%c0_34, %c0_35] : memref<128x64xf32, #tpu.memory_space<vmem>>, vector<128x64xf32>
      %45 = arith.addf %44, %43 : vector<128x64xf32>
      %c0_36 = arith.constant 0 : index
      %c0_37 = arith.constant 0 : index
      %46 = vector.load %arg15[%c0_36, %c0_37] : memref<128x64xf32, #tpu.memory_space<vmem>>, vector<128x64xf32>
      tpu.vector_store %arg15[%c0_36, %c0_37], %45 {strides = array<i32>} : memref<128x64xf32, #tpu.memory_space<vmem>>, vector<128x64xf32>,
    } else {
    }
    %c1_i32 = arith.constant 1 : i32
    %29 = arith.cmpi eq, %arg0, %c1_i32 : i32
    %c2_i32_19 = arith.constant 2 : i32
    %30 = arith.cmpi eq, %arg1, %c2_i32_19 : i32
    %31 = arith.andi %29, %30 : i1
    %32 = arith.extui %31 : i1 to i32
    %c0_i32_20 = arith.constant 0 : i32
    %33 = arith.cmpi ne, %32, %c0_i32_20 : i32
    scf.if %33 {
      %c0_21 = arith.constant 0 : index
      %c0_22 = arith.constant 0 : index
      %34 = vector.load %arg20[%c0_21, %c0_22] : memref<384x64xf32, #tpu.memory_space<vmem>>, vector<384x64xf32>
      %35 = arith.truncf %34 : vector<384x64xf32> to vector<384x64xbf16>
      %c0_23 = arith.constant 0 : index
      %c0_24 = arith.constant 0 : index
      %36 = vector.load %arg16[%c0_23, %c0_24] : memref<384x64xbf16, #tpu.memory_space<vmem>>, vector<384x64xbf16>
      tpu.vector_store %arg16[%c0_23, %c0_24], %35 {strides = array<i32>} : memref<384x64xbf16, #tpu.memory_space<vmem>>, vector<384x64xbf16>,
      %c0_25 = arith.constant 0 : index
      %c0_26 = arith.constant 0 : index
      %37 = vector.load %arg11[%c0_25, %c0_26] : memref<384x64xf32, #tpu.memory_space<vmem>>, vector<384x64xf32>
      %38 = arith.addf %37, %34 : vector<384x64xf32>
      %c0_27 = arith.constant 0 : index
      %c0_28 = arith.constant 0 : index
      %39 = vector.load %arg17[%c0_27, %c0_28] : memref<384x64xf32, #tpu.memory_space<vmem>>, vector<384x64xf32>
      tpu.vector_store %arg17[%c0_27, %c0_28], %38 {strides = array<i32>} : memref<384x64xf32, #tpu.memory_space<vmem>>, vector<384x64xf32>,
      %c0_29 = arith.constant 0 : index
      %c0_30 = arith.constant 0 : index
      %40 = vector.load %arg6[%c0_29, %c0_30] : memref<384x32xbf16, #tpu.memory_space<vmem>>, vector<384x32xbf16>
      %c0_31 = arith.constant 0 : index
      %c0_32 = arith.constant 0 : index
      %41 = vector.load %arg22[%c0_31, %c0_32] : memref<32x64xf32, #tpu.memory_space<vmem>>, vector<32x64xf32>
      %42 = arith.truncf %41 : vector<32x64xf32> to vector<32x64xbf16>
      %cst_33 = arith.constant dense<0.000000e+00> : vector<384x64xf32>
      %43 = tpu.matmul %40, %42, %cst_33 {dimension_numbers = #tpu.dot_dimension_numbers<[1], [0], [0], [1], [0, 0, 1, 1], [], []>} : vector<384x32xbf16>, vector<32x64xbf16>, vector<384x64xf32> -> vector<384x64xf32>
      %c0_34 = arith.constant 0 : index
      %c0_35 = arith.constant 0 : index
      %44 = vector.load %arg12[%c0_34, %c0_35] : memref<384x64xf32, #tpu.memory_space<vmem>>, vector<384x64xf32>
      %45 = arith.addf %44, %43 : vector<384x64xf32>
      %c0_36 = arith.constant 0 : index
      %c0_37 = arith.constant 0 : index
      %46 = vector.load %arg18[%c0_36, %c0_37] : memref<384x64xf32, #tpu.memory_space<vmem>>, vector<384x64xf32>
      tpu.vector_store %arg18[%c0_36, %c0_37], %45 {strides = array<i32>} : memref<384x64xf32, #tpu.memory_space<vmem>>, vector<384x64xf32>,
    } else {
    }
    return
  }
  func.func @transform_0(%arg0: i32, %arg1: i32) -> (i32, i32) {
    %c0_i32 = arith.constant 0 : i32
    return %arg0, %arg1 : i32, i32
  }
  func.func @transform_1(%arg0: i32, %arg1: i32) -> (i32, i32) {
    %c0_i32 = arith.constant 0 : i32
    %c0_i32_0 = arith.constant 0 : i32
    return %arg0, %c0_i32 : i32, i32
  }
  func.func @transform_2(%arg0: i32, %arg1: i32) -> (i32, i32) {
    %c0_i32 = arith.constant 0 : i32
    %c0_i32_0 = arith.constant 0 : i32
    return %arg1, %c0_i32 : i32, i32
  }
  func.func @transform_3(%arg0: i32, %arg1: i32) -> (i32, i32) {
    %c0_i32 = arith.constant 0 : i32
    %c0_i32_0 = arith.constant 0 : i32
    return %arg0, %c0_i32 : i32, i32
  }
  func.func @transform_4(%arg0: i32, %arg1: i32) -> (i32, i32) {
    %c0_i32 = arith.constant 0 : i32
    %c0_i32_0 = arith.constant 0 : i32
    %c0_i32_1 = arith.constant 0 : i32
    return %c0_i32, %c0_i32_0 : i32, i32
  }
  func.func @transform_5(%arg0: i32, %arg1: i32) -> (i32, i32) {
    %c0_i32 = arith.constant 0 : i32
    %c0_i32_0 = arith.constant 0 : i32
    return %c0_i32, %arg0 : i32, i32
  }
  func.func @transform_6(%arg0: i32, %arg1: i32) -> (i32, i32) {
    %c0_i32 = arith.constant 0 : i32
    %c0_i32_0 = arith.constant 0 : i32
    return %c0_i32, %arg1 : i32, i32
  }
  func.func @transform_7(%arg0: i32, %arg1: i32) -> (i32, i32) {
    %c0_i32 = arith.constant 0 : i32
    %c0_i32_0 = arith.constant 0 : i32
    return %arg0, %c0_i32 : i32, i32
  }
  func.func @transform_8(%arg0: i32, %arg1: i32) -> (i32, i32) {
    %c0_i32 = arith.constant 0 : i32
    %c0_i32_0 = arith.constant 0 : i32
    return %arg0, %c0_i32 : i32, i32
  }
  func.func @transform_9(%arg0: i32, %arg1: i32) -> (i32, i32) {
    %c0_i32 = arith.constant 0 : i32
    %c0_i32_0 = arith.constant 0 : i32
    %c0_i32_1 = arith.constant 0 : i32
    return %c0_i32, %c0_i32_0 : i32, i32
  }
  func.func @transform_10(%arg0: i32, %arg1: i32) -> (i32, i32) {
    %c0_i32 = arith.constant 0 : i32
    %c0_i32_0 = arith.constant 0 : i32
    %c0_i32_1 = arith.constant 0 : i32
    return %c0_i32, %c0_i32_0 : i32, i32
  }
  func.func @transform_11(%arg0: i32, %arg1: i32) -> (i32, i32) {
    %c0_i32 = arith.constant 0 : i32
    %c0_i32_0 = arith.constant 0 : i32
    return %arg0, %c0_i32 : i32, i32
  }
  func.func @transform_12(%arg0: i32, %arg1: i32) -> (i32, i32) {
    %c0_i32 = arith.constant 0 : i32
    %c0_i32_0 = arith.constant 0 : i32
    return %arg0, %c0_i32 : i32, i32
  }
  func.func @transform_13(%arg0: i32, %arg1: i32) -> (i32, i32) {
    %c0_i32 = arith.constant 0 : i32
    %c0_i32_0 = arith.constant 0 : i32
    return %arg0, %c0_i32 : i32, i32
  }
  func.func @transform_14(%arg0: i32, %arg1: i32) -> (i32, i32) {
    %c0_i32 = arith.constant 0 : i32
    %c0_i32_0 = arith.constant 0 : i32
    %c0_i32_1 = arith.constant 0 : i32
    return %c0_i32, %c0_i32_0 : i32, i32
  }
  func.func @transform_15(%arg0: i32, %arg1: i32) -> (i32, i32) {
    %c0_i32 = arith.constant 0 : i32
    %c0_i32_0 = arith.constant 0 : i32
    %c0_i32_1 = arith.constant 0 : i32
    return %c0_i32, %c0_i32_0 : i32, i32
  }
  func.func @transform_16(%arg0: i32, %arg1: i32) -> (i32, i32) {
    %c0_i32 = arith.constant 0 : i32
    %c0_i32_0 = arith.constant 0 : i32
    %c0_i32_1 = arith.constant 0 : i32
    return %c0_i32, %c0_i32_0 : i32, i32
  }
}

module attributes {stable_mosaic.version = 11 : i64} {
  func.func @_propagate_kernel(%arg0: i32, %arg1: i32, %arg2: memref<128x128xbf16, #tpu.memory_space<vmem>>, %arg3: memref<128x64xbf16, #tpu.memory_space<vmem>>, %arg4: memref<128x64xbf16, #tpu.memory_space<vmem>>, %arg5: memref<128x32xbf16, #tpu.memory_space<vmem>>, %arg6: memref<384x32xbf16, #tpu.memory_space<vmem>>, %arg7: memref<32x128xbf16, #tpu.memory_space<vmem>>, %arg8: memref<32x128xbf16, #tpu.memory_space<vmem>>, %arg9: memref<128x64xf32, #tpu.memory_space<vmem>>, %arg10: memref<128x64xf32, #tpu.memory_space<vmem>>, %arg11: memref<384x64xf32, #tpu.memory_space<vmem>>, %arg12: memref<384x64xf32, #tpu.memory_space<vmem>>, %arg13: memref<128x64xbf16, #tpu.memory_space<vmem>>, %arg14: memref<128x64xf32, #tpu.memory_space<vmem>>, %arg15: memref<128x64xf32, #tpu.memory_space<vmem>>, %arg16: memref<384x64xbf16, #tpu.memory_space<vmem>>, %arg17: memref<384x64xf32, #tpu.memory_space<vmem>>, %arg18: memref<384x64xf32, #tpu.memory_space<vmem>>, %arg19: memref<128x64xf32, #tpu.memory_space<vmem>>, %arg20: memref<384x64xf32, #tpu.memory_space<vmem>>, %arg21: memref<32x64xf32, #tpu.memory_space<vmem>>, %arg22: memref<32x64xf32, #tpu.memory_space<vmem>>) attributes {dimension_semantics = [#tpu.dimension_semantics<arbitrary>, #tpu.dimension_semantics<arbitrary>], iteration_bounds = array<i64: 2, 3>, scalar_prefetch = 0 : i64, scratch_operands = 4 : i64, tpu.core_type = #tpu.core_type<tc>, window_params = [{transform_indices = @transform_0, window_bounds = array<i64: 128, 128>}, {transform_indices = @transform_1, window_bounds = array<i64: 128, 64>}, {transform_indices = @transform_2, window_bounds = array<i64: 128, 64>}, {transform_indices = @transform_3, window_bounds = array<i64: 128, 32>}, {pipeline_mode = #tpu.pipeline_mode<synchronous>, transform_indices = @transform_4, window_bounds = array<i64: 384, 32>}, {transform_indices = @transform_5, window_bounds = array<i64: 32, 128>}, {transform_indices = @transform_6, window_bounds = array<i64: 32, 128>}, {transform_indices = @transform_7, window_bounds = array<i64: 128, 64>}, {transform_indices = @transform_8, window_bounds = array<i64: 128, 64>}, {pipeline_mode = #tpu.pipeline_mode<synchronous>, transform_indices = @transform_9, window_bounds = array<i64: 384, 64>}, {pipeline_mode = #tpu.pipeline_mode<synchronous>, transform_indices = @transform_10, window_bounds = array<i64: 384, 64>}, {transform_indices = @transform_11, window_bounds = array<i64: 128, 64>}, {transform_indices = @transform_12, window_bounds = array<i64: 128, 64>}, {transform_indices = @transform_13, window_bounds = array<i64: 128, 64>}, {pipeline_mode = #tpu.pipeline_mode<synchronous>, transform_indices = @transform_14, window_bounds = array<i64: 384, 64>}, {pipeline_mode = #tpu.pipeline_mode<synchronous>, transform_indices = @transform_15, window_bounds = array<i64: 384, 64>}, {pipeline_mode = #tpu.pipeline_mode<synchronous>, transform_indices = @transform_16, window_bounds = array<i64: 384, 64>}]} {
    %c0 = arith.constant 0 : index
    %c0_0 = arith.constant 0 : index
    %0 = vector.load %arg2[%c0, %c0_0] : memref<128x128xbf16, #tpu.memory_space<vmem>>, vector<128x128xbf16>
    %c0_1 = arith.constant 0 : index
    %c0_2 = arith.constant 0 : index
    %1 = vector.load %arg3[%c0_1, %c0_2] : memref<128x64xbf16, #tpu.memory_space<vmem>>, vector<128x64xbf16>
    %c0_3 = arith.constant 0 : index
    %c0_4 = arith.constant 0 : index
    %2 = vector.load %arg4[%c0_3, %c0_4] : memref<128x64xbf16, #tpu.memory_space<vmem>>, vector<128x64xbf16>
    %c0_i32 = arith.constant 0 : i32
    %3 = arith.cmpi eq, %arg0, %c0_i32 : i32
    %c0_i32_5 = arith.constant 0 : i32
    %4 = arith.cmpi eq, %arg1, %c0_i32_5 : i32
    %5 = arith.andi %3, %4 : i1
    %6 = arith.extui %5 : i1 to i32
    %c0_i32_6 = arith.constant 0 : i32
    %7 = arith.cmpi ne, %6, %c0_i32_6 : i32
    scf.if %7 {
      %cst_21 = arith.constant 0.000000e+00 : f32
      %34 = vector.broadcast %cst_21 : f32 to vector<384x64xf32>
      %c0_22 = arith.constant 0 : index
      %c0_23 = arith.constant 0 : index
      %35 = vector.load %arg20[%c0_22, %c0_23] : memref<384x64xf32, #tpu.memory_space<vmem>>, vector<384x64xf32>
      tpu.vector_store %arg20[%c0_22, %c0_23], %34 {strides = array<i32>} : memref<384x64xf32, #tpu.memory_space<vmem>>, vector<384x64xf32>,
      %cst_24 = arith.constant 0.000000e+00 : f32
      %36 = vector.broadcast %cst_24 : f32 to vector<32x64xf32>
      %c0_25 = arith.constant 0 : index
      %c0_26 = arith.constant 0 : index
      %37 = vector.load %arg21[%c0_25, %c0_26] : memref<32x64xf32, #tpu.memory_space<vmem>>, vector<32x64xf32>
      tpu.vector_store %arg21[%c0_25, %c0_26], %36 {strides = array<i32>} : memref<32x64xf32, #tpu.memory_space<vmem>>, vector<32x64xf32>,
      %cst_27 = arith.constant 0.000000e+00 : f32
      %38 = vector.broadcast %cst_27 : f32 to vector<32x64xf32>
      %c0_28 = arith.constant 0 : index
      %c0_29 = arith.constant 0 : index
      %39 = vector.load %arg22[%c0_28, %c0_29] : memref<32x64xf32, #tpu.memory_space<vmem>>, vector<32x64xf32>
      tpu.vector_store %arg22[%c0_28, %c0_29], %38 {strides = array<i32>} : memref<32x64xf32, #tpu.memory_space<vmem>>, vector<32x64xf32>,
    } else {
    }
    %c0_i32_7 = arith.constant 0 : i32
    %8 = arith.cmpi eq, %arg1, %c0_i32_7 : i32
    %9 = arith.extui %8 : i1 to i32
    %c0_i32_8 = arith.constant 0 : i32
    %10 = arith.cmpi ne, %9, %c0_i32_8 : i32
    scf.if %10 {
      %cst_21 = arith.constant 0.000000e+00 : f32
      %34 = vector.broadcast %cst_21 : f32 to vector<128x64xf32>
      %c0_22 = arith.constant 0 : index
      %c0_23 = arith.constant 0 : index
      %35 = vector.load %arg19[%c0_22, %c0_23] : memref<128x64xf32, #tpu.memory_space<vmem>>, vector<128x64xf32>
      tpu.vector_store %arg19[%c0_22, %c0_23], %34 {strides = array<i32>} : memref<128x64xf32, #tpu.memory_space<vmem>>, vector<128x64xf32>,
      %c0_24 = arith.constant 0 : index
      %c0_25 = arith.constant 0 : index
      %36 = vector.load %arg22[%c0_24, %c0_25] : memref<32x64xf32, #tpu.memory_space<vmem>>, vector<32x64xf32>
      %c0_26 = arith.constant 0 : index
      %c0_27 = arith.constant 0 : index
      %37 = vector.load %arg7[%c0_26, %c0_27] : memref<32x128xbf16, #tpu.memory_space<vmem>>, vector<32x128xbf16>
      %cst_28 = arith.constant dense<0.000000e+00> : vector<32x64xf32>
      %38 = tpu.matmul %37, %1, %cst_28 {dimension_numbers = #tpu.dot_dimension_numbers<[1], [0], [0], [1], [0, 0, 1, 1], [], []>} : vector<32x128xbf16>, vector<128x64xbf16>, vector<32x64xf32> -> vector<32x64xf32>
      %39 = arith.addf %36, %38 : vector<32x64xf32>
      %c0_29 = arith.constant 0 : index
      %c0_30 = arith.constant 0 : index
      %40 = vector.load %arg22[%c0_29, %c0_30] : memref<32x64xf32, #tpu.memory_space<vmem>>, vector<32x64xf32>
      tpu.vector_store %arg22[%c0_29, %c0_30], %39 {strides = array<i32>} : memref<32x64xf32, #tpu.memory_space<vmem>>, vector<32x64xf32>,
    } else {
    }
    %c0_i32_9 = arith.constant 0 : i32
    %11 = arith.cmpi eq, %arg0, %c0_i32_9 : i32
    %12 = arith.extui %11 : i1 to i32
    %c0_i32_10 = arith.constant 0 : i32
    %13 = arith.cmpi ne, %12, %c0_i32_10 : i32
    scf.if %13 {
      %c0_21 = arith.constant 0 : index
      %c0_22 = arith.constant 0 : index
      %34 = vector.load %arg21[%c0_21, %c0_22] : memref<32x64xf32, #tpu.memory_space<vmem>>, vector<32x64xf32>
      %c0_23 = arith.constant 0 : index
      %c0_24 = arith.constant 0 : index
      %35 = vector.load %arg8[%c0_23, %c0_24] : memref<32x128xbf16, #tpu.memory_space<vmem>>, vector<32x128xbf16>
      %cst_25 = arith.constant dense<0.000000e+00> : vector<32x64xf32>
      %36 = tpu.matmul %35, %2, %cst_25 {dimension_numbers = #tpu.dot_dimension_numbers<[1], [0], [0], [1], [0, 0, 1, 1], [], []>} : vector<32x128xbf16>, vector<128x64xbf16>, vector<32x64xf32> -> vector<32x64xf32>
      %37 = arith.addf %34, %36 : vector<32x64xf32>
      %c0_26 = arith.constant 0 : index
      %c0_27 = arith.constant 0 : index
      %38 = vector.load %arg21[%c0_26, %c0_27] : memref<32x64xf32, #tpu.memory_space<vmem>>, vector<32x64xf32>
      tpu.vector_store %arg21[%c0_26, %c0_27], %37 {strides = array<i32>} : memref<32x64xf32, #tpu.memory_space<vmem>>, vector<32x64xf32>,
    } else {
    }
    %c0_11 = arith.constant 0 : index
    %c0_12 = arith.constant 0 : index
    %14 = vector.load %arg19[%c0_11, %c0_12] : memref<128x64xf32, #tpu.memory_space<vmem>>, vector<128x64xf32>
    %cst = arith.constant dense<0.000000e+00> : vector<128x64xf32>
    %15 = tpu.matmul %0, %2, %cst {dimension_numbers = #tpu.dot_dimension_numbers<[1], [0], [0], [1], [0, 0, 1, 1], [], []>} : vector<128x128xbf16>, vector<128x64xbf16>, vector<128x64xf32> -> vector<128x64xf32>
    %16 = arith.addf %14, %15 : vector<128x64xf32>
    %c0_13 = arith.constant 0 : index
    %c0_14 = arith.constant 0 : index
    %17 = vector.load %arg19[%c0_13, %c0_14] : memref<128x64xf32, #tpu.memory_space<vmem>>, vector<128x64xf32>
    tpu.vector_store %arg19[%c0_13, %c0_14], %16 {strides = array<i32>} : memref<128x64xf32, #tpu.memory_space<vmem>>, vector<128x64xf32>,
    %cst_15 = arith.constant dense<0.000000e+00> : vector<128x64xf32>
    %18 = tpu.matmul %0, %1, %cst_15 {dimension_numbers = #tpu.dot_dimension_numbers<[0], [0], [1], [1], [0, 1, 1, 1], [], []>} : vector<128x128xbf16>, vector<128x64xbf16>, vector<128x64xf32> -> vector<128x64xf32>
    %c128_i32 = arith.constant 128 : i32
    %19 = arith.muli %arg1, %c128_i32 : i32
    %20 = tpu.assume_multiple %19, 128 : i32
    %21 = arith.index_cast %20 : i32 to index
    %c0_16 = arith.constant 0 : index
    %22 = vector.load %arg20[%21, %c0_16] : memref<384x64xf32, #tpu.memory_space<vmem>>, vector<128x64xf32>
    %23 = arith.addf %22, %18 : vector<128x64xf32>
    %24 = arith.index_cast %20 : i32 to index
    %c0_17 = arith.constant 0 : index
    %25 = vector.load %arg20[%24, %c0_17] : memref<384x64xf32, #tpu.memory_space<vmem>>, vector<128x64xf32>
    tpu.vector_store %arg20[%24, %c0_17], %23 {strides = array<i32>} : memref<384x64xf32, #tpu.memory_space<vmem>>, vector<128x64xf32>,
    %c2_i32 = arith.constant 2 : i32
    %26 = arith.cmpi eq, %arg1, %c2_i32 : i32
    %27 = arith.extui %26 : i1 to i32
    %c0_i32_18 = arith.constant 0 : i32
    %28 = arith.cmpi ne, %27, %c0_i32_18 : i32
    scf.if %28 {
      %c0_21 = arith.constant 0 : index
      %c0_22 = arith.constant 0 : index
      %34 = vector.load %arg19[%c0_21, %c0_22] : memref<128x64xf32, #tpu.memory_space<vmem>>, vector<128x64xf32>
      %35 = arith.truncf %34 : vector<128x64xf32> to vector<128x64xbf16>
      %c0_23 = arith.constant 0 : index
      %c0_24 = arith.constant 0 : index
      %36 = vector.load %arg13[%c0_23, %c0_24] : memref<128x64xbf16, #tpu.memory_space<vmem>>, vector<128x64xbf16>
      tpu.vector_store %arg13[%c0_23, %c0_24], %35 {strides = array<i32>} : memref<128x64xbf16, #tpu.memory_space<vmem>>, vector<128x64xbf16>,
      %c0_25 = arith.constant 0 : index
      %c0_26 = arith.constant 0 : index
      %37 = vector.load %arg9[%c0_25, %c0_26] : memref<128x64xf32, #tpu.memory_space<vmem>>, vector<128x64xf32>
      %38 = arith.addf %37, %34 : vector<128x64xf32>
      %c0_27 = arith.constant 0 : index
      %c0_28 = arith.constant 0 : index
      %39 = vector.load %arg14[%c0_27, %c0_28] : memref<128x64xf32, #tpu.memory_space<vmem>>, vector<128x64xf32>
      tpu.vector_store %arg14[%c0_27, %c0_28], %38 {strides = array<i32>} : memref<128x64xf32, #tpu.memory_space<vmem>>, vector<128x64xf32>,
      %c0_29 = arith.constant 0 : index
      %c0_30 = arith.constant 0 : index
      %40 = vector.load %arg5[%c0_29, %c0_30] : memref<128x32xbf16, #tpu.memory_space<vmem>>, vector<128x32xbf16>
      %c0_31 = arith.constant 0 : index
      %c0_32 = arith.constant 0 : index
      %41 = vector.load %arg21[%c0_31, %c0_32] : memref<32x64xf32, #tpu.memory_space<vmem>>, vector<32x64xf32>
      %42 = arith.truncf %41 : vector<32x64xf32> to vector<32x64xbf16>
      %cst_33 = arith.constant dense<0.000000e+00> : vector<128x64xf32>
      %43 = tpu.matmul %40, %42, %cst_33 {dimension_numbers = #tpu.dot_dimension_numbers<[1], [0], [0], [1], [0, 0, 1, 1], [], []>} : vector<128x32xbf16>, vector<32x64xbf16>, vector<128x64xf32> -> vector<128x64xf32>
      %c0_34 = arith.constant 0 : index
      %c0_35 = arith.constant 0 : index
      %44 = vector.load %arg10[%c0_34, %c0_35] : memref<128x64xf32, #tpu.memory_space<vmem>>, vector<128x64xf32>
      %45 = arith.addf %44, %43 : vector<128x64xf32>
      %c0_36 = arith.constant 0 : index
      %c0_37 = arith.constant 0 : index
      %46 = vector.load %arg15[%c0_36, %c0_37] : memref<128x64xf32, #tpu.memory_space<vmem>>, vector<128x64xf32>
      tpu.vector_store %arg15[%c0_36, %c0_37], %45 {strides = array<i32>} : memref<128x64xf32, #tpu.memory_space<vmem>>, vector<128x64xf32>,
    } else {
    }
    %c1_i32 = arith.constant 1 : i32
    %29 = arith.cmpi eq, %arg0, %c1_i32 : i32
    %c2_i32_19 = arith.constant 2 : i32
    %30 = arith.cmpi eq, %arg1, %c2_i32_19 : i32
    %31 = arith.andi %29, %30 : i1
    %32 = arith.extui %31 : i1 to i32
    %c0_i32_20 = arith.constant 0 : i32
    %33 = arith.cmpi ne, %32, %c0_i32_20 : i32
    scf.if %33 {
      %c0_21 = arith.constant 0 : index
      %c0_22 = arith.constant 0 : index
      %34 = vector.load %arg20[%c0_21, %c0_22] : memref<384x64xf32, #tpu.memory_space<vmem>>, vector<384x64xf32>
      %35 = arith.truncf %34 : vector<384x64xf32> to vector<384x64xbf16>
      %c0_23 = arith.constant 0 : index
      %c0_24 = arith.constant 0 : index
      %36 = vector.load %arg16[%c0_23, %c0_24] : memref<384x64xbf16, #tpu.memory_space<vmem>>, vector<384x64xbf16>
      tpu.vector_store %arg16[%c0_23, %c0_24], %35 {strides = array<i32>} : memref<384x64xbf16, #tpu.memory_space<vmem>>, vector<384x64xbf16>,
      %c0_25 = arith.constant 0 : index
      %c0_26 = arith.constant 0 : index
      %37 = vector.load %arg11[%c0_25, %c0_26] : memref<384x64xf32, #tpu.memory_space<vmem>>, vector<384x64xf32>
      %38 = arith.addf %37, %34 : vector<384x64xf32>
      %c0_27 = arith.constant 0 : index
      %c0_28 = arith.constant 0 : index
      %39 = vector.load %arg17[%c0_27, %c0_28] : memref<384x64xf32, #tpu.memory_space<vmem>>, vector<384x64xf32>
      tpu.vector_store %arg17[%c0_27, %c0_28], %38 {strides = array<i32>} : memref<384x64xf32, #tpu.memory_space<vmem>>, vector<384x64xf32>,
      %c0_29 = arith.constant 0 : index
      %c0_30 = arith.constant 0 : index
      %40 = vector.load %arg6[%c0_29, %c0_30] : memref<384x32xbf16, #tpu.memory_space<vmem>>, vector<384x32xbf16>
      %c0_31 = arith.constant 0 : index
      %c0_32 = arith.constant 0 : index
      %41 = vector.load %arg22[%c0_31, %c0_32] : memref<32x64xf32, #tpu.memory_space<vmem>>, vector<32x64xf32>
      %42 = arith.truncf %41 : vector<32x64xf32> to vector<32x64xbf16>
      %cst_33 = arith.constant dense<0.000000e+00> : vector<384x64xf32>
      %43 = tpu.matmul %40, %42, %cst_33 {dimension_numbers = #tpu.dot_dimension_numbers<[1], [0], [0], [1], [0, 0, 1, 1], [], []>} : vector<384x32xbf16>, vector<32x64xbf16>, vector<384x64xf32> -> vector<384x64xf32>
      %c0_34 = arith.constant 0 : index
      %c0_35 = arith.constant 0 : index
      %44 = vector.load %arg12[%c0_34, %c0_35] : memref<384x64xf32, #tpu.memory_space<vmem>>, vector<384x64xf32>
      %45 = arith.addf %44, %43 : vector<384x64xf32>
      %c0_36 = arith.constant 0 : index
      %c0_37 = arith.constant 0 : index
      %46 = vector.load %arg18[%c0_36, %c0_37] : memref<384x64xf32, #tpu.memory_space<vmem>>, vector<384x64xf32>
      tpu.vector_store %arg18[%c0_36, %c0_37], %45 {strides = array<i32>} : memref<384x64xf32, #tpu.memory_space<vmem>>, vector<384x64xf32>,
    } else {
    }
    return
  }
  func.func @transform_0(%arg0: i32, %arg1: i32) -> (i32, i32) {
    %c0_i32 = arith.constant 0 : i32
    return %arg0, %arg1 : i32, i32
  }
  func.func @transform_1(%arg0: i32, %arg1: i32) -> (i32, i32) {
    %c0_i32 = arith.constant 0 : i32
    %c0_i32_0 = arith.constant 0 : i32
    return %arg0, %c0_i32 : i32, i32
  }
  func.func @transform_2(%arg0: i32, %arg1: i32) -> (i32, i32) {
    %c0_i32 = arith.constant 0 : i32
    %c0_i32_0 = arith.constant 0 : i32
    return %arg1, %c0_i32 : i32, i32
  }
  func.func @transform_3(%arg0: i32, %arg1: i32) -> (i32, i32) {
    %c0_i32 = arith.constant 0 : i32
    %c0_i32_0 = arith.constant 0 : i32
    return %arg0, %c0_i32 : i32, i32
  }
  func.func @transform_4(%arg0: i32, %arg1: i32) -> (i32, i32) {
    %c0_i32 = arith.constant 0 : i32
    %c0_i32_0 = arith.constant 0 : i32
    %c0_i32_1 = arith.constant 0 : i32
    return %c0_i32, %c0_i32_0 : i32, i32
  }
  func.func @transform_5(%arg0: i32, %arg1: i32) -> (i32, i32) {
    %c0_i32 = arith.constant 0 : i32
    %c0_i32_0 = arith.constant 0 : i32
    return %c0_i32, %arg0 : i32, i32
  }
  func.func @transform_6(%arg0: i32, %arg1: i32) -> (i32, i32) {
    %c0_i32 = arith.constant 0 : i32
    %c0_i32_0 = arith.constant 0 : i32
    return %c0_i32, %arg1 : i32, i32
  }
  func.func @transform_7(%arg0: i32, %arg1: i32) -> (i32, i32) {
    %c0_i32 = arith.constant 0 : i32
    %c0_i32_0 = arith.constant 0 : i32
    return %arg0, %c0_i32 : i32, i32
  }
  func.func @transform_8(%arg0: i32, %arg1: i32) -> (i32, i32) {
    %c0_i32 = arith.constant 0 : i32
    %c0_i32_0 = arith.constant 0 : i32
    return %arg0, %c0_i32 : i32, i32
  }
  func.func @transform_9(%arg0: i32, %arg1: i32) -> (i32, i32) {
    %c0_i32 = arith.constant 0 : i32
    %c0_i32_0 = arith.constant 0 : i32
    %c0_i32_1 = arith.constant 0 : i32
    return %c0_i32, %c0_i32_0 : i32, i32
  }
  func.func @transform_10(%arg0: i32, %arg1: i32) -> (i32, i32) {
    %c0_i32 = arith.constant 0 : i32
    %c0_i32_0 = arith.constant 0 : i32
    %c0_i32_1 = arith.constant 0 : i32
    return %c0_i32, %c0_i32_0 : i32, i32
  }
  func.func @transform_11(%arg0: i32, %arg1: i32) -> (i32, i32) {
    %c0_i32 = arith.constant 0 : i32
    %c0_i32_0 = arith.constant 0 : i32
    return %arg0, %c0_i32 : i32, i32
  }
  func.func @transform_12(%arg0: i32, %arg1: i32) -> (i32, i32) {
    %c0_i32 = arith.constant 0 : i32
    %c0_i32_0 = arith.constant 0 : i32
    return %arg0, %c0_i32 : i32, i32
  }
  func.func @transform_13(%arg0: i32, %arg1: i32) -> (i32, i32) {
    %c0_i32 = arith.constant 0 : i32
    %c0_i32_0 = arith.constant 0 : i32
    return %arg0, %c0_i32 : i32, i32
  }
  func.func @transform_14(%arg0: i32, %arg1: i32) -> (i32, i32) {
    %c0_i32 = arith.constant 0 : i32
    %c0_i32_0 = arith.constant 0 : i32
    %c0_i32_1 = arith.constant 0 : i32
    return %c0_i32, %c0_i32_0 : i32, i32
  }
  func.func @transform_15(%arg0: i32, %arg1: i32) -> (i32, i32) {
    %c0_i32 = arith.constant 0 : i32
    %c0_i32_0 = arith.constant 0 : i32
    %c0_i32_1 = arith.constant 0 : i32
    return %c0_i32, %c0_i32_0 : i32, i32
  }
  func.func @transform_16(%arg0: i32, %arg1: i32) -> (i32, i32) {
    %c0_i32 = arith.constant 0 : i32
    %c0_i32_0 = arith.constant 0 : i32
    %c0_i32_1 = arith.constant 0 : i32
    return %c0_i32, %c0_i32_0 : i32, i32
  }
}

module attributes {stable_mosaic.version = 11 : i64} {
  func.func @_ssl_bpr_kernel(%arg0: i32, %arg1: memref<128x64xf32, #tpu.memory_space<vmem>>, %arg2: memref<128x64xf32, #tpu.memory_space<vmem>>, %arg3: memref<128x64xf32, #tpu.memory_space<vmem>>, %arg4: memref<128x64xf32, #tpu.memory_space<vmem>>, %arg5: memref<128x64xf32, #tpu.memory_space<vmem>>, %arg6: memref<128x64xf32, #tpu.memory_space<vmem>>, %arg7: memref<128x64xf32, #tpu.memory_space<vmem>>, %arg8: memref<128x64xf32, #tpu.memory_space<vmem>>, %arg9: memref<1x1xf32, #tpu.memory_space<vmem>>, %arg10: memref<1x1xf32, #tpu.memory_space<vmem>>, %arg11: memref<1x1xf32, #tpu.memory_space<vmem>>, %arg12: memref<1x1xf32, #tpu.memory_space<vmem>>, %arg13: memref<1x1xf32, #tpu.memory_space<vmem>>, %arg14: memref<128x1xf32, #tpu.memory_space<vmem>>, %arg15: memref<128x1xf32, #tpu.memory_space<vmem>>, %arg16: memref<128x1xf32, #tpu.memory_space<vmem>>, %arg17: memref<128x1xf32, #tpu.memory_space<vmem>>) attributes {dimension_semantics = [#tpu.dimension_semantics<arbitrary>], iteration_bounds = array<i64: 5>, scalar_prefetch = 0 : i64, scratch_operands = 4 : i64, tpu.core_type = #tpu.core_type<tc>, window_params = [{transform_indices = @transform_0, window_bounds = array<i64: 128, 64>}, {transform_indices = @transform_1, window_bounds = array<i64: 128, 64>}, {pipeline_mode = #tpu.pipeline_mode<synchronous>, transform_indices = @transform_2, window_bounds = array<i64: 128, 64>}, {pipeline_mode = #tpu.pipeline_mode<synchronous>, transform_indices = @transform_3, window_bounds = array<i64: 128, 64>}, {pipeline_mode = #tpu.pipeline_mode<synchronous>, transform_indices = @transform_4, window_bounds = array<i64: 128, 64>}, {pipeline_mode = #tpu.pipeline_mode<synchronous>, transform_indices = @transform_5, window_bounds = array<i64: 128, 64>}, {pipeline_mode = #tpu.pipeline_mode<synchronous>, transform_indices = @transform_6, window_bounds = array<i64: 128, 64>}, {pipeline_mode = #tpu.pipeline_mode<synchronous>, transform_indices = @transform_7, window_bounds = array<i64: 128, 64>}, {pipeline_mode = #tpu.pipeline_mode<synchronous>, transform_indices = @transform_8, window_bounds = array<i64: 1, 1>}, {pipeline_mode = #tpu.pipeline_mode<synchronous>, transform_indices = @transform_9, window_bounds = array<i64: 1, 1>}, {pipeline_mode = #tpu.pipeline_mode<synchronous>, transform_indices = @transform_10, window_bounds = array<i64: 1, 1>}, {pipeline_mode = #tpu.pipeline_mode<synchronous>, transform_indices = @transform_11, window_bounds = array<i64: 1, 1>}, {pipeline_mode = #tpu.pipeline_mode<synchronous>, transform_indices = @transform_12, window_bounds = array<i64: 1, 1>}]} {
    %c0_i32 = arith.constant 0 : i32
    %0 = arith.cmpi eq, %arg0, %c0_i32 : i32
    %1 = arith.extui %0 : i1 to i32
    %c0_i32_0 = arith.constant 0 : i32
    %2 = arith.cmpi ne, %1, %c0_i32_0 : i32
    scf.if %2 {
      %cst = arith.constant 0xFF800000 : f32
      %12 = vector.broadcast %cst : f32 to vector<128x1xf32>
      %c0 = arith.constant 0 : index
      %c0_5 = arith.constant 0 : index
      %13 = vector.load %arg14[%c0, %c0_5] : memref<128x1xf32, #tpu.memory_space<vmem>>, vector<128x1xf32>
      tpu.vector_store %arg14[%c0, %c0_5], %12 {strides = array<i32>} : memref<128x1xf32, #tpu.memory_space<vmem>>, vector<128x1xf32>,
      %cst_6 = arith.constant 0.000000e+00 : f32
      %14 = vector.broadcast %cst_6 : f32 to vector<128x1xf32>
      %c0_7 = arith.constant 0 : index
      %c0_8 = arith.constant 0 : index
      %15 = vector.load %arg15[%c0_7, %c0_8] : memref<128x1xf32, #tpu.memory_space<vmem>>, vector<128x1xf32>
      tpu.vector_store %arg15[%c0_7, %c0_8], %14 {strides = array<i32>} : memref<128x1xf32, #tpu.memory_space<vmem>>, vector<128x1xf32>,
      %cst_9 = arith.constant 0xFF800000 : f32
      %16 = vector.broadcast %cst_9 : f32 to vector<128x1xf32>
      %c0_10 = arith.constant 0 : index
      %c0_11 = arith.constant 0 : index
      %17 = vector.load %arg16[%c0_10, %c0_11] : memref<128x1xf32, #tpu.memory_space<vmem>>, vector<128x1xf32>
      tpu.vector_store %arg16[%c0_10, %c0_11], %16 {strides = array<i32>} : memref<128x1xf32, #tpu.memory_space<vmem>>, vector<128x1xf32>,
      %cst_12 = arith.constant 0.000000e+00 : f32
      %18 = vector.broadcast %cst_12 : f32 to vector<128x1xf32>
      %c0_13 = arith.constant 0 : index
      %c0_14 = arith.constant 0 : index
      %19 = vector.load %arg17[%c0_13, %c0_14] : memref<128x1xf32, #tpu.memory_space<vmem>>, vector<128x1xf32>
      tpu.vector_store %arg17[%c0_13, %c0_14], %18 {strides = array<i32>} : memref<128x1xf32, #tpu.memory_space<vmem>>, vector<128x1xf32>,
    } else {
    }
    %c2_i32 = arith.constant 2 : i32
    %3 = arith.cmpi slt, %arg0, %c2_i32 : i32
    %4 = arith.extui %3 : i1 to i32
    %c0_i32_1 = arith.constant 0 : i32
    %5 = arith.cmpi ne, %4, %c0_i32_1 : i32
    scf.if %5 {
      %c0 = arith.constant 0 : index
      %c0_5 = arith.constant 0 : index
      %12 = vector.load %arg3[%c0, %c0_5] : memref<128x64xf32, #tpu.memory_space<vmem>>, vector<128x64xf32>
      %cst = arith.constant 5.000000e+00 : f32
      %13 = vector.broadcast %cst : f32 to vector<128x64xf32>
      %14 = arith.mulf %12, %13 : vector<128x64xf32>
      %c0_6 = arith.constant 0 : index
      %c0_7 = arith.constant 0 : index
      %15 = vector.load %arg1[%c0_6, %c0_7] : memref<128x64xf32, #tpu.memory_space<vmem>>, vector<128x64xf32>
      %cst_8 = arith.constant dense<0.000000e+00> : vector<128x128xf32>
      %16 = tpu.matmul %14, %15, %cst_8 {dimension_numbers = #tpu.dot_dimension_numbers<[1], [1], [0], [0], [0, 0, 1, 0], [], []>} : vector<128x64xf32>, vector<128x64xf32>, vector<128x128xf32> -> vector<128x128xf32>
      %c0_9 = arith.constant 0 : index
      %c0_10 = arith.constant 0 : index
      %17 = vector.load %arg14[%c0_9, %c0_10] : memref<128x1xf32, #tpu.memory_space<vmem>>, vector<128x1xf32>
      %cst_11 = arith.constant dense<0xFF800000> : vector<128xf32>
      %18 = vector.multi_reduction <maximumf>, %16, %cst_11 [1] : vector<128x128xf32> to vector<128xf32>
      %19 = vector.shape_cast %18 : vector<128xf32> to vector<128x1xf32>
      %20 = arith.maximumf %17, %19 : vector<128x1xf32>
      %c0_12 = arith.constant 0 : index
      %c0_13 = arith.constant 0 : index
      %21 = vector.load %arg15[%c0_12, %c0_13] : memref<128x1xf32, #tpu.memory_space<vmem>>, vector<128x1xf32>
      %c0_14 = arith.constant 0 : index
      %c0_15 = arith.constant 0 : index
      %22 = vector.load %arg14[%c0_14, %c0_15] : memref<128x1xf32, #tpu.memory_space<vmem>>, vector<128x1xf32>
      %23 = arith.subf %22, %20 : vector<128x1xf32>
      %24 = math.exp %23 : vector<128x1xf32>
      %25 = arith.mulf %21, %24 : vector<128x1xf32>
      %26 = vector.broadcast %20 : vector<128x1xf32> to vector<128x128xf32>
      %27 = arith.subf %16, %26 : vector<128x128xf32>
      %28 = math.exp %27 : vector<128x128xf32>
      %cst_16 = arith.constant dense<0.000000e+00> : vector<128xf32>
      %29 = vector.multi_reduction <add>, %28, %cst_16 [1] : vector<128x128xf32> to vector<128xf32>
      %30 = vector.shape_cast %29 : vector<128xf32> to vector<128x1xf32>
      %31 = arith.addf %25, %30 : vector<128x1xf32>
      %c0_17 = arith.constant 0 : index
      %c0_18 = arith.constant 0 : index
      %32 = vector.load %arg15[%c0_17, %c0_18] : memref<128x1xf32, #tpu.memory_space<vmem>>, vector<128x1xf32>
      tpu.vector_store %arg15[%c0_17, %c0_18], %31 {strides = array<i32>} : memref<128x1xf32, #tpu.memory_space<vmem>>, vector<128x1xf32>,
      %c0_19 = arith.constant 0 : index
      %c0_20 = arith.constant 0 : index
      %33 = vector.load %arg14[%c0_19, %c0_20] : memref<128x1xf32, #tpu.memory_space<vmem>>, vector<128x1xf32>
      tpu.vector_store %arg14[%c0_19, %c0_20], %20 {strides = array<i32>} : memref<128x1xf32, #tpu.memory_space<vmem>>, vector<128x1xf32>,
    } else {
    }
    %c2_i32_2 = arith.constant 2 : i32
    %6 = arith.cmpi sge, %arg0, %c2_i32_2 : i32
    %7 = arith.extui %6 : i1 to i32
    %c0_i32_3 = arith.constant 0 : i32
    %8 = arith.cmpi ne, %7, %c0_i32_3 : i32
    scf.if %8 {
      %c0 = arith.constant 0 : index
      %c0_5 = arith.constant 0 : index
      %12 = vector.load %arg4[%c0, %c0_5] : memref<128x64xf32, #tpu.memory_space<vmem>>, vector<128x64xf32>
      %cst = arith.constant 5.000000e+00 : f32
      %13 = vector.broadcast %cst : f32 to vector<128x64xf32>
      %14 = arith.mulf %12, %13 : vector<128x64xf32>
      %c0_6 = arith.constant 0 : index
      %c0_7 = arith.constant 0 : index
      %15 = vector.load %arg2[%c0_6, %c0_7] : memref<128x64xf32, #tpu.memory_space<vmem>>, vector<128x64xf32>
      %cst_8 = arith.constant dense<0.000000e+00> : vector<128x128xf32>
      %16 = tpu.matmul %14, %15, %cst_8 {dimension_numbers = #tpu.dot_dimension_numbers<[1], [1], [0], [0], [0, 0, 1, 0], [], []>} : vector<128x64xf32>, vector<128x64xf32>, vector<128x128xf32> -> vector<128x128xf32>
      %c0_9 = arith.constant 0 : index
      %c0_10 = arith.constant 0 : index
      %17 = vector.load %arg16[%c0_9, %c0_10] : memref<128x1xf32, #tpu.memory_space<vmem>>, vector<128x1xf32>
      %cst_11 = arith.constant dense<0xFF800000> : vector<128xf32>
      %18 = vector.multi_reduction <maximumf>, %16, %cst_11 [1] : vector<128x128xf32> to vector<128xf32>
      %19 = vector.shape_cast %18 : vector<128xf32> to vector<128x1xf32>
      %20 = arith.maximumf %17, %19 : vector<128x1xf32>
      %c0_12 = arith.constant 0 : index
      %c0_13 = arith.constant 0 : index
      %21 = vector.load %arg17[%c0_12, %c0_13] : memref<128x1xf32, #tpu.memory_space<vmem>>, vector<128x1xf32>
      %c0_14 = arith.constant 0 : index
      %c0_15 = arith.constant 0 : index
      %22 = vector.load %arg16[%c0_14, %c0_15] : memref<128x1xf32, #tpu.memory_space<vmem>>, vector<128x1xf32>
      %23 = arith.subf %22, %20 : vector<128x1xf32>
      %24 = math.exp %23 : vector<128x1xf32>
      %25 = arith.mulf %21, %24 : vector<128x1xf32>
      %26 = vector.broadcast %20 : vector<128x1xf32> to vector<128x128xf32>
      %27 = arith.subf %16, %26 : vector<128x128xf32>
      %28 = math.exp %27 : vector<128x128xf32>
      %cst_16 = arith.constant dense<0.000000e+00> : vector<128xf32>
      %29 = vector.multi_reduction <add>, %28, %cst_16 [1] : vector<128x128xf32> to vector<128xf32>
      %30 = vector.shape_cast %29 : vector<128xf32> to vector<128x1xf32>
      %31 = arith.addf %25, %30 : vector<128x1xf32>
      %c0_17 = arith.constant 0 : index
      %c0_18 = arith.constant 0 : index
      %32 = vector.load %arg17[%c0_17, %c0_18] : memref<128x1xf32, #tpu.memory_space<vmem>>, vector<128x1xf32>
      tpu.vector_store %arg17[%c0_17, %c0_18], %31 {strides = array<i32>} : memref<128x1xf32, #tpu.memory_space<vmem>>, vector<128x1xf32>,
      %c0_19 = arith.constant 0 : index
      %c0_20 = arith.constant 0 : index
      %33 = vector.load %arg16[%c0_19, %c0_20] : memref<128x1xf32, #tpu.memory_space<vmem>>, vector<128x1xf32>
      tpu.vector_store %arg16[%c0_19, %c0_20], %20 {strides = array<i32>} : memref<128x1xf32, #tpu.memory_space<vmem>>, vector<128x1xf32>,
    } else {
    }
    %c4_i32 = arith.constant 4 : i32
    %9 = arith.cmpi eq, %arg0, %c4_i32 : i32
    %10 = arith.extui %9 : i1 to i32
    %c0_i32_4 = arith.constant 0 : i32
    %11 = arith.cmpi ne, %10, %c0_i32_4 : i32
    scf.if %11 {
      %c0 = arith.constant 0 : index
      %c0_5 = arith.constant 0 : index
      %12 = vector.load %arg14[%c0, %c0_5] : memref<128x1xf32, #tpu.memory_space<vmem>>, vector<128x1xf32>
      %c0_6 = arith.constant 0 : index
      %c0_7 = arith.constant 0 : index
      %13 = vector.load %arg15[%c0_6, %c0_7] : memref<128x1xf32, #tpu.memory_space<vmem>>, vector<128x1xf32>
      %14 = math.log %13 : vector<128x1xf32>
      %15 = arith.addf %12, %14 : vector<128x1xf32>
      %cst = arith.constant -18.420681 : f32
      %16 = vector.broadcast %cst : f32 to vector<128x1xf32>
      %17 = arith.maximumf %15, %16 : vector<128x1xf32>
      %cst_8 = arith.constant -18.420681 : f32
      %18 = vector.broadcast %cst_8 : f32 to vector<128x1xf32>
      %19 = arith.minimumf %15, %18 : vector<128x1xf32>
      %20 = arith.subf %19, %17 : vector<128x1xf32>
      %21 = math.exp %20 : vector<128x1xf32>
      %cst_9 = arith.constant 1.000000e+00 : f32
      %22 = vector.broadcast %cst_9 : f32 to vector<128x1xf32>
      %23 = arith.addf %22, %21 : vector<128x1xf32>
      %24 = math.log %23 : vector<128x1xf32>
      %25 = arith.addf %17, %24 : vector<128x1xf32>
      %26 = vector.shape_cast %25 : vector<128x1xf32> to vector<1x128x1xf32>
      %cst_10 = arith.constant dense<0.000000e+00> : vector<1xf32>
      %27 = vector.multi_reduction <add>, %26, %cst_10 [1, 2] : vector<1x128x1xf32> to vector<1xf32>
      %28 = vector.shape_cast %27 : vector<1xf32> to vector<1x1x1xf32>
      %29 = vector.extract %28[0, 0, 0] : f32 from vector<1x1x1xf32>
      %30 = vector.broadcast %29 : f32 to vector<1x1xf32>
      %c0_11 = arith.constant 0 : index
      %c0_12 = arith.constant 0 : index
      %31 = vector.load %arg9[%c0_11, %c0_12] : memref<1x1xf32, #tpu.memory_space<vmem>>, vector<1x1xf32>
      tpu.vector_store %arg9[%c0_11, %c0_12], %30 {strides = array<i32>} : memref<1x1xf32, #tpu.memory_space<vmem>>, vector<1x1xf32>,
      %c0_13 = arith.constant 0 : index
      %c0_14 = arith.constant 0 : index
      %32 = vector.load %arg16[%c0_13, %c0_14] : memref<128x1xf32, #tpu.memory_space<vmem>>, vector<128x1xf32>
      %c0_15 = arith.constant 0 : index
      %c0_16 = arith.constant 0 : index
      %33 = vector.load %arg17[%c0_15, %c0_16] : memref<128x1xf32, #tpu.memory_space<vmem>>, vector<128x1xf32>
      %34 = math.log %33 : vector<128x1xf32>
      %35 = arith.addf %32, %34 : vector<128x1xf32>
      %cst_17 = arith.constant -18.420681 : f32
      %36 = vector.broadcast %cst_17 : f32 to vector<128x1xf32>
      %37 = arith.maximumf %35, %36 : vector<128x1xf32>
      %cst_18 = arith.constant -18.420681 : f32
      %38 = vector.broadcast %cst_18 : f32 to vector<128x1xf32>
      %39 = arith.minimumf %35, %38 : vector<128x1xf32>
      %40 = arith.subf %39, %37 : vector<128x1xf32>
      %41 = math.exp %40 : vector<128x1xf32>
      %cst_19 = arith.constant 1.000000e+00 : f32
      %42 = vector.broadcast %cst_19 : f32 to vector<128x1xf32>
      %43 = arith.addf %42, %41 : vector<128x1xf32>
      %44 = math.log %43 : vector<128x1xf32>
      %45 = arith.addf %37, %44 : vector<128x1xf32>
      %46 = vector.shape_cast %45 : vector<128x1xf32> to vector<1x128x1xf32>
      %cst_20 = arith.constant dense<0.000000e+00> : vector<1xf32>
      %47 = vector.multi_reduction <add>, %46, %cst_20 [1, 2] : vector<1x128x1xf32> to vector<1xf32>
      %48 = vector.shape_cast %47 : vector<1xf32> to vector<1x1x1xf32>
      %49 = vector.extract %48[0, 0, 0] : f32 from vector<1x1x1xf32>
      %50 = vector.broadcast %49 : f32 to vector<1x1xf32>
      %c0_21 = arith.constant 0 : index
      %c0_22 = arith.constant 0 : index
      %51 = vector.load %arg10[%c0_21, %c0_22] : memref<1x1xf32, #tpu.memory_space<vmem>>, vector<1x1xf32>
      tpu.vector_store %arg10[%c0_21, %c0_22], %50 {strides = array<i32>} : memref<1x1xf32, #tpu.memory_space<vmem>>, vector<1x1xf32>,
      %c0_23 = arith.constant 0 : index
      %c0_24 = arith.constant 0 : index
      %52 = vector.load %arg5[%c0_23, %c0_24] : memref<128x64xf32, #tpu.memory_space<vmem>>, vector<128x64xf32>
      %c0_25 = arith.constant 0 : index
      %c0_26 = arith.constant 0 : index
      %53 = vector.load %arg6[%c0_25, %c0_26] : memref<128x64xf32, #tpu.memory_space<vmem>>, vector<128x64xf32>
      %c0_27 = arith.constant 0 : index
      %c0_28 = arith.constant 0 : index
      %54 = vector.load %arg3[%c0_27, %c0_28] : memref<128x64xf32, #tpu.memory_space<vmem>>, vector<128x64xf32>
      %55 = arith.mulf %54, %52 : vector<128x64xf32>
      %cst_29 = arith.constant dense<0.000000e+00> : vector<128xf32>
      %56 = vector.multi_reduction <add>, %55, %cst_29 [1] : vector<128x64xf32> to vector<128xf32>
      %57 = vector.shape_cast %56 : vector<128xf32> to vector<128x1xf32>
      %cst_30 = arith.constant 5.000000e+00 : f32
      %58 = vector.broadcast %cst_30 : f32 to vector<128x1xf32>
      %59 = arith.mulf %57, %58 : vector<128x1xf32>
      %cst_31 = arith.constant -5.000000e+00 : f32
      %cst_32 = arith.constant 5.000000e+00 : f32
      %60 = vector.broadcast %cst_31 : f32 to vector<128x1xf32>
      %61 = arith.maximumf %60, %59 : vector<128x1xf32>
      %62 = vector.broadcast %cst_32 : f32 to vector<128x1xf32>
      %63 = arith.minimumf %62, %61 : vector<128x1xf32>
      %c0_33 = arith.constant 0 : index
      %c0_34 = arith.constant 0 : index
      %64 = vector.load %arg4[%c0_33, %c0_34] : memref<128x64xf32, #tpu.memory_space<vmem>>, vector<128x64xf32>
      %65 = arith.mulf %64, %53 : vector<128x64xf32>
      %cst_35 = arith.constant dense<0.000000e+00> : vector<128xf32>
      %66 = vector.multi_reduction <add>, %65, %cst_35 [1] : vector<128x64xf32> to vector<128xf32>
      %67 = vector.shape_cast %66 : vector<128xf32> to vector<128x1xf32>
      %cst_36 = arith.constant 5.000000e+00 : f32
      %68 = vector.broadcast %cst_36 : f32 to vector<128x1xf32>
      %69 = arith.mulf %67, %68 : vector<128x1xf32>
      %cst_37 = arith.constant -5.000000e+00 : f32
      %cst_38 = arith.constant 5.000000e+00 : f32
      %70 = vector.broadcast %cst_37 : f32 to vector<128x1xf32>
      %71 = arith.maximumf %70, %69 : vector<128x1xf32>
      %72 = vector.broadcast %cst_38 : f32 to vector<128x1xf32>
      %73 = arith.minimumf %72, %71 : vector<128x1xf32>
      %74 = vector.shape_cast %63 : vector<128x1xf32> to vector<1x128x1xf32>
      %cst_39 = arith.constant dense<0.000000e+00> : vector<1xf32>
      %75 = vector.multi_reduction <add>, %74, %cst_39 [1, 2] : vector<1x128x1xf32> to vector<1xf32>
      %76 = vector.shape_cast %75 : vector<1xf32> to vector<1x1x1xf32>
      %77 = vector.extract %76[0, 0, 0] : f32 from vector<1x1x1xf32>
      %78 = vector.broadcast %77 : f32 to vector<1x1xf32>
      %c0_40 = arith.constant 0 : index
      %c0_41 = arith.constant 0 : index
      %79 = vector.load %arg11[%c0_40, %c0_41] : memref<1x1xf32, #tpu.memory_space<vmem>>, vector<1x1xf32>
      tpu.vector_store %arg11[%c0_40, %c0_41], %78 {strides = array<i32>} : memref<1x1xf32, #tpu.memory_space<vmem>>, vector<1x1xf32>,
      %80 = vector.shape_cast %73 : vector<128x1xf32> to vector<1x128x1xf32>
      %cst_42 = arith.constant dense<0.000000e+00> : vector<1xf32>
      %81 = vector.multi_reduction <add>, %80, %cst_42 [1, 2] : vector<1x128x1xf32> to vector<1xf32>
      %82 = vector.shape_cast %81 : vector<1xf32> to vector<1x1x1xf32>
      %83 = vector.extract %82[0, 0, 0] : f32 from vector<1x1x1xf32>
      %84 = vector.broadcast %83 : f32 to vector<1x1xf32>
      %c0_43 = arith.constant 0 : index
      %c0_44 = arith.constant 0 : index
      %85 = vector.load %arg12[%c0_43, %c0_44] : memref<1x1xf32, #tpu.memory_space<vmem>>, vector<1x1xf32>
      tpu.vector_store %arg12[%c0_43, %c0_44], %84 {strides = array<i32>} : memref<1x1xf32, #tpu.memory_space<vmem>>, vector<1x1xf32>,
      %c0_45 = arith.constant 0 : index
      %c0_46 = arith.constant 0 : index
      %86 = vector.load %arg7[%c0_45, %c0_46] : memref<128x64xf32, #tpu.memory_space<vmem>>, vector<128x64xf32>
      %87 = arith.mulf %52, %86 : vector<128x64xf32>
      %cst_47 = arith.constant dense<0.000000e+00> : vector<128xf32>
      %88 = vector.multi_reduction <add>, %87, %cst_47 [1] : vector<128x64xf32> to vector<128xf32>
      %89 = vector.shape_cast %88 : vector<128xf32> to vector<128x1xf32>
      %c0_48 = arith.constant 0 : index
      %c0_49 = arith.constant 0 : index
      %90 = vector.load %arg8[%c0_48, %c0_49] : memref<128x64xf32, #tpu.memory_space<vmem>>, vector<128x64xf32>
      %91 = arith.mulf %52, %90 : vector<128x64xf32>
      %cst_50 = arith.constant dense<0.000000e+00> : vector<128xf32>
      %92 = vector.multi_reduction <add>, %91, %cst_50 [1] : vector<128x64xf32> to vector<128xf32>
      %93 = vector.shape_cast %92 : vector<128xf32> to vector<128x1xf32>
      %94 = arith.subf %89, %93 : vector<128x1xf32>
      %cst_51 = arith.constant 0.000000e+00 : f32
      %95 = vector.broadcast %cst_51 : f32 to vector<128x1xf32>
      %96 = arith.minimumf %94, %95 : vector<128x1xf32>
      %97 = math.absf %94 : vector<128x1xf32>
      %cst_52 = arith.constant 0.000000e+00 : f32
      %98 = vector.broadcast %cst_52 : f32 to vector<128x1xf32>
      %99 = arith.subf %98, %97 : vector<128x1xf32>
      %100 = math.exp %99 : vector<128x1xf32>
      %cst_53 = arith.constant 1.000000e+00 : f32
      %101 = vector.broadcast %cst_53 : f32 to vector<128x1xf32>
      %102 = arith.addf %101, %100 : vector<128x1xf32>
      %103 = math.log %102 : vector<128x1xf32>
      %104 = arith.subf %96, %103 : vector<128x1xf32>
      %105 = vector.shape_cast %104 : vector<128x1xf32> to vector<1x128x1xf32>
      %cst_54 = arith.constant dense<0.000000e+00> : vector<1xf32>
      %106 = vector.multi_reduction <add>, %105, %cst_54 [1, 2] : vector<1x128x1xf32> to vector<1xf32>
      %107 = vector.shape_cast %106 : vector<1xf32> to vector<1x1x1xf32>
      %108 = vector.extract %107[0, 0, 0] : f32 from vector<1x1x1xf32>
      %109 = vector.broadcast %108 : f32 to vector<1x1xf32>
      %c0_55 = arith.constant 0 : index
      %c0_56 = arith.constant 0 : index
      %110 = vector.load %arg13[%c0_55, %c0_56] : memref<1x1xf32, #tpu.memory_space<vmem>>, vector<1x1xf32>
      tpu.vector_store %arg13[%c0_55, %c0_56], %109 {strides = array<i32>} : memref<1x1xf32, #tpu.memory_space<vmem>>, vector<1x1xf32>,
    } else {
    }
    return
  }
  func.func @transform_0(%arg0: i32) -> (i32, i32) {
    %c1_i32 = arith.constant 1 : i32
    %0 = arith.minsi %arg0, %c1_i32 : i32
    %c0_i32 = arith.constant 0 : i32
    %c0_i32_0 = arith.constant 0 : i32
    return %0, %c0_i32 : i32, i32
  }
  func.func @transform_1(%arg0: i32) -> (i32, i32) {
    %c2_i32 = arith.constant 2 : i32
    %0 = arith.subi %arg0, %c2_i32 : i32
    %c0_i32 = arith.constant 0 : i32
    %1 = arith.maxsi %0, %c0_i32 : i32
    %c0_i32_0 = arith.constant 0 : i32
    %c0_i32_1 = arith.constant 0 : i32
    return %1, %c0_i32_0 : i32, i32
  }
  func.func @transform_2(%arg0: i32) -> (i32, i32) {
    %c0_i32 = arith.constant 0 : i32
    %c0_i32_0 = arith.constant 0 : i32
    %c0_i32_1 = arith.constant 0 : i32
    return %c0_i32, %c0_i32_0 : i32, i32
  }
  func.func @transform_3(%arg0: i32) -> (i32, i32) {
    %c0_i32 = arith.constant 0 : i32
    %c0_i32_0 = arith.constant 0 : i32
    %c0_i32_1 = arith.constant 0 : i32
    return %c0_i32, %c0_i32_0 : i32, i32
  }
  func.func @transform_4(%arg0: i32) -> (i32, i32) {
    %c0_i32 = arith.constant 0 : i32
    %c0_i32_0 = arith.constant 0 : i32
    %c0_i32_1 = arith.constant 0 : i32
    return %c0_i32, %c0_i32_0 : i32, i32
  }
  func.func @transform_5(%arg0: i32) -> (i32, i32) {
    %c0_i32 = arith.constant 0 : i32
    %c0_i32_0 = arith.constant 0 : i32
    %c0_i32_1 = arith.constant 0 : i32
    return %c0_i32, %c0_i32_0 : i32, i32
  }
  func.func @transform_6(%arg0: i32) -> (i32, i32) {
    %c0_i32 = arith.constant 0 : i32
    %c0_i32_0 = arith.constant 0 : i32
    %c0_i32_1 = arith.constant 0 : i32
    return %c0_i32, %c0_i32_0 : i32, i32
  }
  func.func @transform_7(%arg0: i32) -> (i32, i32) {
    %c0_i32 = arith.constant 0 : i32
    %c0_i32_0 = arith.constant 0 : i32
    %c0_i32_1 = arith.constant 0 : i32
    return %c0_i32, %c0_i32_0 : i32, i32
  }
  func.func @transform_8(%arg0: i32) -> (i32, i32) {
    %c0_i32 = arith.constant 0 : i32
    %c0_i32_0 = arith.constant 0 : i32
    %c0_i32_1 = arith.constant 0 : i32
    return %c0_i32, %c0_i32_0 : i32, i32
  }
  func.func @transform_9(%arg0: i32) -> (i32, i32) {
    %c0_i32 = arith.constant 0 : i32
    %c0_i32_0 = arith.constant 0 : i32
    %c0_i32_1 = arith.constant 0 : i32
    return %c0_i32, %c0_i32_0 : i32, i32
  }
  func.func @transform_10(%arg0: i32) -> (i32, i32) {
    %c0_i32 = arith.constant 0 : i32
    %c0_i32_0 = arith.constant 0 : i32
    %c0_i32_1 = arith.constant 0 : i32
    return %c0_i32, %c0_i32_0 : i32, i32
  }
  func.func @transform_11(%arg0: i32) -> (i32, i32) {
    %c0_i32 = arith.constant 0 : i32
    %c0_i32_0 = arith.constant 0 : i32
    %c0_i32_1 = arith.constant 0 : i32
    return %c0_i32, %c0_i32_0 : i32, i32
  }
  func.func @transform_12(%arg0: i32) -> (i32, i32) {
    %c0_i32 = arith.constant 0 : i32
    %c0_i32_0 = arith.constant 0 : i32
    %c0_i32_1 = arith.constant 0 : i32
    return %c0_i32, %c0_i32_0 : i32, i32
  }
}

</mosaic_0001>

<bundles_post_ra>
// kernel: lightgcl_forward.3
= control target key start
LH: loop header
LB: loop body
LE: loop exit
PB: predicated region body
PF: predicated region fallthrough
CT: control target
= control target key end

     0   :  { %s5858_s0 = inlined_call_operand.vmem [shape: bf16[256,384], index: 0, kind: input, shape index: {}]   ;;  %s5859_s1 = inlined_call_operand.vmem [shape: bf16[256,64], index: 1, kind: input, shape index: {}]   ;;  %s5860_s2 = inlined_call_operand.vmem [shape: bf16[384,64], index: 2, kind: input, shape index: {}]   ;;  %s5861_s3 = inlined_call_operand.vmem [shape: bf16[256,32], index: 3, kind: input, shape index: {}]   ;;  %s5862_s4 = inlined_call_operand.vmem [shape: bf16[384,32], index: 4, kind: input, shape index: {}]   ;;  %s5863_s5 = inlined_call_operand.vmem [shape: bf16[32,256], index: 5, kind: input, shape index: {}]   ;;  %s5864_s6 = inlined_call_operand.vmem [shape: bf16[32,384], index: 6, kind: input, shape index: {}]   ;;  %s5865_s7 = inlined_call_operand.vmem [shape: f32[256,64], index: 7, kind: input, shape index: {}, may-alias: {7,12}]   ;;  %s5866_s8 = inlined_call_operand.vmem [shape: f32[256,64], index: 8, kind: input, shape index: {}, may-alias: {8,13}]   ;;  %s5867_s9 = inlined_call_operand.vmem [shape: f32[384,64], index: 9, kind: input, shape index: {}, may-alias: {9,15}]   ;;  %s5868_s10 = inlined_call_operand.vmem [shape: f32[384,64], index: 10, kind: input, shape index: {}, may-alias: {10,16}]   ;;  %s5869_s11 = inlined_call_operand.vmem [shape: bf16[256,64], index: 11, kind: output, shape index: {0}]   ;;  %s5870_s12 = inlined_call_operand.vmem [shape: f32[256,64], index: 12, kind: output, shape index: {1}, may-alias: {7,12}]   ;;  %s5871_s13 = inlined_call_operand.vmem [shape: f32[256,64], index: 13, kind: output, shape index: {2}, may-alias: {8,13}]   ;;  %s5872_s14 = inlined_call_operand.vmem [shape: bf16[384,64], index: 14, kind: output, shape index: {3}]   ;;  %s5873_s15 = inlined_call_operand.vmem [shape: f32[384,64], index: 15, kind: output, shape index: {4}, may-alias: {9,15}]   ;;  %s5874_s16 = inlined_call_operand.vmem [shape: f32[384,64], index: 16, kind: output, shape index: {5}, may-alias: {10,16}]  }
   0x1   :  { %5883 = sst [smem:[#allocation33_spill]] %s5858_s0 }
   0x2   :  { %5884 = sst [smem:[#allocation34_spill]] %s5859_s1 }
   0x3   :  { %5885 = sst [smem:[#allocation35_spill]] %s5860_s2 }
   0x4   :  { %5886 = sst [smem:[#allocation36_spill]] %s5861_s3 }
   0x5   :  { %5887 = sst [smem:[#allocation37_spill]] %s5862_s4 }
   0x6   :  { %5888 = sst [smem:[#allocation38_spill]] %s5867_s9 }
   0x7   :  { %5889 = sst [smem:[#allocation39_spill]] %s5868_s10 }
   0x8   :  { %5890 = sst [smem:[#allocation40_spill]] %s5869_s11 }
   0x9   :  { %5891 = sst [smem:[#allocation41_spill]] %s5870_s12 }
   0xa   :  { %5892 = sst [smem:[#allocation42_spill]] %s5871_s13 }
   0xb   :  { %5893 = sst [smem:[#allocation43_spill]] %s5872_s14 }
   0xc   :  { %5894 = sst [smem:[#allocation44_spill]] %s5873_s15 }
   0xd   :  { %5895 = sst [smem:[#allocation45_spill]] %s5874_s16 }
   0xe   :  { %s3724_s21 = smov 0   ;;  %s3726_s22 = smov 0  }
   0xf   :  { %s3728_s23 = smov 0   ;;  %s3730_s24 = smov 0  }
  0x10   :  { %s3732_s25 = smov 0   ;;  %s3734_s26 = smov 0  }
  0x11   :  { %s3736_s27 = smov 0   ;;  %s3738_s28 = smov 0  }
  0x12   :  { %s3740_s29 = smov 0   ;;  %s3742_s30 = smov 0  }
  0x13   :  { %s3744_s0 = smov 0  }
  0x14 LB: > { %s36_s17 = sadd.s32 1, %s3627_s29  ;;  %s39_s18 = sadd.s32 1, %s3631_s30  ;;  %s3635_s0 = sphi %s3744_s0, %s27_s0   ;;  %s3631_s30 = sphi %s3742_s30, %s5972_s30   ;;  %s3627_s29 = sphi %s3740_s29, %s5971_s29   ;;  %s3623_s28 = sphi %s3738_s28, %s5970_s28   ;;  %s3619_s27 = sphi %s3736_s27, %s5969_s27   ;;  %s3615_s26 = sphi %s3734_s26, %s5968_s26   ;;  %s3611_s25 = sphi %s3732_s25, %s5967_s25   ;;  %s3607_s24 = sphi %s3730_s24, %s5966_s24   ;;  %s3603_s23 = sphi %s3728_s23, %s5965_s23   ;;  %s3599_s22 = sphi %s3726_s22, %s5964_s22   ;;  %s3595_s21 = sphi %s3724_s21, %s5963_s21  }
  0x15   : > { %p37_p0 = scmp.ge.s32.totalorder %s36_s17, 3  ;;  %s48_s19 = sadd.s32 1, %s3615_s26 }
  0x16   : > { %p55_p1 = scmp.ne.s32.totalorder %s3615_s26, %s3611_s25  ;;  %p56_p2 = scmp.eq.s32.totalorder %s3635_s0, 0 }
  0x17   : > { %s5974_s17 = smov (%p37_p0, %s36_s17), 0  ;;  %s5976_s18 = smov (!%p37_p0, %s39_s18), %s3631_s30 }
  0x18   : > { %5896 = sst [smem:[#allocation9_spill]] %s5974_s17  ;;  %s44_s20 = ssub.s32 %s3627_s29, %s5974_s17 }
  0x19   : > { %p3792_p3 = por %p56_p2, %p55_p1  ;;  %p41_p4 = scmp.ge.s32.totalorder %s5976_s18, 2 }
  0x1a   : > { %s173_s10 = sadd.s32 1, %s3607_s24  ;;  %p180_p5 = scmp.ne.s32.totalorder %s3607_s24, %s3603_s23 }
  0x1b   : > { %p197_p6 = scmp.eq.s32.totalorder %s44_s20, 0  ;;  %s5978_s18 = smov (%p41_p4, %s5976_s18), 0 }
  0x1c   : > { %5898 = sst [smem:[#allocation10_spill]] %s5978_s18  ;;  %p3803_p7 = por %p180_p5, %p56_p2 }
  0x1d   : > { %s199_s17 = sadd.s32 1, %s3599_s22  ;;  %s43_s9 = ssub.s32 %s3631_s30, %s5978_s18 }
  0x1e   : > { %p206_p8 = scmp.ne.s32.totalorder %s3599_s22, %s3595_s21  ;;  %s45_s4 = sor.u32 %s44_s20, %s43_s9 }
  0x1f   : > { %p171_p9 = scmp.eq.s32.totalorder %s43_s9, 0  ;;  %p46_p10 = scmp.eq.s32.totalorder %s45_s4, 0 }
  0x20   : > { %p3814_p11 = por %p206_p8, %p56_p2  ;;  %p2967_p12 = scmp.ge.s32.totalorder %s3635_s0, 6 }
  0x21   : > { %s3819_s2 = scalar_select %p171_p9, %s3607_s24, %s173_s10  }
  0x22   : > { %s3822_s13 = scalar_select %p46_p10, %s3615_s26, %s48_s19  }
  0x23   : > { %5901 = sst [smem:[#allocation11_spill]] %s3819_s2  ;;  %476 = sbr.rel (%p2967_p12) target bundleno = 82 (0x52), region = 28 }
  0x24   : > { %5902 = sst [smem:[#allocation12_spill]] %s3822_s13 }
  0x25   : > { %s3825_s12 = scalar_select %p197_p6, %s3599_s22, %s199_s17  }
  0x28   : > { %479 = sbr.rel (!%p3792_p3) target bundleno = 66 (0x42), region = 32  ;;  %s481_s4 = sand.u32 (%p3792_p3), 1, %s3615_s26  }
  0x29   : > { %s3458_s9 = smul.u32 (%p3792_p3), 48, %s3631_s30  ;;  %s2968_s20 = sshll.u32 (%p3792_p3), %s481_s4, 6 }
  0x2a   : > { %s5903_s19 = sld [smem:[#allocation33_spill]] (%p3792_p3)  ;;  %s483_s16 = scalar_lea.vmem (%p3792_p3), [#allocation6], %s2968_s20 }
  0x2b   : > { %s486_s18 = sadd.s32 (%p3792_p3), %s3627_s29, %s3458_s9 }
  0x2c   : > { %s2971_s11 = sshll.u32 (%p3792_p3), %s486_s18, 2 }
  0x30   : > { %s3836_s13 = scalar_lea.vmem %s5903_s19, %s2971_s11 }
  0x31   : > { %v505_v0 = vld [vmem:[%s3836_s13] sm:$0xf]  ;;  %v507_v1 = vld [vmem:[%s3836_s13 + $0xc] sm:$0xf]  ;;  %v509_v2 = vld [vmem:[%s3836_s13 + $0x18] sm:$0xf] }
  0x32   : > { %506 = vst [vmem:[%s483_s16] sm:$0xf] %v505_v0  ;;  %v511_v3 = vld [vmem:[%s3836_s13 + $0x24] sm:$0xf]  ;;  %v513_v4 = vld [vmem:[%s3836_s13 + $0x30] sm:$0xf] }
  0x33   : > { %508 = vst [vmem:[%s483_s16 + $0x4] sm:$0xf] %v507_v1  ;;  %v515_v5 = vld [vmem:[%s3836_s13 + $0x3c] sm:$0xf]  ;;  %v517_v6 = vld [vmem:[%s3836_s13 + $0x48] sm:$0xf] }
  0x34   : > { %510 = vst [vmem:[%s483_s16 + $0x8] sm:$0xf] %v509_v2  ;;  %v519_v7 = vld [vmem:[%s3836_s13 + $0x54] sm:$0xf]  ;;  %v521_v8 = vld [vmem:[%s3836_s13 + $0x60] sm:$0xf] }
  0x35   : > { %512 = vst [vmem:[%s483_s16 + $0xc] sm:$0xf] %v511_v3  ;;  %v523_v9 = vld [vmem:[%s3836_s13 + $0x6c] sm:$0xf]  ;;  %v525_v10 = vld [vmem:[%s3836_s13 + $0x78] sm:$0xf] }
  0x36   : > { %514 = vst [vmem:[%s483_s16 + $0x10] sm:$0xf] %v513_v4  ;;  %v527_v11 = vld [vmem:[%s3836_s13 + $0x84] sm:$0xf]  ;;  %v529_v12 = vld [vmem:[%s3836_s13 + $0x90] sm:$0xf] }
  0x37   : > { %516 = vst [vmem:[%s483_s16 + $0x14] sm:$0xf] %v515_v5  ;;  %v531_v13 = vld [vmem:[%s3836_s13 + $0x9c] sm:$0xf]  ;;  %v533_v14 = vld [vmem:[%s3836_s13 + $0xa8] sm:$0xf] }
  0x38   : > { %518 = vst [vmem:[%s483_s16 + $0x18] sm:$0xf] %v517_v6  ;;  %v535_v15 = vld [vmem:[%s3836_s13 + $0xb4] sm:$0xf] }
  0x39   : > { %520 = vst [vmem:[%s483_s16 + $0x1c] sm:$0xf] %v519_v7 }
  0x3a   : > { %522 = vst [vmem:[%s483_s16 + $0x20] sm:$0xf] %v521_v8 }
  0x3b   : > { %524 = vst [vmem:[%s483_s16 + $0x24] sm:$0xf] %v523_v9 }
  0x3c   : > { %526 = vst [vmem:[%s483_s16 + $0x28] sm:$0xf] %v525_v10 }
  0x3d   : > { %528 = vst [vmem:[%s483_s16 + $0x2c] sm:$0xf] %v527_v11 }
  0x3e   : > { %530 = vst [vmem:[%s483_s16 + $0x30] sm:$0xf] %v529_v12 }
  0x3f   : > { %532 = vst [vmem:[%s483_s16 + $0x34] sm:$0xf] %v531_v13 }
  0x40   : > { %534 = vst [vmem:[%s483_s16 + $0x38] sm:$0xf] %v533_v14 }
  0x41   : > { %536 = vst [vmem:[%s483_s16 + $0x3c] sm:$0xf] %v535_v15 }
  0x42 PF: > { %619 = sbr.rel (!%p3803_p7) target bundleno = 74 (0x4a), region = 85  ;;  %s621_s2 = sand.u32 (%p3803_p7), 1, %s3607_s24  }
  0x43   : > { %s2973_s11 = sshll.u32 (%p3803_p7), %s3631_s30, 2  ;;  %s2972_s17 = sshll.u32 (%p3803_p7), %s621_s2, 4 }
  0x44   : > { %s625_s9 = scalar_lea.vmem (%p3803_p7), %s5863_s5, %s2973_s11  ;;  %s623_s20 = scalar_lea.vmem (%p3803_p7), [#allocation7], %s2972_s17 }
  0x45   : > { %v642_v16 = vld [vmem:[%s625_s9] sm:$0xf] (%p3803_p7)  ;;  %v644_v17 = vld [vmem:[%s625_s9 + $0x8] sm:$0xf] (%p3803_p7)  ;;  %v646_v18 = vld [vmem:[%s625_s9 + $0x10] sm:$0xf] (%p3803_p7) }
  0x46   : > { %643 = vst [vmem:[%s623_s20] sm:$0xf] (%p3803_p7), %v642_v16  ;;  %v648_v19 = vld [vmem:[%s625_s9 + $0x18] sm:$0xf] (%p3803_p7) }
  0x47   : > { %645 = vst [vmem:[%s623_s20 + $0x4] sm:$0xf] %v644_v17 }
  0x48   : > { %647 = vst [vmem:[%s623_s20 + $0x8] sm:$0xf] %v646_v18 }
  0x49   : > { %649 = vst [vmem:[%s623_s20 + $0xc] sm:$0xf] %v648_v19 }
  0x4a PF: > { %681 = sbr.rel (!%p3814_p11) target bundleno = 82 (0x52), region = 126  ;;  %s683_s13 = sand.u32 (%p3814_p11), 1, %s3599_s22  }
  0x4b   : > { %s2975_s15 = sshll.u32 (%p3814_p11), %s3627_s29, 2  ;;  %s2974_s10 = sshll.u32 (%p3814_p11), %s683_s13, 4 }
  0x4c   : > { %s687_s2 = scalar_lea.vmem (%p3814_p11), %s5864_s6, %s2975_s15  ;;  %s685_s11 = scalar_lea.vmem (%p3814_p11), [#allocation8], %s2974_s10 }
  0x4d   : > { %v704_v20 = vld [vmem:[%s687_s2] sm:$0xf] (%p3814_p11)  ;;  %v706_v21 = vld [vmem:[%s687_s2 + $0xc] sm:$0xf] (%p3814_p11)  ;;  %v708_v22 = vld [vmem:[%s687_s2 + $0x18] sm:$0xf] (%p3814_p11) }
  0x4e   : > { %705 = vst [vmem:[%s685_s11] sm:$0xf] (%p3814_p11), %v704_v20  ;;  %v710_v23 = vld [vmem:[%s687_s2 + $0x24] sm:$0xf] (%p3814_p11) }
  0x4f   : > { %707 = vst [vmem:[%s685_s11 + $0x4] sm:$0xf] %v706_v21 }
  0x50   : > { %709 = vst [vmem:[%s685_s11 + $0x8] sm:$0xf] %v708_v22 }
  0x51   : > { %711 = vst [vmem:[%s685_s11 + $0xc] sm:$0xf] %v710_v23 }
  0x52 PF: > { %p2976_p13 = scmp.ge.s32.totalorder %s3635_s0, 1  ;;  %p760_p0 = scmp.lt.s32.totalorder %s3635_s0, 7 }
  0x54   : > { %p761_p1 = pnand %p2976_p13, %p760_p0 }
  0x56   : > { %764 = sbr.rel (%p761_p1) target bundleno = 1708 (0x6ac), region = 175 }
  0x5b   : > { %s767_s14 = sand.u32 1, %s3611_s25   ;;  %s774_s17 = sand.u32 1, %s3603_s23  }
  0x5c   : > { %s2977_s18 = sshll.u32 %s767_s14, 6  ;;  %s3872_s4 = sshll.u32 %s774_s17, 4 }
  0x5d   : > { %s781_s9 = sand.u32 1, %s3595_s21   ;;  %s2980_s20 = sshll.u32 %s3623_s28, 4 }
  0x5e   : > { %s769_s13 = scalar_lea.vmem [#allocation6], %s2977_s18  ;;  %s3880_s15 = sshll.u32 %s781_s9, 4 }
  0x5f   : > { %v3876_v24 = vld [vmem:[%s769_s13] sm:$0xf]  ;;  %v3878_v25 = vld [vmem:[%s769_s13] sm:$0xf0]  ;;  %p875_p2 = scmp.lt.s32.totalorder %s2980_s20, 31  ;;  %s2982_s25 = sshll.u32 %s3619_s27, 4 }
  0x60   : > { %v3882_v26 = vld [vmem:[%s769_s13 + $0x8] sm:$0xf]  ;;  %v3884_v27 = vld [vmem:[%s769_s13 + $0x8] sm:$0xf0]  ;;  %v3887_v28 = vld [vmem:[%s769_s13 + $0x10] sm:$0xf] }
  0x61   : > { %v3889_v29 = vld [vmem:[%s769_s13 + $0x10] sm:$0xf0]  ;;  %s5980_s20 = smov (!%p875_p2, %s2980_s20), 31  ;;  %v3891_v30 = vld [vmem:[%s769_s13 + $0x18] sm:$0xf]  ;;  %p881_p3 = scmp.lt.s32.totalorder %s2982_s25, 47 }
  0x62   : > { %v3893_v31 = vld [vmem:[%s769_s13 + $0x18] sm:$0xf0]  ;;  %v3895_v32 = vld [vmem:[%s769_s13 + $0x20] sm:$0xf]  ;;  %v3897_v33 = vld [vmem:[%s769_s13 + $0x20] sm:$0xf0] }
  0x63   : > { %p971_p4 = scmp.eq.s32.totalorder %s3623_s28, 0  ;;  %s2981_s21 = sshll.u32 %s5980_s20, 2  ;;  %v3900_v34 = vld [vmem:[%s769_s13 + $0x28] sm:$0xf]  ;;  %v3902_v35 = vld [vmem:[%s769_s13 + $0x28] sm:$0xf0] }
  0x64   : > { %s2987_s23 = sshll.u32 %s5980_s20, 3  ;;  %s5904_s1 = sld [smem:[#allocation34_spill]]  ;;  %v3914_v36 = vld [vmem:[%s769_s13 + $0x30] sm:$0xf]  ;;  %v3916_v37 = vld [vmem:[%s769_s13 + $0x30] sm:$0xf0] }
  0x65   : > { %s5905_s3 = sld [smem:[#allocation36_spill]]  ;;  %v3918_v38 = vld [vmem:[%s769_s13 + $0x38] sm:$0xf]  ;;  %s5982_s25 = smov (!%p881_p3, %s2982_s25), 47  ;;  %v3922_v39 = vld [vmem:[%s769_s13 + $0x38] sm:$0xf0] }
  0x66   : > { %5906 = vst [vmem:[#allocation13_spill] sm:$0xff] %v3918_v38  ;;  %s3930_s9 = scalar_lea.vmem %s5865_s7, %s2987_s23  ;;  %s3935_s19 = scalar_lea.vmem %s5866_s8, %s2987_s23 }
  0x67   : > { %5907 = vst [vmem:[#allocation14_spill] sm:$0xff] %v3922_v39  ;;  %s2983_s13 = sshll.u32 %s5982_s25, 2  ;;  %s5910_s17 = sld [smem:[#allocation40_spill]] }
  0x68   : > { %s5913_s2 = sld [smem:[#allocation42_spill]]  ;;  %p972_p5 = scmp.eq.s32.totalorder %s3619_s27, 0 }
  0x6a   : > { %s3907_s16 = scalar_lea.vmem %s5904_s1, %s2981_s21  ;;  %s5911_s1 = sld [smem:[#allocation41_spill]] }
  0x6b   : > { %s3912_s14 = scalar_lea.vmem %s5905_s3, %s2981_s21  ;;  %v3925_v40 = vld [vmem:[%s3907_s16] sm:$0xf]  ;;  %v3941_v42 = vld [vmem:[%s3907_s16] sm:$0xf0]  ;;  %v3953_v44 = vld [vmem:[%s3907_s16 + $0x8] sm:$0xf]  ;;  %p973_p6 = pnand %p972_p5, %p971_p4 }
  0x6c   : > { %5908 = vst [vmem:[#allocation15_spill] sm:$0xff] %v3925_v40  ;;  %v3938_v41 = vld [vmem:[%s3907_s16] sm:$0xf]  ;;  %v3944_v43 = vld [vmem:[%s3907_s16] sm:$0xf0] }
  0x6d   : > { %5909 = vst [vmem:[#allocation16_spill] sm:$0xff] %v3941_v42  ;;  %s3950_s18 = scalar_lea.vmem %s5910_s17, %s2981_s21  ;;  %v3956_v45 = vld [vmem:[%s3907_s16 + $0x8] sm:$0xf]  ;;  %v3964_v46 = vld [vmem:[%s3907_s16 + $0x8] sm:$0xf0]  ;;  %s5914_s17 = sld [smem:[#allocation35_spill]] }
  0x6e   : > { %5912 = vst [vmem:[#allocation17_spill] sm:$0xff] %v3964_v46  ;;  %v3967_v47 = vld [vmem:[%s3907_s16 + $0x8] sm:$0xf0]  ;;  %v3970_v48 = vld [vmem:[%s3907_s16 + $0x10] sm:$0xf]  ;;  %s3975_s11 = scalar_lea.vmem %s5913_s2, %s2987_s23 }
  0x6f   : > { %v3978_v49 = vld [vmem:[%s3907_s16 + $0x10] sm:$0xf]  ;;  %v3981_v50 = vld [vmem:[%s3907_s16 + $0x10] sm:$0xf0]  ;;  %v3987_v52 = vld [vmem:[%s3907_s16 + $0x18] sm:$0xf] }
  0x70   : > { %s3961_s3 = scalar_lea.vmem %s5911_s1, %s2987_s23  ;;  %v3984_v51 = vld [vmem:[%s3907_s16 + $0x10] sm:$0xf0]  ;;  %v3990_v53 = vld [vmem:[%s3907_s16 + $0x18] sm:$0xf]  ;;  %v3993_v54 = vld [vmem:[%s3907_s16 + $0x18] sm:$0xf0] }
  0x71   : > { %v3996_v55 = vld [vmem:[%s3907_s16 + $0x18] sm:$0xf0]  ;;  %v3999_v56 = vld [vmem:[%s3907_s16 + $0x20] sm:$0xf]  ;;  %v4005_v58 = vld [vmem:[%s3907_s16 + $0x20] sm:$0xf0] }
  0x72   : > { %v4002_v57 = vld [vmem:[%s3907_s16 + $0x20] sm:$0xf]  ;;  %v4008_v59 = vld [vmem:[%s3907_s16 + $0x20] sm:$0xf0]  ;;  %v4011_v60 = vld [vmem:[%s3907_s16 + $0x28] sm:$0xf] }
  0x73   : > { %s4016_s20 = scalar_lea.vmem %s5914_s17, %s2983_s13  ;;  %v4019_v61 = vld [vmem:[%s3907_s16 + $0x28] sm:$0xf]  ;;  %v4022_v62 = vld [vmem:[%s3907_s16 + $0x28] sm:$0xf0]  ;;  %v4028_v0 = vld [vmem:[%s3907_s16 + $0x30] sm:$0xf] }
  0x74   : > { %v4025_v63 = vld [vmem:[%s3907_s16 + $0x28] sm:$0xf0]  ;;  %v4031_v1 = vld [vmem:[%s3907_s16 + $0x30] sm:$0xf]  ;;  %v4034_v2 = vld [vmem:[%s3907_s16 + $0x30] sm:$0xf0] }
  0x75   : > { %v4037_v3 = vld [vmem:[%s3907_s16 + $0x30] sm:$0xf0]  ;;  %v4040_v4 = vld [vmem:[%s3907_s16 + $0x38] sm:$0xf]  ;;  %v4046_v6 = vld [vmem:[%s3907_s16 + $0x38] sm:$0xf0] }
  0x76   : > { %v4043_v5 = vld [vmem:[%s3907_s16 + $0x38] sm:$0xf]  ;;  %v4049_v7 = vld [vmem:[%s3907_s16 + $0x38] sm:$0xf0]  ;;  %v4052_v8 = vld [vmem:[%s4016_s20] sm:$0xf] }
  0x77   : > { %5915 = vst [vmem:[#allocation18_spill] sm:$0xff] %v4052_v8  ;;  %v4055_v9 = vld [vmem:[%s4016_s20] sm:$0xf]  ;;  %v4058_v10 = vld [vmem:[%s4016_s20] sm:$0xf0]  ;;  %s776_s16 = scalar_lea.vmem [#allocation7], %s3872_s4 }
  0x78   : > { %5916 = vst [vmem:[#allocation19_spill] sm:$0xff] %v4058_v10  ;;  %v4061_v11 = vld [vmem:[%s4016_s20] sm:$0xf0]  ;;  %v4064_v12 = vld [vmem:[%s4016_s20 + $0x8] sm:$0xf]  ;;  %s783_s13 = scalar_lea.vmem [#allocation8], %s3880_s15 }
  0x79   : > { %5917 = vst [vmem:[#allocation20_spill] sm:$0xff] %v4064_v12  ;;  %v4067_v13 = vld [vmem:[%s4016_s20 + $0x8] sm:$0xf]  ;;  %v4070_v14 = vld [vmem:[%s4016_s20 + $0x8] sm:$0xf0] }
  0x7a   : > { %5918 = vst [vmem:[#allocation21_spill] sm:$0xff] %v4070_v14  ;;  %v4073_v15 = vld [vmem:[%s4016_s20 + $0x8] sm:$0xf0]  ;;  %v4076_v16 = vld [vmem:[%s4016_s20 + $0x10] sm:$0xf] }
  0x7b   : > { %5919 = vst [vmem:[#allocation22_spill] sm:$0xff] %v4076_v16  ;;  %v4079_v17 = vld [vmem:[%s4016_s20 + $0x10] sm:$0xf]  ;;  %v4082_v18 = vld [vmem:[%s4016_s20 + $0x10] sm:$0xf0] }
  0x7c   : > { %5920 = vst [vmem:[#allocation23_spill] sm:$0xff] %v4082_v18  ;;  %v4085_v19 = vld [vmem:[%s4016_s20 + $0x10] sm:$0xf0]  ;;  %v4088_v20 = vld [vmem:[%s4016_s20 + $0x18] sm:$0xf] }
  0x7d   : > { %5921 = vst [vmem:[#allocation24_spill] sm:$0xff] %v4088_v20  ;;  %v4091_v21 = vld [vmem:[%s4016_s20 + $0x18] sm:$0xf]  ;;  %v4094_v22 = vld [vmem:[%s4016_s20 + $0x18] sm:$0xf0] }
  0x7e   : > { %5922 = vst [vmem:[#allocation25_spill] sm:$0xff] %v4094_v22  ;;  %v4097_v23 = vld [vmem:[%s4016_s20 + $0x18] sm:$0xf0]  ;;  %v4100_v10 = vld [vmem:[%s4016_s20 + $0x20] sm:$0xf] }
  0x7f   : > { %5923 = vst [vmem:[#allocation26_spill] sm:$0xff] %v4100_v10  ;;  %v4103_v8 = vld [vmem:[%s4016_s20 + $0x20] sm:$0xf]  ;;  %v4106_v14 = vld [vmem:[%s4016_s20 + $0x20] sm:$0xf0] }
  0x80   : > { %5924 = vst [vmem:[#allocation27_spill] sm:$0xff] %v4106_v14  ;;  %v4109_v12 = vld [vmem:[%s4016_s20 + $0x20] sm:$0xf0]  ;;  %v4112_v18 = vld [vmem:[%s4016_s20 + $0x28] sm:$0xf] }
  0x81   : > { %5925 = vst [vmem:[#allocation28_spill] sm:$0xff] %v4112_v18  ;;  %v4115_v16 = vld [vmem:[%s4016_s20 + $0x28] sm:$0xf]  ;;  %v4118_v22 = vld [vmem:[%s4016_s20 + $0x28] sm:$0xf0] }
  0x82   : > { %5926 = vst [vmem:[#allocation29_spill] sm:$0xff] %v4118_v22  ;;  %v4121_v20 = vld [vmem:[%s4016_s20 + $0x28] sm:$0xf0]  ;;  %v4124_v39 = vld [vmem:[%s4016_s20 + $0x30] sm:$0xf]  ;;  %976 = sbr.rel (%p973_p6) target bundleno = 192 (0xc0), region = 191 }
  0x83   : > { %5927 = vst [vmem:[#allocation30_spill] sm:$0xff] %v4124_v39  ;;  %v4127_v10 = vld [vmem:[%s4016_s20 + $0x30] sm:$0xf]  ;;  %v4130_v38 = vld [vmem:[%s4016_s20 + $0x30] sm:$0xf0] }
  0x84   : > { %5928 = vst [vmem:[#allocation31_spill] sm:$0xff] %v4130_v38  ;;  %v4133_v42 = vld [vmem:[%s4016_s20 + $0x30] sm:$0xf0]  ;;  %v4136_v14 = vld [vmem:[%s4016_s20 + $0x38] sm:$0xf] }
  0x85   : > { %v4139_v40 = vld [vmem:[%s4016_s20 + $0x38] sm:$0xf]  ;;  %v4142_v46 = vld [vmem:[%s4016_s20 + $0x38] sm:$0xf0] }
  0x86   : > { %5929 = vst [vmem:[#allocation32_spill] sm:$0xff] %v4142_v46  ;;  %v4145_v18 = vld [vmem:[%s4016_s20 + $0x38] sm:$0xf0] }
  0x87   : > { %vm977_vm0 = vcmask 523264   ;;  %v3637_v22 = vmov 0.0  }
  0x88   : > { %978 = vst.msk [vmem:[#allocation3] sm:$0xff] %vm977_vm0, %v3637_v22 }
  0x89   : > { %979 = vst.msk [vmem:[#allocation3 + $0x8] sm:$0xff] %vm977_vm0, %v3637_v22 }
  0x8a   : > { %980 = vst.msk [vmem:[#allocation3 + $0x10] sm:$0xff] %vm977_vm0, %v3637_v22 }
  0x8b   : > { %981 = vst.msk [vmem:[#allocation3 + $0x18] sm:$0xff] %vm977_vm0, %v3637_v22 }
  0x8c   : > { %982 = vst.msk [vmem:[#allocation3 + $0x20] sm:$0xff] %vm977_vm0, %v3637_v22 }
  0x8d   : > { %983 = vst.msk [vmem:[#allocation3 + $0x28] sm:$0xff] %vm977_vm0, %v3637_v22 }
  0x8e   : > { %984 = vst.msk [vmem:[#allocation3 + $0x30] sm:$0xff] %vm977_vm0, %v3637_v22 }
  0x8f   : > { %985 = vst.msk [vmem:[#allocation3 + $0x38] sm:$0xff] %vm977_vm0, %v3637_v22 }
  0x90   : > { %986 = vst.msk [vmem:[#allocation3 + $0x40] sm:$0xff] %vm977_vm0, %v3637_v22 }
  0x91   : > { %987 = vst.msk [vmem:[#allocation3 + $0x48] sm:$0xff] %vm977_vm0, %v3637_v22 }
  0x92   : > { %988 = vst.msk [vmem:[#allocation3 + $0x50] sm:$0xff] %vm977_vm0, %v3637_v22 }
  0x93   : > { %989 = vst.msk [vmem:[#allocation3 + $0x58] sm:$0xff] %vm977_vm0, %v3637_v22 }
  0x94   : > { %990 = vst.msk [vmem:[#allocation3 + $0x60] sm:$0xff] %vm977_vm0, %v3637_v22 }
  0x95   : > { %991 = vst.msk [vmem:[#allocation3 + $0x68] sm:$0xff] %vm977_vm0, %v3637_v22 }
  0x96   : > { %992 = vst.msk [vmem:[#allocation3 + $0x70] sm:$0xff] %vm977_vm0, %v3637_v22 }
  0x97   : > { %993 = vst.msk [vmem:[#allocation3 + $0x78] sm:$0xff] %vm977_vm0, %v3637_v22 }
  0x98   : > { %994 = vst.msk [vmem:[#allocation3 + $0x80] sm:$0xff] %vm977_vm0, %v3637_v22 }
  0x99   : > { %995 = vst.msk [vmem:[#allocation3 + $0x88] sm:$0xff] %vm977_vm0, %v3637_v22 }
  0x9a   : > { %996 = vst.msk [vmem:[#allocation3 + $0x90] sm:$0xff] %vm977_vm0, %v3637_v22 }
  0x9b   : > { %997 = vst.msk [vmem:[#allocation3 + $0x98] sm:$0xff] %vm977_vm0, %v3637_v22 }
  0x9c   : > { %998 = vst.msk [vmem:[#allocation3 + $0xa0] sm:$0xff] %vm977_vm0, %v3637_v22 }
  0x9d   : > { %999 = vst.msk [vmem:[#allocation3 + $0xa8] sm:$0xff] %vm977_vm0, %v3637_v22 }
  0x9e   : > { %1000 = vst.msk [vmem:[#allocation3 + $0xb0] sm:$0xff] %vm977_vm0, %v3637_v22 }
  0x9f   : > { %1001 = vst.msk [vmem:[#allocation3 + $0xb8] sm:$0xff] %vm977_vm0, %v3637_v22 }
  0xa0   : > { %1002 = vst.msk [vmem:[#allocation3 + $0xc0] sm:$0xff] %vm977_vm0, %v3637_v22 }
  0xa1   : > { %1003 = vst.msk [vmem:[#allocation3 + $0xc8] sm:$0xff] %vm977_vm0, %v3637_v22 }
  0xa2   : > { %1004 = vst.msk [vmem:[#allocation3 + $0xd0] sm:$0xff] %vm977_vm0, %v3637_v22 }
  0xa3   : > { %1005 = vst.msk [vmem:[#allocation3 + $0xd8] sm:$0xff] %vm977_vm0, %v3637_v22 }
  0xa4   : > { %1006 = vst.msk [vmem:[#allocation3 + $0xe0] sm:$0xff] %vm977_vm0, %v3637_v22 }
  0xa5   : > { %1007 = vst.msk [vmem:[#allocation3 + $0xe8] sm:$0xff] %vm977_vm0, %v3637_v22 }
  0xa6   : > { %1008 = vst.msk [vmem:[#allocation3 + $0xf0] sm:$0xff] %vm977_vm0, %v3637_v22 }
  0xa7   : > { %1009 = vst.msk [vmem:[#allocation3 + $0xf8] sm:$0xff] %vm977_vm0, %v3637_v22 }
  0xa8   : > { %1010 = vst.msk [vmem:[#allocation3 + $0x100] sm:$0xff] %vm977_vm0, %v3637_v22 }
  0xa9   : > { %1011 = vst.msk [vmem:[#allocation3 + $0x108] sm:$0xff] %vm977_vm0, %v3637_v22 }
  0xaa   : > { %1012 = vst.msk [vmem:[#allocation3 + $0x110] sm:$0xff] %vm977_vm0, %v3637_v22 }
  0xab   : > { %1013 = vst.msk [vmem:[#allocation3 + $0x118] sm:$0xff] %vm977_vm0, %v3637_v22 }
  0xac   : > { %1014 = vst.msk [vmem:[#allocation3 + $0x120] sm:$0xff] %vm977_vm0, %v3637_v22 }
  0xad   : > { %1015 = vst.msk [vmem:[#allocation3 + $0x128] sm:$0xff] %vm977_vm0, %v3637_v22 }
  0xae   : > { %1016 = vst.msk [vmem:[#allocation3 + $0x130] sm:$0xff] %vm977_vm0, %v3637_v22 }
  0xaf   : > { %1017 = vst.msk [vmem:[#allocation3 + $0x138] sm:$0xff] %vm977_vm0, %v3637_v22 }
  0xb0   : > { %1018 = vst.msk [vmem:[#allocation3 + $0x140] sm:$0xff] %vm977_vm0, %v3637_v22 }
  0xb1   : > { %1019 = vst.msk [vmem:[#allocation3 + $0x148] sm:$0xff] %vm977_vm0, %v3637_v22 }
  0xb2   : > { %1020 = vst.msk [vmem:[#allocation3 + $0x150] sm:$0xff] %vm977_vm0, %v3637_v22 }
  0xb3   : > { %1021 = vst.msk [vmem:[#allocation3 + $0x158] sm:$0xff] %vm977_vm0, %v3637_v22 }
  0xb4   : > { %1022 = vst.msk [vmem:[#allocation3 + $0x160] sm:$0xff] %vm977_vm0, %v3637_v22 }
  0xb5   : > { %1023 = vst.msk [vmem:[#allocation3 + $0x168] sm:$0xff] %vm977_vm0, %v3637_v22 }
  0xb6   : > { %1024 = vst.msk [vmem:[#allocation3 + $0x170] sm:$0xff] %vm977_vm0, %v3637_v22 }
  0xb7   : > { %1025 = vst.msk [vmem:[#allocation3 + $0x178] sm:$0xff] %vm977_vm0, %v3637_v22 }
  0xb8   : > { %1026 = vst.msk [vmem:[#allocation4] sm:$0xff] %vm977_vm0, %v3637_v22 }
  0xb9   : > { %1027 = vst.msk [vmem:[#allocation4 + $0x8] sm:$0xff] %vm977_vm0, %v3637_v22 }
  0xba   : > { %1028 = vst.msk [vmem:[#allocation4 + $0x10] sm:$0xff] %vm977_vm0, %v3637_v22 }
  0xbb   : > { %1029 = vst.msk [vmem:[#allocation4 + $0x18] sm:$0xff] %vm977_vm0, %v3637_v22 }
  0xbc   : > { %1030 = vst.msk [vmem:[#allocation5] sm:$0xff] %vm977_vm0, %v3637_v22 }
  0xbd   : > { %1031 = vst.msk [vmem:[#allocation5 + $0x8] sm:$0xff] %vm977_vm0, %v3637_v22 }
  0xbe   : > { %1032 = vst.msk [vmem:[#allocation5 + $0x10] sm:$0xff] %vm977_vm0, %v3637_v22 }
  0xbf   : > { %1033 = vst.msk [vmem:[#allocation5 + $0x18] sm:$0xff] %vm977_vm0, %v3637_v22 }
  0xc0 PF: > { %p2996_p7 = scmp.ne.s32.totalorder %s3619_s27, 0 }
  0xc2   : > { %1036 = sbr.rel (%p2996_p7) target bundleno = 370 (0x172), region = 195 }
  0xc7   : > { %v3036_v38 = vor.u32 %v4049_v7, %v4043_v5  ;;  %v3032_v39 = vor.u32 %v4037_v3, %v4031_v1  ;;  %vm1037_vm1 = vcmask 523264   ;;  %v3638_v46 = vmov 0.0  }
  0xc8   : > { %1038 = vst.msk [vmem:[#allocation2] sm:$0xff] %vm1037_vm1, %v3638_v46  ;;  %v3028_v22 = vor.u32 %v4025_v63, %v4019_v61  ;;  %v3379_v61 = vld [vmem:[%s776_s16 + $0x8] sm:$0xff] }
  0xc9   : > { %1122 = vmatpush.bf16.msra.mxu0 %v3036_v38  ;;  %3414 = vmatpush.bf16.msra.mxu1 %v3036_v38  ;;  %1039 = vst.msk [vmem:[#allocation2 + $0x8] sm:$0xff] %vm1037_vm1, %v3638_v46  ;;  %v3024_v38 = vor.u32 %v4008_v59, %v4002_v57  ;;  %v3016_v57 = vor.u32 %v3984_v51, %v3978_v49  ;;  %v3378_v59 = vld [vmem:[%s776_s16] sm:$0xff] }
  0xca   : > { %1040 = vst.msk [vmem:[#allocation2 + $0x10] sm:$0xff] %vm1037_vm1, %v3638_v46  ;;  %v1054_v49 = vld [vmem:[#allocation5] sm:$0xff] }
  0xcb   : > { %1041 = vst.msk [vmem:[#allocation2 + $0x18] sm:$0xff] %vm1037_vm1, %v3638_v46 }
  0xcc   : > { %1042 = vst.msk [vmem:[#allocation2 + $0x20] sm:$0xff] %vm1037_vm1, %v3638_v46 }
  0xcd   : > { %1123 = vmatpush.bf16.msra.mxu0 %v3032_v39  ;;  %3415 = vmatpush.bf16.msra.mxu1 %v3032_v39  ;;  %1043 = vst.msk [vmem:[#allocation2 + $0x28] sm:$0xff] %vm1037_vm1, %v3638_v46  ;;  %v3020_v39 = vor.u32 %v3996_v55, %v3990_v53  ;;  %v3012_v53 = vor.u32 %v3967_v47, %v3956_v45  ;;  %v1055_v45 = vld [vmem:[#allocation5 + $0x8] sm:$0xff] }
  0xce   : > { %1044 = vst.msk [vmem:[#allocation2 + $0x30] sm:$0xff] %vm1037_vm1, %v3638_v46  ;;  %v3008_v55 = vor.u32 %v3944_v43, %v3938_v41  ;;  %v1057_v41 = vld [vmem:[#allocation5 + $0x18] sm:$0xff] }
  0xcf   : > { %1045 = vst.msk [vmem:[#allocation2 + $0x38] sm:$0xff] %vm1037_vm1, %v3638_v46 }
  0xd0   : > { %1046 = vst.msk [vmem:[#allocation2 + $0x40] sm:$0xff] %vm1037_vm1, %v3638_v46 }
  0xd1   : > { %1124 = vmatpush.bf16.msra.mxu0 %v3028_v22  ;;  %3416 = vmatpush.bf16.msra.mxu1 %v3028_v22  ;;  %1047 = vst.msk [vmem:[#allocation2 + $0x48] sm:$0xff] %vm1037_vm1, %v3638_v46 }
  0xd2   : > { %1048 = vst.msk [vmem:[#allocation2 + $0x50] sm:$0xff] %vm1037_vm1, %v3638_v46 }
  0xd3   : > { %1049 = vst.msk [vmem:[#allocation2 + $0x58] sm:$0xff] %vm1037_vm1, %v3638_v46 }
  0xd4   : > { %1050 = vst.msk [vmem:[#allocation2 + $0x60] sm:$0xff] %vm1037_vm1, %v3638_v46 }
  0xd5   : > { %1125 = vmatpush.bf16.msra.mxu0 %v3024_v38  ;;  %3417 = vmatpush.bf16.msra.mxu1 %v3024_v38  ;;  %1051 = vst.msk [vmem:[#allocation2 + $0x68] sm:$0xff] %vm1037_vm1, %v3638_v46 }
  0xd6   : > { %1052 = vst.msk [vmem:[#allocation2 + $0x70] sm:$0xff] %vm1037_vm1, %v3638_v46 }
  0xd7   : > { %1053 = vst.msk [vmem:[#allocation2 + $0x78] sm:$0xff] %vm1037_vm1, %v3638_v46  ;;  %v1056_v46 = vld [vmem:[#allocation5 + $0x10] sm:$0xff] }
  0xd9   : > { %1126 = vmatpush.bf16.msra.mxu0 %v3020_v39  ;;  %3418 = vmatpush.bf16.msra.mxu1 %v3020_v39 }
  0xdd   : > { %1127 = vmatpush.bf16.msra.mxu0 %v3016_v57  ;;  %3419 = vmatpush.bf16.msra.mxu1 %v3016_v57 }
  0xe1   : > { %1128 = vmatpush.bf16.msra.mxu0 %v3012_v53  ;;  %3420 = vmatpush.bf16.msra.mxu1 %v3012_v53 }
  0xe5   : > { %1129 = vmatpush.bf16.msra.mxu0 %v3008_v55  ;;  %3421 = vmatpush.bf16.msra.mxu1 %v3008_v55 }
  0xe8   : > { %1130 = vmatmul.bf16.vlgmr.msra.gmra.mxu0 %v3378_v59  ;;  %1135 = vmatmul.bf16.vlgmr.msra.gmra.mxu1 %v3379_v61 }
 0x165   : > { %v1131_v51 = vpop.f32.mrf.mxu0  ;;  %v1136_v63 = vpop.f32.mrf.mxu1 }
 0x166   : > { %v1141_v1 = vadd.f32 %v1131_v51, %v1054_v49  ;;  %v1143_v3 = vadd.f32 %v1136_v63, %v1056_v46 }
 0x168   : > { %1145 = vst.msk [vmem:[#allocation5] sm:$0xff] %vm1037_vm1, %v1141_v1 }
 0x169   : > { %1147 = vst.msk [vmem:[#allocation5 + $0x10] sm:$0xff] %vm1037_vm1, %v1143_v3 }
 0x16d   : > { %v1133_v43 = vpop.f32.mrf.mxu0  ;;  %v1138_v47 = vpop.f32.mrf.mxu1 }
 0x16e   : > { %v1142_v5 = vadd.f32 %v1133_v43, %v1055_v45  ;;  %v1144_v7 = vadd.f32 %v1138_v47, %v1057_v41 }
 0x170   : > { %1146 = vst.msk [vmem:[#allocation5 + $0x8] sm:$0xff] %vm1037_vm1, %v1142_v5 }
 0x171   : > { %1148 = vst.msk [vmem:[#allocation5 + $0x18] sm:$0xff] %vm1037_vm1, %v1144_v7 }
 0x172 PF: > { %p3037_p8 = scmp.ne.s32.totalorder %s3623_s28, 0 }
 0x174   : > { %1151 = sbr.rel (%p3037_p8) target bundleno = 548 (0x224), region = 199 }
 0x179   : > { %v3077_v22 = vor.u32 %v4145_v18, %v4139_v40  ;;  %v3073_v38 = vor.u32 %v4133_v42, %v4127_v10  ;;  %v3069_v39 = vor.u32 %v4121_v20, %v4115_v16  ;;  %v3065_v57 = vor.u32 %v4109_v12, %v4103_v8  ;;  %v3380_v12 = vld [vmem:[%s783_s13] sm:$0xff]  ;;  %v3381_v16 = vld [vmem:[%s783_s13 + $0x8] sm:$0xff] }
 0x17a   : > { %v3061_v40 = vor.u32 %v4097_v23, %v4091_v21  ;;  %v3057_v42 = vor.u32 %v4085_v19, %v4079_v17  ;;  %v3053_v10 = vor.u32 %v4073_v15, %v4067_v13  ;;  %v3049_v8 = vor.u32 %v4061_v11, %v4055_v9  ;;  %v1152_v18 = vld [vmem:[#allocation4] sm:$0xff]  ;;  %v1154_v17 = vld [vmem:[#allocation4 + $0x10] sm:$0xff]  ;;  %v1153_v15 = vld [vmem:[#allocation4 + $0x8] sm:$0xff] }
 0x17b   : > { %1220 = vmatpush.bf16.msra.mxu0 %v3077_v22  ;;  %3422 = vmatpush.bf16.msra.mxu1 %v3077_v22  ;;  %vm1243_vm2 = vcmask 523264   ;;  %v1155_v23 = vld [vmem:[#allocation4 + $0x18] sm:$0xff] }
 0x17f   : > { %1221 = vmatpush.bf16.msra.mxu0 %v3073_v38  ;;  %3423 = vmatpush.bf16.msra.mxu1 %v3073_v38 }
 0x183   : > { %1222 = vmatpush.bf16.msra.mxu0 %v3069_v39  ;;  %3424 = vmatpush.bf16.msra.mxu1 %v3069_v39 }
 0x187   : > { %1223 = vmatpush.bf16.msra.mxu0 %v3065_v57  ;;  %3425 = vmatpush.bf16.msra.mxu1 %v3065_v57 }
 0x18b   : > { %1224 = vmatpush.bf16.msra.mxu0 %v3061_v40  ;;  %3426 = vmatpush.bf16.msra.mxu1 %v3061_v40 }
 0x18f   : > { %1225 = vmatpush.bf16.msra.mxu0 %v3057_v42  ;;  %3427 = vmatpush.bf16.msra.mxu1 %v3057_v42 }
 0x193   : > { %1226 = vmatpush.bf16.msra.mxu0 %v3053_v10  ;;  %3428 = vmatpush.bf16.msra.mxu1 %v3053_v10 }
 0x197   : > { %1227 = vmatpush.bf16.msra.mxu0 %v3049_v8  ;;  %3429 = vmatpush.bf16.msra.mxu1 %v3049_v8 }
 0x19a   : > { %1228 = vmatmul.bf16.vlgmr.msra.gmra.mxu0 %v3380_v12  ;;  %1233 = vmatmul.bf16.vlgmr.msra.gmra.mxu1 %v3381_v16 }
 0x217   : > { %v1229_v19 = vpop.f32.mrf.mxu0  ;;  %v1234_v20 = vpop.f32.mrf.mxu1 }
 0x218   : > { %v1239_v21 = vadd.f32 %v1229_v19, %v1152_v18  ;;  %v1241_v13 = vadd.f32 %v1234_v20, %v1154_v17 }
 0x21a   : > { %1244 = vst.msk [vmem:[#allocation4] sm:$0xff] %vm1243_vm2, %v1239_v21 }
 0x21b   : > { %1246 = vst.msk [vmem:[#allocation4 + $0x10] sm:$0xff] %vm1243_vm2, %v1241_v13 }
 0x21f   : > { %v1231_v9 = vpop.f32.mrf.mxu0  ;;  %v1236_v11 = vpop.f32.mrf.mxu1 }
 0x220   : > { %v1240_v53 = vadd.f32 %v1231_v9, %v1153_v15  ;;  %v1242_v55 = vadd.f32 %v1236_v11, %v1155_v23 }
 0x222   : > { %1245 = vst.msk [vmem:[#allocation4 + $0x8] sm:$0xff] %vm1243_vm2, %v1240_v53 }
 0x223   : > { %1247 = vst.msk [vmem:[#allocation4 + $0x18] sm:$0xff] %vm1243_vm2, %v1242_v55 }
 0x224 PF: > { %v4272_v59 = vor.u32 %v3878_v25, %v3876_v24  ;;  %v4277_v61 = vor.u32 %v3884_v27, %v3882_v26  ;;  %v4282_v49 = vor.u32 %v3889_v29, %v3887_v28  ;;  %v4287_v46 = vor.u32 %v3893_v31, %v3891_v30  ;;  %v5941_v51 = vld [vmem:[#allocation27_spill] sm:$0xff]  ;;  %v5942_v1 = vld [vmem:[#allocation24_spill] sm:$0xff]  ;;  %v5944_v45 = vld [vmem:[#allocation22_spill] sm:$0xff]  ;;  %s3174_s4 = sshll.u32 %s3619_s27, 7  ;;  %p1605_p9 = scmp.eq.s32.totalorder %s3619_s27, 2 }
 0x225   : > { %v3097_v24 = vor.u32 %v3897_v33, %v3895_v32  ;;  %v3101_v25 = vor.u32 %v3902_v35, %v3900_v34  ;;  %v3173_v26 = vor.u32 %v4046_v6, %v4040_v4  ;;  %v3169_v27 = vor.u32 %v4034_v2, %v4028_v0  ;;  %v5930_v33 = vld [vmem:[#allocation17_spill] sm:$0xff]  ;;  %v5931_v35 = vld [vmem:[#allocation15_spill] sm:$0xff]  ;;  %v5938_v0 = vld [vmem:[#allocation28_spill] sm:$0xff]  ;;  %s4335_s15 = scalar_lea.vmem [#allocation3], %s3174_s4  ;;  %p3175_p10 = scmp.ne.s32.totalorder %s3619_s27, 2 }
 0x226   : > { %1442 = vxpose.xlu0.c.b16.start [1/8] %v4272_v59, 128  ;;  %v3165_v28 = vor.u32 %v4022_v62, %v4011_v60  ;;  %v3161_v29 = vor.u32 %v4005_v58, %v3999_v56  ;;  %v3105_v30 = vor.u32 %v3916_v37, %v3914_v36  ;;  %v3157_v31 = vor.u32 %v3993_v54, %v3987_v52  ;;  %v5932_v56 = vld [vmem:[#allocation16_spill] sm:$0xff]  ;;  %v5933_v37 = vld [vmem:[#allocation13_spill] sm:$0xff]  ;;  %v5934_v58 = vld [vmem:[#allocation14_spill] sm:$0xff] }
 0x227   : > { %1506 = vmatpush.bf16.msra.mxu1 %v3173_v26  ;;  %3438 = vmatpush.bf16.msra.mxu3 %v3173_v26  ;;  %v3153_v32 = vor.u32 %v3981_v50, %v3970_v48  ;;  %v3149_v34 = vor.u32 %v5930_v33, %v3953_v44  ;;  %v3145_v36 = vor.u32 %v5932_v56, %v5931_v35  ;;  %v5935_v54 = vld [vmem:[#allocation32_spill] sm:$0xff]  ;;  %v5936_v50 = vld [vmem:[#allocation30_spill] sm:$0xff]  ;;  %v5937_v60 = vld [vmem:[#allocation31_spill] sm:$0xff]  ;;  %vm1425_vm3 = vcmask 523264  }
 0x228   : > { %v3109_v52 = vor.u32 %v5934_v58, %v5933_v37  ;;  %v3141_v48 = vor.u32 %v5935_v54, %v4136_v14  ;;  %v3137_v62 = vor.u32 %v5937_v60, %v5936_v50  ;;  %v5939_v2 = vld [vmem:[#allocation29_spill] sm:$0xff]  ;;  %v5940_v6 = vld [vmem:[#allocation26_spill] sm:$0xff]  ;;  %v5945_v41 = vld [vmem:[#allocation23_spill] sm:$0xff] }
 0x229   : > { %v3133_v4 = vor.u32 %v5939_v2, %v5938_v0  ;;  %v3129_v63 = vor.u32 %v5941_v51, %v5940_v6  ;;  %v5943_v14 = vld [vmem:[#allocation25_spill] sm:$0xff]  ;;  %v3121_v43 = vor.u32 %v5945_v41, %v5944_v45  ;;  %v5946_v5 = vld [vmem:[#allocation20_spill] sm:$0xff]  ;;  %v5948_v38 = vld [vmem:[#allocation18_spill] sm:$0xff] }
 0x22a   : > { %3430 = vmatpush.bf16.msra.mxu2 %v3141_v48  ;;  %1360 = vmatpush.bf16.msra.mxu0 %v3141_v48  ;;  %v3125_v3 = vor.u32 %v5943_v14, %v5942_v1  ;;  %v5947_v7 = vld [vmem:[#allocation21_spill] sm:$0xff]  ;;  %v5949_v39 = vld [vmem:[#allocation19_spill] sm:$0xff]  ;;  %v1558_v20 = vld [vmem:[%s4335_s15 + $0x8] sm:$0xff] }
 0x22b   : > { %1507 = vmatpush.bf16.msra.mxu1 %v3169_v27  ;;  %3439 = vmatpush.bf16.msra.mxu3 %v3169_v27  ;;  %v3117_v22 = vor.u32 %v5947_v7, %v5946_v5  ;;  %v3113_v57 = vor.u32 %v5949_v39, %v5948_v38  ;;  %v1557_v18 = vld [vmem:[%s4335_s15] sm:$0xff]  ;;  %v1559_v15 = vld [vmem:[%s4335_s15 + $0x10] sm:$0xff]  ;;  %v1560_v11 = vld [vmem:[%s4335_s15 + $0x18] sm:$0xff] }
 0x22c   : > { %v1562_v33 = vld [vmem:[%s4335_s15 + $0x28] sm:$0xff]  ;;  %v1250_v37 = vld [vmem:[#allocation2 + $0x10] sm:$0xff]  ;;  %v1251_v0 = vld [vmem:[#allocation2 + $0x18] sm:$0xff] }
 0x22d   : > { %v1258_v54 = vld [vmem:[#allocation2 + $0x50] sm:$0xff]  ;;  %v1259_v6 = vld [vmem:[#allocation2 + $0x58] sm:$0xff]  ;;  %v1252_v45 = vld [vmem:[#allocation2 + $0x20] sm:$0xff] }
 0x22e   : > { %3431 = vmatpush.bf16.msra.mxu2 %v3137_v62  ;;  %1361 = vmatpush.bf16.msra.mxu0 %v3137_v62  ;;  %v1563_v48 = vld [vmem:[%s4335_s15 + $0x30] sm:$0xff]  ;;  %v1564_v51 = vld [vmem:[%s4335_s15 + $0x38] sm:$0xff]  ;;  %v1565_v39 = vld [vmem:[%s4335_s15 + $0x40] sm:$0xff] }
 0x22f   : > { %1508 = vmatpush.bf16.msra.mxu1 %v3165_v28  ;;  %3440 = vmatpush.bf16.msra.mxu3 %v3165_v28 }
 0x232   : > { %3432 = vmatpush.bf16.msra.mxu2 %v3133_v4  ;;  %1362 = vmatpush.bf16.msra.mxu0 %v3133_v4 }
 0x233   : > { %1509 = vmatpush.bf16.msra.mxu1 %v3161_v29  ;;  %3441 = vmatpush.bf16.msra.mxu3 %v3161_v29  ;;  %v1249_v29 = vld [vmem:[#allocation2 + $0x8] sm:$0xff] }
 0x236   : > { %1443 = vxpose.xlu0.c.b16.cont [2/8] %v4277_v61, 128  ;;  %3433 = vmatpush.bf16.msra.mxu2 %v3129_v63 }
 0x237   : > { %1510 = vmatpush.bf16.msra.mxu1 %v3157_v31  ;;  %3442 = vmatpush.bf16.msra.mxu3 %v3157_v31 }
 0x238   : > { %1363 = vmatpush.bf16.msra.mxu0 %v3129_v63 }
 0x23a   : > { %3434 = vmatpush.bf16.msra.mxu2 %v3125_v3 }
 0x23b   : > { %1511 = vmatpush.bf16.msra.mxu1 %v3153_v32  ;;  %3443 = vmatpush.bf16.msra.mxu3 %v3153_v32  ;;  %v1257_v32 = vld [vmem:[#allocation2 + $0x48] sm:$0xff] }
 0x23c   : > { %1364 = vmatpush.bf16.msra.mxu0 %v3125_v3 }
 0x23e   : > { %3435 = vmatpush.bf16.msra.mxu2 %v3121_v43 }
 0x23f   : > { %1512 = vmatpush.bf16.msra.mxu1 %v3149_v34  ;;  %3444 = vmatpush.bf16.msra.mxu3 %v3149_v34 }
 0x240   : > { %1365 = vmatpush.bf16.msra.mxu0 %v3121_v43 }
 0x242   : > { %3436 = vmatpush.bf16.msra.mxu2 %v3117_v22 }
 0x243   : > { %1513 = vmatpush.bf16.msra.mxu1 %v3145_v36  ;;  %3445 = vmatpush.bf16.msra.mxu3 %v3145_v36 }
 0x244   : > { %1366 = vmatpush.bf16.msra.mxu0 %v3117_v22  ;;  %v1253_v22 = vld [vmem:[#allocation2 + $0x28] sm:$0xff] }
 0x246   : > { %1444 = vxpose.xlu0.c.b16.cont [3/8] %v4282_v49, 128  ;;  %3437 = vmatpush.bf16.msra.mxu2 %v3113_v57 }
 0x248   : > { %1367 = vmatpush.bf16.msra.mxu0 %v3113_v57 }
 0x249   : > { %1388 = vmatmul.bf16.vlgmr.msra.gmra.mxu2 %v3097_v24 }
 0x24b   : > { %1368 = vmatmul.bf16.vlgmr.msra.gmra.mxu0 %v4272_v59  ;;  %v1248_v59 = vld [vmem:[#allocation2] sm:$0xff] }
 0x256   : > { %1445 = vxpose.xlu0.c.b16.cont [4/8] %v4287_v46, 128 }
 0x259   : > { %1393 = vmatmul.bf16.gmra.mxu2 %v3101_v25 }
 0x25b   : > { %1373 = vmatmul.bf16.gmra.mxu0 %v4277_v61 }
 0x266   : > { %1446 = vxpose.xlu0.c.b16.cont [5/8] %v3097_v24, 128  ;;  %v1561_v24 = vld [vmem:[%s4335_s15 + $0x20] sm:$0xff] }
 0x269   : > { %1398 = vmatmul.bf16.gmra.mxu2 %v3105_v30 }
 0x26b   : > { %1378 = vmatmul.bf16.gmra.mxu0 %v4282_v49 }
 0x276   : > { %1447 = vxpose.xlu0.c.b16.cont [6/8] %v3101_v25, 128 }
 0x279   : > { %1403 = vmatmul.bf16.gmra.mxu2 %v3109_v52 }
 0x27b   : > { %1383 = vmatmul.bf16.gmra.mxu0 %v4287_v46  ;;  %v1256_v46 = vld [vmem:[#allocation2 + $0x40] sm:$0xff] }
 0x286   : > { %1448 = vxpose.xlu0.c.b16.cont [7/8] %v3105_v30, 128 }
 0x296   : > { %1449 = vxpose.xlu0.c.b16.end [8/8] %v3109_v52, 128 }
 0x2c8   : > { %v1369_v61 = vpop.f32.mrf.mxu0 }
 0x2c9   : > { %v1409_v49 = vadd.f32 %v1369_v61, %v1248_v59  ;;  %v1263_v59 = vld [vmem:[#allocation2 + $0x78] sm:$0xff] }
 0x2cb   : > { %1426 = vst.msk [vmem:[#allocation2] sm:$0xff] %vm1425_vm3, %v1409_v49 }
 0x2cc   : > { %v1389_v25 = vpop.f32.mrf.mxu2 }
 0x2cd   : > { %v1417_v26 = vadd.f32 %v1389_v25, %v1256_v46  ;;  %v1568_v25 = vld [vmem:[%s4335_s15 + $0x58] sm:$0xff] }
 0x2cf   : > { %1434 = vst.msk [vmem:[#allocation2 + $0x40] sm:$0xff] %vm1425_vm3, %v1417_v26 }
 0x2d0   : > { %v1371_v30 = vpop.f32.mrf.mxu0 }
 0x2d1   : > { %v1410_v31 = vadd.f32 %v1371_v30, %v1249_v29 }
 0x2d2   : > { %v1450_v44 = vpop.trf.xlu0 }
 0x2d3   : > { %1514 = vmatmul.bf16.vlgmr.msra.gmra.mxu1 %v1450_v44  ;;  %1427 = vst.msk [vmem:[#allocation2 + $0x8] sm:$0xff] %vm1425_vm3, %v1410_v31  ;;  %v1570_v31 = vld [vmem:[%s4335_s15 + $0x68] sm:$0xff] }
 0x2d4   : > { %v1391_v34 = vpop.f32.mrf.mxu2 }
 0x2d5   : > { %v1418_v35 = vadd.f32 %v1391_v34, %v1257_v32  ;;  %v1571_v34 = vld [vmem:[%s4335_s15 + $0x70] sm:$0xff] }
 0x2d7   : > { %1435 = vst.msk [vmem:[#allocation2 + $0x48] sm:$0xff] %vm1425_vm3, %v1418_v35 }
 0x2d8   : > { %v1374_v58 = vpop.f32.mrf.mxu0 }
 0x2d9   : > { %v1411_v52 = vadd.f32 %v1374_v58, %v1250_v37 }
 0x2db   : > { %1428 = vst.msk [vmem:[#allocation2 + $0x10] sm:$0xff] %vm1425_vm3, %v1411_v52 }
 0x2dc   : > { %v1394_v50 = vpop.f32.mrf.mxu2 }
 0x2dd   : > { %v1419_v60 = vadd.f32 %v1394_v50, %v1258_v54 }
 0x2df   : > { %1436 = vst.msk [vmem:[#allocation2 + $0x50] sm:$0xff] %vm1425_vm3, %v1419_v60 }
 0x2e0   : > { %v1376_v2 = vpop.f32.mrf.mxu0 }
 0x2e1   : > { %v1412_v4 = vadd.f32 %v1376_v2, %v1251_v0 }
 0x2e2   : > { %v1451_v47 = vpop.trf.xlu0 }
 0x2e3   : > { %1519 = vmatmul.bf16.gmra.mxu1 %v1451_v47  ;;  %1429 = vst.msk [vmem:[#allocation2 + $0x18] sm:$0xff] %vm1425_vm3, %v1412_v4  ;;  %v1260_v47 = vld [vmem:[#allocation2 + $0x60] sm:$0xff] }
 0x2e4   : > { %v1396_v63 = vpop.f32.mrf.mxu2 }
 0x2e5   : > { %v1420_v1 = vadd.f32 %v1396_v63, %v1259_v6 }
 0x2e7   : > { %1437 = vst.msk [vmem:[#allocation2 + $0x58] sm:$0xff] %vm1425_vm3, %v1420_v1 }
 0x2e8   : > { %v1379_v41 = vpop.f32.mrf.mxu0 }
 0x2e9   : > { %v1413_v43 = vadd.f32 %v1379_v41, %v1252_v45 }
 0x2eb   : > { %1430 = vst.msk [vmem:[#allocation2 + $0x20] sm:$0xff] %vm1425_vm3, %v1413_v43 }
 0x2ec   : > { %v1399_v5 = vpop.f32.mrf.mxu2 }
 0x2ed   : > { %v1421_v7 = vadd.f32 %v1399_v5, %v1260_v47 }
 0x2ef   : > { %1438 = vst.msk [vmem:[#allocation2 + $0x60] sm:$0xff] %vm1425_vm3, %v1421_v7 }
 0x2f0   : > { %v1381_v38 = vpop.f32.mrf.mxu0 }
 0x2f1   : > { %v1414_v57 = vadd.f32 %v1381_v38, %v1253_v22 }
 0x2f2   : > { %v1452_v40 = vpop.trf.xlu0 }
 0x2f3   : > { %1524 = vmatmul.bf16.gmra.mxu1 %v1452_v40  ;;  %v1261_v40 = vld [vmem:[#allocation2 + $0x68] sm:$0xff]  ;;  %1431 = vst.msk [vmem:[#allocation2 + $0x28] sm:$0xff] %vm1425_vm3, %v1414_v57 }
 0x302   : > { %v1453_v42 = vpop.trf.xlu0 }
 0x303   : > { %1529 = vmatmul.bf16.gmra.mxu1 %v1453_v42 }
 0x312   : > { %v1454_v10 = vpop.trf.xlu0 }
 0x313   : > { %1534 = vmatmul.bf16.vlgmr.msra.gmra.mxu3 %v1454_v10  ;;  %v1401_v10 = vpop.f32.mrf.mxu2 }
 0x322   : > { %v1455_v8 = vpop.trf.xlu0 }
 0x323   : > { %1539 = vmatmul.bf16.gmra.mxu3 %v1455_v8 }
 0x332   : > { %v1456_v12 = vpop.trf.xlu0 }
 0x333   : > { %1544 = vmatmul.bf16.gmra.mxu3 %v1456_v12  ;;  %v1422_v12 = vadd.f32 %v1401_v10, %v1261_v40 }
 0x335   : > { %1439 = vst.msk [vmem:[#allocation2 + $0x68] sm:$0xff] %vm1425_vm3, %v1422_v12 }
 0x342   : > { %v1457_v16 = vpop.trf.xlu0 }
 0x343   : > { %1549 = vmatmul.bf16.gmra.mxu3 %v1457_v16  ;;  %v1254_v16 = vld [vmem:[#allocation2 + $0x30] sm:$0xff] }
 0x350   : > { %v1515_v17 = vpop.f32.mrf.mxu1 }
 0x351   : > { %v1573_v19 = vadd.f32 %v1557_v18, %v1515_v17  ;;  %v1384_v18 = vpop.f32.mrf.mxu0  ;;  %v1566_v17 = vld [vmem:[%s4335_s15 + $0x48] sm:$0xff] }
 0x353   : > { %1589 = vst.msk [vmem:[%s4335_s15] sm:$0xff] %vm1425_vm3, %v1573_v19  ;;  %v1415_v19 = vadd.f32 %v1384_v18, %v1254_v16 }
 0x355   : > { %1432 = vst.msk [vmem:[#allocation2 + $0x30] sm:$0xff] %vm1425_vm3, %v1415_v19 }
 0x358   : > { %v1517_v21 = vpop.f32.mrf.mxu1 }
 0x359   : > { %v1574_v13 = vadd.f32 %v1558_v20, %v1517_v21  ;;  %v1262_v20 = vld [vmem:[#allocation2 + $0x70] sm:$0xff] }
 0x35b   : > { %1590 = vst.msk [vmem:[%s4335_s15 + $0x8] sm:$0xff] %vm1425_vm3, %v1574_v13  ;;  %v1404_v13 = vpop.f32.mrf.mxu2 }
 0x360   : > { %v1520_v23 = vpop.f32.mrf.mxu1 }
 0x361   : > { %v1575_v9 = vadd.f32 %v1559_v15, %v1520_v23  ;;  %v1423_v23 = vadd.f32 %v1404_v13, %v1262_v20 }
 0x363   : > { %1591 = vst.msk [vmem:[%s4335_s15 + $0x10] sm:$0xff] %vm1425_vm3, %v1575_v9  ;;  %v1255_v9 = vld [vmem:[#allocation2 + $0x38] sm:$0xff]  ;;  %v1406_v49 = vpop.f32.mrf.mxu2 }
 0x364   : > { %1440 = vst.msk [vmem:[#allocation2 + $0x70] sm:$0xff] %vm1425_vm3, %v1423_v23 }
 0x368   : > { %v1522_v53 = vpop.f32.mrf.mxu1 }
 0x369   : > { %v1576_v55 = vadd.f32 %v1560_v11, %v1522_v53  ;;  %v1386_v11 = vpop.f32.mrf.mxu0  ;;  %v1567_v53 = vld [vmem:[%s4335_s15 + $0x50] sm:$0xff] }
 0x36b   : > { %1592 = vst.msk [vmem:[%s4335_s15 + $0x18] sm:$0xff] %vm1425_vm3, %v1576_v55  ;;  %v1416_v55 = vadd.f32 %v1386_v11, %v1255_v9 }
 0x36d   : > { %1433 = vst.msk [vmem:[#allocation2 + $0x38] sm:$0xff] %vm1425_vm3, %v1416_v55 }
 0x370   : > { %v1525_v27 = vpop.f32.mrf.mxu1 }
 0x371   : > { %v1577_v28 = vadd.f32 %v1561_v24, %v1525_v27  ;;  %v1424_v24 = vadd.f32 %v1406_v49, %v1263_v59 }
 0x373   : > { %1593 = vst.msk [vmem:[%s4335_s15 + $0x20] sm:$0xff] %vm1425_vm3, %v1577_v28  ;;  %v1569_v28 = vld [vmem:[%s4335_s15 + $0x60] sm:$0xff] }
 0x374   : > { %1441 = vst.msk [vmem:[#allocation2 + $0x78] sm:$0xff] %vm1425_vm3, %v1424_v24 }
 0x378   : > { %v1527_v56 = vpop.f32.mrf.mxu1 }
 0x379   : > { %v1578_v36 = vadd.f32 %v1562_v33, %v1527_v56 }
 0x37b   : > { %1594 = vst.msk [vmem:[%s4335_s15 + $0x28] sm:$0xff] %vm1425_vm3, %v1578_v36  ;;  %v1572_v36 = vld [vmem:[%s4335_s15 + $0x78] sm:$0xff] }
 0x380   : > { %v1530_v62 = vpop.f32.mrf.mxu1 }
 0x381   : > { %v1579_v44 = vadd.f32 %v1563_v48, %v1530_v62 }
 0x383   : > { %1595 = vst.msk [vmem:[%s4335_s15 + $0x30] sm:$0xff] %vm1425_vm3, %v1579_v44 }
 0x388   : > { %v1532_v14 = vpop.f32.mrf.mxu1 }
 0x389   : > { %v1580_v3 = vadd.f32 %v1564_v51, %v1532_v14 }
 0x38b   : > { %1596 = vst.msk [vmem:[%s4335_s15 + $0x38] sm:$0xff] %vm1425_vm3, %v1580_v3 }
 0x396   : > { %v1535_v42 = vpop.f32.mrf.mxu3 }
 0x397   : > { %v1581_v8 = vadd.f32 %v1565_v39, %v1535_v42 }
 0x399   : > { %1597 = vst.msk [vmem:[%s4335_s15 + $0x40] sm:$0xff] %vm1425_vm3, %v1581_v8 }
 0x39e   : > { %v1537_v21 = vpop.f32.mrf.mxu3 }
 0x39f   : > { %v1582_v15 = vadd.f32 %v1566_v17, %v1537_v21 }
 0x3a1   : > { %1598 = vst.msk [vmem:[%s4335_s15 + $0x48] sm:$0xff] %vm1425_vm3, %v1582_v15 }
 0x3a6   : > { %v1540_v61 = vpop.f32.mrf.mxu3 }
 0x3a7   : > { %v1583_v46 = vadd.f32 %v1567_v53, %v1540_v61 }
 0x3a9   : > { %1599 = vst.msk [vmem:[%s4335_s15 + $0x50] sm:$0xff] %vm1425_vm3, %v1583_v46 }
 0x3ae   : > { %v1542_v26 = vpop.f32.mrf.mxu3 }
 0x3af   : > { %v1584_v27 = vadd.f32 %v1568_v25, %v1542_v26 }
 0x3b1   : > { %1600 = vst.msk [vmem:[%s4335_s15 + $0x58] sm:$0xff] %vm1425_vm3, %v1584_v27 }
 0x3b6   : > { %v1545_v29 = vpop.f32.mrf.mxu3 }
 0x3b7   : > { %v1585_v30 = vadd.f32 %v1569_v28, %v1545_v29 }
 0x3b9   : > { %1601 = vst.msk [vmem:[%s4335_s15 + $0x60] sm:$0xff] %vm1425_vm3, %v1585_v30 }
 0x3be   : > { %v1547_v32 = vpop.f32.mrf.mxu3 }
 0x3bf   : > { %v1586_v33 = vadd.f32 %v1570_v31, %v1547_v32 }
 0x3c1   : > { %1602 = vst.msk [vmem:[%s4335_s15 + $0x68] sm:$0xff] %vm1425_vm3, %v1586_v33 }
 0x3c6   : > { %v1550_v35 = vpop.f32.mrf.mxu3 }
 0x3c7   : > { %v1587_v56 = vadd.f32 %v1571_v34, %v1550_v35 }
 0x3c9   : > { %1603 = vst.msk [vmem:[%s4335_s15 + $0x70] sm:$0xff] %vm1425_vm3, %v1587_v56 }
 0x3cd   : > { %1608 = sbr.rel (%p3175_p10) target bundleno = 1155 (0x483), region = 203 }
 0x3ce   : > { %v1552_v37 = vpop.f32.mrf.mxu3 }
 0x3cf   : > { %v1588_v58 = vadd.f32 %v1572_v36, %v1552_v37 }
 0x3d1   : > { %1604 = vst.msk [vmem:[%s4335_s15 + $0x78] sm:$0xff] %vm1425_vm3, %v1588_v58 }
 0x3d2   : > { %v1609_v52 = vld [vmem:[#allocation2] sm:$0xff]  ;;  %v4403_v54 = vld [vmem:[#allocation2 + $0x8] sm:$0xff]  ;;  %v4405_v48 = vld [vmem:[#allocation2 + $0x10] sm:$0xff]  ;;  %vm1641_vm4 = vcmask 519168   ;;  %vm1768_vm5 = vcmask 261120  }
 0x3d3   : > { %v4407_v50 = vld [vmem:[#allocation2 + $0x18] sm:$0xff]  ;;  %v4409_v60 = vld [vmem:[#allocation2 + $0x20] sm:$0xff]  ;;  %v4411_v62 = vld [vmem:[#allocation2 + $0x28] sm:$0xff]  ;;  %v1625_v44 = vpack.c.bf16 %v1609_v52, %v1609_v52  ;;  %v1626_v0 = vpack.c.bf16 %v4403_v54, %v4403_v54  ;;  %v1627_v2 = vpack.c.bf16 %v4405_v48, %v4405_v48 }
 0x3d4   : > { %v4417_v4 = vld [vmem:[#allocation2 + $0x30] sm:$0xff]  ;;  %v1628_v6 = vpack.c.bf16 %v4407_v50, %v4407_v50  ;;  %v4421_v51 = vld [vmem:[#allocation2 + $0x38] sm:$0xff]  ;;  %v1629_v63 = vpack.c.bf16 %v4409_v60, %v4409_v60  ;;  %v4427_v1 = vld [vmem:[#allocation2 + $0x40] sm:$0xff]  ;;  %v1630_v14 = vpack.c.bf16 %v4411_v62, %v4411_v62 }
 0x3d5   : > { %1642 = vst.msk [vmem:[%s3950_s18] sm:$0xf] %vm1641_vm4, %v1625_v44  ;;  %v4433_v3 = vld [vmem:[#allocation2 + $0x48] sm:$0xff]  ;;  %v1631_v45 = vpack.c.bf16 %v4417_v4, %v4417_v4  ;;  %v4439_v41 = vld [vmem:[#allocation2 + $0x50] sm:$0xff]  ;;  %v1632_v43 = vpack.c.bf16 %v4421_v51, %v4421_v51  ;;  %v4445_v47 = vld [vmem:[#allocation2 + $0x58] sm:$0xff]  ;;  %v1633_v5 = vpack.c.bf16 %v4427_v1, %v4427_v1 }
 0x3d6   : > { %1643 = vst.msk [vmem:[%s3950_s18 + $0x4] sm:$0xf] %vm1641_vm4, %v1626_v0  ;;  %v4451_v7 = vld [vmem:[#allocation2 + $0x60] sm:$0xff]  ;;  %v1634_v22 = vpack.c.bf16 %v4433_v3, %v4433_v3  ;;  %v4457_v38 = vld [vmem:[#allocation2 + $0x68] sm:$0xff]  ;;  %v1635_v39 = vpack.c.bf16 %v4439_v41, %v4439_v41  ;;  %v4463_v57 = vld [vmem:[#allocation2 + $0x70] sm:$0xff]  ;;  %v1636_v42 = vpack.c.bf16 %v4445_v47, %v4445_v47 }
 0x3d7   : > { %1644 = vst.msk [vmem:[%s3950_s18 + $0x8] sm:$0xf] %vm1641_vm4, %v1627_v2  ;;  %v4465_v40 = vld [vmem:[#allocation2 + $0x78] sm:$0xff]  ;;  %v1724_v10 = vld [vmem:[#allocation4 + $0x10] sm:$0xff]  ;;  %v1637_v8 = vpack.c.bf16 %v4451_v7, %v4451_v7  ;;  %v1722_v16 = vld [vmem:[#allocation4] sm:$0xff]  ;;  %v1638_v17 = vpack.c.bf16 %v4457_v38, %v4457_v38  ;;  %v1639_v21 = vpack.c.bf16 %v4463_v57, %v4463_v57 }
 0x3d8   : > { %1645 = vst.msk [vmem:[%s3950_s18 + $0xc] sm:$0xf] %vm1641_vm4, %v1628_v6  ;;  %v1725_v12 = vld [vmem:[#allocation4 + $0x18] sm:$0xff]  ;;  %v1723_v18 = vld [vmem:[#allocation4 + $0x8] sm:$0xff]  ;;  %v1658_v19 = vld [vmem:[%s3930_s9] sm:$0xff]  ;;  %v1640_v15 = vpack.c.bf16 %v4465_v40, %v4465_v40 }
 0x3d9   : > { %1646 = vst.msk [vmem:[%s3950_s18 + $0x10] sm:$0xf] %vm1641_vm4, %v1629_v63  ;;  %v1727_v20 = vpack.c.bf16 %v1725_v12, %v1724_v10  ;;  %v1659_v13 = vld [vmem:[%s3930_s9 + $0x8] sm:$0xff]  ;;  %v1660_v23 = vld [vmem:[%s3930_s9 + $0x10] sm:$0xff]  ;;  %v1726_v9 = vpack.c.bf16 %v1723_v18, %v1722_v16  ;;  %v1661_v11 = vld [vmem:[%s3930_s9 + $0x18] sm:$0xff]  ;;  %v1674_v59 = vadd.f32 %v1658_v19, %v1609_v52 }
 0x3da   : > { %1647 = vst.msk [vmem:[%s3950_s18 + $0x14] sm:$0xf] %vm1641_vm4, %v1630_v14  ;;  %v1662_v53 = vld [vmem:[%s3930_s9 + $0x20] sm:$0xff]  ;;  %v1663_v55 = vld [vmem:[%s3930_s9 + $0x28] sm:$0xff]  ;;  %v1664_v61 = vld [vmem:[%s3930_s9 + $0x30] sm:$0xff]  ;;  %v1675_v29 = vadd.f32 %v1659_v13, %v4403_v54  ;;  %v1676_v31 = vadd.f32 %v1660_v23, %v4405_v48  ;;  %v1677_v35 = vadd.f32 %v1661_v11, %v4407_v50 }
 0x3db   : > { %1648 = vst.msk [vmem:[%s3950_s18 + $0x18] sm:$0xf] %vm1641_vm4, %v1631_v45  ;;  %1799 = vmatpush.bf16.msra.mxu0 %v1727_v20  ;;  %3446 = vmatpush.bf16.msra.mxu1 %v1727_v20  ;;  %v1665_v49 = vld [vmem:[%s3930_s9 + $0x38] sm:$0xff]  ;;  %v1666_v46 = vld [vmem:[%s3930_s9 + $0x40] sm:$0xff]  ;;  %v1667_v24 = vld [vmem:[%s3930_s9 + $0x48] sm:$0xff]  ;;  %v1678_v37 = vadd.f32 %v1662_v53, %v4409_v60  ;;  %v1679_v58 = vadd.f32 %v1663_v55, %v4411_v62 }
 0x3dc   : > { %1649 = vst.msk [vmem:[%s3950_s18 + $0x1c] sm:$0xf] %vm1641_vm4, %v1632_v43  ;;  %3447 = vmatpush.bf16.msra.mxu2 %v1727_v20  ;;  %3448 = vmatpush.bf16.msra.mxu3 %v1727_v20  ;;  %v1668_v25 = vld [vmem:[%s3930_s9 + $0x50] sm:$0xff]  ;;  %v1669_v26 = vld [vmem:[%s3930_s9 + $0x58] sm:$0xff]  ;;  %v1670_v27 = vld [vmem:[%s3930_s9 + $0x60] sm:$0xff]  ;;  %v1680_v52 = vadd.f32 %v1664_v61, %v4417_v4  ;;  %v1681_v54 = vadd.f32 %v1665_v49, %v4421_v51 }
 0x3dd   : > { %1650 = vst.msk [vmem:[%s3950_s18 + $0x20] sm:$0xf] %vm1641_vm4, %v1633_v5  ;;  %v1671_v28 = vld [vmem:[%s3930_s9 + $0x68] sm:$0xff]  ;;  %v1672_v30 = vld [vmem:[%s3930_s9 + $0x70] sm:$0xff]  ;;  %v3382_v32 = vld [vmem:[%s3912_s14] sm:$0xff]  ;;  %v1682_v48 = vadd.f32 %v1666_v46, %v4427_v1  ;;  %v1683_v50 = vadd.f32 %v1667_v24, %v4433_v3  ;;  %v1684_v60 = vadd.f32 %v1668_v25, %v4439_v41  ;;  %v1685_v62 = vadd.f32 %v1669_v26, %v4445_v47 }
 0x3de   : > { %1651 = vst.msk [vmem:[%s3950_s18 + $0x24] sm:$0xf] %vm1641_vm4, %v1634_v22  ;;  %v3384_v33 = vld [vmem:[%s3912_s14 + $0x10] sm:$0xff]  ;;  %v1673_v34 = vld [vmem:[%s3930_s9 + $0x78] sm:$0xff]  ;;  %v3386_v56 = vld [vmem:[%s3912_s14 + $0x20] sm:$0xff]  ;;  %v1686_v44 = vadd.f32 %v1670_v27, %v4451_v7  ;;  %v1687_v0 = vadd.f32 %v1671_v28, %v4457_v38  ;;  %v1688_v2 = vadd.f32 %v1672_v30, %v4463_v57 }
 0x3df   : > { %1652 = vst.msk [vmem:[%s3950_s18 + $0x28] sm:$0xf] %vm1641_vm4, %v1635_v39  ;;  %1800 = vmatpush.bf16.msra.mxu0 %v1726_v9  ;;  %3449 = vmatpush.bf16.msra.mxu1 %v1726_v9  ;;  %v3388_v36 = vld [vmem:[%s3912_s14 + $0x30] sm:$0xff]  ;;  %v1689_v4 = vadd.f32 %v1673_v34, %v4465_v40  ;;  %v3383_v6 = vld [vmem:[%s3912_s14 + $0x8] sm:$0xff]  ;;  %v3385_v51 = vld [vmem:[%s3912_s14 + $0x18] sm:$0xff] }
 0x3e0   : > { %1653 = vst.msk [vmem:[%s3950_s18 + $0x2c] sm:$0xf] %vm1641_vm4, %v1636_v42  ;;  %3450 = vmatpush.bf16.msra.mxu2 %v1726_v9  ;;  %3451 = vmatpush.bf16.msra.mxu3 %v1726_v9  ;;  %v3387_v63 = vld [vmem:[%s3912_s14 + $0x28] sm:$0xff]  ;;  %v3389_v1 = vld [vmem:[%s3912_s14 + $0x38] sm:$0xff]  ;;  %v1842_v14 = vld [vmem:[%s3935_s19] sm:$0xff] }
 0x3e1   : > { %1654 = vst.msk [vmem:[%s3950_s18 + $0x30] sm:$0xf] %vm1641_vm4, %v1637_v8  ;;  %v1846_v3 = vld [vmem:[%s3935_s19 + $0x20] sm:$0xff]  ;;  %v1843_v45 = vld [vmem:[%s3935_s19 + $0x8] sm:$0xff]  ;;  %v1844_v5 = vld [vmem:[%s3935_s19 + $0x10] sm:$0xff] }
 0x3e2   : > { %1655 = vst.msk [vmem:[%s3950_s18 + $0x34] sm:$0xf] %vm1641_vm4, %v1638_v17  ;;  %3208 = vmatmul.msk.bf16.vlgmr.msra.gmra.mxu0 %vm1768_vm5, %v3382_v32  ;;  %3210 = vmatmul.msk.bf16.vlgmr.msra.gmra.mxu1 %vm1768_vm5, %v3384_v33  ;;  %v1847_v41 = vld [vmem:[%s3935_s19 + $0x28] sm:$0xff]  ;;  %v1848_v7 = vld [vmem:[%s3935_s19 + $0x30] sm:$0xff]  ;;  %v1845_v39 = vld [vmem:[%s3935_s19 + $0x18] sm:$0xff] }
 0x3e3   : > { %1656 = vst.msk [vmem:[%s3950_s18 + $0x38] sm:$0xf] %vm1641_vm4, %v1639_v21  ;;  %3212 = vmatmul.msk.bf16.vlgmr.msra.gmra.mxu2 %vm1768_vm5, %v3386_v56  ;;  %3214 = vmatmul.msk.bf16.vlgmr.msra.gmra.mxu3 %vm1768_vm5, %v3388_v36  ;;  %v1851_v43 = vld [vmem:[%s3935_s19 + $0x48] sm:$0xff]  ;;  %v1852_v22 = vld [vmem:[%s3935_s19 + $0x50] sm:$0xff]  ;;  %v1849_v42 = vld [vmem:[%s3935_s19 + $0x38] sm:$0xff] }
 0x3e4   : > { %1657 = vst.msk [vmem:[%s3950_s18 + $0x3c] sm:$0xf] %vm1641_vm4, %v1640_v15  ;;  %v1855_v47 = vld [vmem:[%s3935_s19 + $0x68] sm:$0xff]  ;;  %v1856_v38 = vld [vmem:[%s3935_s19 + $0x70] sm:$0xff]  ;;  %v1853_v10 = vld [vmem:[%s3935_s19 + $0x58] sm:$0xff] }
 0x3e5   : > { %1690 = vst.msk [vmem:[%s3961_s3] sm:$0xff] %vm1425_vm3, %v1674_v59  ;;  %v1857_v8 = vld [vmem:[%s3935_s19 + $0x78] sm:$0xff]  ;;  %v1850_v18 = vld [vmem:[%s3935_s19 + $0x40] sm:$0xff] }
 0x3e6   : > { %1691 = vst.msk [vmem:[%s3961_s3 + $0x8] sm:$0xff] %vm1425_vm3, %v1675_v29  ;;  %v1854_v17 = vld [vmem:[%s3935_s19 + $0x60] sm:$0xff] }
 0x3e7   : > { %1692 = vst.msk [vmem:[%s3961_s3 + $0x10] sm:$0xff] %vm1425_vm3, %v1676_v31 }
 0x3e8   : > { %1693 = vst.msk [vmem:[%s3961_s3 + $0x18] sm:$0xff] %vm1425_vm3, %v1677_v35 }
 0x3e9   : > { %1694 = vst.msk [vmem:[%s3961_s3 + $0x20] sm:$0xff] %vm1425_vm3, %v1678_v37 }
 0x3ea   : > { %1695 = vst.msk [vmem:[%s3961_s3 + $0x28] sm:$0xff] %vm1425_vm3, %v1679_v58 }
 0x3eb   : > { %1696 = vst.msk [vmem:[%s3961_s3 + $0x30] sm:$0xff] %vm1425_vm3, %v1680_v52 }
 0x3ec   : > { %1697 = vst.msk [vmem:[%s3961_s3 + $0x38] sm:$0xff] %vm1425_vm3, %v1681_v54 }
 0x3ed   : > { %1698 = vst.msk [vmem:[%s3961_s3 + $0x40] sm:$0xff] %vm1425_vm3, %v1682_v48 }
 0x3ee   : > { %1699 = vst.msk [vmem:[%s3961_s3 + $0x48] sm:$0xff] %vm1425_vm3, %v1683_v50 }
 0x3ef   : > { %1700 = vst.msk [vmem:[%s3961_s3 + $0x50] sm:$0xff] %vm1425_vm3, %v1684_v60 }
 0x3f0   : > { %1701 = vst.msk [vmem:[%s3961_s3 + $0x58] sm:$0xff] %vm1425_vm3, %v1685_v62 }
 0x3f1   : > { %1702 = vst.msk [vmem:[%s3961_s3 + $0x60] sm:$0xff] %vm1425_vm3, %v1686_v44 }
 0x3f2   : > { %1703 = vst.msk [vmem:[%s3961_s3 + $0x68] sm:$0xff] %vm1425_vm3, %v1687_v0  ;;  %3209 = vmatmul.msk.bf16.gmra.mxu0 %vm1768_vm5, %v3383_v6  ;;  %3211 = vmatmul.msk.bf16.gmra.mxu1 %vm1768_vm5, %v3385_v51 }
 0x3f3   : > { %1704 = vst.msk [vmem:[%s3961_s3 + $0x70] sm:$0xff] %vm1425_vm3, %v1688_v2  ;;  %3213 = vmatmul.msk.bf16.gmra.mxu2 %vm1768_vm5, %v3387_v63  ;;  %3215 = vmatmul.msk.bf16.gmra.mxu3 %vm1768_vm5, %v3389_v1 }
 0x3f4   : > { %1705 = vst.msk [vmem:[%s3961_s3 + $0x78] sm:$0xff] %vm1425_vm3, %v1689_v4 }
 0x45f   : > { %v1802_v57 = vpop.f32.mrf.mxu0  ;;  %v1812_v40 = vpop.f32.mrf.mxu1 }
 0x460   : > { %v1858_v12 = vadd.f32 %v1842_v14, %v1802_v57  ;;  %v1862_v16 = vadd.f32 %v1846_v3, %v1812_v40 }
 0x462   : > { %1874 = vst.msk [vmem:[%s3975_s11] sm:$0xff] %vm1425_vm3, %v1858_v12 }
 0x463   : > { %1878 = vst.msk [vmem:[%s3975_s11 + $0x20] sm:$0xff] %vm1425_vm3, %v1862_v16 }
 0x466   : > { %v1822_v19 = vpop.f32.mrf.mxu2  ;;  %v1832_v20 = vpop.f32.mrf.mxu3 }
 0x467   : > { %v1866_v21 = vadd.f32 %v1850_v18, %v1822_v19  ;;  %v1804_v13 = vpop.f32.mrf.mxu0  ;;  %v1814_v15 = vpop.f32.mrf.mxu1  ;;  %v1870_v23 = vadd.f32 %v1854_v17, %v1832_v20 }
 0x468   : > { %v1859_v9 = vadd.f32 %v1843_v45, %v1804_v13  ;;  %v1863_v11 = vadd.f32 %v1847_v41, %v1814_v15 }
 0x469   : > { %1882 = vst.msk [vmem:[%s3975_s11 + $0x40] sm:$0xff] %vm1425_vm3, %v1866_v21 }
 0x46a   : > { %1875 = vst.msk [vmem:[%s3975_s11 + $0x8] sm:$0xff] %vm1425_vm3, %v1859_v9 }
 0x46b   : > { %1879 = vst.msk [vmem:[%s3975_s11 + $0x28] sm:$0xff] %vm1425_vm3, %v1863_v11 }
 0x46c   : > { %1886 = vst.msk [vmem:[%s3975_s11 + $0x60] sm:$0xff] %vm1425_vm3, %v1870_v23 }
 0x46e   : > { %v1824_v53 = vpop.f32.mrf.mxu2  ;;  %v1834_v55 = vpop.f32.mrf.mxu3 }
 0x46f   : > { %v1867_v59 = vadd.f32 %v1851_v43, %v1824_v53  ;;  %v1807_v61 = vpop.f32.mrf.mxu0  ;;  %v1817_v49 = vpop.f32.mrf.mxu1  ;;  %v1871_v46 = vadd.f32 %v1855_v47, %v1834_v55 }
 0x470   : > { %v1860_v24 = vadd.f32 %v1844_v5, %v1807_v61  ;;  %v1864_v25 = vadd.f32 %v1848_v7, %v1817_v49 }
 0x471   : > { %1883 = vst.msk [vmem:[%s3975_s11 + $0x48] sm:$0xff] %vm1425_vm3, %v1867_v59 }
 0x472   : > { %1876 = vst.msk [vmem:[%s3975_s11 + $0x10] sm:$0xff] %vm1425_vm3, %v1860_v24 }
 0x473   : > { %1880 = vst.msk [vmem:[%s3975_s11 + $0x30] sm:$0xff] %vm1425_vm3, %v1864_v25 }
 0x474   : > { %1887 = vst.msk [vmem:[%s3975_s11 + $0x68] sm:$0xff] %vm1425_vm3, %v1871_v46 }
 0x476   : > { %v1827_v26 = vpop.f32.mrf.mxu2  ;;  %v1837_v27 = vpop.f32.mrf.mxu3 }
 0x477   : > { %v1868_v28 = vadd.f32 %v1852_v22, %v1827_v26  ;;  %v1809_v29 = vpop.f32.mrf.mxu0  ;;  %v1819_v30 = vpop.f32.mrf.mxu1  ;;  %v1872_v31 = vadd.f32 %v1856_v38, %v1837_v27 }
 0x478   : > { %v1861_v32 = vadd.f32 %v1845_v39, %v1809_v29  ;;  %v1865_v33 = vadd.f32 %v1849_v42, %v1819_v30 }
 0x479   : > { %1884 = vst.msk [vmem:[%s3975_s11 + $0x50] sm:$0xff] %vm1425_vm3, %v1868_v28 }
 0x47a   : > { %1877 = vst.msk [vmem:[%s3975_s11 + $0x18] sm:$0xff] %vm1425_vm3, %v1861_v32 }
 0x47b   : > { %1881 = vst.msk [vmem:[%s3975_s11 + $0x38] sm:$0xff] %vm1425_vm3, %v1865_v33 }
 0x47c   : > { %1888 = vst.msk [vmem:[%s3975_s11 + $0x70] sm:$0xff] %vm1425_vm3, %v1872_v31 }
 0x47e   : > { %v1829_v34 = vpop.f32.mrf.mxu2  ;;  %v1839_v35 = vpop.f32.mrf.mxu3 }
 0x47f   : > { %v1869_v56 = vadd.f32 %v1853_v10, %v1829_v34  ;;  %v1873_v36 = vadd.f32 %v1857_v8, %v1839_v35 }
 0x481   : > { %1885 = vst.msk [vmem:[%s3975_s11 + $0x58] sm:$0xff] %vm1425_vm3, %v1869_v56 }
 0x482   : > { %1889 = vst.msk [vmem:[%s3975_s11 + $0x78] sm:$0xff] %vm1425_vm3, %v1873_v36 }
 0x483 PF: > { %p1890_p11 = scmp.eq.s32.totalorder %s3623_s28, 1 }
 0x485   : > { %p1891_p12 = pnand %p1890_p11, %p1605_p9 }
 0x486   : > { %s5950_s28 = sld [smem:[#allocation43_spill]] (!%p1891_p12) }
 0x487   : > { %1894 = sbr.rel (%p1891_p12) target bundleno = 1708 (0x6ac), region = 207  ;;  %s5952_s15 = sld [smem:[#allocation37_spill]] (!%p1891_p12) }
 0x488   : > { %s5955_s16 = sld [smem:[#allocation44_spill]] (!%p1891_p12) }
 0x489   : > { %s5956_s25 = sld [smem:[#allocation39_spill]] (!%p1891_p12) }
 0x48a   : > { %s5958_s17 = sld [smem:[#allocation45_spill]] (!%p1891_p12) }
 0x48c   : > { %v4625_v37 = vld [vmem:[#allocation3] sm:$0xff]  ;;  %v4627_v58 = vld [vmem:[#allocation3 + $0x8] sm:$0xff]  ;;  %v4629_v52 = vld [vmem:[#allocation3 + $0x10] sm:$0xff]  ;;  %vm1991_vm6 = vcmask 519168   ;;  %s5951_s14 = smov %s5950_s28  ;;  %vm2358_vm7 = vcmask 261120  }
 0x48d   : > { %v4631_v54 = vld [vmem:[#allocation3 + $0x18] sm:$0xff]  ;;  %v4633_v48 = vld [vmem:[#allocation3 + $0x20] sm:$0xff]  ;;  %v4635_v50 = vld [vmem:[#allocation3 + $0x28] sm:$0xff]  ;;  %v1943_v60 = vpack.c.bf16 %v4625_v37, %v4625_v37  ;;  %v1944_v62 = vpack.c.bf16 %v4627_v58, %v4627_v58  ;;  %v1945_v44 = vpack.c.bf16 %v4629_v52, %v4629_v52 }
 0x48e   : > { %v4643_v0 = vld [vmem:[#allocation3 + $0x30] sm:$0xff]  ;;  %v1946_v2 = vpack.c.bf16 %v4631_v54, %v4631_v54  ;;  %v4647_v4 = vld [vmem:[#allocation3 + $0x38] sm:$0xff]  ;;  %v1947_v6 = vpack.c.bf16 %v4633_v48, %v4633_v48  ;;  %v4655_v51 = vld [vmem:[#allocation3 + $0x40] sm:$0xff]  ;;  %v1948_v63 = vpack.c.bf16 %v4635_v50, %v4635_v50 }
 0x48f   : > { %1992 = vst.msk [vmem:[%s5950_s28] sm:$0xf] %vm1991_vm6, %v1943_v60  ;;  %v4663_v1 = vld [vmem:[#allocation3 + $0x48] sm:$0xff]  ;;  %v1949_v14 = vpack.c.bf16 %v4643_v0, %v4643_v0  ;;  %v4671_v3 = vld [vmem:[#allocation3 + $0x50] sm:$0xff]  ;;  %v1950_v45 = vpack.c.bf16 %v4647_v4, %v4647_v4  ;;  %v4679_v41 = vld [vmem:[#allocation3 + $0x58] sm:$0xff]  ;;  %v1951_v43 = vpack.c.bf16 %v4655_v51, %v4655_v51  ;;  %s5953_s28 = sld [smem:[#allocation38_spill]]  ;;  %s5957_s2 = smov %s5956_s25 }
 0x490   : > { %1993 = vst.msk [vmem:[%s5951_s14 + $0x4] sm:$0xf] %vm1991_vm6, %v1944_v62  ;;  %v4687_v47 = vld [vmem:[#allocation3 + $0x60] sm:$0xff]  ;;  %v1952_v5 = vpack.c.bf16 %v4663_v1, %v4663_v1  ;;  %v4695_v7 = vld [vmem:[#allocation3 + $0x68] sm:$0xff]  ;;  %v1953_v22 = vpack.c.bf16 %v4671_v3, %v4671_v3  ;;  %v4703_v38 = vld [vmem:[#allocation3 + $0x70] sm:$0xff]  ;;  %v1954_v39 = vpack.c.bf16 %v4679_v41, %v4679_v41 }
 0x491   : > { %1994 = vst.msk [vmem:[%s5951_s14 + $0x8] sm:$0xf] %vm1991_vm6, %v1945_v44  ;;  %v4711_v57 = vld [vmem:[#allocation3 + $0x78] sm:$0xff]  ;;  %v1955_v40 = vpack.c.bf16 %v4687_v47, %v4687_v47  ;;  %v4719_v42 = vld [vmem:[#allocation3 + $0x80] sm:$0xff]  ;;  %v1956_v10 = vpack.c.bf16 %v4695_v7, %v4695_v7  ;;  %v4727_v8 = vld [vmem:[#allocation3 + $0x88] sm:$0xff]  ;;  %v1957_v12 = vpack.c.bf16 %v4703_v38, %v4703_v38 }
 0x492   : > { %1995 = vst.msk [vmem:[%s5951_s14 + $0xc] sm:$0xf] %vm1991_vm6, %v1946_v2  ;;  %v4735_v16 = vld [vmem:[#allocation3 + $0x90] sm:$0xff]  ;;  %v1958_v18 = vpack.c.bf16 %v4711_v57, %v4711_v57  ;;  %v4743_v17 = vld [vmem:[#allocation3 + $0x98] sm:$0xff]  ;;  %v1959_v19 = vpack.c.bf16 %v4719_v42, %v4719_v42  ;;  %v4751_v20 = vld [vmem:[#allocation3 + $0xa0] sm:$0xff]  ;;  %v1960_v21 = vpack.c.bf16 %v4727_v8, %v4727_v8 }
 0x493   : > { %1996 = vst.msk [vmem:[%s5951_s14 + $0x10] sm:$0xf] %vm1991_vm6, %v1947_v6  ;;  %v4759_v13 = vld [vmem:[#allocation3 + $0xa8] sm:$0xff]  ;;  %v1961_v15 = vpack.c.bf16 %v4735_v16, %v4735_v16  ;;  %v4767_v23 = vld [vmem:[#allocation3 + $0xb0] sm:$0xff]  ;;  %v1962_v9 = vpack.c.bf16 %v4743_v17, %v4743_v17  ;;  %v4775_v11 = vld [vmem:[#allocation3 + $0xb8] sm:$0xff]  ;;  %v1963_v53 = vpack.c.bf16 %v4751_v20, %v4751_v20 }
 0x494   : > { %1997 = vst.msk [vmem:[%s5951_s14 + $0x14] sm:$0xf] %vm1991_vm6, %v1948_v63  ;;  %v4783_v55 = vld [vmem:[#allocation3 + $0xc0] sm:$0xff]  ;;  %v1964_v59 = vpack.c.bf16 %v4759_v13, %v4759_v13  ;;  %v4791_v61 = vld [vmem:[#allocation3 + $0xc8] sm:$0xff]  ;;  %v1965_v49 = vpack.c.bf16 %v4767_v23, %v4767_v23  ;;  %v4799_v46 = vld [vmem:[#allocation3 + $0xd0] sm:$0xff]  ;;  %v1966_v24 = vpack.c.bf16 %v4775_v11, %v4775_v11 }
 0x495   : > { %1998 = vst.msk [vmem:[%s5951_s14 + $0x18] sm:$0xf] %vm1991_vm6, %v1949_v14  ;;  %v4807_v25 = vld [vmem:[#allocation3 + $0xd8] sm:$0xff]  ;;  %v1967_v26 = vpack.c.bf16 %v4783_v55, %v4783_v55  ;;  %v4815_v27 = vld [vmem:[#allocation3 + $0xe0] sm:$0xff]  ;;  %v1968_v28 = vpack.c.bf16 %v4791_v61, %v4791_v61  ;;  %v4823_v29 = vld [vmem:[#allocation3 + $0xe8] sm:$0xff]  ;;  %v1969_v30 = vpack.c.bf16 %v4799_v46, %v4799_v46  ;;  %s5954_s9 = smov %s5953_s28 }
 0x496   : > { %1999 = vst.msk [vmem:[%s5951_s14 + $0x1c] sm:$0xf] %vm1991_vm6, %v1950_v45  ;;  %v4831_v31 = vld [vmem:[#allocation3 + $0xf0] sm:$0xff]  ;;  %v1970_v32 = vpack.c.bf16 %v4807_v25, %v4807_v25  ;;  %v4839_v33 = vld [vmem:[#allocation3 + $0xf8] sm:$0xff]  ;;  %v1971_v34 = vpack.c.bf16 %v4815_v27, %v4815_v27  ;;  %v4847_v35 = vld [vmem:[#allocation3 + $0x100] sm:$0xff]  ;;  %v1972_v56 = vpack.c.bf16 %v4823_v29, %v4823_v29 }
 0x497   : > { %2000 = vst.msk [vmem:[%s5951_s14 + $0x20] sm:$0xf] %vm1991_vm6, %v1951_v43  ;;  %v4855_v36 = vld [vmem:[#allocation3 + $0x108] sm:$0xff]  ;;  %v1973_v60 = vpack.c.bf16 %v4831_v31, %v4831_v31  ;;  %v4863_v62 = vld [vmem:[#allocation3 + $0x110] sm:$0xff]  ;;  %v1974_v44 = vpack.c.bf16 %v4839_v33, %v4839_v33  ;;  %v4871_v2 = vld [vmem:[#allocation3 + $0x118] sm:$0xff]  ;;  %v1975_v63 = vpack.c.bf16 %v4847_v35, %v4847_v35 }
 0x498   : > { %2001 = vst.msk [vmem:[%s5951_s14 + $0x24] sm:$0xf] %vm1991_vm6, %v1952_v5  ;;  %v4873_v6 = vld [vmem:[#allocation3 + $0x120] sm:$0xff]  ;;  %v1976_v14 = vpack.c.bf16 %v4855_v36, %v4855_v36  ;;  %v2234_v45 = vld [vmem:[#allocation5 + $0x10] sm:$0xff]  ;;  %v2235_v43 = vld [vmem:[#allocation5 + $0x18] sm:$0xff] }
 0x499   : > { %2002 = vst.msk [vmem:[%s5951_s14 + $0x28] sm:$0xf] %vm1991_vm6, %v1953_v22  ;;  %v2232_v5 = vld [vmem:[#allocation5] sm:$0xff]  ;;  %v4887_v22 = vld [vmem:[#allocation3 + $0x128] sm:$0xff] }
 0x49a   : > { %2003 = vst.msk [vmem:[%s5951_s14 + $0x2c] sm:$0xf] %vm1991_vm6, %v1954_v39  ;;  %v1977_v39 = vpack.c.bf16 %v4863_v62, %v4863_v62 }
 0x49b   : > { %2004 = vst.msk [vmem:[%s5951_s14 + $0x30] sm:$0xf] %vm1991_vm6, %v1955_v40  ;;  %v2237_v40 = vpack.c.bf16 %v2235_v43, %v2234_v45  ;;  %v4971_v43 = vld [vmem:[#allocation3 + $0x170] sm:$0xff] }
 0x49c   : > { %2005 = vst.msk [vmem:[%s5951_s14 + $0x34] sm:$0xf] %vm1991_vm6, %v1956_v10  ;;  %v2233_v10 = vld [vmem:[#allocation5 + $0x8] sm:$0xff] }
 0x49d   : > { %2006 = vst.msk [vmem:[%s5951_s14 + $0x38] sm:$0xf] %vm1991_vm6, %v1957_v12  ;;  %v4895_v12 = vld [vmem:[#allocation3 + $0x130] sm:$0xff]  ;;  %2437 = vmatpush.bf16.msra.mxu0 %v2237_v40  ;;  %3452 = vmatpush.bf16.msra.mxu1 %v2237_v40 }
 0x49e   : > { %2007 = vst.msk [vmem:[%s5951_s14 + $0x3c] sm:$0xf] %vm1991_vm6, %v1958_v18  ;;  %v1978_v18 = vpack.c.bf16 %v4871_v2, %v4871_v2  ;;  %3453 = vmatpush.bf16.msra.mxu2 %v2237_v40  ;;  %3454 = vmatpush.bf16.msra.mxu3 %v2237_v40 }
 0x49f   : > { %2008 = vst.msk [vmem:[%s5951_s14 + $0x40] sm:$0xf] %vm1991_vm6, %v1959_v19  ;;  %v4903_v19 = vld [vmem:[#allocation3 + $0x138] sm:$0xff] }
 0x4a0   : > { %2009 = vst.msk [vmem:[%s5951_s14 + $0x44] sm:$0xf] %vm1991_vm6, %v1960_v21  ;;  %v1979_v21 = vpack.c.bf16 %v4873_v6, %v4873_v6 }
 0x4a1   : > { %2010 = vst.msk [vmem:[%s5951_s14 + $0x48] sm:$0xf] %vm1991_vm6, %v1961_v15  ;;  %v2236_v15 = vpack.c.bf16 %v2233_v10, %v2232_v5 }
 0x4a2   : > { %2011 = vst.msk [vmem:[%s5951_s14 + $0x4c] sm:$0xf] %vm1991_vm6, %v1962_v9  ;;  %v4911_v9 = vld [vmem:[#allocation3 + $0x140] sm:$0xff] }
 0x4a3   : > { %2012 = vst.msk [vmem:[%s5951_s14 + $0x50] sm:$0xf] %vm1991_vm6, %v1963_v53  ;;  %v1980_v53 = vpack.c.bf16 %v4887_v22, %v4887_v22  ;;  %2438 = vmatpush.bf16.msra.mxu0 %v2236_v15  ;;  %3455 = vmatpush.bf16.msra.mxu1 %v2236_v15 }
 0x4a4   : > { %2013 = vst.msk [vmem:[%s5951_s14 + $0x54] sm:$0xf] %vm1991_vm6, %v1964_v59  ;;  %v4919_v59 = vld [vmem:[#allocation3 + $0x148] sm:$0xff]  ;;  %3456 = vmatpush.bf16.msra.mxu2 %v2236_v15  ;;  %3457 = vmatpush.bf16.msra.mxu3 %v2236_v15 }
 0x4a5   : > { %2014 = vst.msk [vmem:[%s5951_s14 + $0x58] sm:$0xf] %vm1991_vm6, %v1965_v49  ;;  %v1981_v49 = vpack.c.bf16 %v4895_v12, %v4895_v12  ;;  %v2041_v15 = vld [vmem:[%s5954_s9 + $0x8] sm:$0xff] }
 0x4a6   : > { %2015 = vst.msk [vmem:[%s5951_s14 + $0x5c] sm:$0xf] %vm1991_vm6, %v1966_v24  ;;  %v4927_v24 = vld [vmem:[#allocation3 + $0x150] sm:$0xff] }
 0x4a7   : > { %2016 = vst.msk [vmem:[%s5951_s14 + $0x60] sm:$0xf] %vm1991_vm6, %v1967_v26  ;;  %v1982_v26 = vpack.c.bf16 %v4903_v19, %v4903_v19  ;;  %v1985_v45 = vpack.c.bf16 %v4927_v24, %v4927_v24 }
 0x4a8   : > { %2017 = vst.msk [vmem:[%s5951_s14 + $0x64] sm:$0xf] %vm1991_vm6, %v1968_v28  ;;  %v3390_v28 = vld [vmem:[%s5952_s15] sm:$0xff] }
 0x4a9   : > { %2018 = vst.msk [vmem:[%s5951_s14 + $0x68] sm:$0xf] %vm1991_vm6, %v1969_v30  ;;  %v3396_v30 = vld [vmem:[%s5952_s15 + $0x30] sm:$0xff]  ;;  %3312 = vmatmul.msk.bf16.vlgmr.msra.gmra.mxu0 %vm2358_vm7, %v3390_v28 }
 0x4aa   : > { %2019 = vst.msk [vmem:[%s5951_s14 + $0x6c] sm:$0xf] %vm1991_vm6, %v1970_v32  ;;  %v4941_v32 = vld [vmem:[#allocation3 + $0x158] sm:$0xff]  ;;  %3318 = vmatmul.msk.bf16.vlgmr.msra.gmra.mxu1 %vm2358_vm7, %v3396_v30  ;;  %v2044_v30 = vld [vmem:[%s5954_s9 + $0x20] sm:$0xff] }
 0x4ab   : > { %2020 = vst.msk [vmem:[%s5951_s14 + $0x70] sm:$0xf] %vm1991_vm6, %v1971_v34  ;;  %v1983_v34 = vpack.c.bf16 %v4911_v9, %v4911_v9  ;;  %v1986_v5 = vpack.c.bf16 %v4941_v32, %v4941_v32 }
 0x4ac   : > { %2021 = vst.msk [vmem:[%s5951_s14 + $0x74] sm:$0xf] %vm1991_vm6, %v1972_v56  ;;  %v3402_v56 = vld [vmem:[%s5952_s15 + $0x60] sm:$0xff] }
 0x4ad   : > { %2022 = vst.msk [vmem:[%s5951_s14 + $0x78] sm:$0xf] %vm1991_vm6, %v1973_v60  ;;  %v3408_v60 = vld [vmem:[%s5952_s15 + $0x90] sm:$0xff]  ;;  %3324 = vmatmul.msk.bf16.vlgmr.msra.gmra.mxu2 %vm2358_vm7, %v3402_v56 }
 0x4ae   : > { %2023 = vst.msk [vmem:[%s5951_s14 + $0x7c] sm:$0xf] %vm1991_vm6, %v1974_v44  ;;  %v4955_v44 = vld [vmem:[#allocation3 + $0x160] sm:$0xff]  ;;  %3330 = vmatmul.msk.bf16.vlgmr.msra.gmra.mxu3 %vm2358_vm7, %v3408_v60 }
 0x4af   : > { %2024 = vst.msk [vmem:[%s5951_s14 + $0x80] sm:$0xf] %vm1991_vm6, %v1975_v63  ;;  %v1984_v63 = vpack.c.bf16 %v4919_v59, %v4919_v59  ;;  %v1987_v40 = vpack.c.bf16 %v4955_v44, %v4955_v44 }
 0x4b0   : > { %2025 = vst.msk [vmem:[%s5951_s14 + $0x84] sm:$0xf] %vm1991_vm6, %v1976_v14  ;;  %v4963_v14 = vld [vmem:[#allocation3 + $0x168] sm:$0xff] }
 0x4b1   : > { %2026 = vst.msk [vmem:[%s5951_s14 + $0x88] sm:$0xf] %vm1991_vm6, %v1977_v39  ;;  %v4981_v39 = vld [vmem:[#allocation3 + $0x178] sm:$0xff]  ;;  %v1988_v10 = vpack.c.bf16 %v4963_v14, %v4963_v14 }
 0x4b2   : > { %2027 = vst.msk [vmem:[%s5951_s14 + $0x8c] sm:$0xf] %vm1991_vm6, %v1978_v18  ;;  %v2040_v18 = vld [vmem:[%s5953_s28] sm:$0xff] }
 0x4b3   : > { %2028 = vst.msk [vmem:[%s5951_s14 + $0x90] sm:$0xf] %vm1991_vm6, %v1979_v21  ;;  %v1989_v21 = vpack.c.bf16 %v4971_v43, %v4971_v43  ;;  %v2088_v28 = vadd.f32 %v2040_v18, %v4625_v37  ;;  %v2045_v37 = vld [vmem:[%s5954_s9 + $0x28] sm:$0xff] }
 0x4b4   : > { %2029 = vst.msk [vmem:[%s5951_s14 + $0x94] sm:$0xf] %vm1991_vm6, %v1980_v53  ;;  %v1990_v53 = vpack.c.bf16 %v4981_v39, %v4981_v39 }
 0x4b5   : > { %2030 = vst.msk [vmem:[%s5951_s14 + $0x98] sm:$0xf] %vm1991_vm6, %v1981_v49  ;;  %v2042_v49 = vld [vmem:[%s5954_s9 + $0x10] sm:$0xff] }
 0x4b6   : > { %2031 = vst.msk [vmem:[%s5951_s14 + $0x9c] sm:$0xf] %vm1991_vm6, %v1982_v26  ;;  %v2043_v26 = vld [vmem:[%s5954_s9 + $0x18] sm:$0xff]  ;;  %v2090_v56 = vadd.f32 %v2042_v49, %v4629_v52 }
 0x4b7   : > { %2032 = vst.msk [vmem:[%s5951_s14 + $0xa0] sm:$0xf] %vm1991_vm6, %v1983_v34  ;;  %v2089_v34 = vadd.f32 %v2041_v15, %v4627_v58  ;;  %v2046_v58 = vld [vmem:[%s5954_s9 + $0x30] sm:$0xff]  ;;  %v2091_v60 = vadd.f32 %v2043_v26, %v4631_v54  ;;  %v3409_v15 = vld [vmem:[%s5952_s15 + $0x98] sm:$0xff] }
 0x4b8   : > { %2033 = vst.msk [vmem:[%s5951_s14 + $0xa4] sm:$0xf] %vm1991_vm6, %v1984_v63  ;;  %v2047_v63 = vld [vmem:[%s5954_s9 + $0x38] sm:$0xff] }
 0x4b9   : > { %2034 = vst.msk [vmem:[%s5951_s14 + $0xa8] sm:$0xf] %vm1991_vm6, %v1985_v45  ;;  %v2092_v45 = vadd.f32 %v2044_v30, %v4633_v48  ;;  %v2094_v48 = vadd.f32 %v2046_v58, %v4643_v0  ;;  %v3391_v0 = vld [vmem:[%s5952_s15 + $0x8] sm:$0xff] }
 0x4ba   : > { %2035 = vst.msk [vmem:[%s5951_s14 + $0xac] sm:$0xf] %vm1991_vm6, %v1986_v5  ;;  %v2093_v5 = vadd.f32 %v2045_v37, %v4635_v50  ;;  %3313 = vmatmul.msk.bf16.gmra.mxu0 %vm2358_vm7, %v3391_v0 }
 0x4bb   : > { %2036 = vst.msk [vmem:[%s5951_s14 + $0xb0] sm:$0xf] %vm1991_vm6, %v1987_v40  ;;  %v2095_v40 = vadd.f32 %v2047_v63, %v4647_v4  ;;  %v3403_v4 = vld [vmem:[%s5952_s15 + $0x68] sm:$0xff] }
 0x4bc   : > { %2037 = vst.msk [vmem:[%s5951_s14 + $0xb4] sm:$0xf] %vm1991_vm6, %v1988_v10  ;;  %v3397_v10 = vld [vmem:[%s5952_s15 + $0x38] sm:$0xff] }
 0x4bd   : > { %2038 = vst.msk [vmem:[%s5951_s14 + $0xb8] sm:$0xf] %vm1991_vm6, %v1989_v21  ;;  %3319 = vmatmul.msk.bf16.gmra.mxu1 %vm2358_vm7, %v3397_v10  ;;  %3325 = vmatmul.msk.bf16.gmra.mxu2 %vm2358_vm7, %v3403_v4  ;;  %v3410_v10 = vld [vmem:[%s5952_s15 + $0xa0] sm:$0xff] }
 0x4be   : > { %2039 = vst.msk [vmem:[%s5951_s14 + $0xbc] sm:$0xf] %vm1991_vm6, %v1990_v53  ;;  %3331 = vmatmul.msk.bf16.gmra.mxu3 %vm2358_vm7, %v3409_v15 }
 0x4bf   : > { %2136 = vst.msk [vmem:[%s5955_s16] sm:$0xff] %vm1425_vm3, %v2088_v28 }
 0x4c6   : > { %v2048_v52 = vld [vmem:[%s5954_s9 + $0x40] sm:$0xff] }
 0x4c7   : > { %2137 = vst.msk [vmem:[%s5955_s16 + $0x8] sm:$0xff] %vm1425_vm3, %v2089_v34  ;;  %v2096_v21 = vadd.f32 %v2048_v52, %v4655_v51 }
 0x4ce   : > { %v2049_v54 = vld [vmem:[%s5954_s9 + $0x48] sm:$0xff]  ;;  %3332 = vmatmul.msk.bf16.gmra.mxu3 %vm2358_vm7, %v3410_v10 }
 0x4cf   : > { %2138 = vst.msk [vmem:[%s5955_s16 + $0x10] sm:$0xff] %vm1425_vm3, %v2090_v56  ;;  %v2097_v49 = vadd.f32 %v2049_v54, %v4663_v1 }
 0x4d6   : > { %v2050_v50 = vld [vmem:[%s5954_s9 + $0x50] sm:$0xff] }
 0x4d7   : > { %2139 = vst.msk [vmem:[%s5955_s16 + $0x18] sm:$0xff] %vm1425_vm3, %v2091_v60  ;;  %v2098_v26 = vadd.f32 %v2050_v50, %v4671_v3  ;;  %v3398_v50 = vld [vmem:[%s5952_s15 + $0x40] sm:$0xff] }
 0x4d8   : > { %3320 = vmatmul.msk.bf16.gmra.mxu1 %vm2358_vm7, %v3398_v50 }
 0x4de   : > { %v2051_v18 = vld [vmem:[%s5954_s9 + $0x58] sm:$0xff] }
 0x4df   : > { %2140 = vst.msk [vmem:[%s5955_s16 + $0x20] sm:$0xff] %vm1425_vm3, %v2092_v45  ;;  %v2099_v28 = vadd.f32 %v2051_v18, %v4679_v41 }
 0x4e6   : > { %v2052_v53 = vld [vmem:[%s5954_s9 + $0x60] sm:$0xff] }
 0x4e7   : > { %2141 = vst.msk [vmem:[%s5955_s16 + $0x28] sm:$0xff] %vm1425_vm3, %v2093_v5  ;;  %v2100_v30 = vadd.f32 %v2052_v53, %v4687_v47 }
 0x4ee   : > { %v2053_v51 = vld [vmem:[%s5954_s9 + $0x68] sm:$0xff] }
 0x4ef   : > { %2142 = vst.msk [vmem:[%s5955_s16 + $0x30] sm:$0xff] %vm1425_vm3, %v2094_v48  ;;  %v2101_v34 = vadd.f32 %v2053_v51, %v4695_v7 }
 0x4f6   : > { %v2054_v1 = vld [vmem:[%s5954_s9 + $0x70] sm:$0xff] }
 0x4f7   : > { %2143 = vst.msk [vmem:[%s5955_s16 + $0x38] sm:$0xff] %vm1425_vm3, %v2095_v40  ;;  %v2102_v37 = vadd.f32 %v2054_v1, %v4703_v38 }
 0x4fe   : > { %v2055_v3 = vld [vmem:[%s5954_s9 + $0x78] sm:$0xff] }
 0x4ff   : > { %2144 = vst.msk [vmem:[%s5955_s16 + $0x40] sm:$0xff] %vm1425_vm3, %v2096_v21  ;;  %v2103_v56 = vadd.f32 %v2055_v3, %v4711_v57 }
 0x506   : > { %v2056_v41 = vld [vmem:[%s5954_s9 + $0x80] sm:$0xff] }
 0x507   : > { %2145 = vst.msk [vmem:[%s5955_s16 + $0x48] sm:$0xff] %vm1425_vm3, %v2097_v49  ;;  %v2104_v58 = vadd.f32 %v2056_v41, %v4719_v42 }
 0x50e   : > { %v2057_v47 = vld [vmem:[%s5954_s9 + $0x88] sm:$0xff] }
 0x50f   : > { %2146 = vst.msk [vmem:[%s5955_s16 + $0x50] sm:$0xff] %vm1425_vm3, %v2098_v26  ;;  %v2105_v60 = vadd.f32 %v2057_v47, %v4727_v8 }
 0x516   : > { %v2058_v7 = vld [vmem:[%s5954_s9 + $0x90] sm:$0xff] }
 0x517   : > { %2147 = vst.msk [vmem:[%s5955_s16 + $0x58] sm:$0xff] %vm1425_vm3, %v2099_v28  ;;  %v2106_v63 = vadd.f32 %v2058_v7, %v4735_v16  ;;  %v3399_v7 = vld [vmem:[%s5952_s15 + $0x48] sm:$0xff] }
 0x518   : > { %3321 = vmatmul.msk.bf16.gmra.mxu1 %vm2358_vm7, %v3399_v7 }
 0x51e   : > { %v2059_v38 = vld [vmem:[%s5954_s9 + $0x98] sm:$0xff] }
 0x51f   : > { %2148 = vst.msk [vmem:[%s5955_s16 + $0x60] sm:$0xff] %vm1425_vm3, %v2100_v30  ;;  %v2107_v45 = vadd.f32 %v2059_v38, %v4743_v17 }
 0x526   : > { %v2060_v57 = vld [vmem:[%s5954_s9 + $0xa0] sm:$0xff] }
 0x527   : > { %2149 = vst.msk [vmem:[%s5955_s16 + $0x68] sm:$0xff] %vm1425_vm3, %v2101_v34  ;;  %v2108_v52 = vadd.f32 %v2060_v57, %v4751_v20 }
 0x52e   : > { %v2061_v42 = vld [vmem:[%s5954_s9 + $0xa8] sm:$0xff] }
 0x52f   : > { %2150 = vst.msk [vmem:[%s5955_s16 + $0x70] sm:$0xff] %vm1425_vm3, %v2102_v37  ;;  %v2109_v5 = vadd.f32 %v2061_v42, %v4759_v13 }
 0x536   : > { %v2062_v8 = vld [vmem:[%s5954_s9 + $0xb0] sm:$0xff] }
 0x537   : > { %2151 = vst.msk [vmem:[%s5955_s16 + $0x78] sm:$0xff] %vm1425_vm3, %v2103_v56  ;;  %v2110_v54 = vadd.f32 %v2062_v8, %v4767_v23  ;;  %v3392_v23 = vld [vmem:[%s5952_s15 + $0x10] sm:$0xff] }
 0x538   : > { %3314 = vmatmul.msk.bf16.gmra.mxu0 %vm2358_vm7, %v3392_v23  ;;  %v2470_v23 = vpop.f32.mrf.mxu1 }
 0x53e   : > { %v2063_v16 = vld [vmem:[%s5954_s9 + $0xb8] sm:$0xff] }
 0x53f   : > { %2152 = vst.msk [vmem:[%s5955_s16 + $0x80] sm:$0xff] %vm1425_vm3, %v2104_v58  ;;  %v2111_v48 = vadd.f32 %v2063_v16, %v4775_v11  ;;  %v3404_v11 = vld [vmem:[%s5952_s15 + $0x70] sm:$0xff]  ;;  %v3411_v58 = vld [vmem:[%s5952_s15 + $0xa8] sm:$0xff] }
 0x540   : > { %3326 = vmatmul.msk.bf16.gmra.mxu2 %vm2358_vm7, %v3404_v11  ;;  %3333 = vmatmul.msk.bf16.gmra.mxu3 %vm2358_vm7, %v3411_v58  ;;  %v3412_v16 = vld [vmem:[%s5952_s15 + $0xb0] sm:$0xff] }
 0x546   : > { %v2064_v17 = vld [vmem:[%s5954_s9 + $0xc0] sm:$0xff] }
 0x547   : > { %2153 = vst.msk [vmem:[%s5955_s16 + $0x88] sm:$0xff] %vm1425_vm3, %v2105_v60  ;;  %v2112_v0 = vadd.f32 %v2064_v17, %v4783_v55  ;;  %v3401_v17 = vld [vmem:[%s5952_s15 + $0x58] sm:$0xff] }
 0x54e   : > { %v2065_v20 = vld [vmem:[%s5954_s9 + $0xc8] sm:$0xff] }
 0x54f   : > { %2154 = vst.msk [vmem:[%s5955_s16 + $0x90] sm:$0xff] %vm1425_vm3, %v2106_v63  ;;  %v2113_v21 = vadd.f32 %v2065_v20, %v4791_v61  ;;  %v3413_v20 = vld [vmem:[%s5952_s15 + $0xb8] sm:$0xff] }
 0x550   : > { %3334 = vmatmul.msk.bf16.gmra.mxu3 %vm2358_vm7, %v3412_v16 }
 0x556   : > { %v2066_v13 = vld [vmem:[%s5954_s9 + $0xd0] sm:$0xff] }
 0x557   : > { %2155 = vst.msk [vmem:[%s5955_s16 + $0x98] sm:$0xff] %vm1425_vm3, %v2107_v45  ;;  %v2114_v4 = vadd.f32 %v2066_v13, %v4799_v46  ;;  %v2572_v13 = vld [vmem:[%s5957_s2 + $0x60] sm:$0xff] }
 0x55e   : > { %v2067_v40 = vld [vmem:[%s5954_s9 + $0xd8] sm:$0xff] }
 0x55f   : > { %2156 = vst.msk [vmem:[%s5955_s16 + $0xa0] sm:$0xff] %vm1425_vm3, %v2108_v52  ;;  %v2115_v15 = vadd.f32 %v2067_v40, %v4807_v25  ;;  %v3395_v52 = vld [vmem:[%s5952_s15 + $0x28] sm:$0xff]  ;;  %v2620_v40 = vadd.f32 %v2572_v13, %v2470_v23 }
 0x560   : > { %3335 = vmatmul.msk.bf16.gmra.mxu3 %vm2358_vm7, %v3413_v20 }
 0x566   : > { %v2068_v18 = vld [vmem:[%s5954_s9 + $0xe0] sm:$0xff] }
 0x567   : > { %2157 = vst.msk [vmem:[%s5955_s16 + $0xa8] sm:$0xff] %vm1425_vm3, %v2109_v5  ;;  %v2116_v53 = vadd.f32 %v2068_v18, %v4815_v27  ;;  %v3407_v5 = vld [vmem:[%s5952_s15 + $0x88] sm:$0xff] }
 0x56e   : > { %v2069_v55 = vld [vmem:[%s5954_s9 + $0xe8] sm:$0xff] }
 0x56f   : > { %2158 = vst.msk [vmem:[%s5955_s16 + $0xb0] sm:$0xff] %vm1425_vm3, %v2110_v54  ;;  %v2117_v49 = vadd.f32 %v2069_v55, %v4823_v29  ;;  %v2560_v54 = vld [vmem:[%s5956_s25] sm:$0xff]  ;;  %v2530_v55 = vpop.f32.mrf.mxu3 }
 0x570   : > { %2668 = vst.msk [vmem:[%s5958_s17 + $0x60] sm:$0xff] %vm1425_vm3, %v2620_v40 }
 0x576   : > { %v2070_v61 = vld [vmem:[%s5954_s9 + $0xf0] sm:$0xff] }
 0x577   : > { %2159 = vst.msk [vmem:[%s5955_s16 + $0xb8] sm:$0xff] %vm1425_vm3, %v2111_v48  ;;  %v2118_v51 = vadd.f32 %v2070_v61, %v4831_v31  ;;  %v2440_v48 = vpop.f32.mrf.mxu0 }
 0x578   : > { %v2608_v50 = vadd.f32 %v2560_v54, %v2440_v48 }
 0x57a   : > { %2656 = vst.msk [vmem:[%s5958_s17] sm:$0xff] %vm1425_vm3, %v2608_v50 }
 0x57e   : > { %v2071_v46 = vld [vmem:[%s5954_s9 + $0xf8] sm:$0xff] }
 0x57f   : > { %2160 = vst.msk [vmem:[%s5955_s16 + $0xc0] sm:$0xff] %vm1425_vm3, %v2112_v0  ;;  %v2119_v26 = vadd.f32 %v2071_v46, %v4839_v33  ;;  %v2472_v46 = vpop.f32.mrf.mxu1 }
 0x581   : > { %v2584_v0 = vld [vmem:[%s5957_s2 + $0xc0] sm:$0xff]  ;;  %v2561_v10 = vld [vmem:[%s5957_s2 + $0x8] sm:$0xff] }
 0x582   : > { %v2596_v11 = vld [vmem:[%s5957_s2 + $0x120] sm:$0xff]  ;;  %v2573_v18 = vld [vmem:[%s5957_s2 + $0x68] sm:$0xff] }
 0x583   : > { %v2644_v61 = vadd.f32 %v2596_v11, %v2530_v55 }
 0x585   : > { %2692 = vst.msk [vmem:[%s5958_s17 + $0x120] sm:$0xff] %vm1425_vm3, %v2644_v61 }
 0x586   : > { %v2072_v25 = vld [vmem:[%s5954_s9 + $0x100] sm:$0xff] }
 0x587   : > { %2161 = vst.msk [vmem:[%s5955_s16 + $0xc8] sm:$0xff] %vm1425_vm3, %v2113_v21  ;;  %v2120_v1 = vadd.f32 %v2072_v25, %v4847_v35  ;;  %v2500_v21 = vpop.f32.mrf.mxu2  ;;  %v2621_v25 = vadd.f32 %v2573_v18, %v2472_v46 }
 0x589   : > { %2669 = vst.msk [vmem:[%s5958_s17 + $0x68] sm:$0xff] %vm1425_vm3, %v2621_v25 }
 0x58e   : > { %v2073_v27 = vld [vmem:[%s5954_s9 + $0x108] sm:$0xff] }
 0x58f   : > { %2162 = vst.msk [vmem:[%s5955_s16 + $0xd0] sm:$0xff] %vm1425_vm3, %v2114_v4  ;;  %v2121_v28 = vadd.f32 %v2073_v27, %v4855_v36  ;;  %v2632_v4 = vadd.f32 %v2584_v0, %v2500_v21 }
 0x591   : > { %2680 = vst.msk [vmem:[%s5958_s17 + $0xc0] sm:$0xff] %vm1425_vm3, %v2632_v4 }
 0x596   : > { %v2074_v29 = vld [vmem:[%s5954_s9 + $0x110] sm:$0xff] }
 0x597   : > { %2163 = vst.msk [vmem:[%s5955_s16 + $0xd8] sm:$0xff] %vm1425_vm3, %v2115_v15  ;;  %v2122_v3 = vadd.f32 %v2074_v29, %v4863_v62  ;;  %v2442_v15 = vpop.f32.mrf.mxu0 }
 0x59e   : > { %v2075_v31 = vld [vmem:[%s5954_s9 + $0x118] sm:$0xff] }
 0x59f   : > { %2164 = vst.msk [vmem:[%s5955_s16 + $0xe0] sm:$0xff] %vm1425_vm3, %v2116_v53  ;;  %v2123_v30 = vadd.f32 %v2075_v31, %v4871_v2  ;;  %v2609_v53 = vadd.f32 %v2561_v10, %v2442_v15  ;;  %v2532_v31 = vpop.f32.mrf.mxu3 }
 0x5a1   : > { %2657 = vst.msk [vmem:[%s5958_s17 + $0x8] sm:$0xff] %vm1425_vm3, %v2609_v53 }
 0x5a6   : > { %v2076_v33 = vld [vmem:[%s5954_s9 + $0x120] sm:$0xff] }
 0x5a7   : > { %2165 = vst.msk [vmem:[%s5955_s16 + $0xe8] sm:$0xff] %vm1425_vm3, %v2117_v49  ;;  %v2124_v41 = vadd.f32 %v2076_v33, %v4873_v6 }
 0x5a8   : > { %v2585_v49 = vld [vmem:[%s5957_s2 + $0xc8] sm:$0xff]  ;;  %v2574_v29 = vld [vmem:[%s5957_s2 + $0x70] sm:$0xff] }
 0x5a9   : > { %v2597_v27 = vld [vmem:[%s5957_s2 + $0x128] sm:$0xff] }
 0x5aa   : > { %v2645_v33 = vadd.f32 %v2597_v27, %v2532_v31 }
 0x5ae   : > { %v2077_v35 = vld [vmem:[%s5954_s9 + $0x128] sm:$0xff] }
 0x5af   : > { %2166 = vst.msk [vmem:[%s5955_s16 + $0xf0] sm:$0xff] %vm1425_vm3, %v2118_v51  ;;  %v2125_v34 = vadd.f32 %v2077_v35, %v4887_v22  ;;  %v2562_v51 = vld [vmem:[%s5957_s2 + $0x10] sm:$0xff]  ;;  %v2475_v35 = vpop.f32.mrf.mxu1 }
 0x5b0   : > { %2693 = vst.msk [vmem:[%s5958_s17 + $0x128] sm:$0xff] %vm1425_vm3, %v2645_v33 }
 0x5b6   : > { %v2078_v36 = vld [vmem:[%s5954_s9 + $0x130] sm:$0xff] }
 0x5b7   : > { %2167 = vst.msk [vmem:[%s5955_s16 + $0xf8] sm:$0xff] %vm1425_vm3, %v2119_v26  ;;  %v2126_v47 = vadd.f32 %v2078_v36, %v4895_v12  ;;  %v3393_v12 = vld [vmem:[%s5952_s15 + $0x18] sm:$0xff]  ;;  %v2502_v26 = vpop.f32.mrf.mxu2  ;;  %v2622_v36 = vadd.f32 %v2574_v29, %v2475_v35 }
 0x5b8   : > { %3315 = vmatmul.msk.bf16.gmra.mxu0 %vm2358_vm7, %v3393_v12  ;;  %v2477_v12 = vpop.f32.mrf.mxu1 }
 0x5b9   : > { %2670 = vst.msk [vmem:[%s5958_s17 + $0x70] sm:$0xff] %vm1425_vm3, %v2622_v36 }
 0x5be   : > { %v2079_v62 = vld [vmem:[%s5954_s9 + $0x138] sm:$0xff] }
 0x5bf   : > { %2168 = vst.msk [vmem:[%s5955_s16 + $0x100] sm:$0xff] %vm1425_vm3, %v2120_v1  ;;  %v2127_v37 = vadd.f32 %v2079_v62, %v4903_v19  ;;  %v3405_v19 = vld [vmem:[%s5952_s15 + $0x78] sm:$0xff]  ;;  %v2633_v1 = vadd.f32 %v2585_v49, %v2502_v26 }
 0x5c0   : > { %3327 = vmatmul.msk.bf16.gmra.mxu2 %vm2358_vm7, %v3405_v19 }
 0x5c1   : > { %2681 = vst.msk [vmem:[%s5958_s17 + $0xc8] sm:$0xff] %vm1425_vm3, %v2633_v1 }
 0x5c6   : > { %v2080_v2 = vld [vmem:[%s5954_s9 + $0x140] sm:$0xff] }
 0x5c7   : > { %2169 = vst.msk [vmem:[%s5955_s16 + $0x108] sm:$0xff] %vm1425_vm3, %v2121_v28  ;;  %v2128_v38 = vadd.f32 %v2080_v2, %v4911_v9  ;;  %v2445_v28 = vpop.f32.mrf.mxu0 }
 0x5ce   : > { %v2081_v6 = vld [vmem:[%s5954_s9 + $0x148] sm:$0xff] }
 0x5cf   : > { %2170 = vst.msk [vmem:[%s5955_s16 + $0x110] sm:$0xff] %vm1425_vm3, %v2122_v3  ;;  %v2129_v60 = vadd.f32 %v2081_v6, %v4919_v59  ;;  %v2610_v3 = vadd.f32 %v2562_v51, %v2445_v28  ;;  %v2535_v6 = vpop.f32.mrf.mxu3 }
 0x5d1   : > { %2658 = vst.msk [vmem:[%s5958_s17 + $0x10] sm:$0xff] %vm1425_vm3, %v2610_v3 }
 0x5d6   : > { %v2082_v22 = vld [vmem:[%s5954_s9 + $0x150] sm:$0xff] }
 0x5d7   : > { %2171 = vst.msk [vmem:[%s5955_s16 + $0x118] sm:$0xff] %vm1425_vm3, %v2123_v30  ;;  %v2130_v42 = vadd.f32 %v2082_v22, %v4927_v24 }
 0x5d8   : > { %v2586_v30 = vld [vmem:[%s5957_s2 + $0xd0] sm:$0xff]  ;;  %v2575_v2 = vld [vmem:[%s5957_s2 + $0x78] sm:$0xff] }
 0x5d9   : > { %v2598_v62 = vld [vmem:[%s5957_s2 + $0x130] sm:$0xff] }
 0x5da   : > { %v2646_v22 = vadd.f32 %v2598_v62, %v2535_v6 }
 0x5de   : > { %v2083_v56 = vld [vmem:[%s5954_s9 + $0x158] sm:$0xff] }
 0x5df   : > { %2172 = vst.msk [vmem:[%s5955_s16 + $0x120] sm:$0xff] %vm1425_vm3, %v2124_v41  ;;  %v2131_v63 = vadd.f32 %v2083_v56, %v4941_v32  ;;  %v2563_v41 = vld [vmem:[%s5957_s2 + $0x18] sm:$0xff]  ;;  %v2623_v56 = vadd.f32 %v2575_v2, %v2477_v12 }
 0x5e0   : > { %2694 = vst.msk [vmem:[%s5958_s17 + $0x130] sm:$0xff] %vm1425_vm3, %v2646_v22 }
 0x5e1   : > { %2671 = vst.msk [vmem:[%s5958_s17 + $0x78] sm:$0xff] %vm1425_vm3, %v2623_v56 }
 0x5e6   : > { %v2084_v57 = vld [vmem:[%s5954_s9 + $0x160] sm:$0xff] }
 0x5e7   : > { %2173 = vst.msk [vmem:[%s5955_s16 + $0x128] sm:$0xff] %vm1425_vm3, %v2125_v34  ;;  %v2132_v8 = vadd.f32 %v2084_v57, %v4955_v44  ;;  %v2505_v34 = vpop.f32.mrf.mxu2 }
 0x5ee   : > { %v2085_v9 = vld [vmem:[%s5954_s9 + $0x168] sm:$0xff] }
 0x5ef   : > { %2174 = vst.msk [vmem:[%s5955_s16 + $0x130] sm:$0xff] %vm1425_vm3, %v2126_v47  ;;  %v2133_v32 = vadd.f32 %v2085_v9, %v4963_v14  ;;  %v3394_v14 = vld [vmem:[%s5952_s15 + $0x20] sm:$0xff]  ;;  %v2634_v47 = vadd.f32 %v2586_v30, %v2505_v34  ;;  %v2537_v9 = vpop.f32.mrf.mxu3 }
 0x5f0   : > { %3316 = vmatmul.msk.bf16.gmra.mxu0 %vm2358_vm7, %v3394_v14 }
 0x5f1   : > { %2682 = vst.msk [vmem:[%s5958_s17 + $0xd0] sm:$0xff] %vm1425_vm3, %v2634_v47 }
 0x5f6   : > { %v2086_v59 = vld [vmem:[%s5954_s9 + $0x170] sm:$0xff] }
 0x5f7   : > { %2175 = vst.msk [vmem:[%s5955_s16 + $0x138] sm:$0xff] %vm1425_vm3, %v2127_v37  ;;  %v2134_v45 = vadd.f32 %v2086_v59, %v4971_v43  ;;  %v3400_v43 = vld [vmem:[%s5952_s15 + $0x50] sm:$0xff]  ;;  %v2447_v37 = vpop.f32.mrf.mxu0  ;;  %v2540_v16 = vpop.f32.mrf.mxu3 }
 0x5f8   : > { %3322 = vmatmul.msk.bf16.gmra.mxu1 %vm2358_vm7, %v3400_v43  ;;  %v2611_v7 = vadd.f32 %v2563_v41, %v2447_v37 }
 0x5fa   : > { %2659 = vst.msk [vmem:[%s5958_s17 + $0x18] sm:$0xff] %vm1425_vm3, %v2611_v7 }
 0x5fe   : > { %v2087_v24 = vld [vmem:[%s5954_s9 + $0x178] sm:$0xff] }
 0x5ff   : > { %2176 = vst.msk [vmem:[%s5955_s16 + $0x140] sm:$0xff] %vm1425_vm3, %v2128_v38  ;;  %v2135_v44 = vadd.f32 %v2087_v24, %v4981_v39  ;;  %v3406_v39 = vld [vmem:[%s5952_s15 + $0x80] sm:$0xff]  ;;  %v2480_v24 = vpop.f32.mrf.mxu1  ;;  %v2542_v11 = vpop.f32.mrf.mxu3 }
 0x600   : > { %2177 = vst.msk [vmem:[%s5955_s16 + $0x148] sm:$0xff] %vm1425_vm3, %v2129_v60  ;;  %3328 = vmatmul.msk.bf16.gmra.mxu2 %vm2358_vm7, %v3406_v39  ;;  %3317 = vmatmul.msk.bf16.gmra.mxu0 %vm2358_vm7, %v3395_v52  ;;  %v2507_v60 = vpop.f32.mrf.mxu2 }
 0x601   : > { %2178 = vst.msk [vmem:[%s5955_s16 + $0x150] sm:$0xff] %vm1425_vm3, %v2130_v42  ;;  %v2587_v38 = vld [vmem:[%s5957_s2 + $0xd8] sm:$0xff]  ;;  %v2564_v58 = vld [vmem:[%s5957_s2 + $0x20] sm:$0xff] }
 0x602   : > { %2179 = vst.msk [vmem:[%s5955_s16 + $0x158] sm:$0xff] %vm1425_vm3, %v2131_v63  ;;  %v2599_v19 = vld [vmem:[%s5957_s2 + $0x138] sm:$0xff]  ;;  %v2576_v57 = vld [vmem:[%s5957_s2 + $0x80] sm:$0xff]  ;;  %v2635_v42 = vadd.f32 %v2587_v38, %v2507_v60  ;;  %v2450_v63 = vpop.f32.mrf.mxu0 }
 0x603   : > { %2180 = vst.msk [vmem:[%s5955_s16 + $0x160] sm:$0xff] %vm1425_vm3, %v2132_v8  ;;  %v2647_v59 = vadd.f32 %v2599_v19, %v2537_v9  ;;  %v2612_v8 = vadd.f32 %v2564_v58, %v2450_v63 }
 0x604   : > { %2181 = vst.msk [vmem:[%s5955_s16 + $0x168] sm:$0xff] %vm1425_vm3, %v2133_v32  ;;  %v2624_v32 = vadd.f32 %v2576_v57, %v2480_v24 }
 0x605   : > { %2182 = vst.msk [vmem:[%s5955_s16 + $0x170] sm:$0xff] %vm1425_vm3, %v2134_v45 }
 0x606   : > { %2183 = vst.msk [vmem:[%s5955_s16 + $0x178] sm:$0xff] %vm1425_vm3, %v2135_v44 }
 0x607   : > { %2683 = vst.msk [vmem:[%s5958_s17 + $0xd8] sm:$0xff] %vm1425_vm3, %v2635_v42  ;;  %v2482_v20 = vpop.f32.mrf.mxu1  ;;  %v2545_v27 = vpop.f32.mrf.mxu3 }
 0x608   : > { %3323 = vmatmul.msk.bf16.gmra.mxu1 %vm2358_vm7, %v3401_v17  ;;  %2695 = vst.msk [vmem:[%s5958_s17 + $0x138] sm:$0xff] %vm1425_vm3, %v2647_v59  ;;  %v2510_v39 = vpop.f32.mrf.mxu2 }
 0x609   : > { %2660 = vst.msk [vmem:[%s5958_s17 + $0x20] sm:$0xff] %vm1425_vm3, %v2612_v8 }
 0x60a   : > { %2672 = vst.msk [vmem:[%s5958_s17 + $0x80] sm:$0xff] %vm1425_vm3, %v2624_v32 }
 0x60f   : > { %v2485_v55 = vpop.f32.mrf.mxu1  ;;  %v2547_v62 = vpop.f32.mrf.mxu3 }
 0x610   : > { %3329 = vmatmul.msk.bf16.gmra.mxu2 %vm2358_vm7, %v3407_v5  ;;  %v2452_v5 = vpop.f32.mrf.mxu0  ;;  %v2512_v0 = vpop.f32.mrf.mxu2 }
 0x611   : > { %v2588_v45 = vld [vmem:[%s5957_s2 + $0xe0] sm:$0xff]  ;;  %v2565_v14 = vld [vmem:[%s5957_s2 + $0x28] sm:$0xff] }
 0x612   : > { %v2600_v44 = vld [vmem:[%s5957_s2 + $0x140] sm:$0xff]  ;;  %v2577_v43 = vld [vmem:[%s5957_s2 + $0x88] sm:$0xff]  ;;  %v2636_v52 = vadd.f32 %v2588_v45, %v2510_v39  ;;  %v2613_v54 = vadd.f32 %v2565_v14, %v2452_v5 }
 0x613   : > { %v2648_v17 = vadd.f32 %v2600_v44, %v2540_v16  ;;  %v2625_v13 = vadd.f32 %v2577_v43, %v2482_v20 }
 0x614   : > { %2684 = vst.msk [vmem:[%s5958_s17 + $0xe0] sm:$0xff] %vm1425_vm3, %v2636_v52 }
 0x615   : > { %2696 = vst.msk [vmem:[%s5958_s17 + $0x140] sm:$0xff] %vm1425_vm3, %v2648_v17 }
 0x616   : > { %2661 = vst.msk [vmem:[%s5958_s17 + $0x28] sm:$0xff] %vm1425_vm3, %v2613_v54 }
 0x617   : > { %2673 = vst.msk [vmem:[%s5958_s17 + $0x88] sm:$0xff] %vm1425_vm3, %v2625_v13  ;;  %v2487_v31 = vpop.f32.mrf.mxu1  ;;  %v2550_v19 = vpop.f32.mrf.mxu3 }
 0x61e   : > { %v2589_v48 = vld [vmem:[%s5957_s2 + $0xe8] sm:$0xff]  ;;  %v2566_v50 = vld [vmem:[%s5957_s2 + $0x30] sm:$0xff] }
 0x61f   : > { %v2601_v23 = vld [vmem:[%s5957_s2 + $0x148] sm:$0xff]  ;;  %v2578_v40 = vld [vmem:[%s5957_s2 + $0x90] sm:$0xff]  ;;  %v2637_v10 = vadd.f32 %v2589_v48, %v2512_v0  ;;  %v2552_v44 = vpop.f32.mrf.mxu3 }
 0x620   : > { %v2649_v18 = vadd.f32 %v2601_v23, %v2542_v11  ;;  %v2626_v61 = vadd.f32 %v2578_v40, %v2485_v55 }
 0x621   : > { %2685 = vst.msk [vmem:[%s5958_s17 + $0xe8] sm:$0xff] %vm1425_vm3, %v2637_v10 }
 0x622   : > { %2697 = vst.msk [vmem:[%s5958_s17 + $0x148] sm:$0xff] %vm1425_vm3, %v2649_v18 }
 0x623   : > { %2674 = vst.msk [vmem:[%s5958_s17 + $0x90] sm:$0xff] %vm1425_vm3, %v2626_v61 }
 0x627   : > { %v2555_v23 = vpop.f32.mrf.mxu3 }
 0x62f   : > { %v2557_v61 = vpop.f32.mrf.mxu3 }
 0x635   : > { %v2455_v21 = vpop.f32.mrf.mxu0 }
 0x636   : > { %v2614_v4 = vadd.f32 %v2566_v50, %v2455_v21 }
 0x638   : > { %2662 = vst.msk [vmem:[%s5958_s17 + $0x30] sm:$0xff] %vm1425_vm3, %v2614_v4 }
 0x63d   : > { %v2457_v26 = vpop.f32.mrf.mxu0 }
 0x63f   : > { %v2590_v15 = vld [vmem:[%s5957_s2 + $0xf0] sm:$0xff]  ;;  %v2567_v53 = vld [vmem:[%s5957_s2 + $0x38] sm:$0xff] }
 0x640   : > { %v2602_v46 = vld [vmem:[%s5957_s2 + $0x150] sm:$0xff]  ;;  %v2579_v25 = vld [vmem:[%s5957_s2 + $0x98] sm:$0xff]  ;;  %v2615_v1 = vadd.f32 %v2567_v53, %v2457_v26 }
 0x641   : > { %v2650_v29 = vadd.f32 %v2602_v46, %v2545_v27  ;;  %v2627_v33 = vadd.f32 %v2579_v25, %v2487_v31 }
 0x642   : > { %2663 = vst.msk [vmem:[%s5958_s17 + $0x38] sm:$0xff] %vm1425_vm3, %v2615_v1 }
 0x643   : > { %v2515_v49 = vpop.f32.mrf.mxu2  ;;  %2698 = vst.msk [vmem:[%s5958_s17 + $0x150] sm:$0xff] %vm1425_vm3, %v2650_v29 }
 0x644   : > { %v2638_v51 = vadd.f32 %v2590_v15, %v2515_v49  ;;  %2675 = vst.msk [vmem:[%s5958_s17 + $0x98] sm:$0xff] %vm1425_vm3, %v2627_v33 }
 0x646   : > { %2686 = vst.msk [vmem:[%s5958_s17 + $0xf0] sm:$0xff] %vm1425_vm3, %v2638_v51 }
 0x64b   : > { %v2517_v30 = vpop.f32.mrf.mxu2 }
 0x64d   : > { %v2591_v28 = vld [vmem:[%s5957_s2 + $0xf8] sm:$0xff]  ;;  %v2568_v3 = vld [vmem:[%s5957_s2 + $0x40] sm:$0xff] }
 0x64e   : > { %v2603_v35 = vld [vmem:[%s5957_s2 + $0x158] sm:$0xff]  ;;  %v2580_v36 = vld [vmem:[%s5957_s2 + $0xa0] sm:$0xff]  ;;  %v2639_v41 = vadd.f32 %v2591_v28, %v2517_v30 }
 0x64f   : > { %v2651_v2 = vadd.f32 %v2603_v35, %v2547_v62 }
 0x650   : > { %2687 = vst.msk [vmem:[%s5958_s17 + $0xf8] sm:$0xff] %vm1425_vm3, %v2639_v41 }
 0x651   : > { %2699 = vst.msk [vmem:[%s5958_s17 + $0x158] sm:$0xff] %vm1425_vm3, %v2651_v2 }
 0x66d   : > { %v2460_v34 = vpop.f32.mrf.mxu0 }
 0x66e   : > { %v2616_v47 = vadd.f32 %v2568_v3, %v2460_v34 }
 0x670   : > { %2664 = vst.msk [vmem:[%s5958_s17 + $0x40] sm:$0xff] %vm1425_vm3, %v2616_v47 }
 0x675   : > { %v2490_v6 = vpop.f32.mrf.mxu1  ;;  %v2462_v60 = vpop.f32.mrf.mxu0 }
 0x676   : > { %v2628_v22 = vadd.f32 %v2580_v36, %v2490_v6 }
 0x678   : > { %2676 = vst.msk [vmem:[%s5958_s17 + $0xa0] sm:$0xff] %vm1425_vm3, %v2628_v22 }
 0x67d   : > { %v2492_v9 = vpop.f32.mrf.mxu1  ;;  %v2465_v39 = vpop.f32.mrf.mxu0 }
 0x67f   : > { %v2592_v37 = vld [vmem:[%s5957_s2 + $0x100] sm:$0xff]  ;;  %v2569_v7 = vld [vmem:[%s5957_s2 + $0x48] sm:$0xff] }
 0x680   : > { %v2604_v12 = vld [vmem:[%s5957_s2 + $0x160] sm:$0xff]  ;;  %v2581_v56 = vld [vmem:[%s5957_s2 + $0xa8] sm:$0xff]  ;;  %v2617_v42 = vadd.f32 %v2569_v7, %v2462_v60 }
 0x681   : > { %v2652_v57 = vadd.f32 %v2604_v12, %v2550_v19  ;;  %v2629_v59 = vadd.f32 %v2581_v56, %v2492_v9 }
 0x682   : > { %2665 = vst.msk [vmem:[%s5958_s17 + $0x48] sm:$0xff] %vm1425_vm3, %v2617_v42 }
 0x683   : > { %v2520_v38 = vpop.f32.mrf.mxu2  ;;  %2700 = vst.msk [vmem:[%s5958_s17 + $0x160] sm:$0xff] %vm1425_vm3, %v2652_v57 }
 0x684   : > { %v2640_v58 = vadd.f32 %v2592_v37, %v2520_v38  ;;  %2677 = vst.msk [vmem:[%s5958_s17 + $0xa8] sm:$0xff] %vm1425_vm3, %v2629_v59 }
 0x685   : > { %v2495_v16 = vpop.f32.mrf.mxu1  ;;  %v2467_v0 = vpop.f32.mrf.mxu0 }
 0x686   : > { %2688 = vst.msk [vmem:[%s5958_s17 + $0x100] sm:$0xff] %vm1425_vm3, %v2640_v58 }
 0x68b   : > { %v2522_v45 = vpop.f32.mrf.mxu2 }
 0x68d   : > { %v2593_v63 = vld [vmem:[%s5957_s2 + $0x108] sm:$0xff]  ;;  %v2570_v8 = vld [vmem:[%s5957_s2 + $0x50] sm:$0xff]  ;;  %v2497_v11 = vpop.f32.mrf.mxu1 }
 0x68e   : > { %v2605_v24 = vld [vmem:[%s5957_s2 + $0x168] sm:$0xff]  ;;  %v2582_v32 = vld [vmem:[%s5957_s2 + $0xb0] sm:$0xff]  ;;  %v2641_v14 = vadd.f32 %v2593_v63, %v2522_v45  ;;  %v2618_v52 = vadd.f32 %v2570_v8, %v2465_v39 }
 0x68f   : > { %v2653_v43 = vadd.f32 %v2605_v24, %v2552_v44  ;;  %v2630_v17 = vadd.f32 %v2582_v32, %v2495_v16 }
 0x690   : > { %2689 = vst.msk [vmem:[%s5958_s17 + $0x108] sm:$0xff] %vm1425_vm3, %v2641_v14 }
 0x691   : > { %2701 = vst.msk [vmem:[%s5958_s17 + $0x168] sm:$0xff] %vm1425_vm3, %v2653_v43 }
 0x692   : > { %2666 = vst.msk [vmem:[%s5958_s17 + $0x50] sm:$0xff] %vm1425_vm3, %v2618_v52 }
 0x693   : > { %2678 = vst.msk [vmem:[%s5958_s17 + $0xb0] sm:$0xff] %vm1425_vm3, %v2630_v17  ;;  %v2525_v48 = vpop.f32.mrf.mxu2 }
 0x69a   : > { %v2594_v5 = vld [vmem:[%s5957_s2 + $0x110] sm:$0xff]  ;;  %v2571_v54 = vld [vmem:[%s5957_s2 + $0x58] sm:$0xff] }
 0x69b   : > { %v2606_v20 = vld [vmem:[%s5957_s2 + $0x170] sm:$0xff]  ;;  %v2583_v13 = vld [vmem:[%s5957_s2 + $0xb8] sm:$0xff]  ;;  %v2642_v50 = vadd.f32 %v2594_v5, %v2525_v48  ;;  %v2619_v10 = vadd.f32 %v2571_v54, %v2467_v0  ;;  %v2527_v4 = vpop.f32.mrf.mxu2 }
 0x69c   : > { %v2654_v40 = vadd.f32 %v2606_v20, %v2555_v23  ;;  %v2631_v18 = vadd.f32 %v2583_v13, %v2497_v11 }
 0x69d   : > { %2690 = vst.msk [vmem:[%s5958_s17 + $0x110] sm:$0xff] %vm1425_vm3, %v2642_v50 }
 0x69e   : > { %2702 = vst.msk [vmem:[%s5958_s17 + $0x170] sm:$0xff] %vm1425_vm3, %v2654_v40 }
 0x69f   : > { %2667 = vst.msk [vmem:[%s5958_s17 + $0x58] sm:$0xff] %vm1425_vm3, %v2619_v10 }
 0x6a0   : > { %2679 = vst.msk [vmem:[%s5958_s17 + $0xb8] sm:$0xff] %vm1425_vm3, %v2631_v18 }
 0x6a7   : > { %v2595_v21 = vld [vmem:[%s5957_s2 + $0x118] sm:$0xff] }
 0x6a8   : > { %v2607_v55 = vld [vmem:[%s5957_s2 + $0x178] sm:$0xff]  ;;  %v2643_v15 = vadd.f32 %v2595_v21, %v2527_v4 }
 0x6a9   : > { %v2655_v46 = vadd.f32 %v2607_v55, %v2557_v61 }
 0x6aa   : > { %2691 = vst.msk [vmem:[%s5958_s17 + $0x118] sm:$0xff] %vm1425_vm3, %v2643_v15 }
 0x6ab   : > { %2703 = vst.msk [vmem:[%s5958_s17 + $0x178] sm:$0xff] %vm1425_vm3, %v2655_v46 }
 0x6ac PF: > { %s27_s0 = sadd.s32 1, %s3635_s0   ;;  %s5959_s27 = sld [smem:[#allocation11_spill]] }
 0x6ad   : > { %p24_p13 = scmp.ge.s32.totalorder %s27_s0, 8   ;;  %s5960_s28 = sld [smem:[#allocation12_spill]] }
 0x6ae   : > { %s5961_s19 = sld [smem:[#allocation9_spill]]  ;;  %s5963_s21 = smov %s3599_s22 }
 0x6af   : > { %s5962_s18 = sld [smem:[#allocation10_spill]]  ;;  %s5964_s22 = smov %s3825_s12 }
 0x6b0   : > { %s5965_s23 = smov %s3607_s24  ;;  %s5967_s25 = smov %s3615_s26 }
 0x6b1   :  { %26 = sbr.rel (!%p24_p13) target bundleno = 20 (0x14), region = 322 }
 0x6b2   : > { %s5966_s24 = smov %s5959_s27  ;;  %s5969_s27 = smov %s3627_s29 }
 0x6b3   : > { %s5968_s26 = smov %s5960_s28  ;;  %s5970_s28 = smov %s3631_s30 }
 0x6b4   : > { %s5971_s29 = smov %s5961_s19 }
 0x6b5   : > { %s5972_s30 = smov %s5962_s18 }

// kernel: lightgcl_forward.4
= control target key start
LH: loop header
LB: loop body
LE: loop exit
PB: predicated region body
PF: predicated region fallthrough
CT: control target
= control target key end

     0   :  { %s5923_s0 = inlined_call_operand.vmem [shape: bf16[256,384], index: 0, kind: input, shape index: {}]   ;;  %s5924_s1 = inlined_call_operand.vmem [shape: bf16[256,64], index: 1, kind: input, shape index: {}]   ;;  %s5925_s2 = inlined_call_operand.vmem [shape: bf16[384,64], index: 2, kind: input, shape index: {}]   ;;  %s5926_s3 = inlined_call_operand.vmem [shape: bf16[256,32], index: 3, kind: input, shape index: {}]   ;;  %s5927_s4 = inlined_call_operand.vmem [shape: bf16[384,32], index: 4, kind: input, shape index: {}]   ;;  %s5928_s5 = inlined_call_operand.vmem [shape: bf16[32,256], index: 5, kind: input, shape index: {}]   ;;  %s5929_s6 = inlined_call_operand.vmem [shape: bf16[32,384], index: 6, kind: input, shape index: {}]   ;;  %s5930_s7 = inlined_call_operand.vmem [shape: f32[256,64], index: 7, kind: input, shape index: {}, may-alias: {7,12}]   ;;  %s5931_s8 = inlined_call_operand.vmem [shape: f32[256,64], index: 8, kind: input, shape index: {}, may-alias: {8,13}]   ;;  %s5932_s9 = inlined_call_operand.vmem [shape: f32[384,64], index: 9, kind: input, shape index: {}, may-alias: {9,15}]   ;;  %s5933_s10 = inlined_call_operand.vmem [shape: f32[384,64], index: 10, kind: input, shape index: {}, may-alias: {10,16}]   ;;  %s5934_s11 = inlined_call_operand.hbm [shape: bf16[256,64], index: 11, kind: output, shape index: {0}]   ;;  %s5935_s12 = inlined_call_operand.vmem [shape: f32[256,64], index: 12, kind: output, shape index: {1}, may-alias: {7,12}]   ;;  %s5936_s13 = inlined_call_operand.vmem [shape: f32[256,64], index: 13, kind: output, shape index: {2}, may-alias: {8,13}]   ;;  %s5937_s14 = inlined_call_operand.hbm [shape: bf16[384,64], index: 14, kind: output, shape index: {3}]   ;;  %s5938_s15 = inlined_call_operand.vmem [shape: f32[384,64], index: 15, kind: output, shape index: {4}, may-alias: {9,15}]   ;;  %s5939_s16 = inlined_call_operand.vmem [shape: f32[384,64], index: 16, kind: output, shape index: {5}, may-alias: {10,16}]  }
   0x1   :  { %5950 = sst [smem:[#allocation40_spill]] %s5923_s0 }
   0x2   :  { %5951 = sst [smem:[#allocation41_spill]] %s5924_s1 }
   0x3   :  { %5952 = sst [smem:[#allocation42_spill]] %s5925_s2 }
   0x4   :  { %5953 = sst [smem:[#allocation43_spill]] %s5926_s3 }
   0x5   :  { %5954 = sst [smem:[#allocation44_spill]] %s5927_s4 }
   0x6   :  { %5955 = sst [smem:[#allocation45_spill]] %s5928_s5 }
   0x7   :  { %5956 = sst [smem:[#allocation46_spill]] %s5929_s6 }
   0x8   :  { %5957 = sst [smem:[#allocation47_spill]] %s5930_s7 }
   0x9   :  { %5958 = sst [smem:[#allocation48_spill]] %s5931_s8 }
   0xa   :  { %5959 = sst [smem:[#allocation49_spill]] %s5932_s9 }
   0xb   :  { %5960 = sst [smem:[#allocation50_spill]] %s5933_s10 }
   0xc   :  { %5961 = sst [smem:[#allocation51_spill]] %s5934_s11 }
   0xd   :  { %5962 = sst [smem:[#allocation52_spill]] %s5935_s12 }
   0xe   :  { %5963 = sst [smem:[#allocation53_spill]] %s5936_s13 }
   0xf   :  { %5964 = sst [smem:[#allocation54_spill]] %s5937_s14 }
  0x10   :  { %5965 = sst [smem:[#allocation55_spill]] %s5938_s15 }
  0x11   :  { %5966 = sst [smem:[#allocation56_spill]] %s5939_s16 }
  0x12   :  { %22 = vsyncpa [#allocation10], 0 }
  0x13   :  { %24 = vsyncpa [#allocation10 + $0x1], 0 }
  0x14   :  { %25 = vsyncpa [#allocation12], 0  ;;  %s3868_s21 = smov 0   ;;  %s3870_s22 = smov 0  }
  0x15   :  { %s3872_s23 = smov 0   ;;  %s3874_s24 = smov 0  }
  0x16   :  { %s3876_s25 = smov 0   ;;  %s3878_s26 = smov 0  }
  0x17   :  { %s3880_s27 = smov 0   ;;  %s3882_s28 = smov 0  }
  0x18   :  { %s3884_s29 = smov 0   ;;  %s3886_s30 = smov 0  }
  0x19   :  { %s3888_s0 = smov 0   ;;  %s3890_s17 = smov 0  }
  0x1a LB: > { %s3004_s18 = sadd.s32 4294967295, %s3776_s17   ;;  %s40_s20 = sadd.s32 1, %s3768_s30  ;;  %s3776_s17 = sphi %s3890_s17, %s31_s17   ;;  %s3772_s0 = sphi %s3888_s0, %s6055_s0   ;;  %s3768_s30 = sphi %s3886_s30, %s6054_s30   ;;  %s3764_s29 = sphi %s3884_s29, %s6053_s29   ;;  %s3760_s28 = sphi %s3882_s28, %s6052_s28   ;;  %s3756_s27 = sphi %s3880_s27, %s6051_s27   ;;  %s3752_s26 = sphi %s3878_s26, %s6050_s26   ;;  %s3748_s25 = sphi %s3876_s25, %s6049_s25   ;;  %s3744_s24 = sphi %s3874_s24, %s6048_s24   ;;  %s3740_s23 = sphi %s3872_s23, %s6047_s23   ;;  %s3736_s22 = sphi %s3870_s22, %s6046_s22   ;;  %s3732_s21 = sphi %s3868_s21, %s6045_s21  }
  0x1b   : > { %s43_s14 = sadd.s32 1, %s3772_s0  ;;  %p41_p0 = scmp.ge.s32.totalorder %s40_s20, 3 }
  0x1c   : > { %s52_s11 = sadd.s32 1, %s3756_s27  ;;  %p59_p1 = scmp.ne.s32.totalorder %s3756_s27, %s3752_s26 }
  0x1d   : > { %p60_p2 = scmp.eq.s32.totalorder %s3776_s17, 0  ;;  %s6057_s20 = smov (%p41_p0, %s40_s20), 0 }
  0x1e   : > { %5967 = sst [smem:[#allocation15_spill]] %s6057_s20  ;;  %s6059_s14 = smov (!%p41_p0, %s43_s14), %s3772_s0 }
  0x1f   : > { %s48_s19 = ssub.s32 %s3768_s30, %s6057_s20  ;;  %p3943_p3 = por %p60_p2, %p59_p1 }
  0x20   : > { %p45_p4 = scmp.ge.s32.totalorder %s6059_s14, 2  ;;  %s177_s10 = sadd.s32 1, %s3748_s25 }
  0x21   : > { %p184_p5 = scmp.ne.s32.totalorder %s3748_s25, %s3744_s24  ;;  %p201_p6 = scmp.eq.s32.totalorder %s48_s19, 0 }
  0x22   : > { %s6061_s14 = smov (%p45_p4, %s6059_s14), 0  ;;  %s203_s15 = sadd.s32 1, %s3740_s23 }
  0x23   : > { %5969 = sst [smem:[#allocation16_spill]] %s6061_s14  ;;  %p3957_p7 = por %p184_p5, %p60_p2 }
  0x24   : > { %s47_s9 = ssub.s32 %s3772_s0, %s6061_s14  ;;  %p210_p8 = scmp.ne.s32.totalorder %s3740_s23, %s3736_s22 }
  0x25   : > { %s49_s4 = sor.u32 %s48_s19, %s47_s9  ;;  %p175_p9 = scmp.eq.s32.totalorder %s47_s9, 0 }
  0x26   : > { %p50_p10 = scmp.eq.s32.totalorder %s49_s4, 0  ;;  %p3968_p11 = por %p210_p8, %p60_p2 }
  0x27   : > { %s3973_s13 = scalar_select %p175_p9, %s3748_s25, %s177_s10  }
  0x28   : > { %s3976_s12 = scalar_select %p50_p10, %s3756_s27, %s52_s11  }
  0x29   : > { %5972 = sst [smem:[#allocation17_spill]] %s3973_s13  ;;  %p3981_p12 = scmp.eq.s32.totalorder %s3004_s18, 5 }
  0x2a   : > { %5973 = sst [smem:[#allocation18_spill]] %s3976_s12  ;;  %p339_p13 = scmp.ne.s32.totalorder %s3744_s24, %s3732_s21 }
  0x2b   : > { %s3979_s8 = scalar_select %p201_p6, %s3740_s23, %s203_s15  }
  0x2c   : > { %s5976_s19 = sadd.s32 4294967294, %s3776_s17   ;;  %p3994_p1 = por %p3981_p12, %p184_p5 }
  0x2d   : > { %5974 = sst [smem:[#allocation19_spill]] %s3979_s8  ;;  %p340_p0 = scmp.eq.s32.totalorder %s5976_s19, 5 }
  0x2e   : > { %p3007_p4 = scmp.ge.s32.totalorder %s3776_s17, 6 }
  0x2f   : > { %p3998_p2 = por %p340_p0, %p339_p13 }
  0x30   : > { %480 = sbr.rel (%p3007_p4) target bundleno = 107 (0x6b), region = 28 }
  0x35   : > { %483 = sbr.rel (!%p3943_p3) target bundleno = 79 (0x4f), region = 32  ;;  %s485_s10 = sand.u32 (%p3943_p3), 1, %s3756_s27  }
  0x36   : > { %s3503_s11 = smul.u32 (%p3943_p3), 48, %s3772_s0  ;;  %s3008_s15 = sshll.u32 (%p3943_p3), %s485_s10, 6 }
  0x37   : > { %s5979_s13 = sld [smem:[#allocation40_spill]] (%p3943_p3)  ;;  %s487_s16 = scalar_lea.vmem (%p3943_p3), [#allocation6], %s3008_s15 }
  0x38   : > { %s490_s18 = sadd.s32 (%p3943_p3), %s3768_s30, %s3503_s11 }
  0x39   : > { %s3011_s19 = sshll.u32 (%p3943_p3), %s490_s18, 2 }
  0x3d   : > { %s4011_s8 = scalar_lea.vmem %s5979_s13, %s3011_s19 }
  0x3e   : > { %v509_v0 = vld [vmem:[%s4011_s8] sm:$0xf]  ;;  %v511_v1 = vld [vmem:[%s4011_s8 + $0xc] sm:$0xf]  ;;  %v513_v2 = vld [vmem:[%s4011_s8 + $0x18] sm:$0xf] }
  0x3f   : > { %510 = vst [vmem:[%s487_s16] sm:$0xf] %v509_v0  ;;  %v515_v3 = vld [vmem:[%s4011_s8 + $0x24] sm:$0xf]  ;;  %v517_v4 = vld [vmem:[%s4011_s8 + $0x30] sm:$0xf] }
  0x40   : > { %512 = vst [vmem:[%s487_s16 + $0x4] sm:$0xf] %v511_v1  ;;  %v519_v5 = vld [vmem:[%s4011_s8 + $0x3c] sm:$0xf]  ;;  %v521_v6 = vld [vmem:[%s4011_s8 + $0x48] sm:$0xf] }
  0x41   : > { %514 = vst [vmem:[%s487_s16 + $0x8] sm:$0xf] %v513_v2  ;;  %v523_v7 = vld [vmem:[%s4011_s8 + $0x54] sm:$0xf]  ;;  %v525_v8 = vld [vmem:[%s4011_s8 + $0x60] sm:$0xf] }
  0x42   : > { %516 = vst [vmem:[%s487_s16 + $0xc] sm:$0xf] %v515_v3  ;;  %v527_v9 = vld [vmem:[%s4011_s8 + $0x6c] sm:$0xf]  ;;  %v529_v10 = vld [vmem:[%s4011_s8 + $0x78] sm:$0xf] }
  0x43   : > { %518 = vst [vmem:[%s487_s16 + $0x10] sm:$0xf] %v517_v4  ;;  %v531_v11 = vld [vmem:[%s4011_s8 + $0x84] sm:$0xf]  ;;  %v533_v12 = vld [vmem:[%s4011_s8 + $0x90] sm:$0xf] }
  0x44   : > { %520 = vst [vmem:[%s487_s16 + $0x14] sm:$0xf] %v519_v5  ;;  %v535_v13 = vld [vmem:[%s4011_s8 + $0x9c] sm:$0xf]  ;;  %v537_v14 = vld [vmem:[%s4011_s8 + $0xa8] sm:$0xf] }
  0x45   : > { %522 = vst [vmem:[%s487_s16 + $0x18] sm:$0xf] %v521_v6  ;;  %v539_v15 = vld [vmem:[%s4011_s8 + $0xb4] sm:$0xf] }
  0x46   : > { %524 = vst [vmem:[%s487_s16 + $0x1c] sm:$0xf] %v523_v7 }
  0x47   : > { %526 = vst [vmem:[%s487_s16 + $0x20] sm:$0xf] %v525_v8 }
  0x48   : > { %528 = vst [vmem:[%s487_s16 + $0x24] sm:$0xf] %v527_v9 }
  0x49   : > { %530 = vst [vmem:[%s487_s16 + $0x28] sm:$0xf] %v529_v10 }
  0x4a   : > { %532 = vst [vmem:[%s487_s16 + $0x2c] sm:$0xf] %v531_v11 }
  0x4b   : > { %534 = vst [vmem:[%s487_s16 + $0x30] sm:$0xf] %v533_v12 }
  0x4c   : > { %536 = vst [vmem:[%s487_s16 + $0x34] sm:$0xf] %v535_v13 }
  0x4d   : > { %538 = vst [vmem:[%s487_s16 + $0x38] sm:$0xf] %v537_v14 }
  0x4e   : > { %540 = vst [vmem:[%s487_s16 + $0x3c] sm:$0xf] %v539_v15 }
  0x4f PF: > { %623 = sbr.rel (!%p3957_p7) target bundleno = 93 (0x5d), region = 85  ;;  %s625_s12 = sand.u32 (%p3957_p7), 1, %s3748_s25  }
  0x50   : > { %s3013_s13 = sshll.u32 (%p3957_p7), %s3772_s0, 2  ;;  %s3012_s14 = sshll.u32 (%p3957_p7), %s625_s12, 4 }
  0x51   : > { %s5980_s5 = sld [smem:[#allocation45_spill]] (%p3957_p7)  ;;  %s627_s18 = scalar_lea.vmem (%p3957_p7), [#allocation7], %s3012_s14 }
  0x57   : > { %s629_s15 = scalar_lea.vmem %s5980_s5, %s3013_s13 }
  0x58   : > { %v646_v16 = vld [vmem:[%s629_s15] sm:$0xf]  ;;  %v648_v17 = vld [vmem:[%s629_s15 + $0x8] sm:$0xf]  ;;  %v650_v18 = vld [vmem:[%s629_s15 + $0x10] sm:$0xf] }
  0x59   : > { %647 = vst [vmem:[%s627_s18] sm:$0xf] %v646_v16  ;;  %v652_v19 = vld [vmem:[%s629_s15 + $0x18] sm:$0xf] }
  0x5a   : > { %649 = vst [vmem:[%s627_s18 + $0x4] sm:$0xf] %v648_v17 }
  0x5b   : > { %651 = vst [vmem:[%s627_s18 + $0x8] sm:$0xf] %v650_v18 }
  0x5c   : > { %653 = vst [vmem:[%s627_s18 + $0xc] sm:$0xf] %v652_v19 }
  0x5d PF: > { %685 = sbr.rel (!%p3968_p11) target bundleno = 107 (0x6b), region = 126  ;;  %s687_s8 = sand.u32 (%p3968_p11), 1, %s3740_s23  }
  0x5e   : > { %s3015_s20 = sshll.u32 (%p3968_p11), %s3768_s30, 2  ;;  %s3014_s19 = sshll.u32 (%p3968_p11), %s687_s8, 4 }
  0x5f   : > { %s5981_s6 = sld [smem:[#allocation46_spill]] (%p3968_p11)  ;;  %s689_s14 = scalar_lea.vmem (%p3968_p11), [#allocation8], %s3014_s19 }
  0x65   : > { %s691_s13 = scalar_lea.vmem %s5981_s6, %s3015_s20 }
  0x66   : > { %v708_v20 = vld [vmem:[%s691_s13] sm:$0xf]  ;;  %v710_v21 = vld [vmem:[%s691_s13 + $0xc] sm:$0xf]  ;;  %v712_v22 = vld [vmem:[%s691_s13 + $0x18] sm:$0xf] }
  0x67   : > { %709 = vst [vmem:[%s689_s14] sm:$0xf] %v708_v20  ;;  %v714_v23 = vld [vmem:[%s691_s13 + $0x24] sm:$0xf] }
  0x68   : > { %711 = vst [vmem:[%s689_s14 + $0x4] sm:$0xf] %v710_v21 }
  0x69   : > { %713 = vst [vmem:[%s689_s14 + $0x8] sm:$0xf] %v712_v22 }
  0x6a   : > { %715 = vst [vmem:[%s689_s14 + $0xc] sm:$0xf] %v714_v23 }
  0x6b PF: > { %p3016_p3 = scmp.ge.s32.totalorder %s3776_s17, 1  ;;  %p764_p5 = scmp.lt.s32.totalorder %s3776_s17, 7 }
  0x6d   : > { %p765_p6 = pnand %p3016_p3, %p764_p5 }
  0x6f   : > { %768 = sbr.rel (%p765_p6) target bundleno = 1767 (0x6e7), region = 175 }
  0x74   : > { %s771_s2 = sand.u32 1, %s3752_s26   ;;  %s4047_s10 = sand.u32 1, %s3744_s24  }
  0x75   : > { %s3017_s11 = sshll.u32 %s771_s2, 6  ;;  %s785_s18 = sand.u32 1, %s3736_s22  }
  0x76   : > { %s773_s20 = scalar_lea.vmem [#allocation6], %s3017_s11  ;;  %s4056_s19 = sshll.u32 %s785_s18, 4 }
  0x77   : > { %v4052_v24 = vld [vmem:[%s773_s20] sm:$0xf]  ;;  %v4054_v25 = vld [vmem:[%s773_s20] sm:$0xf0]  ;;  %v4058_v26 = vld [vmem:[%s773_s20 + $0x8] sm:$0xf] }
  0x78   : > { %v4060_v27 = vld [vmem:[%s773_s20 + $0x8] sm:$0xf0]  ;;  %s3021_s26 = sshll.u32 %s3764_s29, 4  ;;  %v4063_v28 = vld [vmem:[%s773_s20 + $0x10] sm:$0xf]  ;;  %s3023_s22 = sshll.u32 %s3760_s28, 4 }
  0x79   : > { %v4065_v29 = vld [vmem:[%s773_s20 + $0x10] sm:$0xf0]  ;;  %p879_p7 = scmp.lt.s32.totalorder %s3021_s26, 31  ;;  %v4068_v30 = vld [vmem:[%s773_s20 + $0x18] sm:$0xf]  ;;  %p885_p8 = scmp.lt.s32.totalorder %s3023_s22, 47 }
  0x7a   : > { %v4070_v31 = vld [vmem:[%s773_s20 + $0x18] sm:$0xf0]  ;;  %v4072_v32 = vld [vmem:[%s773_s20 + $0x20] sm:$0xf]  ;;  %v4074_v33 = vld [vmem:[%s773_s20 + $0x20] sm:$0xf0] }
  0x7b   : > { %p970_p9 = scmp.eq.s32.totalorder %s3764_s29, 0  ;;  %s6063_s26 = smov (!%p879_p7, %s3021_s26), 31  ;;  %v4077_v34 = vld [vmem:[%s773_s20 + $0x28] sm:$0xf]  ;;  %v4079_v35 = vld [vmem:[%s773_s20 + $0x28] sm:$0xf0] }
  0x7c   : > { %s6065_s22 = smov (!%p885_p8, %s3023_s22), 47  ;;  %v4083_v36 = vld [vmem:[%s773_s20 + $0x30] sm:$0xf]  ;;  %v4085_v37 = vld [vmem:[%s773_s20 + $0x30] sm:$0xf0]  ;;  %s3022_s16 = sshll.u32 %s6063_s26, 2 }
  0x7d   : > { %s3028_s12 = sshll.u32 %s6063_s26, 3  ;;  %v4087_v38 = vld [vmem:[%s773_s20 + $0x38] sm:$0xf]  ;;  %v4089_v39 = vld [vmem:[%s773_s20 + $0x38] sm:$0xf0]  ;;  %s5984_s1 = sld [smem:[#allocation41_spill]] }
  0x7e   : > { %5982 = vst [vmem:[#allocation20_spill] sm:$0xff] %v4087_v38  ;;  %s3024_s11 = sshll.u32 %s6065_s22, 2  ;;  %s5985_s3 = sld [smem:[#allocation43_spill]] }
  0x7f   : > { %5983 = vst [vmem:[#allocation21_spill] sm:$0xff] %v4089_v39  ;;  %s5988_s8 = sld [smem:[#allocation47_spill]]  ;;  %p971_p10 = scmp.eq.s32.totalorder %s3760_s28, 0 }
  0x80   : > { %s5989_s26 = sld [smem:[#allocation48_spill]]  ;;  %s6010_s15 = sshll.u32 %s4047_s10, 6 }
  0x81   : > { %s5990_s14 = sld [smem:[#allocation52_spill]]  ;;  %p972_p11 = pnand %p971_p10, %p970_p9 }
  0x82   : > { %s5991_s18 = sld [smem:[#allocation53_spill]] }
  0x83   : > { %s4094_s2 = scalar_lea.vmem %s5984_s1, %s3022_s16 }
  0x84   : > { %s4100_s20 = scalar_lea.vmem %s5985_s3, %s3022_s16  ;;  %v4103_v40 = vld [vmem:[%s4094_s2] sm:$0xf]  ;;  %v4109_v42 = vld [vmem:[%s4094_s2] sm:$0xf0]  ;;  %v4125_v44 = vld [vmem:[%s4094_s2 + $0x8] sm:$0xf] }
  0x85   : > { %5986 = vst [vmem:[#allocation22_spill] sm:$0xff] %v4103_v40  ;;  %v4106_v41 = vld [vmem:[%s4094_s2] sm:$0xf]  ;;  %s4114_s22 = scalar_lea.vmem %s5988_s8, %s3028_s12  ;;  %v4122_v43 = vld [vmem:[%s4094_s2] sm:$0xf0] }
  0x86   : > { %5987 = vst [vmem:[#allocation23_spill] sm:$0xff] %v4109_v42  ;;  %s4119_s16 = scalar_lea.vmem %s5989_s26, %s3028_s12  ;;  %v4128_v45 = vld [vmem:[%s4094_s2 + $0x8] sm:$0xf]  ;;  %v4141_v46 = vld [vmem:[%s4094_s2 + $0x8] sm:$0xf0] }
  0x87   : > { %s4133_s8 = scalar_lea.vmem %s5990_s14, %s3028_s12  ;;  %5992 = vst [vmem:[#allocation24_spill] sm:$0xff] %v4141_v46  ;;  %v4144_v47 = vld [vmem:[%s4094_s2 + $0x8] sm:$0xf0]  ;;  %v4147_v48 = vld [vmem:[%s4094_s2 + $0x10] sm:$0xf]  ;;  %s787_s14 = scalar_lea.vmem [#allocation8], %s4056_s19 }
  0x88   : > { %s4138_s26 = scalar_lea.vmem %s5991_s18, %s3028_s12  ;;  %v4150_v49 = vld [vmem:[%s4094_s2 + $0x10] sm:$0xf]  ;;  %v4153_v50 = vld [vmem:[%s4094_s2 + $0x10] sm:$0xf0]  ;;  %v4159_v52 = vld [vmem:[%s4094_s2 + $0x18] sm:$0xf] }
  0x89   : > { %v4156_v51 = vld [vmem:[%s4094_s2 + $0x10] sm:$0xf0]  ;;  %v4162_v53 = vld [vmem:[%s4094_s2 + $0x18] sm:$0xf]  ;;  %v4165_v54 = vld [vmem:[%s4094_s2 + $0x18] sm:$0xf0] }
  0x8a   : > { %v4168_v55 = vld [vmem:[%s4094_s2 + $0x18] sm:$0xf0]  ;;  %v4171_v56 = vld [vmem:[%s4094_s2 + $0x20] sm:$0xf]  ;;  %v4177_v58 = vld [vmem:[%s4094_s2 + $0x20] sm:$0xf0] }
  0x8b   : > { %v4174_v57 = vld [vmem:[%s4094_s2 + $0x20] sm:$0xf]  ;;  %v4180_v59 = vld [vmem:[%s4094_s2 + $0x20] sm:$0xf0]  ;;  %v4183_v60 = vld [vmem:[%s4094_s2 + $0x28] sm:$0xf] }
  0x8c   : > { %s5993_s12 = sld [smem:[#allocation42_spill]]  ;;  %v4191_v61 = vld [vmem:[%s4094_s2 + $0x28] sm:$0xf]  ;;  %v4194_v62 = vld [vmem:[%s4094_s2 + $0x28] sm:$0xf0]  ;;  %s4329_s18 = scalar_lea.vmem [#allocation9], %s6010_s15 }
  0x8d   : > { %v4197_v63 = vld [vmem:[%s4094_s2 + $0x28] sm:$0xf0]  ;;  %v4200_v0 = vld [vmem:[%s4094_s2 + $0x30] sm:$0xf]  ;;  %v4206_v2 = vld [vmem:[%s4094_s2 + $0x30] sm:$0xf0] }
  0x8e   : > { %v4203_v1 = vld [vmem:[%s4094_s2 + $0x30] sm:$0xf]  ;;  %v4209_v3 = vld [vmem:[%s4094_s2 + $0x30] sm:$0xf0]  ;;  %v4212_v4 = vld [vmem:[%s4094_s2 + $0x38] sm:$0xf] }
  0x8f   : > { %v4215_v5 = vld [vmem:[%s4094_s2 + $0x38] sm:$0xf]  ;;  %v4218_v6 = vld [vmem:[%s4094_s2 + $0x38] sm:$0xf0] }
  0x90   : > { %v4221_v7 = vld [vmem:[%s4094_s2 + $0x38] sm:$0xf0]  ;;  %s6009_s2 = sshll.u32 %s4047_s10, 4 }
  0x92   : > { %s4188_s13 = scalar_lea.vmem %s5993_s12, %s3024_s11  ;;  %s4324_s11 = scalar_lea.vmem [#allocation7], %s6009_s2 }
  0x93   : > { %v4224_v8 = vld [vmem:[%s4188_s13] sm:$0xf]  ;;  %v4230_v10 = vld [vmem:[%s4188_s13] sm:$0xf0]  ;;  %v4236_v12 = vld [vmem:[%s4188_s13 + $0x8] sm:$0xf] }
  0x94   : > { %5994 = vst [vmem:[#allocation25_spill] sm:$0xff] %v4224_v8  ;;  %v4227_v9 = vld [vmem:[%s4188_s13] sm:$0xf]  ;;  %v4233_v11 = vld [vmem:[%s4188_s13] sm:$0xf0] }
  0x95   : > { %5995 = vst [vmem:[#allocation26_spill] sm:$0xff] %v4230_v10  ;;  %v4239_v13 = vld [vmem:[%s4188_s13 + $0x8] sm:$0xf]  ;;  %v4242_v14 = vld [vmem:[%s4188_s13 + $0x8] sm:$0xf0] }
  0x96   : > { %5996 = vst [vmem:[#allocation27_spill] sm:$0xff] %v4236_v12  ;;  %v4245_v15 = vld [vmem:[%s4188_s13 + $0x8] sm:$0xf0]  ;;  %v4248_v16 = vld [vmem:[%s4188_s13 + $0x10] sm:$0xf] }
  0x97   : > { %5997 = vst [vmem:[#allocation28_spill] sm:$0xff] %v4242_v14  ;;  %v4251_v17 = vld [vmem:[%s4188_s13 + $0x10] sm:$0xf]  ;;  %v4254_v18 = vld [vmem:[%s4188_s13 + $0x10] sm:$0xf0] }
  0x98   : > { %5998 = vst [vmem:[#allocation29_spill] sm:$0xff] %v4248_v16  ;;  %v4257_v19 = vld [vmem:[%s4188_s13 + $0x10] sm:$0xf0]  ;;  %v4260_v20 = vld [vmem:[%s4188_s13 + $0x18] sm:$0xf] }
  0x99   : > { %5999 = vst [vmem:[#allocation30_spill] sm:$0xff] %v4254_v18  ;;  %v4263_v21 = vld [vmem:[%s4188_s13 + $0x18] sm:$0xf]  ;;  %v4266_v22 = vld [vmem:[%s4188_s13 + $0x18] sm:$0xf0] }
  0x9a   : > { %6000 = vst [vmem:[#allocation31_spill] sm:$0xff] %v4260_v20  ;;  %v4269_v23 = vld [vmem:[%s4188_s13 + $0x18] sm:$0xf0]  ;;  %v4272_v10 = vld [vmem:[%s4188_s13 + $0x20] sm:$0xf] }
  0x9b   : > { %6001 = vst [vmem:[#allocation32_spill] sm:$0xff] %v4266_v22  ;;  %v4275_v8 = vld [vmem:[%s4188_s13 + $0x20] sm:$0xf]  ;;  %v4278_v14 = vld [vmem:[%s4188_s13 + $0x20] sm:$0xf0] }
  0x9c   : > { %6002 = vst [vmem:[#allocation33_spill] sm:$0xff] %v4272_v10  ;;  %v4281_v12 = vld [vmem:[%s4188_s13 + $0x20] sm:$0xf0]  ;;  %v4284_v18 = vld [vmem:[%s4188_s13 + $0x28] sm:$0xf] }
  0x9d   : > { %6003 = vst [vmem:[#allocation34_spill] sm:$0xff] %v4278_v14  ;;  %v4287_v16 = vld [vmem:[%s4188_s13 + $0x28] sm:$0xf]  ;;  %v4290_v22 = vld [vmem:[%s4188_s13 + $0x28] sm:$0xf0] }
  0x9e   : > { %6004 = vst [vmem:[#allocation35_spill] sm:$0xff] %v4284_v18  ;;  %v4293_v20 = vld [vmem:[%s4188_s13 + $0x28] sm:$0xf0]  ;;  %v4296_v10 = vld [vmem:[%s4188_s13 + $0x30] sm:$0xf]  ;;  %975 = sbr.rel (%p972_p11) target bundleno = 220 (0xdc), region = 191 }
  0x9f   : > { %6005 = vst [vmem:[#allocation36_spill] sm:$0xff] %v4290_v22  ;;  %v4299_v39 = vld [vmem:[%s4188_s13 + $0x30] sm:$0xf]  ;;  %v4302_v38 = vld [vmem:[%s4188_s13 + $0x30] sm:$0xf0] }
  0xa0   : > { %6006 = vst [vmem:[#allocation37_spill] sm:$0xff] %v4296_v10  ;;  %v4305_v14 = vld [vmem:[%s4188_s13 + $0x30] sm:$0xf0]  ;;  %v4308_v42 = vld [vmem:[%s4188_s13 + $0x38] sm:$0xf] }
  0xa1   : > { %6007 = vst [vmem:[#allocation38_spill] sm:$0xff] %v4302_v38  ;;  %v4311_v40 = vld [vmem:[%s4188_s13 + $0x38] sm:$0xf]  ;;  %v4314_v18 = vld [vmem:[%s4188_s13 + $0x38] sm:$0xf0] }
  0xa2   : > { %6008 = vst [vmem:[#allocation39_spill] sm:$0xff] %v4314_v18  ;;  %v4317_v46 = vld [vmem:[%s4188_s13 + $0x38] sm:$0xf0] }
  0xa3   : > { %vm976_vm0 = vcmask 523264   ;;  %v3778_v22 = vmov 0.0  }
  0xa4   : > { %977 = vst.msk [vmem:[#allocation3] sm:$0xff] %vm976_vm0, %v3778_v22 }
  0xa5   : > { %978 = vst.msk [vmem:[#allocation3 + $0x8] sm:$0xff] %vm976_vm0, %v3778_v22 }
  0xa6   : > { %979 = vst.msk [vmem:[#allocation3 + $0x10] sm:$0xff] %vm976_vm0, %v3778_v22 }
  0xa7   : > { %980 = vst.msk [vmem:[#allocation3 + $0x18] sm:$0xff] %vm976_vm0, %v3778_v22 }
  0xa8   : > { %981 = vst.msk [vmem:[#allocation3 + $0x20] sm:$0xff] %vm976_vm0, %v3778_v22 }
  0xa9   : > { %982 = vst.msk [vmem:[#allocation3 + $0x28] sm:$0xff] %vm976_vm0, %v3778_v22 }
  0xaa   : > { %983 = vst.msk [vmem:[#allocation3 + $0x30] sm:$0xff] %vm976_vm0, %v3778_v22 }
  0xab   : > { %984 = vst.msk [vmem:[#allocation3 + $0x38] sm:$0xff] %vm976_vm0, %v3778_v22 }
  0xac   : > { %985 = vst.msk [vmem:[#allocation3 + $0x40] sm:$0xff] %vm976_vm0, %v3778_v22 }
  0xad   : > { %986 = vst.msk [vmem:[#allocation3 + $0x48] sm:$0xff] %vm976_vm0, %v3778_v22 }
  0xae   : > { %987 = vst.msk [vmem:[#allocation3 + $0x50] sm:$0xff] %vm976_vm0, %v3778_v22 }
  0xaf   : > { %988 = vst.msk [vmem:[#allocation3 + $0x58] sm:$0xff] %vm976_vm0, %v3778_v22 }
  0xb0   : > { %989 = vst.msk [vmem:[#allocation3 + $0x60] sm:$0xff] %vm976_vm0, %v3778_v22 }
  0xb1   : > { %990 = vst.msk [vmem:[#allocation3 + $0x68] sm:$0xff] %vm976_vm0, %v3778_v22 }
  0xb2   : > { %991 = vst.msk [vmem:[#allocation3 + $0x70] sm:$0xff] %vm976_vm0, %v3778_v22 }
  0xb3   : > { %992 = vst.msk [vmem:[#allocation3 + $0x78] sm:$0xff] %vm976_vm0, %v3778_v22 }
  0xb4   : > { %993 = vst.msk [vmem:[#allocation3 + $0x80] sm:$0xff] %vm976_vm0, %v3778_v22 }
  0xb5   : > { %994 = vst.msk [vmem:[#allocation3 + $0x88] sm:$0xff] %vm976_vm0, %v3778_v22 }
  0xb6   : > { %995 = vst.msk [vmem:[#allocation3 + $0x90] sm:$0xff] %vm976_vm0, %v3778_v22 }
  0xb7   : > { %996 = vst.msk [vmem:[#allocation3 + $0x98] sm:$0xff] %vm976_vm0, %v3778_v22 }
  0xb8   : > { %997 = vst.msk [vmem:[#allocation3 + $0xa0] sm:$0xff] %vm976_vm0, %v3778_v22 }
  0xb9   : > { %998 = vst.msk [vmem:[#allocation3 + $0xa8] sm:$0xff] %vm976_vm0, %v3778_v22 }
  0xba   : > { %999 = vst.msk [vmem:[#allocation3 + $0xb0] sm:$0xff] %vm976_vm0, %v3778_v22 }
  0xbb   : > { %1000 = vst.msk [vmem:[#allocation3 + $0xb8] sm:$0xff] %vm976_vm0, %v3778_v22 }
  0xbc   : > { %1001 = vst.msk [vmem:[#allocation3 + $0xc0] sm:$0xff] %vm976_vm0, %v3778_v22 }
  0xbd   : > { %1002 = vst.msk [vmem:[#allocation3 + $0xc8] sm:$0xff] %vm976_vm0, %v3778_v22 }
  0xbe   : > { %1003 = vst.msk [vmem:[#allocation3 + $0xd0] sm:$0xff] %vm976_vm0, %v3778_v22 }
  0xbf   : > { %1004 = vst.msk [vmem:[#allocation3 + $0xd8] sm:$0xff] %vm976_vm0, %v3778_v22 }
  0xc0   : > { %1005 = vst.msk [vmem:[#allocation3 + $0xe0] sm:$0xff] %vm976_vm0, %v3778_v22 }
  0xc1   : > { %1006 = vst.msk [vmem:[#allocation3 + $0xe8] sm:$0xff] %vm976_vm0, %v3778_v22 }
  0xc2   : > { %1007 = vst.msk [vmem:[#allocation3 + $0xf0] sm:$0xff] %vm976_vm0, %v3778_v22 }
  0xc3   : > { %1008 = vst.msk [vmem:[#allocation3 + $0xf8] sm:$0xff] %vm976_vm0, %v3778_v22 }
  0xc4   : > { %1009 = vst.msk [vmem:[#allocation3 + $0x100] sm:$0xff] %vm976_vm0, %v3778_v22 }
  0xc5   : > { %1010 = vst.msk [vmem:[#allocation3 + $0x108] sm:$0xff] %vm976_vm0, %v3778_v22 }
  0xc6   : > { %1011 = vst.msk [vmem:[#allocation3 + $0x110] sm:$0xff] %vm976_vm0, %v3778_v22 }
  0xc7   : > { %1012 = vst.msk [vmem:[#allocation3 + $0x118] sm:$0xff] %vm976_vm0, %v3778_v22 }
  0xc8   : > { %1013 = vst.msk [vmem:[#allocation3 + $0x120] sm:$0xff] %vm976_vm0, %v3778_v22 }
  0xc9   : > { %1014 = vst.msk [vmem:[#allocation3 + $0x128] sm:$0xff] %vm976_vm0, %v3778_v22 }
  0xca   : > { %1015 = vst.msk [vmem:[#allocation3 + $0x130] sm:$0xff] %vm976_vm0, %v3778_v22 }
  0xcb   : > { %1016 = vst.msk [vmem:[#allocation3 + $0x138] sm:$0xff] %vm976_vm0, %v3778_v22 }
  0xcc   : > { %1017 = vst.msk [vmem:[#allocation3 + $0x140] sm:$0xff] %vm976_vm0, %v3778_v22 }
  0xcd   : > { %1018 = vst.msk [vmem:[#allocation3 + $0x148] sm:$0xff] %vm976_vm0, %v3778_v22 }
  0xce   : > { %1019 = vst.msk [vmem:[#allocation3 + $0x150] sm:$0xff] %vm976_vm0, %v3778_v22 }
  0xcf   : > { %1020 = vst.msk [vmem:[#allocation3 + $0x158] sm:$0xff] %vm976_vm0, %v3778_v22 }
  0xd0   : > { %1021 = vst.msk [vmem:[#allocation3 + $0x160] sm:$0xff] %vm976_vm0, %v3778_v22 }
  0xd1   : > { %1022 = vst.msk [vmem:[#allocation3 + $0x168] sm:$0xff] %vm976_vm0, %v3778_v22 }
  0xd2   : > { %1023 = vst.msk [vmem:[#allocation3 + $0x170] sm:$0xff] %vm976_vm0, %v3778_v22 }
  0xd3   : > { %1024 = vst.msk [vmem:[#allocation3 + $0x178] sm:$0xff] %vm976_vm0, %v3778_v22 }
  0xd4   : > { %1025 = vst.msk [vmem:[#allocation4] sm:$0xff] %vm976_vm0, %v3778_v22 }
  0xd5   : > { %1026 = vst.msk [vmem:[#allocation4 + $0x8] sm:$0xff] %vm976_vm0, %v3778_v22 }
  0xd6   : > { %1027 = vst.msk [vmem:[#allocation4 + $0x10] sm:$0xff] %vm976_vm0, %v3778_v22 }
  0xd7   : > { %1028 = vst.msk [vmem:[#allocation4 + $0x18] sm:$0xff] %vm976_vm0, %v3778_v22 }
  0xd8   : > { %1029 = vst.msk [vmem:[#allocation5] sm:$0xff] %vm976_vm0, %v3778_v22 }
  0xd9   : > { %1030 = vst.msk [vmem:[#allocation5 + $0x8] sm:$0xff] %vm976_vm0, %v3778_v22 }
  0xda   : > { %1031 = vst.msk [vmem:[#allocation5 + $0x10] sm:$0xff] %vm976_vm0, %v3778_v22 }
  0xdb   : > { %1032 = vst.msk [vmem:[#allocation5 + $0x18] sm:$0xff] %vm976_vm0, %v3778_v22 }
  0xdc PF: > { %p3035_p13 = scmp.ne.s32.totalorder %s3760_s28, 0 }
  0xde   : > { %1035 = sbr.rel (%p3035_p13) target bundleno = 398 (0x18e), region = 195 }
  0xe3   : > { %v3075_v38 = vor.u32 %v4221_v7, %v4215_v5  ;;  %v3071_v10 = vor.u32 %v4209_v3, %v4203_v1  ;;  %vm1036_vm1 = vcmask 523264   ;;  %v3779_v18 = vmov 0.0   ;;  %v1053_v1 = vld [vmem:[#allocation5] sm:$0xff] }
  0xe4   : > { %1037 = vst.msk [vmem:[#allocation2] sm:$0xff] %vm1036_vm1, %v3779_v18  ;;  %v3067_v22 = vor.u32 %v4197_v63, %v4191_v61  ;;  %v3059_v61 = vor.u32 %v4168_v55, %v4162_v53  ;;  %v3051_v53 = vor.u32 %v4144_v47, %v4128_v45  ;;  %v3047_v55 = vor.u32 %v4122_v43, %v4106_v41  ;;  %v3423_v63 = vld [vmem:[%s4324_s11 + $0x8] sm:$0xff] }
  0xe5   : > { %1121 = vmatpush.bf16.msra.mxu0 %v3075_v38  ;;  %3459 = vmatpush.bf16.msra.mxu1 %v3075_v38  ;;  %1038 = vst.msk [vmem:[#allocation2 + $0x8] sm:$0xff] %vm1036_vm1, %v3779_v18  ;;  %v3063_v38 = vor.u32 %v4180_v59, %v4174_v57  ;;  %v3055_v57 = vor.u32 %v4156_v51, %v4150_v49  ;;  %v3422_v59 = vld [vmem:[%s4324_s11] sm:$0xff]  ;;  %v1054_v45 = vld [vmem:[#allocation5 + $0x8] sm:$0xff]  ;;  %v1056_v47 = vld [vmem:[#allocation5 + $0x18] sm:$0xff] }
  0xe6   : > { %1039 = vst.msk [vmem:[#allocation2 + $0x10] sm:$0xff] %vm1036_vm1, %v3779_v18  ;;  %v1055_v49 = vld [vmem:[#allocation5 + $0x10] sm:$0xff] }
  0xe7   : > { %1040 = vst.msk [vmem:[#allocation2 + $0x18] sm:$0xff] %vm1036_vm1, %v3779_v18 }
  0xe8   : > { %1041 = vst.msk [vmem:[#allocation2 + $0x20] sm:$0xff] %vm1036_vm1, %v3779_v18 }
  0xe9   : > { %1122 = vmatpush.bf16.msra.mxu0 %v3071_v10  ;;  %3460 = vmatpush.bf16.msra.mxu1 %v3071_v10  ;;  %1042 = vst.msk [vmem:[#allocation2 + $0x28] sm:$0xff] %vm1036_vm1, %v3779_v18 }
  0xea   : > { %1043 = vst.msk [vmem:[#allocation2 + $0x30] sm:$0xff] %vm1036_vm1, %v3779_v18 }
  0xeb   : > { %1044 = vst.msk [vmem:[#allocation2 + $0x38] sm:$0xff] %vm1036_vm1, %v3779_v18 }
  0xec   : > { %1045 = vst.msk [vmem:[#allocation2 + $0x40] sm:$0xff] %vm1036_vm1, %v3779_v18 }
  0xed   : > { %1123 = vmatpush.bf16.msra.mxu0 %v3067_v22  ;;  %3461 = vmatpush.bf16.msra.mxu1 %v3067_v22  ;;  %1046 = vst.msk [vmem:[#allocation2 + $0x48] sm:$0xff] %vm1036_vm1, %v3779_v18 }
  0xee   : > { %1047 = vst.msk [vmem:[#allocation2 + $0x50] sm:$0xff] %vm1036_vm1, %v3779_v18 }
  0xef   : > { %1048 = vst.msk [vmem:[#allocation2 + $0x58] sm:$0xff] %vm1036_vm1, %v3779_v18 }
  0xf0   : > { %1049 = vst.msk [vmem:[#allocation2 + $0x60] sm:$0xff] %vm1036_vm1, %v3779_v18 }
  0xf1   : > { %1124 = vmatpush.bf16.msra.mxu0 %v3063_v38  ;;  %3462 = vmatpush.bf16.msra.mxu1 %v3063_v38  ;;  %1050 = vst.msk [vmem:[#allocation2 + $0x68] sm:$0xff] %vm1036_vm1, %v3779_v18 }
  0xf2   : > { %1051 = vst.msk [vmem:[#allocation2 + $0x70] sm:$0xff] %vm1036_vm1, %v3779_v18 }
  0xf3   : > { %1052 = vst.msk [vmem:[#allocation2 + $0x78] sm:$0xff] %vm1036_vm1, %v3779_v18 }
  0xf5   : > { %1125 = vmatpush.bf16.msra.mxu0 %v3059_v61  ;;  %3463 = vmatpush.bf16.msra.mxu1 %v3059_v61 }
  0xf9   : > { %1126 = vmatpush.bf16.msra.mxu0 %v3055_v57  ;;  %3464 = vmatpush.bf16.msra.mxu1 %v3055_v57 }
  0xfd   : > { %1127 = vmatpush.bf16.msra.mxu0 %v3051_v53  ;;  %3465 = vmatpush.bf16.msra.mxu1 %v3051_v53 }
 0x101   : > { %1128 = vmatpush.bf16.msra.mxu0 %v3047_v55  ;;  %3466 = vmatpush.bf16.msra.mxu1 %v3047_v55 }
 0x104   : > { %1129 = vmatmul.bf16.vlgmr.msra.gmra.mxu0 %v3422_v59  ;;  %1134 = vmatmul.bf16.vlgmr.msra.gmra.mxu1 %v3423_v63 }
 0x181   : > { %v1130_v51 = vpop.f32.mrf.mxu0  ;;  %v1135_v3 = vpop.f32.mrf.mxu1 }
 0x182   : > { %v1140_v5 = vadd.f32 %v1130_v51, %v1053_v1  ;;  %v1142_v7 = vadd.f32 %v1135_v3, %v1055_v49 }
 0x184   : > { %1144 = vst.msk [vmem:[#allocation5] sm:$0xff] %vm1036_vm1, %v1140_v5 }
 0x185   : > { %1146 = vst.msk [vmem:[#allocation5 + $0x10] sm:$0xff] %vm1036_vm1, %v1142_v7 }
 0x189   : > { %v1132_v10 = vpop.f32.mrf.mxu0  ;;  %v1137_v41 = vpop.f32.mrf.mxu1 }
 0x18a   : > { %v1141_v43 = vadd.f32 %v1132_v10, %v1054_v45  ;;  %v1143_v18 = vadd.f32 %v1137_v41, %v1056_v47 }
 0x18c   : > { %1145 = vst.msk [vmem:[#allocation5 + $0x8] sm:$0xff] %vm1036_vm1, %v1141_v43 }
 0x18d   : > { %1147 = vst.msk [vmem:[#allocation5 + $0x18] sm:$0xff] %vm1036_vm1, %v1143_v18 }
 0x18e PF: > { %p3076_p0 = scmp.ne.s32.totalorder %s3764_s29, 0 }
 0x190   : > { %1150 = sbr.rel (%p3076_p0) target bundleno = 576 (0x240), region = 199 }
 0x195   : > { %v3116_v22 = vor.u32 %v4317_v46, %v4311_v40  ;;  %v3112_v38 = vor.u32 %v4305_v14, %v4299_v39  ;;  %v3108_v61 = vor.u32 %v4293_v20, %v4287_v16  ;;  %v3104_v57 = vor.u32 %v4281_v12, %v4275_v8  ;;  %v3424_v12 = vld [vmem:[%s787_s14] sm:$0xff]  ;;  %v3425_v14 = vld [vmem:[%s787_s14 + $0x8] sm:$0xff] }
 0x196   : > { %v3100_v40 = vor.u32 %v4269_v23, %v4263_v21  ;;  %v3096_v39 = vor.u32 %v4257_v19, %v4251_v17  ;;  %v3092_v46 = vor.u32 %v4245_v15, %v4239_v13  ;;  %v3088_v8 = vor.u32 %v4233_v11, %v4227_v9  ;;  %v1151_v16 = vld [vmem:[#allocation4] sm:$0xff]  ;;  %v1153_v17 = vld [vmem:[#allocation4 + $0x10] sm:$0xff]  ;;  %v1152_v15 = vld [vmem:[#allocation4 + $0x8] sm:$0xff] }
 0x197   : > { %1219 = vmatpush.bf16.msra.mxu0 %v3116_v22  ;;  %3467 = vmatpush.bf16.msra.mxu1 %v3116_v22  ;;  %vm1242_vm2 = vcmask 523264   ;;  %v1154_v23 = vld [vmem:[#allocation4 + $0x18] sm:$0xff] }
 0x19b   : > { %1220 = vmatpush.bf16.msra.mxu0 %v3112_v38  ;;  %3468 = vmatpush.bf16.msra.mxu1 %v3112_v38 }
 0x19f   : > { %1221 = vmatpush.bf16.msra.mxu0 %v3108_v61  ;;  %3469 = vmatpush.bf16.msra.mxu1 %v3108_v61 }
 0x1a3   : > { %1222 = vmatpush.bf16.msra.mxu0 %v3104_v57  ;;  %3470 = vmatpush.bf16.msra.mxu1 %v3104_v57 }
 0x1a7   : > { %1223 = vmatpush.bf16.msra.mxu0 %v3100_v40  ;;  %3471 = vmatpush.bf16.msra.mxu1 %v3100_v40 }
 0x1ab   : > { %1224 = vmatpush.bf16.msra.mxu0 %v3096_v39  ;;  %3472 = vmatpush.bf16.msra.mxu1 %v3096_v39 }
 0x1af   : > { %1225 = vmatpush.bf16.msra.mxu0 %v3092_v46  ;;  %3473 = vmatpush.bf16.msra.mxu1 %v3092_v46 }
 0x1b3   : > { %1226 = vmatpush.bf16.msra.mxu0 %v3088_v8  ;;  %3474 = vmatpush.bf16.msra.mxu1 %v3088_v8 }
 0x1b6   : > { %1227 = vmatmul.bf16.vlgmr.msra.gmra.mxu0 %v3424_v12  ;;  %1232 = vmatmul.bf16.vlgmr.msra.gmra.mxu1 %v3425_v14 }
 0x233   : > { %v1228_v19 = vpop.f32.mrf.mxu0  ;;  %v1233_v20 = vpop.f32.mrf.mxu1 }
 0x234   : > { %v1238_v21 = vadd.f32 %v1228_v19, %v1151_v16  ;;  %v1240_v13 = vadd.f32 %v1233_v20, %v1153_v17 }
 0x236   : > { %1243 = vst.msk [vmem:[#allocation4] sm:$0xff] %vm1242_vm2, %v1238_v21 }
 0x237   : > { %1245 = vst.msk [vmem:[#allocation4 + $0x10] sm:$0xff] %vm1242_vm2, %v1240_v13 }
 0x23b   : > { %v1230_v9 = vpop.f32.mrf.mxu0  ;;  %v1235_v11 = vpop.f32.mrf.mxu1 }
 0x23c   : > { %v1239_v53 = vadd.f32 %v1230_v9, %v1152_v15  ;;  %v1241_v55 = vadd.f32 %v1235_v11, %v1154_v23 }
 0x23e   : > { %1244 = vst.msk [vmem:[#allocation4 + $0x8] sm:$0xff] %vm1242_vm2, %v1239_v53 }
 0x23f   : > { %1246 = vst.msk [vmem:[#allocation4 + $0x18] sm:$0xff] %vm1242_vm2, %v1241_v55 }
 0x240 PF: > { %v4449_v59 = vor.u32 %v4054_v25, %v4052_v24  ;;  %v4454_v63 = vor.u32 %v4060_v27, %v4058_v26  ;;  %v4459_v1 = vor.u32 %v4065_v29, %v4063_v28  ;;  %v4464_v49 = vor.u32 %v4070_v31, %v4068_v30  ;;  %v6022_v51 = vld [vmem:[#allocation34_spill] sm:$0xff]  ;;  %v6023_v5 = vld [vmem:[#allocation31_spill] sm:$0xff]  ;;  %v6025_v45 = vld [vmem:[#allocation29_spill] sm:$0xff]  ;;  %s3213_s19 = sshll.u32 %s3760_s28, 7  ;;  %p1604_p4 = scmp.eq.s32.totalorder %s3760_s28, 2 }
 0x241   : > { %v3136_v24 = vor.u32 %v4074_v33, %v4072_v32  ;;  %v3140_v25 = vor.u32 %v4079_v35, %v4077_v34  ;;  %v3212_v26 = vor.u32 %v4218_v6, %v4212_v4  ;;  %v3208_v27 = vor.u32 %v4206_v2, %v4200_v0  ;;  %v6011_v33 = vld [vmem:[#allocation24_spill] sm:$0xff]  ;;  %v6012_v35 = vld [vmem:[#allocation22_spill] sm:$0xff]  ;;  %v6019_v0 = vld [vmem:[#allocation35_spill] sm:$0xff]  ;;  %s4512_s1 = scalar_lea.vmem [#allocation3], %s3213_s19  ;;  %p3214_p3 = scmp.ne.s32.totalorder %s3760_s28, 2 }
 0x242   : > { %1441 = vxpose.xlu0.c.b16.start [1/8] %v4449_v59, 128  ;;  %v3204_v28 = vor.u32 %v4194_v62, %v4183_v60  ;;  %v3200_v29 = vor.u32 %v4177_v58, %v4171_v56  ;;  %v3144_v30 = vor.u32 %v4085_v37, %v4083_v36  ;;  %v3196_v31 = vor.u32 %v4165_v54, %v4159_v52  ;;  %v6013_v56 = vld [vmem:[#allocation23_spill] sm:$0xff]  ;;  %v6014_v37 = vld [vmem:[#allocation20_spill] sm:$0xff]  ;;  %v6015_v58 = vld [vmem:[#allocation21_spill] sm:$0xff] }
 0x243   : > { %1505 = vmatpush.bf16.msra.mxu1 %v3212_v26  ;;  %3483 = vmatpush.bf16.msra.mxu3 %v3212_v26  ;;  %v3192_v32 = vor.u32 %v4153_v50, %v4147_v48  ;;  %v3188_v34 = vor.u32 %v6011_v33, %v4125_v44  ;;  %v3184_v36 = vor.u32 %v6013_v56, %v6012_v35  ;;  %v6016_v54 = vld [vmem:[#allocation39_spill] sm:$0xff]  ;;  %v6017_v50 = vld [vmem:[#allocation37_spill] sm:$0xff]  ;;  %v6018_v60 = vld [vmem:[#allocation38_spill] sm:$0xff]  ;;  %vm1424_vm3 = vcmask 523264  }
 0x244   : > { %v3148_v52 = vor.u32 %v6015_v58, %v6014_v37  ;;  %v3180_v48 = vor.u32 %v6016_v54, %v4308_v42  ;;  %v3176_v62 = vor.u32 %v6018_v60, %v6017_v50  ;;  %v6020_v2 = vld [vmem:[#allocation36_spill] sm:$0xff]  ;;  %v6021_v6 = vld [vmem:[#allocation33_spill] sm:$0xff]  ;;  %v6026_v47 = vld [vmem:[#allocation30_spill] sm:$0xff] }
 0x245   : > { %v3172_v4 = vor.u32 %v6020_v2, %v6019_v0  ;;  %v3168_v3 = vor.u32 %v6022_v51, %v6021_v6  ;;  %v6024_v42 = vld [vmem:[#allocation32_spill] sm:$0xff]  ;;  %v3160_v10 = vor.u32 %v6026_v47, %v6025_v45  ;;  %v6027_v43 = vld [vmem:[#allocation27_spill] sm:$0xff]  ;;  %v6029_v38 = vld [vmem:[#allocation25_spill] sm:$0xff] }
 0x246   : > { %3475 = vmatpush.bf16.msra.mxu2 %v3180_v48  ;;  %1359 = vmatpush.bf16.msra.mxu0 %v3180_v48  ;;  %v3164_v7 = vor.u32 %v6024_v42, %v6023_v5  ;;  %v6028_v18 = vld [vmem:[#allocation28_spill] sm:$0xff]  ;;  %v6030_v61 = vld [vmem:[#allocation26_spill] sm:$0xff]  ;;  %v1557_v20 = vld [vmem:[%s4512_s1 + $0x8] sm:$0xff] }
 0x247   : > { %1506 = vmatpush.bf16.msra.mxu1 %v3208_v27  ;;  %3484 = vmatpush.bf16.msra.mxu3 %v3208_v27  ;;  %v3156_v22 = vor.u32 %v6028_v18, %v6027_v43  ;;  %v3152_v57 = vor.u32 %v6030_v61, %v6029_v38  ;;  %v1556_v16 = vld [vmem:[%s4512_s1] sm:$0xff]  ;;  %v1558_v15 = vld [vmem:[%s4512_s1 + $0x10] sm:$0xff]  ;;  %v1559_v11 = vld [vmem:[%s4512_s1 + $0x18] sm:$0xff] }
 0x248   : > { %v1561_v33 = vld [vmem:[%s4512_s1 + $0x28] sm:$0xff]  ;;  %v1249_v37 = vld [vmem:[#allocation2 + $0x10] sm:$0xff]  ;;  %v1250_v0 = vld [vmem:[#allocation2 + $0x18] sm:$0xff] }
 0x249   : > { %v1257_v54 = vld [vmem:[#allocation2 + $0x50] sm:$0xff]  ;;  %v1258_v6 = vld [vmem:[#allocation2 + $0x58] sm:$0xff]  ;;  %v1251_v45 = vld [vmem:[#allocation2 + $0x20] sm:$0xff] }
 0x24a   : > { %3476 = vmatpush.bf16.msra.mxu2 %v3176_v62  ;;  %1360 = vmatpush.bf16.msra.mxu0 %v3176_v62  ;;  %v1562_v48 = vld [vmem:[%s4512_s1 + $0x30] sm:$0xff]  ;;  %v1563_v51 = vld [vmem:[%s4512_s1 + $0x38] sm:$0xff]  ;;  %v1564_v61 = vld [vmem:[%s4512_s1 + $0x40] sm:$0xff] }
 0x24b   : > { %1507 = vmatpush.bf16.msra.mxu1 %v3204_v28  ;;  %3485 = vmatpush.bf16.msra.mxu3 %v3204_v28 }
 0x24e   : > { %3477 = vmatpush.bf16.msra.mxu2 %v3172_v4  ;;  %1361 = vmatpush.bf16.msra.mxu0 %v3172_v4 }
 0x24f   : > { %1508 = vmatpush.bf16.msra.mxu1 %v3200_v29  ;;  %3486 = vmatpush.bf16.msra.mxu3 %v3200_v29  ;;  %v1248_v29 = vld [vmem:[#allocation2 + $0x8] sm:$0xff] }
 0x252   : > { %1442 = vxpose.xlu0.c.b16.cont [2/8] %v4454_v63, 128  ;;  %3478 = vmatpush.bf16.msra.mxu2 %v3168_v3 }
 0x253   : > { %1509 = vmatpush.bf16.msra.mxu1 %v3196_v31  ;;  %3487 = vmatpush.bf16.msra.mxu3 %v3196_v31 }
 0x254   : > { %1362 = vmatpush.bf16.msra.mxu0 %v3168_v3 }
 0x256   : > { %3479 = vmatpush.bf16.msra.mxu2 %v3164_v7 }
 0x257   : > { %1510 = vmatpush.bf16.msra.mxu1 %v3192_v32  ;;  %3488 = vmatpush.bf16.msra.mxu3 %v3192_v32  ;;  %v1256_v32 = vld [vmem:[#allocation2 + $0x48] sm:$0xff] }
 0x258   : > { %1363 = vmatpush.bf16.msra.mxu0 %v3164_v7 }
 0x25a   : > { %3480 = vmatpush.bf16.msra.mxu2 %v3160_v10 }
 0x25b   : > { %1511 = vmatpush.bf16.msra.mxu1 %v3188_v34  ;;  %3489 = vmatpush.bf16.msra.mxu3 %v3188_v34 }
 0x25c   : > { %1364 = vmatpush.bf16.msra.mxu0 %v3160_v10 }
 0x25e   : > { %3481 = vmatpush.bf16.msra.mxu2 %v3156_v22 }
 0x25f   : > { %1512 = vmatpush.bf16.msra.mxu1 %v3184_v36  ;;  %3490 = vmatpush.bf16.msra.mxu3 %v3184_v36 }
 0x260   : > { %1365 = vmatpush.bf16.msra.mxu0 %v3156_v22  ;;  %v1252_v22 = vld [vmem:[#allocation2 + $0x28] sm:$0xff] }
 0x262   : > { %1443 = vxpose.xlu0.c.b16.cont [3/8] %v4459_v1, 128  ;;  %3482 = vmatpush.bf16.msra.mxu2 %v3152_v57 }
 0x264   : > { %1366 = vmatpush.bf16.msra.mxu0 %v3152_v57 }
 0x265   : > { %1387 = vmatmul.bf16.vlgmr.msra.gmra.mxu2 %v3136_v24 }
 0x267   : > { %1367 = vmatmul.bf16.vlgmr.msra.gmra.mxu0 %v4449_v59  ;;  %v1247_v59 = vld [vmem:[#allocation2] sm:$0xff] }
 0x272   : > { %1444 = vxpose.xlu0.c.b16.cont [4/8] %v4464_v49, 128 }
 0x275   : > { %1392 = vmatmul.bf16.gmra.mxu2 %v3140_v25 }
 0x277   : > { %1372 = vmatmul.bf16.gmra.mxu0 %v4454_v63 }
 0x282   : > { %1445 = vxpose.xlu0.c.b16.cont [5/8] %v3136_v24, 128  ;;  %v1560_v24 = vld [vmem:[%s4512_s1 + $0x20] sm:$0xff] }
 0x285   : > { %1397 = vmatmul.bf16.gmra.mxu2 %v3144_v30 }
 0x287   : > { %1377 = vmatmul.bf16.gmra.mxu0 %v4459_v1 }
 0x292   : > { %1446 = vxpose.xlu0.c.b16.cont [6/8] %v3140_v25, 128 }
 0x295   : > { %1402 = vmatmul.bf16.gmra.mxu2 %v3148_v52 }
 0x297   : > { %1382 = vmatmul.bf16.gmra.mxu0 %v4464_v49  ;;  %v1255_v49 = vld [vmem:[#allocation2 + $0x40] sm:$0xff] }
 0x2a2   : > { %1447 = vxpose.xlu0.c.b16.cont [7/8] %v3144_v30, 128 }
 0x2b2   : > { %1448 = vxpose.xlu0.c.b16.end [8/8] %v3148_v52, 128 }
 0x2e4   : > { %v1368_v63 = vpop.f32.mrf.mxu0 }
 0x2e5   : > { %v1408_v1 = vadd.f32 %v1368_v63, %v1247_v59  ;;  %v1262_v59 = vld [vmem:[#allocation2 + $0x78] sm:$0xff] }
 0x2e7   : > { %1425 = vst.msk [vmem:[#allocation2] sm:$0xff] %vm1424_vm3, %v1408_v1 }
 0x2e8   : > { %v1388_v25 = vpop.f32.mrf.mxu2 }
 0x2e9   : > { %v1416_v26 = vadd.f32 %v1388_v25, %v1255_v49  ;;  %v1567_v25 = vld [vmem:[%s4512_s1 + $0x58] sm:$0xff] }
 0x2eb   : > { %1433 = vst.msk [vmem:[#allocation2 + $0x40] sm:$0xff] %vm1424_vm3, %v1416_v26 }
 0x2ec   : > { %v1370_v30 = vpop.f32.mrf.mxu0 }
 0x2ed   : > { %v1409_v31 = vadd.f32 %v1370_v30, %v1248_v29 }
 0x2ee   : > { %v1449_v44 = vpop.trf.xlu0 }
 0x2ef   : > { %1513 = vmatmul.bf16.vlgmr.msra.gmra.mxu1 %v1449_v44  ;;  %1426 = vst.msk [vmem:[#allocation2 + $0x8] sm:$0xff] %vm1424_vm3, %v1409_v31  ;;  %v1569_v31 = vld [vmem:[%s4512_s1 + $0x68] sm:$0xff] }
 0x2f0   : > { %v1390_v34 = vpop.f32.mrf.mxu2 }
 0x2f1   : > { %v1417_v35 = vadd.f32 %v1390_v34, %v1256_v32  ;;  %v1570_v34 = vld [vmem:[%s4512_s1 + $0x70] sm:$0xff] }
 0x2f3   : > { %1434 = vst.msk [vmem:[#allocation2 + $0x48] sm:$0xff] %vm1424_vm3, %v1417_v35 }
 0x2f4   : > { %v1373_v58 = vpop.f32.mrf.mxu0 }
 0x2f5   : > { %v1410_v52 = vadd.f32 %v1373_v58, %v1249_v37 }
 0x2f7   : > { %1427 = vst.msk [vmem:[#allocation2 + $0x10] sm:$0xff] %vm1424_vm3, %v1410_v52 }
 0x2f8   : > { %v1393_v50 = vpop.f32.mrf.mxu2 }
 0x2f9   : > { %v1418_v60 = vadd.f32 %v1393_v50, %v1257_v54 }
 0x2fb   : > { %1435 = vst.msk [vmem:[#allocation2 + $0x50] sm:$0xff] %vm1424_vm3, %v1418_v60 }
 0x2fc   : > { %v1375_v2 = vpop.f32.mrf.mxu0 }
 0x2fd   : > { %v1411_v4 = vadd.f32 %v1375_v2, %v1250_v0 }
 0x2fe   : > { %v1450_v41 = vpop.trf.xlu0 }
 0x2ff   : > { %1518 = vmatmul.bf16.gmra.mxu1 %v1450_v41  ;;  %1428 = vst.msk [vmem:[#allocation2 + $0x18] sm:$0xff] %vm1424_vm3, %v1411_v4  ;;  %v1259_v41 = vld [vmem:[#allocation2 + $0x60] sm:$0xff] }
 0x300   : > { %v1395_v3 = vpop.f32.mrf.mxu2 }
 0x301   : > { %v1419_v5 = vadd.f32 %v1395_v3, %v1258_v6 }
 0x303   : > { %1436 = vst.msk [vmem:[#allocation2 + $0x58] sm:$0xff] %vm1424_vm3, %v1419_v5 }
 0x304   : > { %v1378_v47 = vpop.f32.mrf.mxu0 }
 0x305   : > { %v1412_v10 = vadd.f32 %v1378_v47, %v1251_v45 }
 0x307   : > { %1429 = vst.msk [vmem:[#allocation2 + $0x20] sm:$0xff] %vm1424_vm3, %v1412_v10 }
 0x308   : > { %v1398_v43 = vpop.f32.mrf.mxu2 }
 0x309   : > { %v1420_v18 = vadd.f32 %v1398_v43, %v1259_v41 }
 0x30b   : > { %1437 = vst.msk [vmem:[#allocation2 + $0x60] sm:$0xff] %vm1424_vm3, %v1420_v18 }
 0x30c   : > { %v1380_v38 = vpop.f32.mrf.mxu0 }
 0x30d   : > { %v1413_v57 = vadd.f32 %v1380_v38, %v1252_v22 }
 0x30e   : > { %v1451_v40 = vpop.trf.xlu0 }
 0x30f   : > { %1523 = vmatmul.bf16.gmra.mxu1 %v1451_v40  ;;  %v1260_v40 = vld [vmem:[#allocation2 + $0x68] sm:$0xff]  ;;  %1430 = vst.msk [vmem:[#allocation2 + $0x28] sm:$0xff] %vm1424_vm3, %v1413_v57 }
 0x31e   : > { %v1452_v39 = vpop.trf.xlu0 }
 0x31f   : > { %1528 = vmatmul.bf16.gmra.mxu1 %v1452_v39 }
 0x32e   : > { %v1453_v46 = vpop.trf.xlu0 }
 0x32f   : > { %1533 = vmatmul.bf16.vlgmr.msra.gmra.mxu3 %v1453_v46  ;;  %v1400_v46 = vpop.f32.mrf.mxu2 }
 0x33e   : > { %v1454_v8 = vpop.trf.xlu0 }
 0x33f   : > { %1538 = vmatmul.bf16.gmra.mxu3 %v1454_v8 }
 0x34e   : > { %v1455_v12 = vpop.trf.xlu0 }
 0x34f   : > { %1543 = vmatmul.bf16.gmra.mxu3 %v1455_v12  ;;  %v1421_v12 = vadd.f32 %v1400_v46, %v1260_v40 }
 0x351   : > { %1438 = vst.msk [vmem:[#allocation2 + $0x68] sm:$0xff] %vm1424_vm3, %v1421_v12 }
 0x35e   : > { %v1456_v14 = vpop.trf.xlu0 }
 0x35f   : > { %1548 = vmatmul.bf16.gmra.mxu3 %v1456_v14  ;;  %v1253_v14 = vld [vmem:[#allocation2 + $0x30] sm:$0xff] }
 0x36c   : > { %v1514_v17 = vpop.f32.mrf.mxu1 }
 0x36d   : > { %v1572_v19 = vadd.f32 %v1556_v16, %v1514_v17  ;;  %v1383_v16 = vpop.f32.mrf.mxu0  ;;  %v1565_v17 = vld [vmem:[%s4512_s1 + $0x48] sm:$0xff] }
 0x36f   : > { %1588 = vst.msk [vmem:[%s4512_s1] sm:$0xff] %vm1424_vm3, %v1572_v19  ;;  %v1414_v19 = vadd.f32 %v1383_v16, %v1253_v14 }
 0x371   : > { %1431 = vst.msk [vmem:[#allocation2 + $0x30] sm:$0xff] %vm1424_vm3, %v1414_v19 }
 0x374   : > { %v1516_v21 = vpop.f32.mrf.mxu1 }
 0x375   : > { %v1573_v13 = vadd.f32 %v1557_v20, %v1516_v21  ;;  %v1261_v20 = vld [vmem:[#allocation2 + $0x70] sm:$0xff] }
 0x377   : > { %1589 = vst.msk [vmem:[%s4512_s1 + $0x8] sm:$0xff] %vm1424_vm3, %v1573_v13  ;;  %v1403_v13 = vpop.f32.mrf.mxu2 }
 0x37c   : > { %v1519_v23 = vpop.f32.mrf.mxu1 }
 0x37d   : > { %v1574_v9 = vadd.f32 %v1558_v15, %v1519_v23  ;;  %v1422_v23 = vadd.f32 %v1403_v13, %v1261_v20 }
 0x37f   : > { %1590 = vst.msk [vmem:[%s4512_s1 + $0x10] sm:$0xff] %vm1424_vm3, %v1574_v9  ;;  %v1254_v9 = vld [vmem:[#allocation2 + $0x38] sm:$0xff]  ;;  %v1405_v1 = vpop.f32.mrf.mxu2 }
 0x380   : > { %1439 = vst.msk [vmem:[#allocation2 + $0x70] sm:$0xff] %vm1424_vm3, %v1422_v23 }
 0x384   : > { %v1521_v53 = vpop.f32.mrf.mxu1 }
 0x385   : > { %v1575_v55 = vadd.f32 %v1559_v11, %v1521_v53  ;;  %v1385_v11 = vpop.f32.mrf.mxu0  ;;  %v1566_v53 = vld [vmem:[%s4512_s1 + $0x50] sm:$0xff] }
 0x387   : > { %1591 = vst.msk [vmem:[%s4512_s1 + $0x18] sm:$0xff] %vm1424_vm3, %v1575_v55  ;;  %v1415_v55 = vadd.f32 %v1385_v11, %v1254_v9 }
 0x389   : > { %1432 = vst.msk [vmem:[#allocation2 + $0x38] sm:$0xff] %vm1424_vm3, %v1415_v55 }
 0x38c   : > { %v1524_v27 = vpop.f32.mrf.mxu1 }
 0x38d   : > { %v1576_v28 = vadd.f32 %v1560_v24, %v1524_v27  ;;  %v1423_v24 = vadd.f32 %v1405_v1, %v1262_v59 }
 0x38f   : > { %1592 = vst.msk [vmem:[%s4512_s1 + $0x20] sm:$0xff] %vm1424_vm3, %v1576_v28  ;;  %v1568_v28 = vld [vmem:[%s4512_s1 + $0x60] sm:$0xff] }
 0x390   : > { %1440 = vst.msk [vmem:[#allocation2 + $0x78] sm:$0xff] %vm1424_vm3, %v1423_v24 }
 0x394   : > { %v1526_v56 = vpop.f32.mrf.mxu1 }
 0x395   : > { %v1577_v36 = vadd.f32 %v1561_v33, %v1526_v56 }
 0x397   : > { %1593 = vst.msk [vmem:[%s4512_s1 + $0x28] sm:$0xff] %vm1424_vm3, %v1577_v36  ;;  %v1571_v36 = vld [vmem:[%s4512_s1 + $0x78] sm:$0xff] }
 0x39c   : > { %v1529_v62 = vpop.f32.mrf.mxu1 }
 0x39d   : > { %v1578_v44 = vadd.f32 %v1562_v48, %v1529_v62 }
 0x39f   : > { %1594 = vst.msk [vmem:[%s4512_s1 + $0x30] sm:$0xff] %vm1424_vm3, %v1578_v44 }
 0x3a4   : > { %v1531_v42 = vpop.f32.mrf.mxu1 }
 0x3a5   : > { %v1579_v7 = vadd.f32 %v1563_v51, %v1531_v42 }
 0x3a7   : > { %1595 = vst.msk [vmem:[%s4512_s1 + $0x38] sm:$0xff] %vm1424_vm3, %v1579_v7 }
 0x3b2   : > { %v1534_v39 = vpop.f32.mrf.mxu3 }
 0x3b3   : > { %v1580_v8 = vadd.f32 %v1564_v61, %v1534_v39 }
 0x3b5   : > { %1596 = vst.msk [vmem:[%s4512_s1 + $0x40] sm:$0xff] %vm1424_vm3, %v1580_v8 }
 0x3ba   : > { %v1536_v21 = vpop.f32.mrf.mxu3 }
 0x3bb   : > { %v1581_v15 = vadd.f32 %v1565_v17, %v1536_v21 }
 0x3bd   : > { %1597 = vst.msk [vmem:[%s4512_s1 + $0x48] sm:$0xff] %vm1424_vm3, %v1581_v15 }
 0x3c2   : > { %v1539_v63 = vpop.f32.mrf.mxu3 }
 0x3c3   : > { %v1582_v49 = vadd.f32 %v1566_v53, %v1539_v63 }
 0x3c5   : > { %1598 = vst.msk [vmem:[%s4512_s1 + $0x50] sm:$0xff] %vm1424_vm3, %v1582_v49 }
 0x3ca   : > { %v1541_v26 = vpop.f32.mrf.mxu3 }
 0x3cb   : > { %v1583_v27 = vadd.f32 %v1567_v25, %v1541_v26 }
 0x3cd   : > { %1599 = vst.msk [vmem:[%s4512_s1 + $0x58] sm:$0xff] %vm1424_vm3, %v1583_v27 }
 0x3d2   : > { %v1544_v29 = vpop.f32.mrf.mxu3 }
 0x3d3   : > { %v1584_v30 = vadd.f32 %v1568_v28, %v1544_v29 }
 0x3d5   : > { %1600 = vst.msk [vmem:[%s4512_s1 + $0x60] sm:$0xff] %vm1424_vm3, %v1584_v30 }
 0x3da   : > { %v1546_v32 = vpop.f32.mrf.mxu3 }
 0x3db   : > { %v1585_v33 = vadd.f32 %v1569_v31, %v1546_v32 }
 0x3dd   : > { %1601 = vst.msk [vmem:[%s4512_s1 + $0x68] sm:$0xff] %vm1424_vm3, %v1585_v33 }
 0x3e2   : > { %v1549_v35 = vpop.f32.mrf.mxu3 }
 0x3e3   : > { %v1586_v56 = vadd.f32 %v1570_v34, %v1549_v35 }
 0x3e5   : > { %1602 = vst.msk [vmem:[%s4512_s1 + $0x70] sm:$0xff] %vm1424_vm3, %v1586_v56 }
 0x3e9   : > { %1607 = sbr.rel (%p3214_p3) target bundleno = 1183 (0x49f), region = 203 }
 0x3ea   : > { %v1551_v37 = vpop.f32.mrf.mxu3 }
 0x3eb   : > { %v1587_v58 = vadd.f32 %v1571_v36, %v1551_v37 }
 0x3ed   : > { %1603 = vst.msk [vmem:[%s4512_s1 + $0x78] sm:$0xff] %vm1424_vm3, %v1587_v58 }
 0x3ee   : > { %v1608_v52 = vld [vmem:[#allocation2] sm:$0xff]  ;;  %v4580_v54 = vld [vmem:[#allocation2 + $0x8] sm:$0xff]  ;;  %v4582_v48 = vld [vmem:[#allocation2 + $0x10] sm:$0xff]  ;;  %vm1640_vm4 = vcmask 519168   ;;  %vm1767_vm5 = vcmask 261120  }
 0x3ef   : > { %v4584_v50 = vld [vmem:[#allocation2 + $0x18] sm:$0xff]  ;;  %v4586_v60 = vld [vmem:[#allocation2 + $0x20] sm:$0xff]  ;;  %v4588_v62 = vld [vmem:[#allocation2 + $0x28] sm:$0xff]  ;;  %v1624_v44 = vpack.c.bf16 %v1608_v52, %v1608_v52  ;;  %v1625_v0 = vpack.c.bf16 %v4580_v54, %v4580_v54  ;;  %v1626_v2 = vpack.c.bf16 %v4582_v48, %v4582_v48 }
 0x3f0   : > { %v4594_v4 = vld [vmem:[#allocation2 + $0x30] sm:$0xff]  ;;  %v1627_v6 = vpack.c.bf16 %v4584_v50, %v4584_v50  ;;  %v4598_v51 = vld [vmem:[#allocation2 + $0x38] sm:$0xff]  ;;  %v1628_v3 = vpack.c.bf16 %v4586_v60, %v4586_v60  ;;  %v4604_v5 = vld [vmem:[#allocation2 + $0x40] sm:$0xff]  ;;  %v1629_v42 = vpack.c.bf16 %v4588_v62, %v4588_v62 }
 0x3f1   : > { %1641 = vst.msk [vmem:[%s4329_s18] sm:$0xf] %vm1640_vm4, %v1624_v44  ;;  %v4610_v7 = vld [vmem:[#allocation2 + $0x48] sm:$0xff]  ;;  %v1630_v45 = vpack.c.bf16 %v4594_v4, %v4594_v4  ;;  %v4616_v47 = vld [vmem:[#allocation2 + $0x50] sm:$0xff]  ;;  %v1631_v10 = vpack.c.bf16 %v4598_v51, %v4598_v51  ;;  %v4622_v41 = vld [vmem:[#allocation2 + $0x58] sm:$0xff]  ;;  %v1632_v43 = vpack.c.bf16 %v4604_v5, %v4604_v5 }
 0x3f2   : > { %1642 = vst.msk [vmem:[%s4329_s18 + $0x4] sm:$0xf] %vm1640_vm4, %v1625_v0  ;;  %v4628_v18 = vld [vmem:[#allocation2 + $0x60] sm:$0xff]  ;;  %v1633_v22 = vpack.c.bf16 %v4610_v7, %v4610_v7  ;;  %v4634_v38 = vld [vmem:[#allocation2 + $0x68] sm:$0xff]  ;;  %v1634_v61 = vpack.c.bf16 %v4616_v47, %v4616_v47  ;;  %v4640_v57 = vld [vmem:[#allocation2 + $0x70] sm:$0xff]  ;;  %v1635_v39 = vpack.c.bf16 %v4622_v41, %v4622_v41 }
 0x3f3   : > { %1643 = vst.msk [vmem:[%s4329_s18 + $0x8] sm:$0xf] %vm1640_vm4, %v1626_v2  ;;  %v4642_v40 = vld [vmem:[#allocation2 + $0x78] sm:$0xff]  ;;  %v1723_v46 = vld [vmem:[#allocation4 + $0x10] sm:$0xff]  ;;  %v1636_v8 = vpack.c.bf16 %v4628_v18, %v4628_v18  ;;  %v1721_v14 = vld [vmem:[#allocation4] sm:$0xff]  ;;  %v1637_v17 = vpack.c.bf16 %v4634_v38, %v4634_v38  ;;  %v1638_v21 = vpack.c.bf16 %v4640_v57, %v4640_v57 }
 0x3f4   : > { %1644 = vst.msk [vmem:[%s4329_s18 + $0xc] sm:$0xf] %vm1640_vm4, %v1627_v6  ;;  %v1724_v12 = vld [vmem:[#allocation4 + $0x18] sm:$0xff]  ;;  %v1722_v16 = vld [vmem:[#allocation4 + $0x8] sm:$0xff]  ;;  %v1657_v19 = vld [vmem:[%s4114_s22] sm:$0xff]  ;;  %v1639_v15 = vpack.c.bf16 %v4642_v40, %v4642_v40 }
 0x3f5   : > { %1645 = vst.msk [vmem:[%s4329_s18 + $0x10] sm:$0xf] %vm1640_vm4, %v1628_v3  ;;  %v1726_v20 = vpack.c.bf16 %v1724_v12, %v1723_v46  ;;  %v1658_v13 = vld [vmem:[%s4114_s22 + $0x8] sm:$0xff]  ;;  %v1659_v23 = vld [vmem:[%s4114_s22 + $0x10] sm:$0xff]  ;;  %v1725_v9 = vpack.c.bf16 %v1722_v16, %v1721_v14  ;;  %v1660_v11 = vld [vmem:[%s4114_s22 + $0x18] sm:$0xff]  ;;  %v1673_v59 = vadd.f32 %v1657_v19, %v1608_v52 }
 0x3f6   : > { %1646 = vst.msk [vmem:[%s4329_s18 + $0x14] sm:$0xf] %vm1640_vm4, %v1629_v42  ;;  %v1661_v53 = vld [vmem:[%s4114_s22 + $0x20] sm:$0xff]  ;;  %v1662_v55 = vld [vmem:[%s4114_s22 + $0x28] sm:$0xff]  ;;  %v1663_v63 = vld [vmem:[%s4114_s22 + $0x30] sm:$0xff]  ;;  %v1674_v29 = vadd.f32 %v1658_v13, %v4580_v54  ;;  %v1675_v31 = vadd.f32 %v1659_v23, %v4582_v48  ;;  %v1676_v35 = vadd.f32 %v1660_v11, %v4584_v50 }
 0x3f7   : > { %1647 = vst.msk [vmem:[%s4329_s18 + $0x18] sm:$0xf] %vm1640_vm4, %v1630_v45  ;;  %1798 = vmatpush.bf16.msra.mxu0 %v1726_v20  ;;  %3491 = vmatpush.bf16.msra.mxu1 %v1726_v20  ;;  %v1664_v1 = vld [vmem:[%s4114_s22 + $0x38] sm:$0xff]  ;;  %v1665_v49 = vld [vmem:[%s4114_s22 + $0x40] sm:$0xff]  ;;  %v1666_v24 = vld [vmem:[%s4114_s22 + $0x48] sm:$0xff]  ;;  %v1677_v37 = vadd.f32 %v1661_v53, %v4586_v60  ;;  %v1678_v58 = vadd.f32 %v1662_v55, %v4588_v62 }
 0x3f8   : > { %1648 = vst.msk [vmem:[%s4329_s18 + $0x1c] sm:$0xf] %vm1640_vm4, %v1631_v10  ;;  %3492 = vmatpush.bf16.msra.mxu2 %v1726_v20  ;;  %3493 = vmatpush.bf16.msra.mxu3 %v1726_v20  ;;  %v1667_v25 = vld [vmem:[%s4114_s22 + $0x50] sm:$0xff]  ;;  %v1668_v26 = vld [vmem:[%s4114_s22 + $0x58] sm:$0xff]  ;;  %v1669_v27 = vld [vmem:[%s4114_s22 + $0x60] sm:$0xff]  ;;  %v1679_v52 = vadd.f32 %v1663_v63, %v4594_v4  ;;  %v1680_v54 = vadd.f32 %v1664_v1, %v4598_v51 }
 0x3f9   : > { %1649 = vst.msk [vmem:[%s4329_s18 + $0x20] sm:$0xf] %vm1640_vm4, %v1632_v43  ;;  %v1670_v28 = vld [vmem:[%s4114_s22 + $0x68] sm:$0xff]  ;;  %v1671_v30 = vld [vmem:[%s4114_s22 + $0x70] sm:$0xff]  ;;  %v3426_v32 = vld [vmem:[%s4100_s20] sm:$0xff]  ;;  %v1681_v48 = vadd.f32 %v1665_v49, %v4604_v5  ;;  %v1682_v50 = vadd.f32 %v1666_v24, %v4610_v7  ;;  %v1683_v60 = vadd.f32 %v1667_v25, %v4616_v47  ;;  %v1684_v62 = vadd.f32 %v1668_v26, %v4622_v41 }
 0x3fa   : > { %1650 = vst.msk [vmem:[%s4329_s18 + $0x24] sm:$0xf] %vm1640_vm4, %v1633_v22  ;;  %v3428_v33 = vld [vmem:[%s4100_s20 + $0x10] sm:$0xff]  ;;  %v1672_v34 = vld [vmem:[%s4114_s22 + $0x78] sm:$0xff]  ;;  %v3430_v56 = vld [vmem:[%s4100_s20 + $0x20] sm:$0xff]  ;;  %v1685_v44 = vadd.f32 %v1669_v27, %v4628_v18  ;;  %v1686_v0 = vadd.f32 %v1670_v28, %v4634_v38  ;;  %v1687_v2 = vadd.f32 %v1671_v30, %v4640_v57 }
 0x3fb   : > { %1651 = vst.msk [vmem:[%s4329_s18 + $0x28] sm:$0xf] %vm1640_vm4, %v1634_v61  ;;  %1799 = vmatpush.bf16.msra.mxu0 %v1725_v9  ;;  %3494 = vmatpush.bf16.msra.mxu1 %v1725_v9  ;;  %v3432_v36 = vld [vmem:[%s4100_s20 + $0x30] sm:$0xff]  ;;  %v1688_v4 = vadd.f32 %v1672_v34, %v4642_v40  ;;  %v3427_v6 = vld [vmem:[%s4100_s20 + $0x8] sm:$0xff]  ;;  %v3429_v51 = vld [vmem:[%s4100_s20 + $0x18] sm:$0xff] }
 0x3fc   : > { %1652 = vst.msk [vmem:[%s4329_s18 + $0x2c] sm:$0xf] %vm1640_vm4, %v1635_v39  ;;  %3495 = vmatpush.bf16.msra.mxu2 %v1725_v9  ;;  %3496 = vmatpush.bf16.msra.mxu3 %v1725_v9  ;;  %v3431_v3 = vld [vmem:[%s4100_s20 + $0x28] sm:$0xff]  ;;  %v3433_v5 = vld [vmem:[%s4100_s20 + $0x38] sm:$0xff]  ;;  %v1841_v42 = vld [vmem:[%s4119_s16] sm:$0xff] }
 0x3fd   : > { %1653 = vst.msk [vmem:[%s4329_s18 + $0x30] sm:$0xf] %vm1640_vm4, %v1636_v8  ;;  %v1845_v7 = vld [vmem:[%s4119_s16 + $0x20] sm:$0xff]  ;;  %v1842_v45 = vld [vmem:[%s4119_s16 + $0x8] sm:$0xff]  ;;  %v1843_v43 = vld [vmem:[%s4119_s16 + $0x10] sm:$0xff] }
 0x3fe   : > { %1654 = vst.msk [vmem:[%s4329_s18 + $0x34] sm:$0xf] %vm1640_vm4, %v1637_v17  ;;  %3247 = vmatmul.msk.bf16.vlgmr.msra.gmra.mxu0 %vm1767_vm5, %v3426_v32  ;;  %3249 = vmatmul.msk.bf16.vlgmr.msra.gmra.mxu1 %vm1767_vm5, %v3428_v33  ;;  %v1846_v47 = vld [vmem:[%s4119_s16 + $0x28] sm:$0xff]  ;;  %v1847_v18 = vld [vmem:[%s4119_s16 + $0x30] sm:$0xff]  ;;  %v1844_v61 = vld [vmem:[%s4119_s16 + $0x18] sm:$0xff] }
 0x3ff   : > { %1655 = vst.msk [vmem:[%s4329_s18 + $0x38] sm:$0xf] %vm1640_vm4, %v1638_v21  ;;  %3251 = vmatmul.msk.bf16.vlgmr.msra.gmra.mxu2 %vm1767_vm5, %v3430_v56  ;;  %3253 = vmatmul.msk.bf16.vlgmr.msra.gmra.mxu3 %vm1767_vm5, %v3432_v36  ;;  %v1850_v10 = vld [vmem:[%s4119_s16 + $0x48] sm:$0xff]  ;;  %v1851_v22 = vld [vmem:[%s4119_s16 + $0x50] sm:$0xff]  ;;  %v1848_v39 = vld [vmem:[%s4119_s16 + $0x38] sm:$0xff] }
 0x400   : > { %1656 = vst.msk [vmem:[%s4329_s18 + $0x3c] sm:$0xf] %vm1640_vm4, %v1639_v15  ;;  %v1854_v41 = vld [vmem:[%s4119_s16 + $0x68] sm:$0xff]  ;;  %v1855_v38 = vld [vmem:[%s4119_s16 + $0x70] sm:$0xff]  ;;  %v1852_v46 = vld [vmem:[%s4119_s16 + $0x58] sm:$0xff] }
 0x401   : > { %1689 = vst.msk [vmem:[%s4133_s8] sm:$0xff] %vm1424_vm3, %v1673_v59  ;;  %v1856_v8 = vld [vmem:[%s4119_s16 + $0x78] sm:$0xff]  ;;  %v1849_v16 = vld [vmem:[%s4119_s16 + $0x40] sm:$0xff] }
 0x402   : > { %1690 = vst.msk [vmem:[%s4133_s8 + $0x8] sm:$0xff] %vm1424_vm3, %v1674_v29  ;;  %v1853_v17 = vld [vmem:[%s4119_s16 + $0x60] sm:$0xff] }
 0x403   : > { %1691 = vst.msk [vmem:[%s4133_s8 + $0x10] sm:$0xff] %vm1424_vm3, %v1675_v31 }
 0x404   : > { %1692 = vst.msk [vmem:[%s4133_s8 + $0x18] sm:$0xff] %vm1424_vm3, %v1676_v35 }
 0x405   : > { %1693 = vst.msk [vmem:[%s4133_s8 + $0x20] sm:$0xff] %vm1424_vm3, %v1677_v37 }
 0x406   : > { %1694 = vst.msk [vmem:[%s4133_s8 + $0x28] sm:$0xff] %vm1424_vm3, %v1678_v58 }
 0x407   : > { %1695 = vst.msk [vmem:[%s4133_s8 + $0x30] sm:$0xff] %vm1424_vm3, %v1679_v52 }
 0x408   : > { %1696 = vst.msk [vmem:[%s4133_s8 + $0x38] sm:$0xff] %vm1424_vm3, %v1680_v54 }
 0x409   : > { %1697 = vst.msk [vmem:[%s4133_s8 + $0x40] sm:$0xff] %vm1424_vm3, %v1681_v48 }
 0x40a   : > { %1698 = vst.msk [vmem:[%s4133_s8 + $0x48] sm:$0xff] %vm1424_vm3, %v1682_v50 }
 0x40b   : > { %1699 = vst.msk [vmem:[%s4133_s8 + $0x50] sm:$0xff] %vm1424_vm3, %v1683_v60 }
 0x40c   : > { %1700 = vst.msk [vmem:[%s4133_s8 + $0x58] sm:$0xff] %vm1424_vm3, %v1684_v62 }
 0x40d   : > { %1701 = vst.msk [vmem:[%s4133_s8 + $0x60] sm:$0xff] %vm1424_vm3, %v1685_v44 }
 0x40e   : > { %1702 = vst.msk [vmem:[%s4133_s8 + $0x68] sm:$0xff] %vm1424_vm3, %v1686_v0  ;;  %3248 = vmatmul.msk.bf16.gmra.mxu0 %vm1767_vm5, %v3427_v6  ;;  %3250 = vmatmul.msk.bf16.gmra.mxu1 %vm1767_vm5, %v3429_v51 }
 0x40f   : > { %1703 = vst.msk [vmem:[%s4133_s8 + $0x70] sm:$0xff] %vm1424_vm3, %v1687_v2  ;;  %3252 = vmatmul.msk.bf16.gmra.mxu2 %vm1767_vm5, %v3431_v3  ;;  %3254 = vmatmul.msk.bf16.gmra.mxu3 %vm1767_vm5, %v3433_v5 }
 0x410   : > { %1704 = vst.msk [vmem:[%s4133_s8 + $0x78] sm:$0xff] %vm1424_vm3, %v1688_v4 }
 0x47b   : > { %v1801_v57 = vpop.f32.mrf.mxu0  ;;  %v1811_v40 = vpop.f32.mrf.mxu1 }
 0x47c   : > { %v1857_v12 = vadd.f32 %v1841_v42, %v1801_v57  ;;  %v1861_v14 = vadd.f32 %v1845_v7, %v1811_v40 }
 0x47e   : > { %1873 = vst.msk [vmem:[%s4138_s26] sm:$0xff] %vm1424_vm3, %v1857_v12 }
 0x47f   : > { %1877 = vst.msk [vmem:[%s4138_s26 + $0x20] sm:$0xff] %vm1424_vm3, %v1861_v14 }
 0x482   : > { %v1821_v19 = vpop.f32.mrf.mxu2  ;;  %v1831_v20 = vpop.f32.mrf.mxu3 }
 0x483   : > { %v1865_v21 = vadd.f32 %v1849_v16, %v1821_v19  ;;  %v1803_v13 = vpop.f32.mrf.mxu0  ;;  %v1813_v15 = vpop.f32.mrf.mxu1  ;;  %v1869_v23 = vadd.f32 %v1853_v17, %v1831_v20 }
 0x484   : > { %v1858_v9 = vadd.f32 %v1842_v45, %v1803_v13  ;;  %v1862_v11 = vadd.f32 %v1846_v47, %v1813_v15 }
 0x485   : > { %1881 = vst.msk [vmem:[%s4138_s26 + $0x40] sm:$0xff] %vm1424_vm3, %v1865_v21 }
 0x486   : > { %1874 = vst.msk [vmem:[%s4138_s26 + $0x8] sm:$0xff] %vm1424_vm3, %v1858_v9 }
 0x487   : > { %1878 = vst.msk [vmem:[%s4138_s26 + $0x28] sm:$0xff] %vm1424_vm3, %v1862_v11 }
 0x488   : > { %1885 = vst.msk [vmem:[%s4138_s26 + $0x60] sm:$0xff] %vm1424_vm3, %v1869_v23 }
 0x48a   : > { %v1823_v53 = vpop.f32.mrf.mxu2  ;;  %v1833_v55 = vpop.f32.mrf.mxu3 }
 0x48b   : > { %v1866_v59 = vadd.f32 %v1850_v10, %v1823_v53  ;;  %v1806_v63 = vpop.f32.mrf.mxu0  ;;  %v1816_v1 = vpop.f32.mrf.mxu1  ;;  %v1870_v49 = vadd.f32 %v1854_v41, %v1833_v55 }
 0x48c   : > { %v1859_v24 = vadd.f32 %v1843_v43, %v1806_v63  ;;  %v1863_v25 = vadd.f32 %v1847_v18, %v1816_v1 }
 0x48d   : > { %1882 = vst.msk [vmem:[%s4138_s26 + $0x48] sm:$0xff] %vm1424_vm3, %v1866_v59 }
 0x48e   : > { %1875 = vst.msk [vmem:[%s4138_s26 + $0x10] sm:$0xff] %vm1424_vm3, %v1859_v24 }
 0x48f   : > { %1879 = vst.msk [vmem:[%s4138_s26 + $0x30] sm:$0xff] %vm1424_vm3, %v1863_v25 }
 0x490   : > { %1886 = vst.msk [vmem:[%s4138_s26 + $0x68] sm:$0xff] %vm1424_vm3, %v1870_v49 }
 0x492   : > { %v1826_v26 = vpop.f32.mrf.mxu2  ;;  %v1836_v27 = vpop.f32.mrf.mxu3 }
 0x493   : > { %v1867_v28 = vadd.f32 %v1851_v22, %v1826_v26  ;;  %v1808_v29 = vpop.f32.mrf.mxu0  ;;  %v1818_v30 = vpop.f32.mrf.mxu1  ;;  %v1871_v31 = vadd.f32 %v1855_v38, %v1836_v27 }
 0x494   : > { %v1860_v32 = vadd.f32 %v1844_v61, %v1808_v29  ;;  %v1864_v33 = vadd.f32 %v1848_v39, %v1818_v30 }
 0x495   : > { %1883 = vst.msk [vmem:[%s4138_s26 + $0x50] sm:$0xff] %vm1424_vm3, %v1867_v28 }
 0x496   : > { %1876 = vst.msk [vmem:[%s4138_s26 + $0x18] sm:$0xff] %vm1424_vm3, %v1860_v32 }
 0x497   : > { %1880 = vst.msk [vmem:[%s4138_s26 + $0x38] sm:$0xff] %vm1424_vm3, %v1864_v33 }
 0x498   : > { %1887 = vst.msk [vmem:[%s4138_s26 + $0x70] sm:$0xff] %vm1424_vm3, %v1871_v31 }
 0x49a   : > { %v1828_v34 = vpop.f32.mrf.mxu2  ;;  %v1838_v35 = vpop.f32.mrf.mxu3 }
 0x49b   : > { %v1868_v56 = vadd.f32 %v1852_v46, %v1828_v34  ;;  %v1872_v36 = vadd.f32 %v1856_v8, %v1838_v35 }
 0x49d   : > { %1884 = vst.msk [vmem:[%s4138_s26 + $0x58] sm:$0xff] %vm1424_vm3, %v1868_v56 }
 0x49e   : > { %1888 = vst.msk [vmem:[%s4138_s26 + $0x78] sm:$0xff] %vm1424_vm3, %v1872_v36 }
 0x49f PF: > { %p1889_p5 = scmp.eq.s32.totalorder %s3764_s29, 1 }
 0x4a1   : > { %p1890_p6 = pnand %p1889_p5, %p1604_p4 }
 0x4a2   : > { %s6031_s22 = sld [smem:[#allocation44_spill]] (!%p1890_p6) }
 0x4a3   : > { %1893 = sbr.rel (%p1890_p6) target bundleno = 1736 (0x6c8), region = 207  ;;  %s6033_s15 = sld [smem:[#allocation49_spill]] (!%p1890_p6) }
 0x4a4   : > { %s6034_s20 = sld [smem:[#allocation55_spill]] (!%p1890_p6) }
 0x4a5   : > { %s6037_s2 = sld [smem:[#allocation56_spill]] (!%p1890_p6) }
 0x4a8   : > { %v4802_v37 = vld [vmem:[#allocation3] sm:$0xff]  ;;  %v4804_v58 = vld [vmem:[#allocation3 + $0x8] sm:$0xff]  ;;  %v4806_v52 = vld [vmem:[#allocation3 + $0x10] sm:$0xff]  ;;  %vm1990_vm6 = vcmask 519168   ;;  %s6032_s16 = smov %s6031_s22  ;;  %vm2357_vm7 = vcmask 261120  }
 0x4a9   : > { %v4808_v54 = vld [vmem:[#allocation3 + $0x18] sm:$0xff]  ;;  %v4810_v48 = vld [vmem:[#allocation3 + $0x20] sm:$0xff]  ;;  %v4812_v50 = vld [vmem:[#allocation3 + $0x28] sm:$0xff]  ;;  %v1942_v60 = vpack.c.bf16 %v4802_v37, %v4802_v37  ;;  %v1943_v62 = vpack.c.bf16 %v4804_v58, %v4804_v58  ;;  %v1944_v44 = vpack.c.bf16 %v4806_v52, %v4806_v52 }
 0x4aa   : > { %v4820_v0 = vld [vmem:[#allocation3 + $0x30] sm:$0xff]  ;;  %v1945_v2 = vpack.c.bf16 %v4808_v54, %v4808_v54  ;;  %v4824_v4 = vld [vmem:[#allocation3 + $0x38] sm:$0xff]  ;;  %v1946_v6 = vpack.c.bf16 %v4810_v48, %v4810_v48  ;;  %v4829_v51 = vld [vmem:[#allocation3 + $0x40] sm:$0xff]  ;;  %v1947_v3 = vpack.c.bf16 %v4812_v50, %v4812_v50 }
 0x4ab   : > { %1991 = vst.msk [vmem:[#allocation11] sm:$0xf] %vm1990_vm6, %v1942_v60  ;;  %v4834_v5 = vld [vmem:[#allocation3 + $0x48] sm:$0xff]  ;;  %v1948_v42 = vpack.c.bf16 %v4820_v0, %v4820_v0  ;;  %v4839_v7 = vld [vmem:[#allocation3 + $0x50] sm:$0xff]  ;;  %v1949_v45 = vpack.c.bf16 %v4824_v4, %v4824_v4  ;;  %v4844_v47 = vld [vmem:[#allocation3 + $0x58] sm:$0xff]  ;;  %v1950_v10 = vpack.c.bf16 %v4829_v51, %v4829_v51 }
 0x4ac   : > { %1992 = vst.msk [vmem:[#allocation11 + $0x4] sm:$0xf] %vm1990_vm6, %v1943_v62  ;;  %v4849_v41 = vld [vmem:[#allocation3 + $0x60] sm:$0xff]  ;;  %v1951_v43 = vpack.c.bf16 %v4834_v5, %v4834_v5  ;;  %v4854_v18 = vld [vmem:[#allocation3 + $0x68] sm:$0xff]  ;;  %v1952_v22 = vpack.c.bf16 %v4839_v7, %v4839_v7  ;;  %v4859_v38 = vld [vmem:[#allocation3 + $0x70] sm:$0xff]  ;;  %v1953_v61 = vpack.c.bf16 %v4844_v47, %v4844_v47 }
 0x4ad   : > { %1993 = vst.msk [vmem:[#allocation11 + $0x8] sm:$0xf] %vm1990_vm6, %v1944_v44  ;;  %v4864_v57 = vld [vmem:[#allocation3 + $0x78] sm:$0xff]  ;;  %v1954_v40 = vpack.c.bf16 %v4849_v41, %v4849_v41  ;;  %v4869_v39 = vld [vmem:[#allocation3 + $0x80] sm:$0xff]  ;;  %v1955_v46 = vpack.c.bf16 %v4854_v18, %v4854_v18  ;;  %v4874_v8 = vld [vmem:[#allocation3 + $0x88] sm:$0xff]  ;;  %v1956_v12 = vpack.c.bf16 %v4859_v38, %v4859_v38 }
 0x4ae   : > { %1994 = vst.msk [vmem:[#allocation11 + $0xc] sm:$0xf] %vm1990_vm6, %v1945_v2  ;;  %v4879_v14 = vld [vmem:[#allocation3 + $0x90] sm:$0xff]  ;;  %v1957_v16 = vpack.c.bf16 %v4864_v57, %v4864_v57  ;;  %v4884_v17 = vld [vmem:[#allocation3 + $0x98] sm:$0xff]  ;;  %v1958_v19 = vpack.c.bf16 %v4869_v39, %v4869_v39  ;;  %v4889_v20 = vld [vmem:[#allocation3 + $0xa0] sm:$0xff]  ;;  %v1959_v21 = vpack.c.bf16 %v4874_v8, %v4874_v8 }
 0x4af   : > { %1995 = vst.msk [vmem:[#allocation11 + $0x10] sm:$0xf] %vm1990_vm6, %v1946_v6  ;;  %v4894_v13 = vld [vmem:[#allocation3 + $0xa8] sm:$0xff]  ;;  %v1960_v15 = vpack.c.bf16 %v4879_v14, %v4879_v14  ;;  %v4899_v23 = vld [vmem:[#allocation3 + $0xb0] sm:$0xff]  ;;  %v1961_v9 = vpack.c.bf16 %v4884_v17, %v4884_v17  ;;  %v4904_v11 = vld [vmem:[#allocation3 + $0xb8] sm:$0xff]  ;;  %v1962_v53 = vpack.c.bf16 %v4889_v20, %v4889_v20 }
 0x4b0   : > { %1996 = vst.msk [vmem:[#allocation11 + $0x14] sm:$0xf] %vm1990_vm6, %v1947_v3  ;;  %v4909_v55 = vld [vmem:[#allocation3 + $0xc0] sm:$0xff]  ;;  %v1963_v59 = vpack.c.bf16 %v4894_v13, %v4894_v13  ;;  %v4914_v63 = vld [vmem:[#allocation3 + $0xc8] sm:$0xff]  ;;  %v1964_v1 = vpack.c.bf16 %v4899_v23, %v4899_v23  ;;  %v4919_v49 = vld [vmem:[#allocation3 + $0xd0] sm:$0xff]  ;;  %v1965_v24 = vpack.c.bf16 %v4904_v11, %v4904_v11 }
 0x4b1   : > { %1997 = vst.msk [vmem:[#allocation11 + $0x18] sm:$0xf] %vm1990_vm6, %v1948_v42  ;;  %v4924_v25 = vld [vmem:[#allocation3 + $0xd8] sm:$0xff]  ;;  %v1966_v26 = vpack.c.bf16 %v4909_v55, %v4909_v55  ;;  %v4929_v27 = vld [vmem:[#allocation3 + $0xe0] sm:$0xff]  ;;  %v1967_v28 = vpack.c.bf16 %v4914_v63, %v4914_v63  ;;  %v4934_v29 = vld [vmem:[#allocation3 + $0xe8] sm:$0xff]  ;;  %v1968_v30 = vpack.c.bf16 %v4919_v49, %v4919_v49 }
 0x4b2   : > { %1998 = vst.msk [vmem:[#allocation11 + $0x1c] sm:$0xf] %vm1990_vm6, %v1949_v45  ;;  %v4939_v31 = vld [vmem:[#allocation3 + $0xf0] sm:$0xff]  ;;  %v1969_v32 = vpack.c.bf16 %v4924_v25, %v4924_v25  ;;  %v4944_v33 = vld [vmem:[#allocation3 + $0xf8] sm:$0xff]  ;;  %v1970_v34 = vpack.c.bf16 %v4929_v27, %v4929_v27  ;;  %v4949_v35 = vld [vmem:[#allocation3 + $0x100] sm:$0xff]  ;;  %v1971_v56 = vpack.c.bf16 %v4934_v29, %v4934_v29 }
 0x4b3   : > { %1999 = vst.msk [vmem:[#allocation11 + $0x20] sm:$0xf] %vm1990_vm6, %v1950_v10  ;;  %v4954_v36 = vld [vmem:[#allocation3 + $0x108] sm:$0xff]  ;;  %v1972_v60 = vpack.c.bf16 %v4939_v31, %v4939_v31  ;;  %v4959_v62 = vld [vmem:[#allocation3 + $0x110] sm:$0xff]  ;;  %v1973_v44 = vpack.c.bf16 %v4944_v33, %v4944_v33  ;;  %v4964_v2 = vld [vmem:[#allocation3 + $0x118] sm:$0xff]  ;;  %v1974_v3 = vpack.c.bf16 %v4949_v35, %v4949_v35 }
 0x4b4   : > { %2000 = vst.msk [vmem:[#allocation11 + $0x24] sm:$0xf] %vm1990_vm6, %v1951_v43  ;;  %v4966_v6 = vld [vmem:[#allocation3 + $0x120] sm:$0xff]  ;;  %v1975_v42 = vpack.c.bf16 %v4954_v36, %v4954_v36  ;;  %v2233_v45 = vld [vmem:[#allocation5 + $0x10] sm:$0xff]  ;;  %v2234_v10 = vld [vmem:[#allocation5 + $0x18] sm:$0xff] }
 0x4b5   : > { %2001 = vst.msk [vmem:[#allocation11 + $0x28] sm:$0xf] %vm1990_vm6, %v1952_v22  ;;  %v2231_v43 = vld [vmem:[#allocation5] sm:$0xff]  ;;  %v4974_v22 = vld [vmem:[#allocation3 + $0x128] sm:$0xff] }
 0x4b6   : > { %2002 = vst.msk [vmem:[#allocation11 + $0x2c] sm:$0xf] %vm1990_vm6, %v1953_v61  ;;  %v1976_v61 = vpack.c.bf16 %v4959_v62, %v4959_v62 }
 0x4b7   : > { %2003 = vst.msk [vmem:[#allocation11 + $0x30] sm:$0xf] %vm1990_vm6, %v1954_v40  ;;  %v2236_v40 = vpack.c.bf16 %v2234_v10, %v2233_v45  ;;  %v5031_v10 = vld [vmem:[#allocation3 + $0x170] sm:$0xff] }
 0x4b8   : > { %2004 = vst.msk [vmem:[#allocation11 + $0x34] sm:$0xf] %vm1990_vm6, %v1955_v46  ;;  %v2232_v46 = vld [vmem:[#allocation5 + $0x8] sm:$0xff] }
 0x4b9   : > { %2005 = vst.msk [vmem:[#allocation11 + $0x38] sm:$0xf] %vm1990_vm6, %v1956_v12  ;;  %v4979_v12 = vld [vmem:[#allocation3 + $0x130] sm:$0xff]  ;;  %2436 = vmatpush.bf16.msra.mxu0 %v2236_v40  ;;  %3497 = vmatpush.bf16.msra.mxu1 %v2236_v40 }
 0x4ba   : > { %2006 = vst.msk [vmem:[#allocation11 + $0x3c] sm:$0xf] %vm1990_vm6, %v1957_v16  ;;  %v1977_v16 = vpack.c.bf16 %v4964_v2, %v4964_v2  ;;  %3498 = vmatpush.bf16.msra.mxu2 %v2236_v40  ;;  %3499 = vmatpush.bf16.msra.mxu3 %v2236_v40 }
 0x4bb   : > { %2007 = vst.msk [vmem:[#allocation11 + $0x40] sm:$0xf] %vm1990_vm6, %v1958_v19  ;;  %v4984_v19 = vld [vmem:[#allocation3 + $0x138] sm:$0xff] }
 0x4bc   : > { %2008 = vst.msk [vmem:[#allocation11 + $0x44] sm:$0xf] %vm1990_vm6, %v1959_v21  ;;  %v1978_v21 = vpack.c.bf16 %v4966_v6, %v4966_v6 }
 0x4bd   : > { %2009 = vst.msk [vmem:[#allocation11 + $0x48] sm:$0xf] %vm1990_vm6, %v1960_v15  ;;  %v2235_v15 = vpack.c.bf16 %v2232_v46, %v2231_v43 }
 0x4be   : > { %2010 = vst.msk [vmem:[#allocation11 + $0x4c] sm:$0xf] %vm1990_vm6, %v1961_v9  ;;  %v4989_v9 = vld [vmem:[#allocation3 + $0x140] sm:$0xff] }
 0x4bf   : > { %2011 = vst.msk [vmem:[#allocation11 + $0x50] sm:$0xf] %vm1990_vm6, %v1962_v53  ;;  %v1979_v53 = vpack.c.bf16 %v4974_v22, %v4974_v22  ;;  %2437 = vmatpush.bf16.msra.mxu0 %v2235_v15  ;;  %3500 = vmatpush.bf16.msra.mxu1 %v2235_v15 }
 0x4c0   : > { %2012 = vst.msk [vmem:[#allocation11 + $0x54] sm:$0xf] %vm1990_vm6, %v1963_v59  ;;  %v4994_v59 = vld [vmem:[#allocation3 + $0x148] sm:$0xff]  ;;  %3501 = vmatpush.bf16.msra.mxu2 %v2235_v15  ;;  %3502 = vmatpush.bf16.msra.mxu3 %v2235_v15 }
 0x4c1   : > { %2013 = vst.msk [vmem:[#allocation11 + $0x58] sm:$0xf] %vm1990_vm6, %v1964_v1  ;;  %v1980_v1 = vpack.c.bf16 %v4979_v12, %v4979_v12  ;;  %v2040_v15 = vld [vmem:[%s6033_s15 + $0x8] sm:$0xff] }
 0x4c2   : > { %2014 = vst.msk [vmem:[#allocation11 + $0x5c] sm:$0xf] %vm1990_vm6, %v1965_v24  ;;  %v4999_v24 = vld [vmem:[#allocation3 + $0x150] sm:$0xff] }
 0x4c3   : > { %2015 = vst.msk [vmem:[#allocation11 + $0x60] sm:$0xf] %vm1990_vm6, %v1966_v26  ;;  %v1981_v26 = vpack.c.bf16 %v4984_v19, %v4984_v19  ;;  %v1984_v45 = vpack.c.bf16 %v4999_v24, %v4999_v24 }
 0x4c4   : > { %2016 = vst.msk [vmem:[#allocation11 + $0x64] sm:$0xf] %vm1990_vm6, %v1967_v28  ;;  %v3434_v28 = vld [vmem:[%s6031_s22] sm:$0xff]  ;;  %s6035_s22 = sld [smem:[#allocation50_spill]] }
 0x4c5   : > { %2017 = vst.msk [vmem:[#allocation11 + $0x68] sm:$0xf] %vm1990_vm6, %v1968_v30  ;;  %v3440_v30 = vld [vmem:[%s6032_s16 + $0x30] sm:$0xff]  ;;  %3351 = vmatmul.msk.bf16.vlgmr.msra.gmra.mxu0 %vm2357_vm7, %v3434_v28 }
 0x4c6   : > { %2018 = vst.msk [vmem:[#allocation11 + $0x6c] sm:$0xf] %vm1990_vm6, %v1969_v32  ;;  %v5010_v32 = vld [vmem:[#allocation3 + $0x158] sm:$0xff]  ;;  %3357 = vmatmul.msk.bf16.vlgmr.msra.gmra.mxu1 %vm2357_vm7, %v3440_v30  ;;  %v2043_v30 = vld [vmem:[%s6033_s15 + $0x20] sm:$0xff] }
 0x4c7   : > { %2019 = vst.msk [vmem:[#allocation11 + $0x70] sm:$0xf] %vm1990_vm6, %v1970_v34  ;;  %v1982_v34 = vpack.c.bf16 %v4989_v9, %v4989_v9  ;;  %v1985_v43 = vpack.c.bf16 %v5010_v32, %v5010_v32 }
 0x4c8   : > { %2020 = vst.msk [vmem:[#allocation11 + $0x74] sm:$0xf] %vm1990_vm6, %v1971_v56  ;;  %v3446_v56 = vld [vmem:[%s6032_s16 + $0x60] sm:$0xff] }
 0x4c9   : > { %2021 = vst.msk [vmem:[#allocation11 + $0x78] sm:$0xf] %vm1990_vm6, %v1972_v60  ;;  %v3452_v60 = vld [vmem:[%s6032_s16 + $0x90] sm:$0xff]  ;;  %3363 = vmatmul.msk.bf16.vlgmr.msra.gmra.mxu2 %vm2357_vm7, %v3446_v56  ;;  %v2044_v56 = vld [vmem:[%s6033_s15 + $0x28] sm:$0xff] }
 0x4ca   : > { %2022 = vst.msk [vmem:[#allocation11 + $0x7c] sm:$0xf] %vm1990_vm6, %v1973_v44  ;;  %v5021_v44 = vld [vmem:[#allocation3 + $0x160] sm:$0xff]  ;;  %3369 = vmatmul.msk.bf16.vlgmr.msra.gmra.mxu3 %vm2357_vm7, %v3452_v60  ;;  %s6036_s8 = smov %s6035_s22 }
 0x4cb   : > { %2023 = vst.msk [vmem:[#allocation11 + $0x80] sm:$0xf] %vm1990_vm6, %v1974_v3  ;;  %v1983_v3 = vpack.c.bf16 %v4994_v59, %v4994_v59  ;;  %v1986_v40 = vpack.c.bf16 %v5021_v44, %v5021_v44 }
 0x4cc   : > { %2024 = vst.msk [vmem:[#allocation11 + $0x84] sm:$0xf] %vm1990_vm6, %v1975_v42  ;;  %v5026_v42 = vld [vmem:[#allocation3 + $0x168] sm:$0xff] }
 0x4cd   : > { %2025 = vst.msk [vmem:[#allocation11 + $0x88] sm:$0xf] %vm1990_vm6, %v1976_v61  ;;  %v5038_v61 = vld [vmem:[#allocation3 + $0x178] sm:$0xff]  ;;  %v1987_v46 = vpack.c.bf16 %v5026_v42, %v5026_v42 }
 0x4ce   : > { %2026 = vst.msk [vmem:[#allocation11 + $0x8c] sm:$0xf] %vm1990_vm6, %v1977_v16  ;;  %v2039_v16 = vld [vmem:[%s6033_s15] sm:$0xff] }
 0x4cf   : > { %2027 = vst.msk [vmem:[#allocation11 + $0x90] sm:$0xf] %vm1990_vm6, %v1978_v21  ;;  %v1988_v21 = vpack.c.bf16 %v5031_v10, %v5031_v10  ;;  %v2087_v28 = vadd.f32 %v2039_v16, %v4802_v37  ;;  %v2045_v37 = vld [vmem:[%s6033_s15 + $0x30] sm:$0xff] }
 0x4d0   : > { %2028 = vst.msk [vmem:[#allocation11 + $0x94] sm:$0xf] %vm1990_vm6, %v1979_v53  ;;  %v1989_v53 = vpack.c.bf16 %v5038_v61, %v5038_v61 }
 0x4d1   : > { %2029 = vst.msk [vmem:[#allocation11 + $0x98] sm:$0xf] %vm1990_vm6, %v1980_v1  ;;  %v2041_v1 = vld [vmem:[%s6033_s15 + $0x10] sm:$0xff] }
 0x4d2   : > { %2030 = vst.msk [vmem:[#allocation11 + $0x9c] sm:$0xf] %vm1990_vm6, %v1981_v26  ;;  %v2042_v26 = vld [vmem:[%s6033_s15 + $0x18] sm:$0xff]  ;;  %v2089_v60 = vadd.f32 %v2041_v1, %v4806_v52 }
 0x4d3   : > { %2031 = vst.msk [vmem:[#allocation11 + $0xa0] sm:$0xf] %vm1990_vm6, %v1982_v34  ;;  %v2088_v34 = vadd.f32 %v2040_v15, %v4804_v58  ;;  %v2046_v58 = vld [vmem:[%s6033_s15 + $0x38] sm:$0xff] }
 0x4d4   : > { %2032 = vst.msk [vmem:[#allocation11 + $0xa4] sm:$0xf] %vm1990_vm6, %v1983_v3  ;;  %v2090_v3 = vadd.f32 %v2042_v26, %v4808_v54  ;;  %v3453_v15 = vld [vmem:[%s6032_s16 + $0x98] sm:$0xff] }
 0x4d5   : > { %2033 = vst.msk [vmem:[#allocation11 + $0xa8] sm:$0xf] %vm1990_vm6, %v1984_v45  ;;  %v2091_v45 = vadd.f32 %v2043_v30, %v4810_v48  ;;  %v2093_v48 = vadd.f32 %v2045_v37, %v4820_v0  ;;  %v3435_v0 = vld [vmem:[%s6032_s16 + $0x8] sm:$0xff] }
 0x4d6   : > { %2034 = vst.msk [vmem:[#allocation11 + $0xac] sm:$0xf] %vm1990_vm6, %v1985_v43  ;;  %v2092_v43 = vadd.f32 %v2044_v56, %v4812_v50  ;;  %3352 = vmatmul.msk.bf16.gmra.mxu0 %vm2357_vm7, %v3435_v0 }
 0x4d7   : > { %2035 = vst.msk [vmem:[#allocation11 + $0xb0] sm:$0xf] %vm1990_vm6, %v1986_v40  ;;  %v2094_v40 = vadd.f32 %v2046_v58, %v4824_v4  ;;  %v3447_v4 = vld [vmem:[%s6032_s16 + $0x68] sm:$0xff] }
 0x4d8   : > { %2036 = vst.msk [vmem:[#allocation11 + $0xb4] sm:$0xf] %vm1990_vm6, %v1987_v46  ;;  %v3441_v46 = vld [vmem:[%s6032_s16 + $0x38] sm:$0xff] }
 0x4d9   : > { %2037 = vst.msk [vmem:[#allocation11 + $0xb8] sm:$0xf] %vm1990_vm6, %v1988_v21  ;;  %3358 = vmatmul.msk.bf16.gmra.mxu1 %vm2357_vm7, %v3441_v46  ;;  %3364 = vmatmul.msk.bf16.gmra.mxu2 %vm2357_vm7, %v3447_v4  ;;  %v3454_v46 = vld [vmem:[%s6032_s16 + $0xa0] sm:$0xff] }
 0x4da   : > { %2038 = vst.msk [vmem:[#allocation11 + $0xbc] sm:$0xf] %vm1990_vm6, %v1989_v53  ;;  %3370 = vmatmul.msk.bf16.gmra.mxu3 %vm2357_vm7, %v3453_v15 }
 0x4db   : > { %2135 = vst.msk [vmem:[%s6034_s20] sm:$0xff] %vm1424_vm3, %v2087_v28 }
 0x4e2   : > { %v2047_v52 = vld [vmem:[%s6033_s15 + $0x40] sm:$0xff] }
 0x4e3   : > { %2136 = vst.msk [vmem:[%s6034_s20 + $0x8] sm:$0xff] %vm1424_vm3, %v2088_v34  ;;  %v2095_v21 = vadd.f32 %v2047_v52, %v4829_v51 }
 0x4ea   : > { %v2048_v54 = vld [vmem:[%s6033_s15 + $0x48] sm:$0xff]  ;;  %3371 = vmatmul.msk.bf16.gmra.mxu3 %vm2357_vm7, %v3454_v46 }
 0x4eb   : > { %2137 = vst.msk [vmem:[%s6034_s20 + $0x10] sm:$0xff] %vm1424_vm3, %v2089_v60  ;;  %v2096_v1 = vadd.f32 %v2048_v54, %v4834_v5 }
 0x4f2   : > { %v2049_v50 = vld [vmem:[%s6033_s15 + $0x50] sm:$0xff] }
 0x4f3   : > { %2138 = vst.msk [vmem:[%s6034_s20 + $0x18] sm:$0xff] %vm1424_vm3, %v2090_v3  ;;  %v2097_v26 = vadd.f32 %v2049_v50, %v4839_v7  ;;  %v3442_v50 = vld [vmem:[%s6032_s16 + $0x40] sm:$0xff] }
 0x4f4   : > { %3359 = vmatmul.msk.bf16.gmra.mxu1 %vm2357_vm7, %v3442_v50 }
 0x4fa   : > { %v2050_v16 = vld [vmem:[%s6033_s15 + $0x58] sm:$0xff] }
 0x4fb   : > { %2139 = vst.msk [vmem:[%s6034_s20 + $0x20] sm:$0xff] %vm1424_vm3, %v2091_v45  ;;  %v2098_v28 = vadd.f32 %v2050_v16, %v4844_v47 }
 0x502   : > { %v2051_v53 = vld [vmem:[%s6033_s15 + $0x60] sm:$0xff] }
 0x503   : > { %2140 = vst.msk [vmem:[%s6034_s20 + $0x28] sm:$0xff] %vm1424_vm3, %v2092_v43  ;;  %v2099_v30 = vadd.f32 %v2051_v53, %v4849_v41 }
 0x50a   : > { %v2052_v51 = vld [vmem:[%s6033_s15 + $0x68] sm:$0xff] }
 0x50b   : > { %2141 = vst.msk [vmem:[%s6034_s20 + $0x30] sm:$0xff] %vm1424_vm3, %v2093_v48  ;;  %v2100_v34 = vadd.f32 %v2052_v51, %v4854_v18 }
 0x512   : > { %v2053_v5 = vld [vmem:[%s6033_s15 + $0x70] sm:$0xff] }
 0x513   : > { %2142 = vst.msk [vmem:[%s6034_s20 + $0x38] sm:$0xff] %vm1424_vm3, %v2094_v40  ;;  %v2101_v56 = vadd.f32 %v2053_v5, %v4859_v38 }
 0x51a   : > { %v2054_v7 = vld [vmem:[%s6033_s15 + $0x78] sm:$0xff] }
 0x51b   : > { %2143 = vst.msk [vmem:[%s6034_s20 + $0x40] sm:$0xff] %vm1424_vm3, %v2095_v21  ;;  %v2102_v60 = vadd.f32 %v2054_v7, %v4864_v57 }
 0x522   : > { %v2055_v47 = vld [vmem:[%s6033_s15 + $0x80] sm:$0xff] }
 0x523   : > { %2144 = vst.msk [vmem:[%s6034_s20 + $0x48] sm:$0xff] %vm1424_vm3, %v2096_v1  ;;  %v2103_v37 = vadd.f32 %v2055_v47, %v4869_v39 }
 0x52a   : > { %v2056_v41 = vld [vmem:[%s6033_s15 + $0x88] sm:$0xff] }
 0x52b   : > { %2145 = vst.msk [vmem:[%s6034_s20 + $0x50] sm:$0xff] %vm1424_vm3, %v2097_v26  ;;  %v2104_v3 = vadd.f32 %v2056_v41, %v4874_v8 }
 0x532   : > { %v2057_v18 = vld [vmem:[%s6033_s15 + $0x90] sm:$0xff] }
 0x533   : > { %2146 = vst.msk [vmem:[%s6034_s20 + $0x58] sm:$0xff] %vm1424_vm3, %v2098_v28  ;;  %v2105_v58 = vadd.f32 %v2057_v18, %v4879_v14  ;;  %v3443_v18 = vld [vmem:[%s6032_s16 + $0x48] sm:$0xff] }
 0x534   : > { %3360 = vmatmul.msk.bf16.gmra.mxu1 %vm2357_vm7, %v3443_v18 }
 0x53a   : > { %v2058_v38 = vld [vmem:[%s6033_s15 + $0x98] sm:$0xff] }
 0x53b   : > { %2147 = vst.msk [vmem:[%s6034_s20 + $0x60] sm:$0xff] %vm1424_vm3, %v2099_v30  ;;  %v2106_v45 = vadd.f32 %v2058_v38, %v4884_v17 }
 0x542   : > { %v2059_v57 = vld [vmem:[%s6033_s15 + $0xa0] sm:$0xff] }
 0x543   : > { %2148 = vst.msk [vmem:[%s6034_s20 + $0x68] sm:$0xff] %vm1424_vm3, %v2100_v34  ;;  %v2107_v52 = vadd.f32 %v2059_v57, %v4889_v20 }
 0x54a   : > { %v2060_v39 = vld [vmem:[%s6033_s15 + $0xa8] sm:$0xff] }
 0x54b   : > { %2149 = vst.msk [vmem:[%s6034_s20 + $0x70] sm:$0xff] %vm1424_vm3, %v2101_v56  ;;  %v2108_v43 = vadd.f32 %v2060_v39, %v4894_v13 }
 0x552   : > { %v2061_v8 = vld [vmem:[%s6033_s15 + $0xb0] sm:$0xff] }
 0x553   : > { %2150 = vst.msk [vmem:[%s6034_s20 + $0x78] sm:$0xff] %vm1424_vm3, %v2102_v60  ;;  %v2109_v54 = vadd.f32 %v2061_v8, %v4899_v23  ;;  %v3436_v23 = vld [vmem:[%s6032_s16 + $0x10] sm:$0xff] }
 0x554   : > { %3353 = vmatmul.msk.bf16.gmra.mxu0 %vm2357_vm7, %v3436_v23  ;;  %v2469_v23 = vpop.f32.mrf.mxu1 }
 0x55a   : > { %v2062_v14 = vld [vmem:[%s6033_s15 + $0xb8] sm:$0xff] }
 0x55b   : > { %2151 = vst.msk [vmem:[%s6034_s20 + $0x80] sm:$0xff] %vm1424_vm3, %v2103_v37  ;;  %v2110_v48 = vadd.f32 %v2062_v14, %v4904_v11  ;;  %v3448_v11 = vld [vmem:[%s6032_s16 + $0x70] sm:$0xff]  ;;  %v3455_v37 = vld [vmem:[%s6032_s16 + $0xa8] sm:$0xff] }
 0x55c   : > { %3365 = vmatmul.msk.bf16.gmra.mxu2 %vm2357_vm7, %v3448_v11  ;;  %3372 = vmatmul.msk.bf16.gmra.mxu3 %vm2357_vm7, %v3455_v37  ;;  %v3456_v14 = vld [vmem:[%s6032_s16 + $0xb0] sm:$0xff] }
 0x562   : > { %v2063_v17 = vld [vmem:[%s6033_s15 + $0xc0] sm:$0xff] }
 0x563   : > { %2152 = vst.msk [vmem:[%s6034_s20 + $0x88] sm:$0xff] %vm1424_vm3, %v2104_v3  ;;  %v2111_v0 = vadd.f32 %v2063_v17, %v4909_v55  ;;  %v3445_v17 = vld [vmem:[%s6032_s16 + $0x58] sm:$0xff] }
 0x56a   : > { %v2064_v20 = vld [vmem:[%s6033_s15 + $0xc8] sm:$0xff] }
 0x56b   : > { %2153 = vst.msk [vmem:[%s6034_s20 + $0x90] sm:$0xff] %vm1424_vm3, %v2105_v58  ;;  %v2112_v21 = vadd.f32 %v2064_v20, %v4914_v63  ;;  %v3457_v20 = vld [vmem:[%s6032_s16 + $0xb8] sm:$0xff] }
 0x56c   : > { %3373 = vmatmul.msk.bf16.gmra.mxu3 %vm2357_vm7, %v3456_v14 }
 0x572   : > { %v2065_v13 = vld [vmem:[%s6033_s15 + $0xd0] sm:$0xff] }
 0x573   : > { %2154 = vst.msk [vmem:[%s6034_s20 + $0x98] sm:$0xff] %vm1424_vm3, %v2106_v45  ;;  %v2113_v4 = vadd.f32 %v2065_v13, %v4919_v49  ;;  %v2571_v13 = vld [vmem:[%s6036_s8 + $0x60] sm:$0xff] }
 0x57a   : > { %v2066_v40 = vld [vmem:[%s6033_s15 + $0xd8] sm:$0xff] }
 0x57b   : > { %2155 = vst.msk [vmem:[%s6034_s20 + $0xa0] sm:$0xff] %vm1424_vm3, %v2107_v52  ;;  %v2114_v15 = vadd.f32 %v2066_v40, %v4924_v25  ;;  %v3439_v52 = vld [vmem:[%s6032_s16 + $0x28] sm:$0xff]  ;;  %v2619_v40 = vadd.f32 %v2571_v13, %v2469_v23 }
 0x57c   : > { %3374 = vmatmul.msk.bf16.gmra.mxu3 %vm2357_vm7, %v3457_v20 }
 0x582   : > { %v2067_v16 = vld [vmem:[%s6033_s15 + $0xe0] sm:$0xff] }
 0x583   : > { %2156 = vst.msk [vmem:[%s6034_s20 + $0xa8] sm:$0xff] %vm1424_vm3, %v2108_v43  ;;  %v2115_v53 = vadd.f32 %v2067_v16, %v4929_v27  ;;  %v3451_v43 = vld [vmem:[%s6032_s16 + $0x88] sm:$0xff] }
 0x58a   : > { %v2068_v55 = vld [vmem:[%s6033_s15 + $0xe8] sm:$0xff] }
 0x58b   : > { %2157 = vst.msk [vmem:[%s6034_s20 + $0xb0] sm:$0xff] %vm1424_vm3, %v2109_v54  ;;  %v2116_v1 = vadd.f32 %v2068_v55, %v4934_v29  ;;  %v2559_v54 = vld [vmem:[%s6035_s22] sm:$0xff]  ;;  %v2529_v55 = vpop.f32.mrf.mxu3 }
 0x58c   : > { %2667 = vst.msk [vmem:[%s6037_s2 + $0x60] sm:$0xff] %vm1424_vm3, %v2619_v40 }
 0x592   : > { %v2069_v63 = vld [vmem:[%s6033_s15 + $0xf0] sm:$0xff] }
 0x593   : > { %2158 = vst.msk [vmem:[%s6034_s20 + $0xb8] sm:$0xff] %vm1424_vm3, %v2110_v48  ;;  %v2117_v51 = vadd.f32 %v2069_v63, %v4939_v31  ;;  %v2439_v48 = vpop.f32.mrf.mxu0 }
 0x594   : > { %v2607_v50 = vadd.f32 %v2559_v54, %v2439_v48 }
 0x596   : > { %2655 = vst.msk [vmem:[%s6037_s2] sm:$0xff] %vm1424_vm3, %v2607_v50 }
 0x59a   : > { %v2070_v49 = vld [vmem:[%s6033_s15 + $0xf8] sm:$0xff] }
 0x59b   : > { %2159 = vst.msk [vmem:[%s6034_s20 + $0xc0] sm:$0xff] %vm1424_vm3, %v2111_v0  ;;  %v2118_v26 = vadd.f32 %v2070_v49, %v4944_v33  ;;  %v2471_v49 = vpop.f32.mrf.mxu1 }
 0x59d   : > { %v2583_v0 = vld [vmem:[%s6036_s8 + $0xc0] sm:$0xff]  ;;  %v2560_v46 = vld [vmem:[%s6036_s8 + $0x8] sm:$0xff] }
 0x59e   : > { %v2595_v11 = vld [vmem:[%s6036_s8 + $0x120] sm:$0xff]  ;;  %v2572_v16 = vld [vmem:[%s6036_s8 + $0x68] sm:$0xff] }
 0x59f   : > { %v2643_v63 = vadd.f32 %v2595_v11, %v2529_v55 }
 0x5a1   : > { %2691 = vst.msk [vmem:[%s6037_s2 + $0x120] sm:$0xff] %vm1424_vm3, %v2643_v63 }
 0x5a2   : > { %v2071_v25 = vld [vmem:[%s6033_s15 + $0x100] sm:$0xff] }
 0x5a3   : > { %2160 = vst.msk [vmem:[%s6034_s20 + $0xc8] sm:$0xff] %vm1424_vm3, %v2112_v21  ;;  %v2119_v5 = vadd.f32 %v2071_v25, %v4949_v35  ;;  %v2499_v21 = vpop.f32.mrf.mxu2  ;;  %v2620_v25 = vadd.f32 %v2572_v16, %v2471_v49 }
 0x5a5   : > { %2668 = vst.msk [vmem:[%s6037_s2 + $0x68] sm:$0xff] %vm1424_vm3, %v2620_v25 }
 0x5aa   : > { %v2072_v27 = vld [vmem:[%s6033_s15 + $0x108] sm:$0xff] }
 0x5ab   : > { %2161 = vst.msk [vmem:[%s6034_s20 + $0xd0] sm:$0xff] %vm1424_vm3, %v2113_v4  ;;  %v2120_v28 = vadd.f32 %v2072_v27, %v4954_v36  ;;  %v2631_v4 = vadd.f32 %v2583_v0, %v2499_v21 }
 0x5ad   : > { %2679 = vst.msk [vmem:[%s6037_s2 + $0xc0] sm:$0xff] %vm1424_vm3, %v2631_v4 }
 0x5b2   : > { %v2073_v29 = vld [vmem:[%s6033_s15 + $0x110] sm:$0xff] }
 0x5b3   : > { %2162 = vst.msk [vmem:[%s6034_s20 + $0xd8] sm:$0xff] %vm1424_vm3, %v2114_v15  ;;  %v2121_v7 = vadd.f32 %v2073_v29, %v4959_v62  ;;  %v2441_v15 = vpop.f32.mrf.mxu0 }
 0x5ba   : > { %v2074_v31 = vld [vmem:[%s6033_s15 + $0x118] sm:$0xff] }
 0x5bb   : > { %2163 = vst.msk [vmem:[%s6034_s20 + $0xe0] sm:$0xff] %vm1424_vm3, %v2115_v53  ;;  %v2122_v30 = vadd.f32 %v2074_v31, %v4964_v2  ;;  %v2608_v53 = vadd.f32 %v2560_v46, %v2441_v15  ;;  %v2531_v31 = vpop.f32.mrf.mxu3 }
 0x5bd   : > { %2656 = vst.msk [vmem:[%s6037_s2 + $0x8] sm:$0xff] %vm1424_vm3, %v2608_v53 }
 0x5c2   : > { %v2075_v33 = vld [vmem:[%s6033_s15 + $0x120] sm:$0xff] }
 0x5c3   : > { %2164 = vst.msk [vmem:[%s6034_s20 + $0xe8] sm:$0xff] %vm1424_vm3, %v2116_v1  ;;  %v2123_v47 = vadd.f32 %v2075_v33, %v4966_v6 }
 0x5c4   : > { %v2584_v1 = vld [vmem:[%s6036_s8 + $0xc8] sm:$0xff]  ;;  %v2573_v29 = vld [vmem:[%s6036_s8 + $0x70] sm:$0xff] }
 0x5c5   : > { %v2596_v27 = vld [vmem:[%s6036_s8 + $0x128] sm:$0xff] }
 0x5c6   : > { %v2644_v33 = vadd.f32 %v2596_v27, %v2531_v31 }
 0x5ca   : > { %v2076_v35 = vld [vmem:[%s6033_s15 + $0x128] sm:$0xff] }
 0x5cb   : > { %2165 = vst.msk [vmem:[%s6034_s20 + $0xf0] sm:$0xff] %vm1424_vm3, %v2117_v51  ;;  %v2124_v34 = vadd.f32 %v2076_v35, %v4974_v22  ;;  %v2561_v51 = vld [vmem:[%s6036_s8 + $0x10] sm:$0xff]  ;;  %v2474_v35 = vpop.f32.mrf.mxu1 }
 0x5cc   : > { %2692 = vst.msk [vmem:[%s6037_s2 + $0x128] sm:$0xff] %vm1424_vm3, %v2644_v33 }
 0x5d2   : > { %v2077_v36 = vld [vmem:[%s6033_s15 + $0x130] sm:$0xff] }
 0x5d3   : > { %2166 = vst.msk [vmem:[%s6034_s20 + $0xf8] sm:$0xff] %vm1424_vm3, %v2118_v26  ;;  %v2125_v41 = vadd.f32 %v2077_v36, %v4979_v12  ;;  %v3437_v12 = vld [vmem:[%s6032_s16 + $0x18] sm:$0xff]  ;;  %v2501_v26 = vpop.f32.mrf.mxu2  ;;  %v2621_v36 = vadd.f32 %v2573_v29, %v2474_v35 }
 0x5d4   : > { %3354 = vmatmul.msk.bf16.gmra.mxu0 %vm2357_vm7, %v3437_v12  ;;  %v2476_v12 = vpop.f32.mrf.mxu1 }
 0x5d5   : > { %2669 = vst.msk [vmem:[%s6037_s2 + $0x70] sm:$0xff] %vm1424_vm3, %v2621_v36 }
 0x5da   : > { %v2078_v62 = vld [vmem:[%s6033_s15 + $0x138] sm:$0xff] }
 0x5db   : > { %2167 = vst.msk [vmem:[%s6034_s20 + $0x100] sm:$0xff] %vm1424_vm3, %v2119_v5  ;;  %v2126_v56 = vadd.f32 %v2078_v62, %v4984_v19  ;;  %v3449_v19 = vld [vmem:[%s6032_s16 + $0x78] sm:$0xff]  ;;  %v2632_v5 = vadd.f32 %v2584_v1, %v2501_v26 }
 0x5dc   : > { %3366 = vmatmul.msk.bf16.gmra.mxu2 %vm2357_vm7, %v3449_v19 }
 0x5dd   : > { %2680 = vst.msk [vmem:[%s6037_s2 + $0xc8] sm:$0xff] %vm1424_vm3, %v2632_v5 }
 0x5e2   : > { %v2079_v2 = vld [vmem:[%s6033_s15 + $0x140] sm:$0xff] }
 0x5e3   : > { %2168 = vst.msk [vmem:[%s6034_s20 + $0x108] sm:$0xff] %vm1424_vm3, %v2120_v28  ;;  %v2127_v38 = vadd.f32 %v2079_v2, %v4989_v9  ;;  %v2444_v28 = vpop.f32.mrf.mxu0 }
 0x5ea   : > { %v2080_v6 = vld [vmem:[%s6033_s15 + $0x148] sm:$0xff] }
 0x5eb   : > { %2169 = vst.msk [vmem:[%s6034_s20 + $0x110] sm:$0xff] %vm1424_vm3, %v2121_v7  ;;  %v2128_v3 = vadd.f32 %v2080_v6, %v4994_v59  ;;  %v2609_v7 = vadd.f32 %v2561_v51, %v2444_v28  ;;  %v2534_v6 = vpop.f32.mrf.mxu3 }
 0x5ed   : > { %2657 = vst.msk [vmem:[%s6037_s2 + $0x10] sm:$0xff] %vm1424_vm3, %v2609_v7 }
 0x5f2   : > { %v2081_v22 = vld [vmem:[%s6033_s15 + $0x150] sm:$0xff] }
 0x5f3   : > { %2170 = vst.msk [vmem:[%s6034_s20 + $0x118] sm:$0xff] %vm1424_vm3, %v2122_v30  ;;  %v2129_v39 = vadd.f32 %v2081_v22, %v4999_v24 }
 0x5f4   : > { %v2585_v30 = vld [vmem:[%s6036_s8 + $0xd0] sm:$0xff]  ;;  %v2574_v2 = vld [vmem:[%s6036_s8 + $0x78] sm:$0xff] }
 0x5f5   : > { %v2597_v62 = vld [vmem:[%s6036_s8 + $0x130] sm:$0xff] }
 0x5f6   : > { %v2645_v22 = vadd.f32 %v2597_v62, %v2534_v6 }
 0x5fa   : > { %v2082_v60 = vld [vmem:[%s6033_s15 + $0x158] sm:$0xff] }
 0x5fb   : > { %2171 = vst.msk [vmem:[%s6034_s20 + $0x120] sm:$0xff] %vm1424_vm3, %v2123_v47  ;;  %v2130_v58 = vadd.f32 %v2082_v60, %v5010_v32  ;;  %v2562_v47 = vld [vmem:[%s6036_s8 + $0x18] sm:$0xff]  ;;  %v2622_v60 = vadd.f32 %v2574_v2, %v2476_v12 }
 0x5fc   : > { %2693 = vst.msk [vmem:[%s6037_s2 + $0x130] sm:$0xff] %vm1424_vm3, %v2645_v22 }
 0x5fd   : > { %2670 = vst.msk [vmem:[%s6037_s2 + $0x78] sm:$0xff] %vm1424_vm3, %v2622_v60 }
 0x602   : > { %v2083_v57 = vld [vmem:[%s6033_s15 + $0x160] sm:$0xff] }
 0x603   : > { %2172 = vst.msk [vmem:[%s6034_s20 + $0x128] sm:$0xff] %vm1424_vm3, %v2124_v34  ;;  %v2131_v8 = vadd.f32 %v2083_v57, %v5021_v44  ;;  %v2504_v34 = vpop.f32.mrf.mxu2 }
 0x60a   : > { %v2084_v9 = vld [vmem:[%s6033_s15 + $0x168] sm:$0xff] }
 0x60b   : > { %2173 = vst.msk [vmem:[%s6034_s20 + $0x130] sm:$0xff] %vm1424_vm3, %v2125_v41  ;;  %v2132_v32 = vadd.f32 %v2084_v9, %v5026_v42  ;;  %v3438_v42 = vld [vmem:[%s6032_s16 + $0x20] sm:$0xff]  ;;  %v2633_v41 = vadd.f32 %v2585_v30, %v2504_v34  ;;  %v2536_v9 = vpop.f32.mrf.mxu3 }
 0x60c   : > { %3355 = vmatmul.msk.bf16.gmra.mxu0 %vm2357_vm7, %v3438_v42 }
 0x60d   : > { %2681 = vst.msk [vmem:[%s6037_s2 + $0xd0] sm:$0xff] %vm1424_vm3, %v2633_v41 }
 0x612   : > { %v2085_v59 = vld [vmem:[%s6033_s15 + $0x170] sm:$0xff] }
 0x613   : > { %2174 = vst.msk [vmem:[%s6034_s20 + $0x138] sm:$0xff] %vm1424_vm3, %v2126_v56  ;;  %v2133_v45 = vadd.f32 %v2085_v59, %v5031_v10  ;;  %v3444_v10 = vld [vmem:[%s6032_s16 + $0x50] sm:$0xff]  ;;  %v2446_v56 = vpop.f32.mrf.mxu0  ;;  %v2539_v14 = vpop.f32.mrf.mxu3 }
 0x614   : > { %3361 = vmatmul.msk.bf16.gmra.mxu1 %vm2357_vm7, %v3444_v10  ;;  %v2610_v18 = vadd.f32 %v2562_v47, %v2446_v56 }
 0x616   : > { %2658 = vst.msk [vmem:[%s6037_s2 + $0x18] sm:$0xff] %vm1424_vm3, %v2610_v18 }
 0x61a   : > { %v2086_v24 = vld [vmem:[%s6033_s15 + $0x178] sm:$0xff] }
 0x61b   : > { %2175 = vst.msk [vmem:[%s6034_s20 + $0x140] sm:$0xff] %vm1424_vm3, %v2127_v38  ;;  %v2134_v44 = vadd.f32 %v2086_v24, %v5038_v61  ;;  %v3450_v61 = vld [vmem:[%s6032_s16 + $0x80] sm:$0xff]  ;;  %v2479_v24 = vpop.f32.mrf.mxu1  ;;  %v2541_v11 = vpop.f32.mrf.mxu3 }
 0x61c   : > { %2176 = vst.msk [vmem:[%s6034_s20 + $0x148] sm:$0xff] %vm1424_vm3, %v2128_v3  ;;  %3367 = vmatmul.msk.bf16.gmra.mxu2 %vm2357_vm7, %v3450_v61  ;;  %3356 = vmatmul.msk.bf16.gmra.mxu0 %vm2357_vm7, %v3439_v52  ;;  %v2506_v3 = vpop.f32.mrf.mxu2 }
 0x61d   : > { %2177 = vst.msk [vmem:[%s6034_s20 + $0x150] sm:$0xff] %vm1424_vm3, %v2129_v39  ;;  %v2586_v38 = vld [vmem:[%s6036_s8 + $0xd8] sm:$0xff]  ;;  %v2563_v37 = vld [vmem:[%s6036_s8 + $0x20] sm:$0xff] }
 0x61e   : > { %2178 = vst.msk [vmem:[%s6034_s20 + $0x158] sm:$0xff] %vm1424_vm3, %v2130_v58  ;;  %v2598_v19 = vld [vmem:[%s6036_s8 + $0x138] sm:$0xff]  ;;  %v2575_v57 = vld [vmem:[%s6036_s8 + $0x80] sm:$0xff]  ;;  %v2634_v39 = vadd.f32 %v2586_v38, %v2506_v3  ;;  %v2449_v58 = vpop.f32.mrf.mxu0 }
 0x61f   : > { %2179 = vst.msk [vmem:[%s6034_s20 + $0x160] sm:$0xff] %vm1424_vm3, %v2131_v8  ;;  %v2646_v59 = vadd.f32 %v2598_v19, %v2536_v9  ;;  %v2611_v8 = vadd.f32 %v2563_v37, %v2449_v58 }
 0x620   : > { %2180 = vst.msk [vmem:[%s6034_s20 + $0x168] sm:$0xff] %vm1424_vm3, %v2132_v32  ;;  %v2623_v32 = vadd.f32 %v2575_v57, %v2479_v24 }
 0x621   : > { %2181 = vst.msk [vmem:[%s6034_s20 + $0x170] sm:$0xff] %vm1424_vm3, %v2133_v45 }
 0x622   : > { %2182 = vst.msk [vmem:[%s6034_s20 + $0x178] sm:$0xff] %vm1424_vm3, %v2134_v44 }
 0x623   : > { %2682 = vst.msk [vmem:[%s6037_s2 + $0xd8] sm:$0xff] %vm1424_vm3, %v2634_v39  ;;  %v2481_v20 = vpop.f32.mrf.mxu1  ;;  %v2544_v27 = vpop.f32.mrf.mxu3 }
 0x624   : > { %3362 = vmatmul.msk.bf16.gmra.mxu1 %vm2357_vm7, %v3445_v17  ;;  %2694 = vst.msk [vmem:[%s6037_s2 + $0x138] sm:$0xff] %vm1424_vm3, %v2646_v59  ;;  %v2509_v61 = vpop.f32.mrf.mxu2 }
 0x625   : > { %2659 = vst.msk [vmem:[%s6037_s2 + $0x20] sm:$0xff] %vm1424_vm3, %v2611_v8 }
 0x626   : > { %2671 = vst.msk [vmem:[%s6037_s2 + $0x80] sm:$0xff] %vm1424_vm3, %v2623_v32 }
 0x62b   : > { %v2484_v55 = vpop.f32.mrf.mxu1  ;;  %v2546_v62 = vpop.f32.mrf.mxu3 }
 0x62c   : > { %3368 = vmatmul.msk.bf16.gmra.mxu2 %vm2357_vm7, %v3451_v43  ;;  %v2451_v43 = vpop.f32.mrf.mxu0  ;;  %v2511_v0 = vpop.f32.mrf.mxu2 }
 0x62d   : > { %v2587_v45 = vld [vmem:[%s6036_s8 + $0xe0] sm:$0xff]  ;;  %v2564_v42 = vld [vmem:[%s6036_s8 + $0x28] sm:$0xff] }
 0x62e   : > { %v2599_v44 = vld [vmem:[%s6036_s8 + $0x140] sm:$0xff]  ;;  %v2576_v10 = vld [vmem:[%s6036_s8 + $0x88] sm:$0xff]  ;;  %v2635_v52 = vadd.f32 %v2587_v45, %v2509_v61  ;;  %v2612_v54 = vadd.f32 %v2564_v42, %v2451_v43 }
 0x62f   : > { %v2647_v17 = vadd.f32 %v2599_v44, %v2539_v14  ;;  %v2624_v13 = vadd.f32 %v2576_v10, %v2481_v20 }
 0x630   : > { %2683 = vst.msk [vmem:[%s6037_s2 + $0xe0] sm:$0xff] %vm1424_vm3, %v2635_v52 }
 0x631   : > { %2695 = vst.msk [vmem:[%s6037_s2 + $0x140] sm:$0xff] %vm1424_vm3, %v2647_v17 }
 0x632   : > { %2660 = vst.msk [vmem:[%s6037_s2 + $0x28] sm:$0xff] %vm1424_vm3, %v2612_v54 }
 0x633   : > { %2672 = vst.msk [vmem:[%s6037_s2 + $0x88] sm:$0xff] %vm1424_vm3, %v2624_v13  ;;  %v2486_v31 = vpop.f32.mrf.mxu1  ;;  %v2549_v19 = vpop.f32.mrf.mxu3 }
 0x63a   : > { %v2588_v48 = vld [vmem:[%s6036_s8 + $0xe8] sm:$0xff]  ;;  %v2565_v50 = vld [vmem:[%s6036_s8 + $0x30] sm:$0xff] }
 0x63b   : > { %v2600_v23 = vld [vmem:[%s6036_s8 + $0x148] sm:$0xff]  ;;  %v2577_v40 = vld [vmem:[%s6036_s8 + $0x90] sm:$0xff]  ;;  %v2636_v46 = vadd.f32 %v2588_v48, %v2511_v0  ;;  %v2551_v44 = vpop.f32.mrf.mxu3 }
 0x63c   : > { %v2648_v16 = vadd.f32 %v2600_v23, %v2541_v11  ;;  %v2625_v63 = vadd.f32 %v2577_v40, %v2484_v55 }
 0x63d   : > { %2684 = vst.msk [vmem:[%s6037_s2 + $0xe8] sm:$0xff] %vm1424_vm3, %v2636_v46 }
 0x63e   : > { %2696 = vst.msk [vmem:[%s6037_s2 + $0x148] sm:$0xff] %vm1424_vm3, %v2648_v16 }
 0x63f   : > { %2673 = vst.msk [vmem:[%s6037_s2 + $0x90] sm:$0xff] %vm1424_vm3, %v2625_v63 }
 0x643   : > { %v2554_v23 = vpop.f32.mrf.mxu3 }
 0x64b   : > { %v2556_v63 = vpop.f32.mrf.mxu3 }
 0x651   : > { %v2454_v21 = vpop.f32.mrf.mxu0 }
 0x652   : > { %v2613_v4 = vadd.f32 %v2565_v50, %v2454_v21 }
 0x654   : > { %2661 = vst.msk [vmem:[%s6037_s2 + $0x30] sm:$0xff] %vm1424_vm3, %v2613_v4 }
 0x659   : > { %v2456_v26 = vpop.f32.mrf.mxu0 }
 0x65b   : > { %v2589_v15 = vld [vmem:[%s6036_s8 + $0xf0] sm:$0xff]  ;;  %v2566_v53 = vld [vmem:[%s6036_s8 + $0x38] sm:$0xff] }
 0x65c   : > { %v2601_v49 = vld [vmem:[%s6036_s8 + $0x150] sm:$0xff]  ;;  %v2578_v25 = vld [vmem:[%s6036_s8 + $0x98] sm:$0xff]  ;;  %v2614_v5 = vadd.f32 %v2566_v53, %v2456_v26 }
 0x65d   : > { %v2649_v29 = vadd.f32 %v2601_v49, %v2544_v27  ;;  %v2626_v33 = vadd.f32 %v2578_v25, %v2486_v31 }
 0x65e   : > { %2662 = vst.msk [vmem:[%s6037_s2 + $0x38] sm:$0xff] %vm1424_vm3, %v2614_v5 }
 0x65f   : > { %v2514_v1 = vpop.f32.mrf.mxu2  ;;  %2697 = vst.msk [vmem:[%s6037_s2 + $0x150] sm:$0xff] %vm1424_vm3, %v2649_v29 }
 0x660   : > { %v2637_v51 = vadd.f32 %v2589_v15, %v2514_v1  ;;  %2674 = vst.msk [vmem:[%s6037_s2 + $0x98] sm:$0xff] %vm1424_vm3, %v2626_v33 }
 0x662   : > { %2685 = vst.msk [vmem:[%s6037_s2 + $0xf0] sm:$0xff] %vm1424_vm3, %v2637_v51 }
 0x667   : > { %v2516_v30 = vpop.f32.mrf.mxu2 }
 0x669   : > { %v2590_v28 = vld [vmem:[%s6036_s8 + $0xf8] sm:$0xff]  ;;  %v2567_v7 = vld [vmem:[%s6036_s8 + $0x40] sm:$0xff] }
 0x66a   : > { %v2602_v35 = vld [vmem:[%s6036_s8 + $0x158] sm:$0xff]  ;;  %v2579_v36 = vld [vmem:[%s6036_s8 + $0xa0] sm:$0xff]  ;;  %v2638_v47 = vadd.f32 %v2590_v28, %v2516_v30 }
 0x66b   : > { %v2650_v2 = vadd.f32 %v2602_v35, %v2546_v62 }
 0x66c   : > { %2686 = vst.msk [vmem:[%s6037_s2 + $0xf8] sm:$0xff] %vm1424_vm3, %v2638_v47 }
 0x66d   : > { %2698 = vst.msk [vmem:[%s6037_s2 + $0x158] sm:$0xff] %vm1424_vm3, %v2650_v2 }
 0x689   : > { %v2459_v34 = vpop.f32.mrf.mxu0 }
 0x68a   : > { %v2615_v41 = vadd.f32 %v2567_v7, %v2459_v34 }
 0x68c   : > { %2663 = vst.msk [vmem:[%s6037_s2 + $0x40] sm:$0xff] %vm1424_vm3, %v2615_v41 }
 0x691   : > { %v2489_v6 = vpop.f32.mrf.mxu1  ;;  %v2461_v3 = vpop.f32.mrf.mxu0 }
 0x692   : > { %v2627_v22 = vadd.f32 %v2579_v36, %v2489_v6 }
 0x694   : > { %2675 = vst.msk [vmem:[%s6037_s2 + $0xa0] sm:$0xff] %vm1424_vm3, %v2627_v22 }
 0x699   : > { %v2491_v9 = vpop.f32.mrf.mxu1  ;;  %v2464_v61 = vpop.f32.mrf.mxu0 }
 0x69b   : > { %v2591_v56 = vld [vmem:[%s6036_s8 + $0x100] sm:$0xff]  ;;  %v2568_v18 = vld [vmem:[%s6036_s8 + $0x48] sm:$0xff] }
 0x69c   : > { %v2603_v12 = vld [vmem:[%s6036_s8 + $0x160] sm:$0xff]  ;;  %v2580_v60 = vld [vmem:[%s6036_s8 + $0xa8] sm:$0xff]  ;;  %v2616_v39 = vadd.f32 %v2568_v18, %v2461_v3 }
 0x69d   : > { %v2651_v57 = vadd.f32 %v2603_v12, %v2549_v19  ;;  %v2628_v59 = vadd.f32 %v2580_v60, %v2491_v9 }
 0x69e   : > { %2664 = vst.msk [vmem:[%s6037_s2 + $0x48] sm:$0xff] %vm1424_vm3, %v2616_v39 }
 0x69f   : > { %v2519_v38 = vpop.f32.mrf.mxu2  ;;  %2699 = vst.msk [vmem:[%s6037_s2 + $0x160] sm:$0xff] %vm1424_vm3, %v2651_v57 }
 0x6a0   : > { %v2639_v37 = vadd.f32 %v2591_v56, %v2519_v38  ;;  %2676 = vst.msk [vmem:[%s6037_s2 + $0xa8] sm:$0xff] %vm1424_vm3, %v2628_v59 }
 0x6a1   : > { %v2494_v14 = vpop.f32.mrf.mxu1  ;;  %v2466_v0 = vpop.f32.mrf.mxu0 }
 0x6a2   : > { %2687 = vst.msk [vmem:[%s6037_s2 + $0x100] sm:$0xff] %vm1424_vm3, %v2639_v37 }
 0x6a7   : > { %v2521_v45 = vpop.f32.mrf.mxu2 }
 0x6a9   : > { %v2592_v58 = vld [vmem:[%s6036_s8 + $0x108] sm:$0xff]  ;;  %v2569_v8 = vld [vmem:[%s6036_s8 + $0x50] sm:$0xff]  ;;  %v2496_v11 = vpop.f32.mrf.mxu1 }
 0x6aa   : > { %v2604_v24 = vld [vmem:[%s6036_s8 + $0x168] sm:$0xff]  ;;  %v2581_v32 = vld [vmem:[%s6036_s8 + $0xb0] sm:$0xff]  ;;  %v2640_v42 = vadd.f32 %v2592_v58, %v2521_v45  ;;  %v2617_v52 = vadd.f32 %v2569_v8, %v2464_v61 }
 0x6ab   : > { %v2652_v10 = vadd.f32 %v2604_v24, %v2551_v44  ;;  %v2629_v17 = vadd.f32 %v2581_v32, %v2494_v14 }
 0x6ac   : > { %2688 = vst.msk [vmem:[%s6037_s2 + $0x108] sm:$0xff] %vm1424_vm3, %v2640_v42 }
 0x6ad   : > { %2700 = vst.msk [vmem:[%s6037_s2 + $0x168] sm:$0xff] %vm1424_vm3, %v2652_v10 }
 0x6ae   : > { %2665 = vst.msk [vmem:[%s6037_s2 + $0x50] sm:$0xff] %vm1424_vm3, %v2617_v52 }
 0x6af   : > { %2677 = vst.msk [vmem:[%s6037_s2 + $0xb0] sm:$0xff] %vm1424_vm3, %v2629_v17  ;;  %v2524_v48 = vpop.f32.mrf.mxu2 }
 0x6b6   : > { %v2593_v43 = vld [vmem:[%s6036_s8 + $0x110] sm:$0xff]  ;;  %v2570_v54 = vld [vmem:[%s6036_s8 + $0x58] sm:$0xff] }
 0x6b7   : > { %v2605_v20 = vld [vmem:[%s6036_s8 + $0x170] sm:$0xff]  ;;  %v2582_v13 = vld [vmem:[%s6036_s8 + $0xb8] sm:$0xff]  ;;  %v2641_v50 = vadd.f32 %v2593_v43, %v2524_v48  ;;  %v2618_v46 = vadd.f32 %v2570_v54, %v2466_v0  ;;  %v2526_v4 = vpop.f32.mrf.mxu2 }
 0x6b8   : > { %v2653_v40 = vadd.f32 %v2605_v20, %v2554_v23  ;;  %v2630_v16 = vadd.f32 %v2582_v13, %v2496_v11 }
 0x6b9   : > { %2689 = vst.msk [vmem:[%s6037_s2 + $0x110] sm:$0xff] %vm1424_vm3, %v2641_v50 }
 0x6ba   : > { %2701 = vst.msk [vmem:[%s6037_s2 + $0x170] sm:$0xff] %vm1424_vm3, %v2653_v40 }
 0x6bb   : > { %2666 = vst.msk [vmem:[%s6037_s2 + $0x58] sm:$0xff] %vm1424_vm3, %v2618_v46 }
 0x6bc   : > { %2678 = vst.msk [vmem:[%s6037_s2 + $0xb8] sm:$0xff] %vm1424_vm3, %v2630_v16 }
 0x6c3   : > { %v2594_v21 = vld [vmem:[%s6036_s8 + $0x118] sm:$0xff] }
 0x6c4   : > { %v2606_v55 = vld [vmem:[%s6036_s8 + $0x178] sm:$0xff]  ;;  %v2642_v15 = vadd.f32 %v2594_v21, %v2526_v4 }
 0x6c5   : > { %v2654_v49 = vadd.f32 %v2606_v55, %v2556_v63 }
 0x6c6   : > { %2690 = vst.msk [vmem:[%s6037_s2 + $0x118] sm:$0xff] %vm1424_vm3, %v2642_v15 }
 0x6c7   : > { %2702 = vst.msk [vmem:[%s6037_s2 + $0x178] sm:$0xff] %vm1424_vm3, %v2654_v49 }
 0x6c8 PF: > { %s3458_s13 = sshll.u32 %s3764_s29, 6  ;;  %s6038_s19 = sld [smem:[#allocation51_spill]] }
 0x6c9   : > { %s2726_s1 = sshll.u32 %s4329_s18, 4  ;;  %s2704_s22 = scalar_lea.sflag [#allocation10], %s4047_s10  ;;  %s2727_s1 = int_to_ptr.vmem [resolvable:$true] %s2726_s1 }
 0x6ce   : > { %s2725_s5 = scalar_lea.hbm %s6038_s19, %s3458_s13  ;;  %s3638_s29 = scalar_lea.hbm %s6038_s19, 128 }
 0x6cf   : > { %s2728_s28 = sshll.u32 %s2725_s5, 4  ;;  %s2729_s28 = int_to_ptr.hbm [resolvable:$true] %s2728_s28 }
 0x6d0   : > { %s3632_s26 = sshra.s32 %s2729_s28, 4  ;;  %s3633_s26 = int_to_ptr.hbm [resolvable:$true] %s3632_s26 }
 0x6d1   : > { %s3634_s6 = scalar_lea.hbm %s3633_s26, 64  ;;  %p3639_p10 = scmp.lt.s32.totalorder %s3633_s26, %s6038_s19 }
 0x6d2   : > { %p3635_p7 = scmp.ne.s32.totalorder %s3633_s26, %s3634_s6  ;;  %p3640_p11 = scmp.lt.s32.totalorder %s3638_s29, %s3634_s6 }
 0x6d4   : > { %p3636_p8 = pnand %p3635_p7, %p3994_p1  ;;  %p3641_p13 = por %p3640_p11, %p3639_p10 }
 0x6d6   : > { %p3637_p9 = pneg %p3636_p8 }
 0x6d8   : > { %p3642_p0 = pnand %p3641_p13, %p3637_p9 }
 0x6da   : > { %3645 = shalt.err (!%p3642_p0)
}
 0x6db   : > { %s3780_s10 = smov 64   ;;  %s3781_s18 = smov 4  }
 0x6dc   : > { %3504 = dma.vmem_to_hbm [thread:$0]  (%p3994_p1), %s2727_s1, 1024, %s2729_s28, %s2704_s22, %s3780_s10, %s3780_s10, %s3781_s18  }
 0x6dd   : > { %s6039_s14 = sld [smem:[#allocation54_spill]]  ;;  %s3782_s3 = smov [#allocation11]  }
 0x6de   : > { %s2748_s12 = sshll.u32 %s3782_s3, 4  ;;  %s2749_s12 = int_to_ptr.vmem [resolvable:$true] %s2748_s12 }
 0x6e3   : > { %s2750_s5 = sshll.u32 %s6039_s14, 4  ;;  %s2751_s5 = int_to_ptr.hbm [resolvable:$true] %s2750_s5 }
 0x6e4   : > { %3506 = dma.vmem_to_hbm [thread:$0]  (%p3981_p12), %s2749_s12, 3072, %s2751_s5, [#allocation12], %s3780_s10, %s3780_s10, %s3781_s18  }
 0x6e5   : > { %3723 = dma.done.wait (%p3981_p12), [#allocation12], 3072  }
 0x6e6   : > { %3725 = vsyncadd (%p3981_p12), [#allocation12], 4294964224 }
 0x6e7 PF: > { %p3516_p1 = scmp.ge.s32.totalorder %s3776_s17, 2  ;;  %s2782_s6 = sand.u32 1, %s3732_s21  }
 0x6e8   : > { %s2783_s4 = scalar_lea.sflag [#allocation10], %s2782_s6 }
 0x6e9   : > { %p3511_p4 = pnand %p3516_p1, %p3998_p2 }
 0x6eb   : > { %p3512_p3 = pneg %p3511_p4 }
 0x6ed   : > { %3727 = dma.done.wait (%p3512_p3), %s2783_s4, 1024  }
 0x6ee   : > { %3729 = vsyncadd (%p3512_p3), %s2783_s4, 4294966272  ;;  %s31_s17 = sadd.s32 1, %s3776_s17   ;;  %s6040_s8 = sld [smem:[#allocation19_spill]] }
 0x6ef   : > { %p28_p5 = scmp.ge.s32.totalorder %s31_s17, 8   ;;  %s6041_s7 = sld [smem:[#allocation17_spill]] }
 0x6f0   : > { %s6042_s2 = sld [smem:[#allocation18_spill]]  ;;  %s6045_s21 = smov %s3744_s24 }
 0x6f1   : > { %s6043_s1 = sld [smem:[#allocation15_spill]]  ;;  %s6046_s22 = smov %s3740_s23 }
 0x6f2   : > { %s6044_s10 = sld [smem:[#allocation16_spill]]  ;;  %s6048_s24 = smov %s3748_s25 }
 0x6f3   : > { %s6050_s26 = smov %s3756_s27  ;;  %s6052_s28 = smov %s3768_s30 }
 0x6f4   : > { %s6047_s23 = smov %s6040_s8  ;;  %s6053_s29 = smov %s3772_s0 }
 0x6f5   : > { %s6049_s25 = smov %s6041_s7  ;;  %30 = sbr.rel (!%p28_p5) target bundleno = 26 (0x1a), region = 327 }
 0x6f6   : > { %s6051_s27 = smov %s6042_s2 }
 0x6f7   : > { %s6054_s30 = smov %s6043_s1 }
 0x6f8   : > { %s6055_s0 = smov %s6044_s10 }
 0x6fa   :  { %2805 = vsyncpa [#allocation10], 1 }
 0x6fb   :  { %2807 = vsyncpa [#allocation10 + $0x1], 1 }
 0x6fc   :  { %2808 = vsyncpa [#allocation12], 1 }

// kernel: lightgcl_forward.5
= control target key start
LH: loop header
LB: loop body
LE: loop exit
PB: predicated region body
PF: predicated region fallthrough
CT: control target
= control target key end

     0   :  { %18 = vsyncpa [#allocation7], 0  ;;  %s5889_s0 = inlined_call_operand.vmem [shape: f32[256,64], index: 0, kind: input, shape index: {}]   ;;  %s5890_s1 = inlined_call_operand.vmem [shape: f32[384,64], index: 1, kind: input, shape index: {}]   ;;  %s5891_s2 = inlined_call_operand.vmem [shape: f32[128,64], index: 2, kind: input, shape index: {}]   ;;  %s5892_s3 = inlined_call_operand.vmem [shape: f32[128,64], index: 3, kind: input, shape index: {}]   ;;  %s5893_s4 = inlined_call_operand.vmem [shape: f32[128,64], index: 4, kind: input, shape index: {}]   ;;  %s5894_s5 = inlined_call_operand.vmem [shape: f32[128,64], index: 5, kind: input, shape index: {}]   ;;  %s5895_s6 = inlined_call_operand.vmem [shape: f32[128,64], index: 6, kind: input, shape index: {}]   ;;  %s5896_s7 = inlined_call_operand.vmem [shape: f32[128,64], index: 7, kind: input, shape index: {}]   ;;  %s5897_s8 = inlined_call_operand.hbm [shape: f32[1,1], index: 8, kind: output, shape index: {0}]   ;;  %s5898_s9 = inlined_call_operand.hbm [shape: f32[1,1], index: 9, kind: output, shape index: {1}]   ;;  %s5899_s10 = inlined_call_operand.hbm [shape: f32[1,1], index: 10, kind: output, shape index: {2}]   ;;  %s5900_s11 = inlined_call_operand.hbm [shape: f32[1,1], index: 11, kind: output, shape index: {3}]   ;;  %s5901_s12 = inlined_call_operand.hbm [shape: f32[1,1], index: 12, kind: output, shape index: {4}]  }
   0x1   :  { %19 = vsyncpa [#allocation9], 0 }
   0x2   :  { %20 = vsyncpa [#allocation12], 0  ;;  %s3991_s21 = smov 0  }
   0x3 LB: > { %s3997_s22 = sadd.s32 4294967295, %s3915_s21   ;;  %p3085_p0 = scmp.ge.s32.totalorder %s3915_s21, 1  ;;  %s3915_s21 = sphi %s3991_s21, %s26_s21  }
   0x4   : > { %p381_p1 = scmp.lt.s32.totalorder %s3915_s21, 6 }
   0x6   : > { %p382_p2 = pnand %p3085_p0, %p381_p1 }
   0x7   : > { %p428_p3 = scmp.lt.s32.totalorder (!%p382_p2), %s3997_s22, 1  ;;  %s3088_s23 = sadd.s32 (!%p382_p2), 4294967294, %s3997_s22 }
   0x8   : > { %385 = sbr.rel (%p382_p2) target bundleno = 1930 (0x78a), region = 52  ;;  %p439_p4 = scmp.gt.s32.totalorder (!%p382_p2), %s3088_s23, 0 }
   0x9   : > { %p3091_p7 = scmp.ne.s32.totalorder (!%p382_p2), %s3997_s22, 0 }
   0xd   : > { %s429_s24 = scalar_select %p428_p3, %s3997_s22, 1 }
   0xe   : > { %s5941_s23 = smov (!%p439_p4, %s3088_s23), 0 }
   0xf   : > { %s3086_s25 = sshll.u32 %s429_s24, 4  ;;  %s3089_s26 = sshll.u32 %s5941_s23, 4 }
  0x10   : > { %p431_p5 = scmp.lt.s32.totalorder %s3086_s25, 31  ;;  %p442_p6 = scmp.lt.s32.totalorder %s3089_s26, 47 }
  0x11   : > { %453 = sbr.rel (%p3091_p7) target bundleno = 87 (0x57), region = 56 }
  0x12   : > { %s5943_s25 = smov (!%p431_p5, %s3086_s25), 31  ;;  %s5945_s26 = smov (!%p442_p6, %s3089_s26), 47 }
  0x13   : > { %s3087_s27 = sshll.u32 %s5943_s25, 3  ;;  %s3090_s13 = sshll.u32 %s5945_s26, 3 }
  0x14   : > { %s4007_s30 = scalar_lea.vmem %s5889_s0, %s3087_s27  ;;  %s4012_s16 = scalar_lea.vmem %s5890_s1, %s3090_s13 }
  0x16   : > { %vm454_vm0 = vcmask 7168   ;;  %v3917_v0 = vmov -inf   ;;  %v3918_v1 = vmov 0.0  }
  0x17   : > { %455 = vst.msk [vmem:[#allocation2] sm:$0xff] %vm454_vm0, %v3917_v0 }
  0x18   : > { %456 = vst.msk [vmem:[#allocation2 + $0x8] sm:$0xff] %vm454_vm0, %v3917_v0 }
  0x19   : > { %457 = vst.msk [vmem:[#allocation2 + $0x10] sm:$0xff] %vm454_vm0, %v3917_v0 }
  0x1a   : > { %458 = vst.msk [vmem:[#allocation2 + $0x18] sm:$0xff] %vm454_vm0, %v3917_v0 }
  0x1b   : > { %459 = vst.msk [vmem:[#allocation2 + $0x20] sm:$0xff] %vm454_vm0, %v3917_v0 }
  0x1c   : > { %460 = vst.msk [vmem:[#allocation2 + $0x28] sm:$0xff] %vm454_vm0, %v3917_v0 }
  0x1d   : > { %461 = vst.msk [vmem:[#allocation2 + $0x30] sm:$0xff] %vm454_vm0, %v3917_v0 }
  0x1e   : > { %462 = vst.msk [vmem:[#allocation2 + $0x38] sm:$0xff] %vm454_vm0, %v3917_v0 }
  0x1f   : > { %463 = vst.msk [vmem:[#allocation2 + $0x40] sm:$0xff] %vm454_vm0, %v3917_v0 }
  0x20   : > { %464 = vst.msk [vmem:[#allocation2 + $0x48] sm:$0xff] %vm454_vm0, %v3917_v0 }
  0x21   : > { %465 = vst.msk [vmem:[#allocation2 + $0x50] sm:$0xff] %vm454_vm0, %v3917_v0 }
  0x22   : > { %466 = vst.msk [vmem:[#allocation2 + $0x58] sm:$0xff] %vm454_vm0, %v3917_v0 }
  0x23   : > { %467 = vst.msk [vmem:[#allocation2 + $0x60] sm:$0xff] %vm454_vm0, %v3917_v0 }
  0x24   : > { %468 = vst.msk [vmem:[#allocation2 + $0x68] sm:$0xff] %vm454_vm0, %v3917_v0 }
  0x25   : > { %469 = vst.msk [vmem:[#allocation2 + $0x70] sm:$0xff] %vm454_vm0, %v3917_v0 }
  0x26   : > { %470 = vst.msk [vmem:[#allocation2 + $0x78] sm:$0xff] %vm454_vm0, %v3917_v0 }
  0x27   : > { %487 = vst.msk [vmem:[#allocation4] sm:$0xff] %vm454_vm0, %v3917_v0 }
  0x28   : > { %488 = vst.msk [vmem:[#allocation4 + $0x8] sm:$0xff] %vm454_vm0, %v3917_v0 }
  0x29   : > { %489 = vst.msk [vmem:[#allocation4 + $0x10] sm:$0xff] %vm454_vm0, %v3917_v0 }
  0x2a   : > { %490 = vst.msk [vmem:[#allocation4 + $0x18] sm:$0xff] %vm454_vm0, %v3917_v0 }
  0x2b   : > { %491 = vst.msk [vmem:[#allocation4 + $0x20] sm:$0xff] %vm454_vm0, %v3917_v0 }
  0x2c   : > { %492 = vst.msk [vmem:[#allocation4 + $0x28] sm:$0xff] %vm454_vm0, %v3917_v0 }
  0x2d   : > { %493 = vst.msk [vmem:[#allocation4 + $0x30] sm:$0xff] %vm454_vm0, %v3917_v0 }
  0x2e   : > { %494 = vst.msk [vmem:[#allocation4 + $0x38] sm:$0xff] %vm454_vm0, %v3917_v0 }
  0x2f   : > { %495 = vst.msk [vmem:[#allocation4 + $0x40] sm:$0xff] %vm454_vm0, %v3917_v0 }
  0x30   : > { %496 = vst.msk [vmem:[#allocation4 + $0x48] sm:$0xff] %vm454_vm0, %v3917_v0 }
  0x31   : > { %497 = vst.msk [vmem:[#allocation4 + $0x50] sm:$0xff] %vm454_vm0, %v3917_v0 }
  0x32   : > { %498 = vst.msk [vmem:[#allocation4 + $0x58] sm:$0xff] %vm454_vm0, %v3917_v0 }
  0x33   : > { %499 = vst.msk [vmem:[#allocation4 + $0x60] sm:$0xff] %vm454_vm0, %v3917_v0 }
  0x34   : > { %500 = vst.msk [vmem:[#allocation4 + $0x68] sm:$0xff] %vm454_vm0, %v3917_v0 }
  0x35   : > { %501 = vst.msk [vmem:[#allocation4 + $0x70] sm:$0xff] %vm454_vm0, %v3917_v0 }
  0x36   : > { %502 = vst.msk [vmem:[#allocation4 + $0x78] sm:$0xff] %vm454_vm0, %v3917_v0 }
  0x37   : > { %471 = vst.msk [vmem:[#allocation3] sm:$0xff] %vm454_vm0, %v3918_v1 }
  0x38   : > { %472 = vst.msk [vmem:[#allocation3 + $0x8] sm:$0xff] %vm454_vm0, %v3918_v1 }
  0x39   : > { %473 = vst.msk [vmem:[#allocation3 + $0x10] sm:$0xff] %vm454_vm0, %v3918_v1 }
  0x3a   : > { %474 = vst.msk [vmem:[#allocation3 + $0x18] sm:$0xff] %vm454_vm0, %v3918_v1 }
  0x3b   : > { %475 = vst.msk [vmem:[#allocation3 + $0x20] sm:$0xff] %vm454_vm0, %v3918_v1 }
  0x3c   : > { %476 = vst.msk [vmem:[#allocation3 + $0x28] sm:$0xff] %vm454_vm0, %v3918_v1 }
  0x3d   : > { %477 = vst.msk [vmem:[#allocation3 + $0x30] sm:$0xff] %vm454_vm0, %v3918_v1 }
  0x3e   : > { %478 = vst.msk [vmem:[#allocation3 + $0x38] sm:$0xff] %vm454_vm0, %v3918_v1 }
  0x3f   : > { %479 = vst.msk [vmem:[#allocation3 + $0x40] sm:$0xff] %vm454_vm0, %v3918_v1 }
  0x40   : > { %480 = vst.msk [vmem:[#allocation3 + $0x48] sm:$0xff] %vm454_vm0, %v3918_v1 }
  0x41   : > { %481 = vst.msk [vmem:[#allocation3 + $0x50] sm:$0xff] %vm454_vm0, %v3918_v1 }
  0x42   : > { %482 = vst.msk [vmem:[#allocation3 + $0x58] sm:$0xff] %vm454_vm0, %v3918_v1 }
  0x43   : > { %483 = vst.msk [vmem:[#allocation3 + $0x60] sm:$0xff] %vm454_vm0, %v3918_v1 }
  0x44   : > { %484 = vst.msk [vmem:[#allocation3 + $0x68] sm:$0xff] %vm454_vm0, %v3918_v1 }
  0x45   : > { %485 = vst.msk [vmem:[#allocation3 + $0x70] sm:$0xff] %vm454_vm0, %v3918_v1 }
  0x46   : > { %486 = vst.msk [vmem:[#allocation3 + $0x78] sm:$0xff] %vm454_vm0, %v3918_v1 }
  0x47   : > { %503 = vst.msk [vmem:[#allocation5] sm:$0xff] %vm454_vm0, %v3918_v1 }
  0x48   : > { %504 = vst.msk [vmem:[#allocation5 + $0x8] sm:$0xff] %vm454_vm0, %v3918_v1 }
  0x49   : > { %505 = vst.msk [vmem:[#allocation5 + $0x10] sm:$0xff] %vm454_vm0, %v3918_v1 }
  0x4a   : > { %506 = vst.msk [vmem:[#allocation5 + $0x18] sm:$0xff] %vm454_vm0, %v3918_v1 }
  0x4b   : > { %507 = vst.msk [vmem:[#allocation5 + $0x20] sm:$0xff] %vm454_vm0, %v3918_v1 }
  0x4c   : > { %508 = vst.msk [vmem:[#allocation5 + $0x28] sm:$0xff] %vm454_vm0, %v3918_v1 }
  0x4d   : > { %509 = vst.msk [vmem:[#allocation5 + $0x30] sm:$0xff] %vm454_vm0, %v3918_v1 }
  0x4e   : > { %510 = vst.msk [vmem:[#allocation5 + $0x38] sm:$0xff] %vm454_vm0, %v3918_v1 }
  0x4f   : > { %511 = vst.msk [vmem:[#allocation5 + $0x40] sm:$0xff] %vm454_vm0, %v3918_v1 }
  0x50   : > { %512 = vst.msk [vmem:[#allocation5 + $0x48] sm:$0xff] %vm454_vm0, %v3918_v1 }
  0x51   : > { %513 = vst.msk [vmem:[#allocation5 + $0x50] sm:$0xff] %vm454_vm0, %v3918_v1 }
  0x52   : > { %514 = vst.msk [vmem:[#allocation5 + $0x58] sm:$0xff] %vm454_vm0, %v3918_v1 }
  0x53   : > { %515 = vst.msk [vmem:[#allocation5 + $0x60] sm:$0xff] %vm454_vm0, %v3918_v1 }
  0x54   : > { %516 = vst.msk [vmem:[#allocation5 + $0x68] sm:$0xff] %vm454_vm0, %v3918_v1 }
  0x55   : > { %517 = vst.msk [vmem:[#allocation5 + $0x70] sm:$0xff] %vm454_vm0, %v3918_v1 }
  0x56   : > { %518 = vst.msk [vmem:[#allocation5 + $0x78] sm:$0xff] %vm454_vm0, %v3918_v1 }
  0x57 PF: > { %p3092_p8 = scmp.ge.s32.totalorder %s3997_s22, 2 }
  0x59   : > { %522 = sbr.rel (%p3092_p8) target bundleno = 704 (0x2c0), region = 60 }
  0x5e   : > { %v570_v2 = vld [vmem:[%s4007_s30 + $0x78] sm:$0xff]  ;;  %vm571_vm1 = vcmask 523264   ;;  %v569_v3 = vld [vmem:[%s4007_s30 + $0x70] sm:$0xff]  ;;  %v568_v4 = vld [vmem:[%s4007_s30 + $0x68] sm:$0xff]  ;;  %vm1053_vm2 = vcmask 7168  }
  0x5f   : > { %3093 = vmatpush.xpose.msk.msra.mxu0 %vm571_vm1, %v570_v2  ;;  %3205 = vmatpush.xpose.msk.msra.mxu3 %vm571_vm1, %v570_v2  ;;  %v567_v5 = vld [vmem:[%s4007_s30 + $0x60] sm:$0xff]  ;;  %v566_v6 = vld [vmem:[%s4007_s30 + $0x58] sm:$0xff]  ;;  %v565_v7 = vld [vmem:[%s4007_s30 + $0x50] sm:$0xff] }
  0x60   : > { %3203 = vmatpush.xpose.msk.msra.mxu1 %vm571_vm1, %v570_v2  ;;  %3204 = vmatpush.xpose.msk.msra.mxu2 %vm571_vm1, %v570_v2  ;;  %v564_v8 = vld [vmem:[%s4007_s30 + $0x48] sm:$0xff]  ;;  %v563_v9 = vld [vmem:[%s4007_s30 + $0x40] sm:$0xff]  ;;  %v562_v10 = vld [vmem:[%s4007_s30 + $0x38] sm:$0xff]  ;;  %v3919_v2 = vmov 0  }
  0x61   : > { %v561_v11 = vld [vmem:[%s4007_s30 + $0x30] sm:$0xff]  ;;  %v560_v12 = vld [vmem:[%s4007_s30 + $0x28] sm:$0xff]  ;;  %v559_v13 = vld [vmem:[%s4007_s30 + $0x20] sm:$0xff]  ;;  %3356 = vset.pattern.permute.xlu1 %v3919_v2  ;;  %3357 = vset.pattern.permute.xlu0 %v3919_v2 }
  0x62   : > { %v558_v14 = vld [vmem:[%s4007_s30 + $0x18] sm:$0xff]  ;;  %v557_v15 = vld [vmem:[%s4007_s30 + $0x10] sm:$0xff]  ;;  %v556_v16 = vld [vmem:[%s4007_s30 + $0x8] sm:$0xff]  ;;  %3358 = vset.pattern.permute.xlu2 %v3919_v2 }
  0x63   : > { %3094 = vmatpush.xpose.msk.msra.mxu0 %vm571_vm1, %v569_v3  ;;  %3208 = vmatpush.xpose.msk.msra.mxu3 %vm571_vm1, %v569_v3  ;;  %v523_v17 = vld [vmem:[%s5891_s2] sm:$0xff]  ;;  %v524_v26 = vld [vmem:[%s5891_s2 + $0x8] sm:$0xff]  ;;  %v537_v34 = vld [vmem:[%s5891_s2 + $0x70] sm:$0xff] }
  0x64   : > { %3206 = vmatpush.xpose.msk.msra.mxu1 %vm571_vm1, %v569_v3  ;;  %3207 = vmatpush.xpose.msk.msra.mxu2 %vm571_vm1, %v569_v3  ;;  %v535_v18 = vld [vmem:[%s5891_s2 + $0x60] sm:$0xff]  ;;  %v539_v22 = vmul.f32 5.0, %v523_v17  ;;  %v536_v27 = vld [vmem:[%s5891_s2 + $0x68] sm:$0xff]  ;;  %v540_v30 = vmul.f32 5.0, %v524_v26  ;;  %v525_v35 = vld [vmem:[%s5891_s2 + $0x10] sm:$0xff]  ;;  %v553_v38 = vmul.f32 5.0, %v537_v34 }
  0x65   : > { %v555_v19 = vld [vmem:[%s4007_s30] sm:$0xff]  ;;  %v551_v23 = vmul.f32 5.0, %v535_v18  ;;  %v532_v28 = vld [vmem:[%s5891_s2 + $0x48] sm:$0xff]  ;;  %v552_v31 = vmul.f32 5.0, %v536_v27  ;;  %v529_v36 = vld [vmem:[%s5891_s2 + $0x30] sm:$0xff]  ;;  %v541_v39 = vmul.f32 5.0, %v525_v35 }
  0x66   : > { %v527_v20 = vld [vmem:[%s5891_s2 + $0x20] sm:$0xff]  ;;  %v528_v29 = vld [vmem:[%s5891_s2 + $0x28] sm:$0xff]  ;;  %v548_v32 = vmul.f32 5.0, %v532_v28  ;;  %v533_v37 = vld [vmem:[%s5891_s2 + $0x50] sm:$0xff]  ;;  %v545_v40 = vmul.f32 5.0, %v529_v36 }
  0x67   : > { %3095 = vmatpush.xpose.msk.msra.mxu0 %vm571_vm1, %v568_v4  ;;  %3211 = vmatpush.xpose.msk.msra.mxu3 %vm571_vm1, %v568_v4  ;;  %v531_v21 = vld [vmem:[%s5891_s2 + $0x40] sm:$0xff]  ;;  %v543_v24 = vmul.f32 5.0, %v527_v20  ;;  %v544_v33 = vmul.f32 5.0, %v528_v29  ;;  %v549_v41 = vmul.f32 5.0, %v533_v37  ;;  %v538_v42 = vld [vmem:[%s5891_s2 + $0x78] sm:$0xff]  ;;  %v4313_v20 = vld [vmem:[#allocation2 + $0x8] sm:$0xff] }
  0x68   : > { %3209 = vmatpush.xpose.msk.msra.mxu1 %vm571_vm1, %v568_v4  ;;  %3210 = vmatpush.xpose.msk.msra.mxu2 %vm571_vm1, %v568_v4  ;;  %v547_v25 = vmul.f32 5.0, %v531_v21  ;;  %v526_v43 = vld [vmem:[%s5891_s2 + $0x18] sm:$0xff]  ;;  %v554_v46 = vmul.f32 5.0, %v538_v42  ;;  %v4272_v3 = vld [vmem:[#allocation2] sm:$0xff]  ;;  %v4347_v35 = vld [vmem:[#allocation2 + $0x70] sm:$0xff] }
  0x69   : > { %v534_v44 = vld [vmem:[%s5891_s2 + $0x58] sm:$0xff]  ;;  %v542_v47 = vmul.f32 5.0, %v526_v43  ;;  %v4274_v4 = vld [vmem:[#allocation2 + $0x20] sm:$0xff]  ;;  %v4369_v43 = vld [vmem:[#allocation2 + $0x50] sm:$0xff] }
  0x6a   : > { %v530_v45 = vld [vmem:[%s5891_s2 + $0x38] sm:$0xff]  ;;  %v550_v48 = vmul.f32 5.0, %v534_v44  ;;  %v4371_v44 = vld [vmem:[#allocation2 + $0x30] sm:$0xff] }
  0x6b   : > { %3096 = vmatpush.xpose.msk.msra.mxu0 %vm571_vm1, %v567_v5  ;;  %3214 = vmatpush.xpose.msk.msra.mxu3 %vm571_vm1, %v567_v5  ;;  %v546_v49 = vmul.f32 5.0, %v530_v45 }
  0x6c   : > { %3212 = vmatpush.xpose.msk.msra.mxu1 %vm571_vm1, %v567_v5  ;;  %3213 = vmatpush.xpose.msk.msra.mxu2 %vm571_vm1, %v567_v5 }
  0x6f   : > { %3097 = vmatpush.xpose.msk.msra.mxu0 %vm571_vm1, %v566_v6  ;;  %3217 = vmatpush.xpose.msk.msra.mxu3 %vm571_vm1, %v566_v6 }
  0x70   : > { %3215 = vmatpush.xpose.msk.msra.mxu1 %vm571_vm1, %v566_v6  ;;  %3216 = vmatpush.xpose.msk.msra.mxu2 %vm571_vm1, %v566_v6 }
  0x73   : > { %3098 = vmatpush.xpose.msk.msra.mxu0 %vm571_vm1, %v565_v7  ;;  %3220 = vmatpush.xpose.msk.msra.mxu3 %vm571_vm1, %v565_v7 }
  0x74   : > { %3218 = vmatpush.xpose.msk.msra.mxu1 %vm571_vm1, %v565_v7  ;;  %3219 = vmatpush.xpose.msk.msra.mxu2 %vm571_vm1, %v565_v7 }
  0x77   : > { %3099 = vmatpush.xpose.msk.msra.mxu0 %vm571_vm1, %v564_v8  ;;  %3223 = vmatpush.xpose.msk.msra.mxu3 %vm571_vm1, %v564_v8 }
  0x78   : > { %3221 = vmatpush.xpose.msk.msra.mxu1 %vm571_vm1, %v564_v8  ;;  %3222 = vmatpush.xpose.msk.msra.mxu2 %vm571_vm1, %v564_v8 }
  0x7b   : > { %3100 = vmatpush.xpose.msk.msra.mxu0 %vm571_vm1, %v563_v9  ;;  %3226 = vmatpush.xpose.msk.msra.mxu3 %vm571_vm1, %v563_v9 }
  0x7c   : > { %3224 = vmatpush.xpose.msk.msra.mxu1 %vm571_vm1, %v563_v9  ;;  %3225 = vmatpush.xpose.msk.msra.mxu2 %vm571_vm1, %v563_v9 }
  0x7f   : > { %3101 = vmatpush.xpose.msk.msra.mxu0 %vm571_vm1, %v562_v10  ;;  %3229 = vmatpush.xpose.msk.msra.mxu3 %vm571_vm1, %v562_v10 }
  0x80   : > { %3227 = vmatpush.xpose.msk.msra.mxu1 %vm571_vm1, %v562_v10  ;;  %3228 = vmatpush.xpose.msk.msra.mxu2 %vm571_vm1, %v562_v10 }
  0x83   : > { %3102 = vmatpush.xpose.msk.msra.mxu0 %vm571_vm1, %v561_v11  ;;  %3232 = vmatpush.xpose.msk.msra.mxu3 %vm571_vm1, %v561_v11 }
  0x84   : > { %3230 = vmatpush.xpose.msk.msra.mxu1 %vm571_vm1, %v561_v11  ;;  %3231 = vmatpush.xpose.msk.msra.mxu2 %vm571_vm1, %v561_v11  ;;  %v4291_v11 = vld [vmem:[#allocation2 + $0x60] sm:$0xff] }
  0x87   : > { %3103 = vmatpush.xpose.msk.msra.mxu0 %vm571_vm1, %v560_v12  ;;  %3235 = vmatpush.xpose.msk.msra.mxu3 %vm571_vm1, %v560_v12 }
  0x88   : > { %3233 = vmatpush.xpose.msk.msra.mxu1 %vm571_vm1, %v560_v12  ;;  %3234 = vmatpush.xpose.msk.msra.mxu2 %vm571_vm1, %v560_v12  ;;  %v4293_v12 = vld [vmem:[#allocation2 + $0x40] sm:$0xff] }
  0x8b   : > { %3104 = vmatpush.xpose.msk.msra.mxu0 %vm571_vm1, %v559_v13  ;;  %3238 = vmatpush.xpose.msk.msra.mxu3 %vm571_vm1, %v559_v13 }
  0x8c   : > { %3236 = vmatpush.xpose.msk.msra.mxu1 %vm571_vm1, %v559_v13  ;;  %3237 = vmatpush.xpose.msk.msra.mxu2 %vm571_vm1, %v559_v13 }
  0x8f   : > { %3105 = vmatpush.xpose.msk.msra.mxu0 %vm571_vm1, %v558_v14  ;;  %3241 = vmatpush.xpose.msk.msra.mxu3 %vm571_vm1, %v558_v14 }
  0x90   : > { %3239 = vmatpush.xpose.msk.msra.mxu1 %vm571_vm1, %v558_v14  ;;  %3240 = vmatpush.xpose.msk.msra.mxu2 %vm571_vm1, %v558_v14 }
  0x93   : > { %3106 = vmatpush.xpose.msk.msra.mxu0 %vm571_vm1, %v557_v15  ;;  %3244 = vmatpush.xpose.msk.msra.mxu3 %vm571_vm1, %v557_v15 }
  0x94   : > { %3242 = vmatpush.xpose.msk.msra.mxu1 %vm571_vm1, %v557_v15  ;;  %3243 = vmatpush.xpose.msk.msra.mxu2 %vm571_vm1, %v557_v15 }
  0x97   : > { %3107 = vmatpush.xpose.msk.msra.mxu0 %vm571_vm1, %v556_v16  ;;  %3247 = vmatpush.xpose.msk.msra.mxu3 %vm571_vm1, %v556_v16 }
  0x98   : > { %3245 = vmatpush.xpose.msk.msra.mxu1 %vm571_vm1, %v556_v16  ;;  %3246 = vmatpush.xpose.msk.msra.mxu2 %vm571_vm1, %v556_v16 }
  0x9b   : > { %3108 = vmatpush.xpose.msk.msra.mxu0 %vm571_vm1, %v555_v19  ;;  %3250 = vmatpush.xpose.msk.msra.mxu3 %vm571_vm1, %v555_v19 }
  0x9c   : > { %3248 = vmatpush.xpose.msk.msra.mxu1 %vm571_vm1, %v555_v19  ;;  %3249 = vmatpush.xpose.msk.msra.mxu2 %vm571_vm1, %v555_v19  ;;  %v4311_v19 = vld [vmem:[#allocation2 + $0x68] sm:$0xff] }
  0x9e   : > { %3109 = vmatmul.msk.f32.vlgmr.msra.gmra.mxu0 %vm571_vm1, %v539_v22  ;;  %3121 = vmatmul.msk.f32.vlgmr.msra.gmra.mxu3 %vm571_vm1, %v551_v23  ;;  %v4318_v23 = vld [vmem:[#allocation2 + $0x28] sm:$0xff] }
  0x9f   : > { %3113 = vmatmul.msk.f32.vlgmr.msra.gmra.mxu1 %vm571_vm1, %v543_v24  ;;  %3117 = vmatmul.msk.f32.vlgmr.msra.gmra.mxu2 %vm571_vm1, %v547_v25 }
  0xa6   : > { %3110 = vmatmul.msk.f32.gmra.mxu0 %vm571_vm1, %v540_v30  ;;  %3122 = vmatmul.msk.f32.gmra.mxu3 %vm571_vm1, %v552_v31  ;;  %v4340_v31 = vld [vmem:[#allocation2 + $0x10] sm:$0xff] }
  0xa7   : > { %3118 = vmatmul.msk.f32.gmra.mxu2 %vm571_vm1, %v548_v32  ;;  %3114 = vmatmul.msk.f32.gmra.mxu1 %vm571_vm1, %v544_v33  ;;  %v4342_v32 = vld [vmem:[#allocation2 + $0x48] sm:$0xff] }
  0xae   : > { %3123 = vmatmul.msk.f32.gmra.mxu3 %vm571_vm1, %v553_v38  ;;  %3111 = vmatmul.msk.f32.gmra.mxu0 %vm571_vm1, %v541_v39 }
  0xaf   : > { %3115 = vmatmul.msk.f32.gmra.mxu1 %vm571_vm1, %v545_v40  ;;  %3119 = vmatmul.msk.f32.gmra.mxu2 %vm571_vm1, %v549_v41 }
  0xb6   : > { %3124 = vmatmul.msk.f32.gmra.mxu3 %vm571_vm1, %v554_v46  ;;  %3112 = vmatmul.msk.f32.gmra.mxu0 %vm571_vm1, %v542_v47  ;;  %v4376_v47 = vld [vmem:[#allocation2 + $0x58] sm:$0xff] }
  0xb7   : > { %3120 = vmatmul.msk.f32.gmra.mxu2 %vm571_vm1, %v550_v48  ;;  %3116 = vmatmul.msk.f32.gmra.mxu1 %vm571_vm1, %v546_v49 }
 0x11b   : > { %v4224_v50 = vpop.f32.mrf.mxu0 }
 0x11c   : > { %749 = vmax.xlane.f32.xlu0 %v4224_v50  ;;  %v4227_v51 = vpop.f32.mrf.mxu1 }
 0x11d   : > { %757 = vmax.xlane.f32.xlu2 %v4227_v51 }
 0x121   : > { %v4230_v52 = vpop.f32.mrf.mxu3 }
 0x122   : > { %v4232_v53 = vpop.f32.mrf.mxu2 }
 0x123   : > { %v4236_v54 = vpop.f32.mrf.mxu0 }
 0x124   : > { %773 = vmax.xlane.f32.xlu0 %v4230_v52  ;;  %v4240_v56 = vpop.f32.mrf.mxu1 }
 0x125   : > { %765 = vmax.xlane.f32.xlu2 %v4232_v53 }
 0x129   : > { %v4238_v55 = vpop.f32.mrf.mxu3 }
 0x12a   : > { %v4242_v57 = vpop.f32.mrf.mxu2  ;;  %775 = vmax.xlane.f32.xlu1 %v4238_v55 }
 0x12b   : > { %v4247_v58 = vpop.f32.mrf.mxu0 }
 0x12c   : > { %751 = vmax.xlane.f32.xlu0 %v4236_v54  ;;  %v4256_v61 = vpop.f32.mrf.mxu1 }
 0x12d   : > { %759 = vmax.xlane.f32.xlu2 %v4240_v56 }
 0x131   : > { %v4253_v60 = vpop.f32.mrf.mxu3 }
 0x132   : > { %753 = vmax.xlane.f32.xlu1 %v4247_v58  ;;  %v4250_v59 = vpop.f32.mrf.mxu2 }
 0x133   : > { %v4263_v63 = vpop.f32.mrf.mxu0 }
 0x134   : > { %767 = vmax.xlane.f32.xlu0 %v4242_v57  ;;  %v4269_v1 = vpop.f32.mrf.mxu1 }
 0x135   : > { %777 = vmax.xlane.f32.xlu2 %v4253_v60 }
 0x139   : > { %v4265_v0 = vpop.f32.mrf.mxu3 }
 0x13a   : > { %769 = vmax.xlane.f32.xlu1 %v4250_v59  ;;  %v4259_v62 = vpop.f32.mrf.mxu2 }
 0x13c   : > { %761 = vmax.xlane.f32.xlu0 %v4256_v61 }
 0x13d   : > { %771 = vmax.xlane.f32.xlu2 %v4259_v62 }
 0x142   : > { %755 = vmax.xlane.f32.xlu1 %v4263_v63 }
 0x144   : > { %779 = vmax.xlane.f32.xlu0 %v4265_v0 }
 0x14a   : > { %763 = vmax.xlane.f32.xlu1 %v4269_v1 }
 0x18f   : > { %v750_v5 = vpop.xlane.xlu0 %749 }
 0x190   : > { %v4277_v6 = vmax.f32 %v4272_v3, %v750_v5  ;;  %v758_v7 = vpop.xlane.xlu2 %757 }
 0x191   : > { %v4280_v8 = vmax.f32 %v4274_v4, %v758_v7 }
 0x192   : > { %1070 = vst.msk [vmem:[#allocation2] sm:$0xff] %vm1053_vm2, %v4277_v6  ;;  %879 = vperm.xlu1 %3356, %v4277_v6  }
 0x193   : > { %1074 = vst.msk [vmem:[#allocation2 + $0x20] sm:$0xff] %vm1053_vm2, %v4280_v8 }
 0x197   : > { %v774_v13 = vpop.xlane.xlu0 %773 }
 0x198   : > { %v4296_v14 = vmax.f32 %v4291_v11, %v774_v13  ;;  %v766_v15 = vpop.xlane.xlu2 %765 }
 0x199   : > { %v4299_v16 = vmax.f32 %v4293_v12, %v766_v15 }
 0x19a   : > { %1082 = vst.msk [vmem:[#allocation2 + $0x60] sm:$0xff] %vm1053_vm2, %v4296_v14  ;;  %939 = vperm.xlu0 %3357, %v4296_v14   ;;  %899 = vperm.xlu1 %3356, %v4280_v8  }
 0x19b   : > { %1078 = vst.msk [vmem:[#allocation2 + $0x40] sm:$0xff] %vm1053_vm2, %v4299_v16 }
 0x19d   : > { %v776_v21 = vpop.xlane.xlu1 %775 }
 0x19e   : > { %v4316_v22 = vmax.f32 %v4311_v19, %v776_v21  ;;  %v4399_v21 = vld [vmem:[#allocation2 + $0x18] sm:$0xff] }
 0x19f   : > { %v752_v24 = vpop.xlane.xlu0 %751 }
 0x1a0   : > { %v4321_v25 = vmax.f32 %v4313_v20, %v752_v24  ;;  %1083 = vst.msk [vmem:[#allocation2 + $0x68] sm:$0xff] %vm1053_vm2, %v4316_v22  ;;  %v760_v27 = vpop.xlane.xlu2 %759  ;;  %v4401_v24 = vld [vmem:[#allocation2 + $0x78] sm:$0xff] }
 0x1a1   : > { %v4328_v28 = vmax.f32 %v4318_v23, %v760_v27 }
 0x1a2   : > { %1071 = vst.msk [vmem:[#allocation2 + $0x8] sm:$0xff] %vm1053_vm2, %v4321_v25  ;;  %884 = vperm.xlu2 %3358, %v4321_v25   ;;  %919 = vperm.xlu1 %3356, %v4299_v16  }
 0x1a3   : > { %1075 = vst.msk [vmem:[#allocation2 + $0x28] sm:$0xff] %vm1053_vm2, %v4328_v28 }
 0x1a5   : > { %v754_v33 = vpop.xlane.xlu1 %753 }
 0x1a6   : > { %v4345_v34 = vmax.f32 %v4340_v31, %v754_v33 }
 0x1a7   : > { %v768_v36 = vpop.xlane.xlu0 %767 }
 0x1a8   : > { %v4350_v37 = vmax.f32 %v4342_v32, %v768_v36  ;;  %1072 = vst.msk [vmem:[#allocation2 + $0x10] sm:$0xff] %vm1053_vm2, %v4345_v34  ;;  %v778_v39 = vpop.xlane.xlu2 %777 }
 0x1a9   : > { %v4357_v40 = vmax.f32 %v4347_v35, %v778_v39 }
 0x1aa   : > { %1079 = vst.msk [vmem:[#allocation2 + $0x48] sm:$0xff] %vm1053_vm2, %v4350_v37  ;;  %904 = vperm.xlu2 %3358, %v4328_v28   ;;  %924 = vperm.xlu0 %3357, %v4350_v37  }
 0x1ab   : > { %5904 = vst [vmem:[#allocation17_spill] sm:$0xff] %v4357_v40 }
 0x1ac   : > { %1084 = vst.msk [vmem:[#allocation2 + $0x70] sm:$0xff] %vm1053_vm2, %v4357_v40 }
 0x1ad   : > { %v770_v45 = vpop.xlane.xlu1 %769 }
 0x1ae   : > { %v4374_v46 = vmax.f32 %v4369_v43, %v770_v45 }
 0x1af   : > { %v762_v48 = vpop.xlane.xlu0 %761 }
 0x1b0   : > { %v4379_v49 = vmax.f32 %v4371_v44, %v762_v48  ;;  %1080 = vst.msk [vmem:[#allocation2 + $0x50] sm:$0xff] %vm1053_vm2, %v4374_v46  ;;  %v772_v5 = vpop.xlane.xlu2 %771 }
 0x1b1   : > { %v4386_v7 = vmax.f32 %v4376_v47, %v772_v5  ;;  %v4420_v5 = vld [vmem:[#allocation2 + $0x38] sm:$0xff] }
 0x1b2   : > { %1076 = vst.msk [vmem:[#allocation2 + $0x30] sm:$0xff] %vm1053_vm2, %v4379_v49  ;;  %944 = vperm.xlu2 %3358, %v4316_v22   ;;  %889 = vperm.xlu0 %3357, %v4345_v34  }
 0x1b3   : > { %909 = vperm.xlu1 %3356, %v4379_v49   ;;  %1081 = vst.msk [vmem:[#allocation2 + $0x58] sm:$0xff] %vm1053_vm2, %v4386_v7 }
 0x1b5   : > { %v756_v27 = vpop.xlane.xlu1 %755 }
 0x1b6   : > { %v4404_v33 = vmax.f32 %v4399_v21, %v756_v27 }
 0x1b7   : > { %v780_v36 = vpop.xlane.xlu0 %779 }
 0x1b8   : > { %v4407_v39 = vmax.f32 %v4401_v24, %v780_v36  ;;  %1073 = vst.msk [vmem:[#allocation2 + $0x18] sm:$0xff] %vm1053_vm2, %v4404_v33 }
 0x1ba   : > { %1085 = vst.msk [vmem:[#allocation2 + $0x78] sm:$0xff] %vm1053_vm2, %v4407_v39  ;;  %954 = vperm.xlu0 %3357, %v4407_v39   ;;  %929 = vperm.xlu2 %3358, %v4374_v46  }
 0x1bb   : > { %949 = vperm.xlu1 %3356, %v4357_v40  }
 0x1bd   : > { %v764_v27 = vpop.xlane.xlu1 %763 }
 0x1be   : > { %v4423_v36 = vmax.f32 %v4420_v5, %v764_v27 }
 0x1c0   : > { %1077 = vst.msk [vmem:[#allocation2 + $0x38] sm:$0xff] %vm1053_vm2, %v4423_v36 }
 0x1c2   : > { %894 = vperm.xlu2 %3358, %v4404_v33  }
 0x1c3   : > { %934 = vperm.xlu1 %3356, %v4386_v7  }
 0x1ca   : > { %914 = vperm.xlu2 %3358, %v4423_v36  }
 0x1fc   : > { %v885_v15 = vpop.permute.xlu2 %884 }
 0x1fd   : > { %v958_v10 = vsub.f32 %v4236_v54, %v885_v15 }
 0x204   : > { %v905_v48 = vpop.permute.xlu2 %904  ;;  %v880_v26 = vpop.permute.xlu1 %879 }
 0x205   : > { %v957_v13 = vsub.f32 %v4224_v50, %v880_v26 }
 0x207   : > { %v973_v45 = vmul.f32 1.442695, %v957_v13  ;;  %v975_v13 = vmul.f32 1.442695, %v958_v10 }
 0x209   : > { %3359 = vpow2.f32 %v973_v45 }
 0x20c   : > { %v4433_v27 = vpop.permute.xlu2 %944  ;;  %v940_v38 = vpop.permute.xlu0 %939 }
 0x20d   : > { %v969_v42 = vsub.f32 %v4230_v52, %v940_v38  ;;  %v900_v2 = vpop.permute.xlu1 %899  ;;  %v962_v52 = vsub.f32 %v4240_v56, %v905_v48 }
 0x20e   : > { %v961_v30 = vsub.f32 %v4227_v51, %v900_v2 }
 0x20f   : > { %v997_v41 = vmul.f32 1.442695, %v969_v42  ;;  %v3360_v29 = vpop.eup %3359 }
 0x210   : > { %v981_v18 = vmul.f32 1.442695, %v961_v30  ;;  %1005 = vadd.xlane.f32.xlu2 %v3360_v29 }
 0x211   : > { %3361 = vpow2.f32 %v997_v41 }
 0x212   : > { %3363 = vpow2.f32 %v981_v18  ;;  %v983_v18 = vmul.f32 1.442695, %v962_v52 }
 0x214   : > { %v930_v17 = vpop.permute.xlu2 %929 }
 0x215   : > { %v920_v50 = vpop.permute.xlu1 %919  ;;  %v967_v51 = vsub.f32 %v4250_v59, %v930_v17 }
 0x216   : > { %v965_v26 = vsub.f32 %v4232_v53, %v920_v50 }
 0x217   : > { %v3362_v45 = vpop.eup %3361  ;;  %v993_v38 = vmul.f32 1.442695, %v967_v51 }
 0x218   : > { %v989_v9 = vmul.f32 1.442695, %v965_v26  ;;  %v3364_v40 = vpop.eup %3363  ;;  %1029 = vadd.xlane.f32.xlu0 %v3362_v45 }
 0x219   : > { %1013 = vadd.xlane.f32.xlu1 %v3364_v40 }
 0x21a   : > { %3365 = vpow2.f32 %v989_v9 }
 0x21b   : > { %3367 = vpow2.f32 %v975_v13  ;;  %v970_v13 = vsub.f32 %v4238_v55, %v4433_v27 }
 0x21c   : > { %v925_v29 = vpop.permute.xlu0 %924  ;;  %v895_v30 = vpop.permute.xlu2 %894 }
 0x21d   : > { %v966_v54 = vsub.f32 %v4242_v57, %v925_v29  ;;  %v960_v10 = vsub.f32 %v4263_v63, %v895_v30  ;;  %v999_v29 = vmul.f32 1.442695, %v970_v13 }
 0x21f   : > { %v991_v41 = vmul.f32 1.442695, %v966_v54  ;;  %v979_v56 = vmul.f32 1.442695, %v960_v10 }
 0x220   : > { %v3366_v53 = vpop.eup %3365 }
 0x221   : > { %v3368_v42 = vpop.eup %3367  ;;  %3369 = vpow2.f32 %v991_v41  ;;  %1021 = vadd.xlane.f32.xlu2 %v3366_v53 }
 0x222   : > { %3371 = vpow2.f32 %v983_v18  ;;  %1007 = vadd.xlane.f32.xlu1 %v3368_v42 }
 0x223   : > { %3373 = vpow2.f32 %v993_v38 }
 0x224   : > { %v890_v9 = vpop.permute.xlu0 %889  ;;  %v915_v40 = vpop.permute.xlu2 %914  ;;  %3375 = vpow2.f32 %v979_v56 }
 0x225   : > { %v959_v59 = vsub.f32 %v4247_v58, %v890_v9  ;;  %v964_v17 = vsub.f32 %v4269_v1, %v915_v40  ;;  %v910_v57 = vpop.permute.xlu1 %909  ;;  %v5906_v40 = vsub.f32 %v4291_v11, %v4296_v14 }
 0x226   : > { %v963_v26 = vsub.f32 %v4256_v61, %v910_v57 }
 0x227   : > { %v3370_v2 = vpop.eup %3369  ;;  %v977_v15 = vmul.f32 1.442695, %v959_v59  ;;  %v987_v48 = vmul.f32 1.442695, %v964_v17  ;;  %v853_v59 = vmul.f32 1.442695, %v5906_v40 }
 0x228   : > { %v3372_v50 = vpop.eup %3371  ;;  %1023 = vadd.xlane.f32.xlu0 %v3370_v2  ;;  %v985_v58 = vmul.f32 1.442695, %v963_v26  ;;  %v797_v2 = vld [vmem:[#allocation3] sm:$0xff] }
 0x229   : > { %v3374_v63 = vpop.eup %3373  ;;  %3377 = vpow2.f32 %v977_v15  ;;  %1015 = vadd.xlane.f32.xlu2 %v3372_v50  ;;  %v801_v26 = vld [vmem:[#allocation3 + $0x20] sm:$0xff] }
 0x22a   : > { %3379 = vpow2.f32 %v987_v48  ;;  %1025 = vadd.xlane.f32.xlu1 %v3374_v63  ;;  %v3376_v1 = vpop.eup %3375  ;;  %v5909_v63 = vsub.f32 %v4313_v20, %v4321_v25  ;;  %v5911_v20 = vsub.f32 %v4318_v23, %v4328_v28  ;;  %v5913_v28 = vsub.f32 %v4340_v31, %v4345_v34  ;;  %v802_v31 = vld [vmem:[#allocation3 + $0x28] sm:$0xff] }
 0x22b   : > { %3381 = vpow2.f32 %v985_v58 }
 0x22c   : > { %v955_v52 = vpop.permute.xlu0 %954  ;;  %3383 = vpow2.f32 %v999_v29  ;;  %v831_v11 = vmul.f32 1.442695, %v5909_v63  ;;  %v839_v25 = vmul.f32 1.442695, %v5911_v20  ;;  %v5912_v29 = vsub.f32 %v4369_v43, %v4374_v46 }
 0x22d   : > { %v950_v45 = vpop.permute.xlu1 %949  ;;  %v972_v54 = vsub.f32 %v4265_v0, %v955_v52 }
 0x22e   : > { %v971_v53 = vsub.f32 %v4253_v60, %v950_v45  ;;  %v5907_v60 = vsub.f32 %v4274_v4, %v4280_v8  ;;  %v809_v4 = vld [vmem:[#allocation3 + $0x60] sm:$0xff] }
 0x22f   : > { %v3378_v51 = vpop.eup %3377  ;;  %v1003_v61 = vmul.f32 1.442695, %v972_v54 }
 0x230   : > { %v3380_v30 = vpop.eup %3379  ;;  %1009 = vadd.xlane.f32.xlu0 %v3378_v51  ;;  %v1001_v10 = vmul.f32 1.442695, %v971_v53  ;;  %v837_v17 = vmul.f32 1.442695, %v5907_v60 }
 0x231   : > { %1011 = vadd.xlane.f32.xlu2 %v3376_v1  ;;  %v3382_v41 = vpop.eup %3381  ;;  %3385 = vpow2.f32 %v1003_v61  ;;  %v5910_v1 = vsub.f32 %v4342_v32, %v4350_v37  ;;  %v805_v61 = vld [vmem:[#allocation3 + $0x40] sm:$0xff]  ;;  %v798_v32 = vld [vmem:[#allocation3 + $0x8] sm:$0xff] }
 0x232   : > { %1019 = vadd.xlane.f32.xlu1 %v3380_v30  ;;  %v3384_v27 = vpop.eup %3383  ;;  %v849_v30 = vmul.f32 1.442695, %v5912_v29  ;;  %v810_v29 = vld [vmem:[#allocation3 + $0x68] sm:$0xff] }
 0x235   : > { %v935_v18 = vpop.permute.xlu1 %934 }
 0x236   : > { %v968_v38 = vsub.f32 %v4259_v62, %v935_v18  ;;  %v5905_v62 = vsub.f32 %v4272_v3, %v4277_v6  ;;  %v5908_v3 = vsub.f32 %v4293_v12, %v4299_v16  ;;  %v847_v12 = vmul.f32 1.442695, %v5910_v1 }
 0x237   : > { %v3386_v42 = vpop.eup %3385 }
 0x238   : > { %v995_v55 = vmul.f32 1.442695, %v968_v38  ;;  %1017 = vadd.xlane.f32.xlu0 %v3382_v41  ;;  %v829_v9 = vmul.f32 1.442695, %v5905_v62  ;;  %v845_v6 = vmul.f32 1.442695, %v5908_v3 }
 0x239   : > { %v833_v41 = vmul.f32 1.442695, %v5913_v28  ;;  %v808_v28 = vld [vmem:[#allocation3 + $0x58] sm:$0xff] }
 0x23a   : > { %3387 = vpow2.f32 %v995_v55  ;;  %1031 = vadd.xlane.f32.xlu1 %v3384_v27  ;;  %v5914_v55 = vsub.f32 %v4399_v21, %v4404_v33 }
 0x23b   : > { %3389 = vpow2.f32 %v1001_v10 }
 0x23c   : > { %3391 = vpow2.f32 %v829_v9  ;;  %v835_v27 = vmul.f32 1.442695, %v5914_v55  ;;  %v807_v9 = vld [vmem:[#allocation3 + $0x50] sm:$0xff] }
 0x23d   : > { %3393 = vpow2.f32 %v853_v59 }
 0x23e   : > { %3395 = vpow2.f32 %v837_v17 }
 0x23f   : > { %3397 = vpow2.f32 %v845_v6  ;;  %v799_v6 = vld [vmem:[#allocation3 + $0x10] sm:$0xff] }
 0x240   : > { %v3388_v56 = vpop.eup %3387  ;;  %1035 = vadd.xlane.f32.xlu0 %v3386_v42  ;;  %3399 = vpow2.f32 %v831_v11  ;;  %v5915_v42 = vsub.f32 %v4420_v5, %v4423_v36  ;;  %v5916_v5 = vsub.f32 %v4371_v44, %v4379_v49  ;;  %v800_v11 = vld [vmem:[#allocation3 + $0x18] sm:$0xff] }
 0x241   : > { %1027 = vadd.xlane.f32.xlu2 %v3388_v56  ;;  %v3390_v0 = vpop.eup %3389  ;;  %3401 = vpow2.f32 %v847_v12  ;;  %v804_v44 = vld [vmem:[#allocation3 + $0x38] sm:$0xff]  ;;  %v5919_v12 = vsub.f32 %v4376_v47, %v4386_v7  ;;  %v5920_v47 = vld [vmem:[#allocation17_spill] sm:$0xff] }
 0x242   : > { %v3392_v57 = vpop.eup %3391  ;;  %3403 = vpow2.f32 %v839_v25  ;;  %v843_v56 = vmul.f32 1.442695, %v5915_v42  ;;  %v841_v36 = vmul.f32 1.442695, %v5916_v5  ;;  %v803_v25 = vld [vmem:[#allocation3 + $0x30] sm:$0xff]  ;;  %v5921_v7 = vsub.f32 %v4347_v35, %v5920_v47 }
 0x243   : > { %v861_v15 = vmul.f32 %v3392_v57, %v797_v2  ;;  %v3394_v14 = vpop.eup %3393  ;;  %3405 = vpow2.f32 %v849_v30 }
 0x244   : > { %v3396_v8 = vpop.eup %3395  ;;  %v873_v13 = vmul.f32 %v3394_v14, %v809_v4  ;;  %3407 = vpow2.f32 %v833_v41 }
 0x245   : > { %v865_v45 = vmul.f32 %v3396_v8, %v801_v26  ;;  %v3398_v54 = vpop.eup %3397  ;;  %3409 = vpow2.f32 %v835_v27 }
 0x246   : > { %v3400_v18 = vpop.eup %3399  ;;  %v869_v37 = vmul.f32 %v3398_v54, %v805_v61  ;;  %3411 = vpow2.f32 %v843_v56 }
 0x247   : > { %v862_v23 = vmul.f32 %v3400_v18, %v798_v32  ;;  %v3402_v10 = vpop.eup %3401  ;;  %3413 = vpow2.f32 %v841_v36  ;;  %v857_v18 = vmul.f32 1.442695, %v5921_v7 }
 0x248   : > { %v3404_v62 = vpop.eup %3403 }
 0x249   : > { %1033 = vadd.xlane.f32.xlu2 %v3390_v0  ;;  %v806_v0 = vld [vmem:[#allocation3 + $0x48] sm:$0xff]  ;;  %v3406_v34 = vpop.eup %3405  ;;  %v866_v33 = vmul.f32 %v3404_v62, %v802_v31 }
 0x24a   : > { %v870_v40 = vmul.f32 %v3402_v10, %v806_v0  ;;  %v871_v17 = vmul.f32 %v3406_v34, %v807_v9  ;;  %v811_v10 = vld [vmem:[#allocation3 + $0x70] sm:$0xff] }
 0x283   : > { %v1006_v48 = vpop.xlane.xlu2 %1005 }
 0x284   : > { %v1037_v50 = vadd.f32 %v1006_v48, %v861_v15  ;;  %v3408_v48 = vpop.eup %3407 }
 0x285   : > { %v3410_v63 = vpop.eup %3409  ;;  %v863_v49 = vmul.f32 %v3408_v48, %v799_v6 }
 0x286   : > { %1054 = vst.msk [vmem:[#allocation3] sm:$0xff] %vm1053_vm2, %v1037_v50  ;;  %v5917_v50 = vsub.f32 %v4311_v19, %v4316_v22  ;;  %v3412_v14 = vpop.eup %3411  ;;  %v864_v8 = vmul.f32 %v3410_v63, %v800_v11  ;;  %v5918_v19 = vsub.f32 %v4401_v24, %v4407_v39 }
 0x287   : > { %v3414_v20 = vpop.eup %3413 }
 0x288   : > { %v855_v3 = vmul.f32 1.442695, %v5917_v50  ;;  %v859_v22 = vmul.f32 1.442695, %v5918_v19  ;;  %v867_v24 = vmul.f32 %v3414_v20, %v803_v25 }
 0x28a   : > { %3415 = vpow2.f32 %v855_v3 }
 0x28b   : > { %v1030_v58 = vpop.xlane.xlu0 %1029  ;;  %3417 = vpow2.f32 %v859_v22 }
 0x28c   : > { %v1049_v16 = vadd.f32 %v1030_v58, %v873_v13  ;;  %v1014_v52 = vpop.xlane.xlu1 %1013  ;;  %v868_v58 = vmul.f32 %v3412_v14, %v804_v44 }
 0x28d   : > { %v1041_v51 = vadd.f32 %v1014_v52, %v865_v45 }
 0x28e   : > { %1066 = vst.msk [vmem:[#allocation3 + $0x60] sm:$0xff] %vm1053_vm2, %v1049_v16  ;;  %v851_v16 = vmul.f32 1.442695, %v5919_v12 }
 0x28f   : > { %1058 = vst.msk [vmem:[#allocation3 + $0x20] sm:$0xff] %vm1053_vm2, %v1041_v51 }
 0x290   : > { %v3416_v51 = vpop.eup %3415  ;;  %3419 = vpow2.f32 %v851_v16 }
 0x291   : > { %v874_v54 = vmul.f32 %v3416_v51, %v810_v29  ;;  %3421 = vpow2.f32 %v857_v18 }
 0x294   : > { %v1022_v38 = vpop.xlane.xlu2 %1021 }
 0x295   : > { %v1045_v43 = vadd.f32 %v1022_v38, %v869_v37  ;;  %v1008_v46 = vpop.xlane.xlu1 %1007  ;;  %v3418_v37 = vpop.eup %3417  ;;  %v812_v38 = vld [vmem:[#allocation3 + $0x78] sm:$0xff] }
 0x296   : > { %v1038_v53 = vadd.f32 %v1008_v46, %v862_v23  ;;  %v3420_v23 = vpop.eup %3419  ;;  %v876_v41 = vmul.f32 %v3418_v37, %v812_v38 }
 0x297   : > { %1062 = vst.msk [vmem:[#allocation3 + $0x40] sm:$0xff] %vm1053_vm2, %v1045_v43  ;;  %v872_v46 = vmul.f32 %v3420_v23, %v808_v28  ;;  %v3422_v35 = vpop.eup %3421 }
 0x298   : > { %1055 = vst.msk [vmem:[#allocation3 + $0x8] sm:$0xff] %vm1053_vm2, %v1038_v53  ;;  %v875_v42 = vmul.f32 %v3422_v35, %v811_v10 }
 0x29b   : > { %v1024_v21 = vpop.xlane.xlu0 %1023 }
 0x29c   : > { %v1046_v59 = vadd.f32 %v1024_v21, %v870_v40  ;;  %v1016_v60 = vpop.xlane.xlu2 %1015 }
 0x29d   : > { %v1042_v57 = vadd.f32 %v1016_v60, %v866_v33  ;;  %v1026_v2 = vpop.xlane.xlu1 %1025 }
 0x29e   : > { %1063 = vst.msk [vmem:[#allocation3 + $0x48] sm:$0xff] %vm1053_vm2, %v1046_v59  ;;  %v1047_v15 = vadd.f32 %v1026_v2, %v871_v17 }
 0x29f   : > { %1059 = vst.msk [vmem:[#allocation3 + $0x28] sm:$0xff] %vm1053_vm2, %v1042_v57 }
 0x2a0   : > { %1064 = vst.msk [vmem:[#allocation3 + $0x50] sm:$0xff] %vm1053_vm2, %v1047_v15 }
 0x2a3   : > { %v1010_v4 = vpop.xlane.xlu0 %1009 }
 0x2a4   : > { %v1039_v26 = vadd.f32 %v1010_v4, %v863_v49  ;;  %v1012_v13 = vpop.xlane.xlu2 %1011 }
 0x2a5   : > { %v1040_v45 = vadd.f32 %v1012_v13, %v864_v8  ;;  %v1020_v1 = vpop.xlane.xlu1 %1019 }
 0x2a6   : > { %1056 = vst.msk [vmem:[#allocation3 + $0x10] sm:$0xff] %vm1053_vm2, %v1039_v26  ;;  %v1044_v52 = vadd.f32 %v1020_v1, %v868_v58 }
 0x2a7   : > { %1057 = vst.msk [vmem:[#allocation3 + $0x18] sm:$0xff] %vm1053_vm2, %v1040_v45 }
 0x2a8   : > { %1061 = vst.msk [vmem:[#allocation3 + $0x38] sm:$0xff] %vm1053_vm2, %v1044_v52 }
 0x2ab   : > { %v1018_v39 = vpop.xlane.xlu0 %1017 }
 0x2ac   : > { %v1043_v30 = vadd.f32 %v1018_v39, %v867_v24 }
 0x2ad   : > { %v1032_v61 = vpop.xlane.xlu1 %1031 }
 0x2ae   : > { %1060 = vst.msk [vmem:[#allocation3 + $0x30] sm:$0xff] %vm1053_vm2, %v1043_v30  ;;  %v1050_v32 = vadd.f32 %v1032_v61, %v874_v54 }
 0x2b0   : > { %1067 = vst.msk [vmem:[#allocation3 + $0x68] sm:$0xff] %vm1053_vm2, %v1050_v32 }
 0x2b3   : > { %v1036_v43 = vpop.xlane.xlu0 %1035 }
 0x2b4   : > { %v1052_v55 = vadd.f32 %v1036_v43, %v876_v41  ;;  %v1028_v27 = vpop.xlane.xlu2 %1027 }
 0x2b5   : > { %v1048_v53 = vadd.f32 %v1028_v27, %v872_v46 }
 0x2b6   : > { %1069 = vst.msk [vmem:[#allocation3 + $0x78] sm:$0xff] %vm1053_vm2, %v1052_v55 }
 0x2b7   : > { %1065 = vst.msk [vmem:[#allocation3 + $0x58] sm:$0xff] %vm1053_vm2, %v1048_v53 }
 0x2bc   : > { %v1034_v56 = vpop.xlane.xlu2 %1033 }
 0x2bd   : > { %v1051_v0 = vadd.f32 %v1034_v56, %v875_v42 }
 0x2bf   : > { %1068 = vst.msk [vmem:[#allocation3 + $0x70] sm:$0xff] %vm1053_vm2, %v1051_v0 }
 0x2c0 PF: > { %p3125_p9 = scmp.lt.s32.totalorder %s3997_s22, 2 }
 0x2c2   : > { %1089 = sbr.rel (%p3125_p9) target bundleno = 1321 (0x529), region = 64 }
 0x2c7   : > { %v1137_v62 = vld [vmem:[%s4012_s16 + $0x78] sm:$0xff]  ;;  %vm1138_vm3 = vcmask 523264   ;;  %v1136_v31 = vld [vmem:[%s4012_s16 + $0x70] sm:$0xff]  ;;  %v1135_v34 = vld [vmem:[%s4012_s16 + $0x68] sm:$0xff]  ;;  %vm1620_vm4 = vcmask 7168  }
 0x2c8   : > { %3126 = vmatpush.xpose.msk.msra.mxu0 %vm1138_vm3, %v1137_v62  ;;  %3253 = vmatpush.xpose.msk.msra.mxu3 %vm1138_vm3, %v1137_v62  ;;  %v1134_v9 = vld [vmem:[%s4012_s16 + $0x60] sm:$0xff]  ;;  %v1133_v40 = vld [vmem:[%s4012_s16 + $0x58] sm:$0xff]  ;;  %v1132_v21 = vld [vmem:[%s4012_s16 + $0x50] sm:$0xff] }
 0x2c9   : > { %3251 = vmatpush.xpose.msk.msra.mxu1 %vm1138_vm3, %v1137_v62  ;;  %3252 = vmatpush.xpose.msk.msra.mxu2 %vm1138_vm3, %v1137_v62  ;;  %v1131_v33 = vld [vmem:[%s4012_s16 + $0x48] sm:$0xff]  ;;  %v1130_v59 = vld [vmem:[%s4012_s16 + $0x40] sm:$0xff]  ;;  %v1129_v60 = vld [vmem:[%s4012_s16 + $0x38] sm:$0xff]  ;;  %v3920_v62 = vmov 0  }
 0x2ca   : > { %v1128_v17 = vld [vmem:[%s4012_s16 + $0x30] sm:$0xff]  ;;  %v1127_v5 = vld [vmem:[%s4012_s16 + $0x28] sm:$0xff]  ;;  %v1126_v36 = vld [vmem:[%s4012_s16 + $0x20] sm:$0xff]  ;;  %3423 = vset.pattern.permute.xlu1 %v3920_v62  ;;  %3424 = vset.pattern.permute.xlu0 %v3920_v62 }
 0x2cb   : > { %v1125_v57 = vld [vmem:[%s4012_s16 + $0x18] sm:$0xff]  ;;  %v1124_v2 = vld [vmem:[%s4012_s16 + $0x10] sm:$0xff]  ;;  %v1123_v15 = vld [vmem:[%s4012_s16 + $0x8] sm:$0xff]  ;;  %3425 = vset.pattern.permute.xlu2 %v3920_v62 }
 0x2cc   : > { %3127 = vmatpush.xpose.msk.msra.mxu0 %vm1138_vm3, %v1136_v31  ;;  %3256 = vmatpush.xpose.msk.msra.mxu3 %vm1138_vm3, %v1136_v31  ;;  %v1090_v48 = vld [vmem:[%s5892_s3] sm:$0xff]  ;;  %v1091_v4 = vld [vmem:[%s5892_s3 + $0x8] sm:$0xff]  ;;  %v1104_v1 = vld [vmem:[%s5892_s3 + $0x70] sm:$0xff] }
 0x2cd   : > { %3254 = vmatpush.xpose.msk.msra.mxu1 %vm1138_vm3, %v1136_v31  ;;  %3255 = vmatpush.xpose.msk.msra.mxu2 %vm1138_vm3, %v1136_v31  ;;  %v1102_v50 = vld [vmem:[%s5892_s3 + $0x60] sm:$0xff]  ;;  %v1106_v11 = vmul.f32 5.0, %v1090_v48  ;;  %v1103_v8 = vld [vmem:[%s5892_s3 + $0x68] sm:$0xff]  ;;  %v1107_v58 = vmul.f32 5.0, %v1091_v4  ;;  %v1092_v12 = vld [vmem:[%s5892_s3 + $0x10] sm:$0xff]  ;;  %v1120_v20 = vmul.f32 5.0, %v1104_v1 }
 0x2ce   : > { %v1122_v3 = vld [vmem:[%s4012_s16] sm:$0xff]  ;;  %v1118_v14 = vmul.f32 5.0, %v1102_v50  ;;  %v1099_v26 = vld [vmem:[%s5892_s3 + $0x48] sm:$0xff]  ;;  %v1119_v19 = vmul.f32 5.0, %v1103_v8  ;;  %v1096_v16 = vld [vmem:[%s5892_s3 + $0x30] sm:$0xff]  ;;  %v1108_v25 = vmul.f32 5.0, %v1092_v12 }
 0x2cf   : > { %v1094_v6 = vld [vmem:[%s5892_s3 + $0x20] sm:$0xff]  ;;  %v1095_v13 = vld [vmem:[%s5892_s3 + $0x28] sm:$0xff]  ;;  %v1115_v22 = vmul.f32 5.0, %v1099_v26  ;;  %v1100_v52 = vld [vmem:[%s5892_s3 + $0x50] sm:$0xff]  ;;  %v1112_v51 = vmul.f32 5.0, %v1096_v16 }
 0x2d0   : > { %3128 = vmatpush.xpose.msk.msra.mxu0 %vm1138_vm3, %v1135_v34  ;;  %3259 = vmatpush.xpose.msk.msra.mxu3 %vm1138_vm3, %v1135_v34  ;;  %v1098_v63 = vld [vmem:[%s5892_s3 + $0x40] sm:$0xff]  ;;  %v1110_v44 = vmul.f32 5.0, %v1094_v6  ;;  %v1111_v45 = vmul.f32 5.0, %v1095_v13  ;;  %v1116_v29 = vmul.f32 5.0, %v1100_v52  ;;  %v1105_v24 = vld [vmem:[%s5892_s3 + $0x78] sm:$0xff]  ;;  %v4749_v6 = vld [vmem:[#allocation4 + $0x8] sm:$0xff] }
 0x2d1   : > { %3257 = vmatpush.xpose.msk.msra.mxu1 %vm1138_vm3, %v1135_v34  ;;  %3258 = vmatpush.xpose.msk.msra.mxu2 %vm1138_vm3, %v1135_v34  ;;  %v1114_v49 = vmul.f32 5.0, %v1098_v63  ;;  %v1093_v39 = vld [vmem:[%s5892_s3 + $0x18] sm:$0xff]  ;;  %v1121_v61 = vmul.f32 5.0, %v1105_v24  ;;  %v4708_v31 = vld [vmem:[#allocation4] sm:$0xff]  ;;  %v4783_v12 = vld [vmem:[#allocation4 + $0x70] sm:$0xff] }
 0x2d2   : > { %v1101_v30 = vld [vmem:[%s5892_s3 + $0x58] sm:$0xff]  ;;  %v1109_v47 = vmul.f32 5.0, %v1093_v39  ;;  %v4710_v34 = vld [vmem:[#allocation4 + $0x20] sm:$0xff]  ;;  %v4805_v39 = vld [vmem:[#allocation4 + $0x50] sm:$0xff] }
 0x2d3   : > { %v1097_v54 = vld [vmem:[%s5892_s3 + $0x38] sm:$0xff]  ;;  %v1117_v7 = vmul.f32 5.0, %v1101_v30  ;;  %v4807_v30 = vld [vmem:[#allocation4 + $0x30] sm:$0xff] }
 0x2d4   : > { %3129 = vmatpush.xpose.msk.msra.mxu0 %vm1138_vm3, %v1134_v9  ;;  %3262 = vmatpush.xpose.msk.msra.mxu3 %vm1138_vm3, %v1134_v9  ;;  %v1113_v18 = vmul.f32 5.0, %v1097_v54 }
 0x2d5   : > { %3260 = vmatpush.xpose.msk.msra.mxu1 %vm1138_vm3, %v1134_v9  ;;  %3261 = vmatpush.xpose.msk.msra.mxu2 %vm1138_vm3, %v1134_v9 }
 0x2d8   : > { %3130 = vmatpush.xpose.msk.msra.mxu0 %vm1138_vm3, %v1133_v40  ;;  %3265 = vmatpush.xpose.msk.msra.mxu3 %vm1138_vm3, %v1133_v40 }
 0x2d9   : > { %3263 = vmatpush.xpose.msk.msra.mxu1 %vm1138_vm3, %v1133_v40  ;;  %3264 = vmatpush.xpose.msk.msra.mxu2 %vm1138_vm3, %v1133_v40 }
 0x2dc   : > { %3131 = vmatpush.xpose.msk.msra.mxu0 %vm1138_vm3, %v1132_v21  ;;  %3268 = vmatpush.xpose.msk.msra.mxu3 %vm1138_vm3, %v1132_v21 }
 0x2dd   : > { %3266 = vmatpush.xpose.msk.msra.mxu1 %vm1138_vm3, %v1132_v21  ;;  %3267 = vmatpush.xpose.msk.msra.mxu2 %vm1138_vm3, %v1132_v21 }
 0x2e0   : > { %3132 = vmatpush.xpose.msk.msra.mxu0 %vm1138_vm3, %v1131_v33  ;;  %3271 = vmatpush.xpose.msk.msra.mxu3 %vm1138_vm3, %v1131_v33 }
 0x2e1   : > { %3269 = vmatpush.xpose.msk.msra.mxu1 %vm1138_vm3, %v1131_v33  ;;  %3270 = vmatpush.xpose.msk.msra.mxu2 %vm1138_vm3, %v1131_v33 }
 0x2e4   : > { %3133 = vmatpush.xpose.msk.msra.mxu0 %vm1138_vm3, %v1130_v59  ;;  %3274 = vmatpush.xpose.msk.msra.mxu3 %vm1138_vm3, %v1130_v59 }
 0x2e5   : > { %3272 = vmatpush.xpose.msk.msra.mxu1 %vm1138_vm3, %v1130_v59  ;;  %3273 = vmatpush.xpose.msk.msra.mxu2 %vm1138_vm3, %v1130_v59 }
 0x2e8   : > { %3134 = vmatpush.xpose.msk.msra.mxu0 %vm1138_vm3, %v1129_v60  ;;  %3277 = vmatpush.xpose.msk.msra.mxu3 %vm1138_vm3, %v1129_v60 }
 0x2e9   : > { %3275 = vmatpush.xpose.msk.msra.mxu1 %vm1138_vm3, %v1129_v60  ;;  %3276 = vmatpush.xpose.msk.msra.mxu2 %vm1138_vm3, %v1129_v60 }
 0x2ec   : > { %3135 = vmatpush.xpose.msk.msra.mxu0 %vm1138_vm3, %v1128_v17  ;;  %3280 = vmatpush.xpose.msk.msra.mxu3 %vm1138_vm3, %v1128_v17 }
 0x2ed   : > { %3278 = vmatpush.xpose.msk.msra.mxu1 %vm1138_vm3, %v1128_v17  ;;  %3279 = vmatpush.xpose.msk.msra.mxu2 %vm1138_vm3, %v1128_v17  ;;  %v4727_v17 = vld [vmem:[#allocation4 + $0x60] sm:$0xff] }
 0x2f0   : > { %3136 = vmatpush.xpose.msk.msra.mxu0 %vm1138_vm3, %v1127_v5  ;;  %3283 = vmatpush.xpose.msk.msra.mxu3 %vm1138_vm3, %v1127_v5 }
 0x2f1   : > { %3281 = vmatpush.xpose.msk.msra.mxu1 %vm1138_vm3, %v1127_v5  ;;  %3282 = vmatpush.xpose.msk.msra.mxu2 %vm1138_vm3, %v1127_v5  ;;  %v4729_v5 = vld [vmem:[#allocation4 + $0x40] sm:$0xff] }
 0x2f4   : > { %3137 = vmatpush.xpose.msk.msra.mxu0 %vm1138_vm3, %v1126_v36  ;;  %3286 = vmatpush.xpose.msk.msra.mxu3 %vm1138_vm3, %v1126_v36 }
 0x2f5   : > { %3284 = vmatpush.xpose.msk.msra.mxu1 %vm1138_vm3, %v1126_v36  ;;  %3285 = vmatpush.xpose.msk.msra.mxu2 %vm1138_vm3, %v1126_v36 }
 0x2f8   : > { %3138 = vmatpush.xpose.msk.msra.mxu0 %vm1138_vm3, %v1125_v57  ;;  %3289 = vmatpush.xpose.msk.msra.mxu3 %vm1138_vm3, %v1125_v57 }
 0x2f9   : > { %3287 = vmatpush.xpose.msk.msra.mxu1 %vm1138_vm3, %v1125_v57  ;;  %3288 = vmatpush.xpose.msk.msra.mxu2 %vm1138_vm3, %v1125_v57 }
 0x2fc   : > { %3139 = vmatpush.xpose.msk.msra.mxu0 %vm1138_vm3, %v1124_v2  ;;  %3292 = vmatpush.xpose.msk.msra.mxu3 %vm1138_vm3, %v1124_v2 }
 0x2fd   : > { %3290 = vmatpush.xpose.msk.msra.mxu1 %vm1138_vm3, %v1124_v2  ;;  %3291 = vmatpush.xpose.msk.msra.mxu2 %vm1138_vm3, %v1124_v2 }
 0x300   : > { %3140 = vmatpush.xpose.msk.msra.mxu0 %vm1138_vm3, %v1123_v15  ;;  %3295 = vmatpush.xpose.msk.msra.mxu3 %vm1138_vm3, %v1123_v15 }
 0x301   : > { %3293 = vmatpush.xpose.msk.msra.mxu1 %vm1138_vm3, %v1123_v15  ;;  %3294 = vmatpush.xpose.msk.msra.mxu2 %vm1138_vm3, %v1123_v15 }
 0x304   : > { %3141 = vmatpush.xpose.msk.msra.mxu0 %vm1138_vm3, %v1122_v3  ;;  %3298 = vmatpush.xpose.msk.msra.mxu3 %vm1138_vm3, %v1122_v3 }
 0x305   : > { %3296 = vmatpush.xpose.msk.msra.mxu1 %vm1138_vm3, %v1122_v3  ;;  %3297 = vmatpush.xpose.msk.msra.mxu2 %vm1138_vm3, %v1122_v3  ;;  %v4747_v3 = vld [vmem:[#allocation4 + $0x68] sm:$0xff] }
 0x307   : > { %3142 = vmatmul.msk.f32.vlgmr.msra.gmra.mxu0 %vm1138_vm3, %v1106_v11  ;;  %3154 = vmatmul.msk.f32.vlgmr.msra.gmra.mxu3 %vm1138_vm3, %v1118_v14  ;;  %v4754_v14 = vld [vmem:[#allocation4 + $0x28] sm:$0xff] }
 0x308   : > { %3146 = vmatmul.msk.f32.vlgmr.msra.gmra.mxu1 %vm1138_vm3, %v1110_v44  ;;  %3150 = vmatmul.msk.f32.vlgmr.msra.gmra.mxu2 %vm1138_vm3, %v1114_v49 }
 0x30f   : > { %3143 = vmatmul.msk.f32.gmra.mxu0 %vm1138_vm3, %v1107_v58  ;;  %3155 = vmatmul.msk.f32.gmra.mxu3 %vm1138_vm3, %v1119_v19  ;;  %v4776_v19 = vld [vmem:[#allocation4 + $0x10] sm:$0xff] }
 0x310   : > { %3151 = vmatmul.msk.f32.gmra.mxu2 %vm1138_vm3, %v1115_v22  ;;  %3147 = vmatmul.msk.f32.gmra.mxu1 %vm1138_vm3, %v1111_v45  ;;  %v4778_v22 = vld [vmem:[#allocation4 + $0x48] sm:$0xff] }
 0x317   : > { %3156 = vmatmul.msk.f32.gmra.mxu3 %vm1138_vm3, %v1120_v20  ;;  %3144 = vmatmul.msk.f32.gmra.mxu0 %vm1138_vm3, %v1108_v25 }
 0x318   : > { %3148 = vmatmul.msk.f32.gmra.mxu1 %vm1138_vm3, %v1112_v51  ;;  %3152 = vmatmul.msk.f32.gmra.mxu2 %vm1138_vm3, %v1116_v29 }
 0x31f   : > { %3157 = vmatmul.msk.f32.gmra.mxu3 %vm1138_vm3, %v1121_v61  ;;  %3145 = vmatmul.msk.f32.gmra.mxu0 %vm1138_vm3, %v1109_v47  ;;  %v4812_v47 = vld [vmem:[#allocation4 + $0x58] sm:$0xff] }
 0x320   : > { %3153 = vmatmul.msk.f32.gmra.mxu2 %vm1138_vm3, %v1117_v7  ;;  %3149 = vmatmul.msk.f32.gmra.mxu1 %vm1138_vm3, %v1113_v18 }
 0x384   : > { %v4660_v32 = vpop.f32.mrf.mxu0 }
 0x385   : > { %1316 = vmax.xlane.f32.xlu0 %v4660_v32  ;;  %v4663_v37 = vpop.f32.mrf.mxu1 }
 0x386   : > { %1324 = vmax.xlane.f32.xlu2 %v4663_v37 }
 0x38a   : > { %v4666_v38 = vpop.f32.mrf.mxu3 }
 0x38b   : > { %v4668_v23 = vpop.f32.mrf.mxu2 }
 0x38c   : > { %v4672_v28 = vpop.f32.mrf.mxu0 }
 0x38d   : > { %1340 = vmax.xlane.f32.xlu0 %v4666_v38  ;;  %v4676_v43 = vpop.f32.mrf.mxu1 }
 0x38e   : > { %1332 = vmax.xlane.f32.xlu2 %v4668_v23 }
 0x392   : > { %v4674_v41 = vpop.f32.mrf.mxu3 }
 0x393   : > { %v4678_v46 = vpop.f32.mrf.mxu2  ;;  %1342 = vmax.xlane.f32.xlu1 %v4674_v41 }
 0x394   : > { %v4683_v55 = vpop.f32.mrf.mxu0 }
 0x395   : > { %1318 = vmax.xlane.f32.xlu0 %v4672_v28  ;;  %v4692_v35 = vpop.f32.mrf.mxu1 }
 0x396   : > { %1326 = vmax.xlane.f32.xlu2 %v4676_v43 }
 0x39a   : > { %v4689_v53 = vpop.f32.mrf.mxu3 }
 0x39b   : > { %1320 = vmax.xlane.f32.xlu1 %v4683_v55  ;;  %v4686_v27 = vpop.f32.mrf.mxu2 }
 0x39c   : > { %v4699_v42 = vpop.f32.mrf.mxu0 }
 0x39d   : > { %1334 = vmax.xlane.f32.xlu0 %v4678_v46  ;;  %v4705_v0 = vpop.f32.mrf.mxu1 }
 0x39e   : > { %1344 = vmax.xlane.f32.xlu2 %v4689_v53 }
 0x3a2   : > { %v4701_v56 = vpop.f32.mrf.mxu3 }
 0x3a3   : > { %1336 = vmax.xlane.f32.xlu1 %v4686_v27  ;;  %v4695_v10 = vpop.f32.mrf.mxu2 }
 0x3a5   : > { %1328 = vmax.xlane.f32.xlu0 %v4692_v35 }
 0x3a6   : > { %1338 = vmax.xlane.f32.xlu2 %v4695_v10 }
 0x3ab   : > { %1322 = vmax.xlane.f32.xlu1 %v4699_v42 }
 0x3ad   : > { %1346 = vmax.xlane.f32.xlu0 %v4701_v56 }
 0x3b3   : > { %1330 = vmax.xlane.f32.xlu1 %v4705_v0 }
 0x3f8   : > { %v1317_v9 = vpop.xlane.xlu0 %1316 }
 0x3f9   : > { %v4713_v40 = vmax.f32 %v4708_v31, %v1317_v9  ;;  %v1325_v21 = vpop.xlane.xlu2 %1324 }
 0x3fa   : > { %v4716_v33 = vmax.f32 %v4710_v34, %v1325_v21 }
 0x3fb   : > { %1637 = vst.msk [vmem:[#allocation4] sm:$0xff] %vm1620_vm4, %v4713_v40  ;;  %1446 = vperm.xlu1 %3423, %v4713_v40  }
 0x3fc   : > { %1641 = vst.msk [vmem:[#allocation4 + $0x20] sm:$0xff] %vm1620_vm4, %v4716_v33 }
 0x400   : > { %v1341_v36 = vpop.xlane.xlu0 %1340 }
 0x401   : > { %v4732_v57 = vmax.f32 %v4727_v17, %v1341_v36  ;;  %v1333_v2 = vpop.xlane.xlu2 %1332 }
 0x402   : > { %v4735_v15 = vmax.f32 %v4729_v5, %v1333_v2 }
 0x403   : > { %1649 = vst.msk [vmem:[#allocation4 + $0x60] sm:$0xff] %vm1620_vm4, %v4732_v57  ;;  %1506 = vperm.xlu0 %3424, %v4732_v57   ;;  %1466 = vperm.xlu1 %3423, %v4716_v33  }
 0x404   : > { %1645 = vst.msk [vmem:[#allocation4 + $0x40] sm:$0xff] %vm1620_vm4, %v4735_v15 }
 0x406   : > { %v1343_v63 = vpop.xlane.xlu1 %1342 }
 0x407   : > { %v4752_v11 = vmax.f32 %v4747_v3, %v1343_v63  ;;  %v4835_v63 = vld [vmem:[#allocation4 + $0x18] sm:$0xff] }
 0x408   : > { %v1319_v44 = vpop.xlane.xlu0 %1318 }
 0x409   : > { %v4757_v49 = vmax.f32 %v4749_v6, %v1319_v44  ;;  %1650 = vst.msk [vmem:[#allocation4 + $0x68] sm:$0xff] %vm1620_vm4, %v4752_v11  ;;  %v1327_v8 = vpop.xlane.xlu2 %1326  ;;  %v4837_v44 = vld [vmem:[#allocation4 + $0x78] sm:$0xff] }
 0x40a   : > { %v4764_v26 = vmax.f32 %v4754_v14, %v1327_v8 }
 0x40b   : > { %1638 = vst.msk [vmem:[#allocation4 + $0x8] sm:$0xff] %vm1620_vm4, %v4757_v49  ;;  %1451 = vperm.xlu2 %3425, %v4757_v49   ;;  %1486 = vperm.xlu1 %3423, %v4735_v15  }
 0x40c   : > { %1642 = vst.msk [vmem:[#allocation4 + $0x28] sm:$0xff] %vm1620_vm4, %v4764_v26 }
 0x40e   : > { %v1321_v45 = vpop.xlane.xlu1 %1320 }
 0x40f   : > { %v4781_v1 = vmax.f32 %v4776_v19, %v1321_v45 }
 0x410   : > { %v1335_v16 = vpop.xlane.xlu0 %1334 }
 0x411   : > { %v4786_v52 = vmax.f32 %v4778_v22, %v1335_v16  ;;  %1639 = vst.msk [vmem:[#allocation4 + $0x10] sm:$0xff] %vm1620_vm4, %v4781_v1  ;;  %v1345_v25 = vpop.xlane.xlu2 %1344 }
 0x412   : > { %v4793_v51 = vmax.f32 %v4783_v12, %v1345_v25 }
 0x413   : > { %1646 = vst.msk [vmem:[#allocation4 + $0x48] sm:$0xff] %vm1620_vm4, %v4786_v52  ;;  %1471 = vperm.xlu2 %3425, %v4764_v26   ;;  %1491 = vperm.xlu0 %3424, %v4786_v52  }
 0x414   : > { %5922 = vst [vmem:[#allocation18_spill] sm:$0xff] %v4793_v51 }
 0x415   : > { %1651 = vst.msk [vmem:[#allocation4 + $0x70] sm:$0xff] %vm1620_vm4, %v4793_v51 }
 0x416   : > { %v1337_v54 = vpop.xlane.xlu1 %1336 }
 0x417   : > { %v4810_v61 = vmax.f32 %v4805_v39, %v1337_v54 }
 0x418   : > { %v1329_v7 = vpop.xlane.xlu0 %1328 }
 0x419   : > { %v4815_v18 = vmax.f32 %v4807_v30, %v1329_v7  ;;  %1647 = vst.msk [vmem:[#allocation4 + $0x50] sm:$0xff] %vm1620_vm4, %v4810_v61  ;;  %v1339_v9 = vpop.xlane.xlu2 %1338 }
 0x41a   : > { %v4822_v21 = vmax.f32 %v4812_v47, %v1339_v9  ;;  %v4856_v9 = vld [vmem:[#allocation4 + $0x38] sm:$0xff] }
 0x41b   : > { %1643 = vst.msk [vmem:[#allocation4 + $0x30] sm:$0xff] %vm1620_vm4, %v4815_v18  ;;  %1511 = vperm.xlu2 %3425, %v4752_v11   ;;  %1456 = vperm.xlu0 %3424, %v4781_v1  }
 0x41c   : > { %1476 = vperm.xlu1 %3423, %v4815_v18   ;;  %1648 = vst.msk [vmem:[#allocation4 + $0x58] sm:$0xff] %vm1620_vm4, %v4822_v21 }
 0x41e   : > { %v1323_v8 = vpop.xlane.xlu1 %1322 }
 0x41f   : > { %v4840_v45 = vmax.f32 %v4835_v63, %v1323_v8 }
 0x420   : > { %v1347_v16 = vpop.xlane.xlu0 %1346 }
 0x421   : > { %v4843_v25 = vmax.f32 %v4837_v44, %v1347_v16  ;;  %1640 = vst.msk [vmem:[#allocation4 + $0x18] sm:$0xff] %vm1620_vm4, %v4840_v45 }
 0x423   : > { %1652 = vst.msk [vmem:[#allocation4 + $0x78] sm:$0xff] %vm1620_vm4, %v4843_v25  ;;  %1521 = vperm.xlu0 %3424, %v4843_v25   ;;  %1496 = vperm.xlu2 %3425, %v4810_v61  }
 0x424   : > { %1516 = vperm.xlu1 %3423, %v4793_v51  }
 0x426   : > { %v1331_v8 = vpop.xlane.xlu1 %1330 }
 0x427   : > { %v4859_v16 = vmax.f32 %v4856_v9, %v1331_v8 }
 0x429   : > { %1644 = vst.msk [vmem:[#allocation4 + $0x38] sm:$0xff] %vm1620_vm4, %v4859_v16 }
 0x42b   : > { %1461 = vperm.xlu2 %3425, %v4840_v45  }
 0x42c   : > { %1501 = vperm.xlu1 %3423, %v4822_v21  }
 0x433   : > { %1481 = vperm.xlu2 %3425, %v4859_v16  }
 0x465   : > { %v1452_v2 = vpop.permute.xlu2 %1451 }
 0x466   : > { %v1525_v60 = vsub.f32 %v4672_v28, %v1452_v2 }
 0x46d   : > { %v1472_v7 = vpop.permute.xlu2 %1471  ;;  %v1447_v4 = vpop.permute.xlu1 %1446 }
 0x46e   : > { %v1524_v36 = vsub.f32 %v4660_v32, %v1447_v4 }
 0x470   : > { %v1540_v54 = vmul.f32 1.442695, %v1524_v36  ;;  %v1542_v36 = vmul.f32 1.442695, %v1525_v60 }
 0x472   : > { %3426 = vpow2.f32 %v1540_v54 }
 0x475   : > { %v4869_v8 = vpop.permute.xlu2 %1511  ;;  %v1507_v20 = vpop.permute.xlu0 %1506 }
 0x476   : > { %v1536_v24 = vsub.f32 %v4666_v38, %v1507_v20  ;;  %v1467_v62 = vpop.permute.xlu1 %1466  ;;  %v1529_v38 = vsub.f32 %v4676_v43, %v1472_v7 }
 0x477   : > { %v1528_v58 = vsub.f32 %v4663_v37, %v1467_v62 }
 0x478   : > { %v1564_v29 = vmul.f32 1.442695, %v1536_v24  ;;  %v3427_v13 = vpop.eup %3426 }
 0x479   : > { %v1548_v50 = vmul.f32 1.442695, %v1528_v58  ;;  %1572 = vadd.xlane.f32.xlu2 %v3427_v13 }
 0x47a   : > { %3428 = vpow2.f32 %v1564_v29 }
 0x47b   : > { %3430 = vpow2.f32 %v1548_v50  ;;  %v1550_v50 = vmul.f32 1.442695, %v1529_v38 }
 0x47d   : > { %v1497_v48 = vpop.permute.xlu2 %1496 }
 0x47e   : > { %v1487_v32 = vpop.permute.xlu1 %1486  ;;  %v1534_v37 = vsub.f32 %v4686_v27, %v1497_v48 }
 0x47f   : > { %v1532_v4 = vsub.f32 %v4668_v23, %v1487_v32 }
 0x480   : > { %v3429_v54 = vpop.eup %3428  ;;  %v1560_v20 = vmul.f32 1.442695, %v1534_v37 }
 0x481   : > { %v1556_v59 = vmul.f32 1.442695, %v1532_v4  ;;  %v3431_v51 = vpop.eup %3430  ;;  %1596 = vadd.xlane.f32.xlu0 %v3429_v54 }
 0x482   : > { %1580 = vadd.xlane.f32.xlu1 %v3431_v51 }
 0x483   : > { %3432 = vpow2.f32 %v1556_v59 }
 0x484   : > { %3434 = vpow2.f32 %v1542_v36  ;;  %v1537_v36 = vsub.f32 %v4674_v41, %v4869_v8 }
 0x485   : > { %v1492_v13 = vpop.permute.xlu0 %1491  ;;  %v1462_v58 = vpop.permute.xlu2 %1461 }
 0x486   : > { %v1533_v28 = vsub.f32 %v4678_v46, %v1492_v13  ;;  %v1527_v60 = vsub.f32 %v4699_v42, %v1462_v58  ;;  %v1566_v13 = vmul.f32 1.442695, %v1537_v36 }
 0x488   : > { %v1558_v29 = vmul.f32 1.442695, %v1533_v28  ;;  %v1546_v43 = vmul.f32 1.442695, %v1527_v60 }
 0x489   : > { %v3433_v23 = vpop.eup %3432 }
 0x48a   : > { %v3435_v24 = vpop.eup %3434  ;;  %3436 = vpow2.f32 %v1558_v29  ;;  %1588 = vadd.xlane.f32.xlu2 %v3433_v23 }
 0x48b   : > { %3438 = vpow2.f32 %v1550_v50  ;;  %1574 = vadd.xlane.f32.xlu1 %v3435_v24 }
 0x48c   : > { %3440 = vpow2.f32 %v1560_v20 }
 0x48d   : > { %v1457_v59 = vpop.permute.xlu0 %1456  ;;  %v1482_v51 = vpop.permute.xlu2 %1481  ;;  %3442 = vpow2.f32 %v1546_v43 }
 0x48e   : > { %v1526_v27 = vsub.f32 %v4683_v55, %v1457_v59  ;;  %v1531_v48 = vsub.f32 %v4705_v0, %v1482_v51  ;;  %v1477_v46 = vpop.permute.xlu1 %1476  ;;  %v5924_v51 = vsub.f32 %v4727_v17, %v4732_v57 }
 0x48f   : > { %v1530_v4 = vsub.f32 %v4692_v35, %v1477_v46 }
 0x490   : > { %v3437_v62 = vpop.eup %3436  ;;  %v1544_v2 = vmul.f32 1.442695, %v1526_v27  ;;  %v1554_v7 = vmul.f32 1.442695, %v1531_v48  ;;  %v1420_v27 = vmul.f32 1.442695, %v5924_v51 }
 0x491   : > { %v3439_v32 = vpop.eup %3438  ;;  %1590 = vadd.xlane.f32.xlu0 %v3437_v62  ;;  %v1552_v55 = vmul.f32 1.442695, %v1530_v4  ;;  %v1364_v62 = vld [vmem:[#allocation5] sm:$0xff] }
 0x492   : > { %v3441_v42 = vpop.eup %3440  ;;  %3444 = vpow2.f32 %v1544_v2  ;;  %1582 = vadd.xlane.f32.xlu2 %v3439_v32  ;;  %v1368_v4 = vld [vmem:[#allocation5 + $0x20] sm:$0xff] }
 0x493   : > { %3446 = vpow2.f32 %v1554_v7  ;;  %1592 = vadd.xlane.f32.xlu1 %v3441_v42  ;;  %v3443_v0 = vpop.eup %3442  ;;  %v5927_v42 = vsub.f32 %v4749_v6, %v4757_v49  ;;  %v5929_v6 = vsub.f32 %v4754_v14, %v4764_v26  ;;  %v5931_v26 = vsub.f32 %v4776_v19, %v4781_v1  ;;  %v1369_v19 = vld [vmem:[#allocation5 + $0x28] sm:$0xff] }
 0x494   : > { %3448 = vpow2.f32 %v1552_v55 }
 0x495   : > { %v1522_v38 = vpop.permute.xlu0 %1521  ;;  %3450 = vpow2.f32 %v1566_v13  ;;  %v1398_v17 = vmul.f32 1.442695, %v5927_v42  ;;  %v1406_v49 = vmul.f32 1.442695, %v5929_v6  ;;  %v5930_v13 = vsub.f32 %v4805_v39, %v4810_v61 }
 0x496   : > { %v1517_v54 = vpop.permute.xlu1 %1516  ;;  %v1539_v28 = vsub.f32 %v4701_v56, %v1522_v38 }
 0x497   : > { %v1538_v23 = vsub.f32 %v4689_v53, %v1517_v54  ;;  %v5925_v53 = vsub.f32 %v4710_v34, %v4716_v33  ;;  %v1376_v34 = vld [vmem:[#allocation5 + $0x60] sm:$0xff] }
 0x498   : > { %v3445_v37 = vpop.eup %3444  ;;  %v1570_v35 = vmul.f32 1.442695, %v1539_v28 }
 0x499   : > { %v3447_v58 = vpop.eup %3446  ;;  %1576 = vadd.xlane.f32.xlu0 %v3445_v37  ;;  %v1568_v60 = vmul.f32 1.442695, %v1538_v23  ;;  %v1404_v48 = vmul.f32 1.442695, %v5925_v53 }
 0x49a   : > { %1578 = vadd.xlane.f32.xlu2 %v3443_v0  ;;  %v3449_v29 = vpop.eup %3448  ;;  %3452 = vpow2.f32 %v1570_v35  ;;  %v5928_v0 = vsub.f32 %v4778_v22, %v4786_v52  ;;  %v1372_v35 = vld [vmem:[#allocation5 + $0x40] sm:$0xff]  ;;  %v1365_v22 = vld [vmem:[#allocation5 + $0x8] sm:$0xff] }
 0x49b   : > { %1586 = vadd.xlane.f32.xlu1 %v3447_v58  ;;  %v3451_v8 = vpop.eup %3450  ;;  %v1416_v58 = vmul.f32 1.442695, %v5930_v13  ;;  %v1377_v13 = vld [vmem:[#allocation5 + $0x68] sm:$0xff] }
 0x49e   : > { %v1502_v50 = vpop.permute.xlu1 %1501 }
 0x49f   : > { %v1535_v20 = vsub.f32 %v4695_v10, %v1502_v50  ;;  %v5923_v10 = vsub.f32 %v4708_v31, %v4713_v40  ;;  %v5926_v31 = vsub.f32 %v4729_v5, %v4735_v15  ;;  %v1414_v5 = vmul.f32 1.442695, %v5928_v0 }
 0x4a0   : > { %v3453_v24 = vpop.eup %3452 }
 0x4a1   : > { %v1562_v41 = vmul.f32 1.442695, %v1535_v20  ;;  %1584 = vadd.xlane.f32.xlu0 %v3449_v29  ;;  %v1396_v59 = vmul.f32 1.442695, %v5923_v10  ;;  %v1412_v40 = vmul.f32 1.442695, %v5926_v31 }
 0x4a2   : > { %v1400_v29 = vmul.f32 1.442695, %v5931_v26  ;;  %v1375_v26 = vld [vmem:[#allocation5 + $0x58] sm:$0xff] }
 0x4a3   : > { %3454 = vpow2.f32 %v1562_v41  ;;  %1598 = vadd.xlane.f32.xlu1 %v3451_v8  ;;  %v5932_v41 = vsub.f32 %v4835_v63, %v4840_v45 }
 0x4a4   : > { %3456 = vpow2.f32 %v1568_v60 }
 0x4a5   : > { %3458 = vpow2.f32 %v1396_v59  ;;  %v1402_v8 = vmul.f32 1.442695, %v5932_v41  ;;  %v1374_v59 = vld [vmem:[#allocation5 + $0x50] sm:$0xff] }
 0x4a6   : > { %3460 = vpow2.f32 %v1420_v27 }
 0x4a7   : > { %3462 = vpow2.f32 %v1404_v48 }
 0x4a8   : > { %3464 = vpow2.f32 %v1412_v40  ;;  %v1366_v40 = vld [vmem:[#allocation5 + $0x10] sm:$0xff] }
 0x4a9   : > { %v3455_v43 = vpop.eup %3454  ;;  %1602 = vadd.xlane.f32.xlu0 %v3453_v24  ;;  %3466 = vpow2.f32 %v1398_v17  ;;  %v5933_v24 = vsub.f32 %v4856_v9, %v4859_v16  ;;  %v5934_v9 = vsub.f32 %v4807_v30, %v4815_v18  ;;  %v1367_v17 = vld [vmem:[#allocation5 + $0x18] sm:$0xff] }
 0x4aa   : > { %1594 = vadd.xlane.f32.xlu2 %v3455_v43  ;;  %v3457_v56 = vpop.eup %3456  ;;  %3468 = vpow2.f32 %v1414_v5  ;;  %v1371_v30 = vld [vmem:[#allocation5 + $0x38] sm:$0xff]  ;;  %v5937_v5 = vsub.f32 %v4812_v47, %v4822_v21  ;;  %v5938_v47 = vld [vmem:[#allocation18_spill] sm:$0xff] }
 0x4ab   : > { %v3459_v46 = vpop.eup %3458  ;;  %3470 = vpow2.f32 %v1406_v49  ;;  %v1410_v43 = vmul.f32 1.442695, %v5933_v24  ;;  %v1408_v16 = vmul.f32 1.442695, %v5934_v9  ;;  %v1370_v49 = vld [vmem:[#allocation5 + $0x30] sm:$0xff]  ;;  %v5939_v21 = vsub.f32 %v4783_v12, %v5938_v47 }
 0x4ac   : > { %v1428_v2 = vmul.f32 %v3459_v46, %v1364_v62  ;;  %v3461_v57 = vpop.eup %3460  ;;  %3472 = vpow2.f32 %v1416_v58 }
 0x4ad   : > { %v3463_v33 = vpop.eup %3462  ;;  %v1440_v36 = vmul.f32 %v3461_v57, %v1376_v34  ;;  %3474 = vpow2.f32 %v1400_v29 }
 0x4ae   : > { %v1432_v54 = vmul.f32 %v3463_v33, %v1368_v4  ;;  %v3465_v28 = vpop.eup %3464  ;;  %3476 = vpow2.f32 %v1402_v8 }
 0x4af   : > { %v3467_v50 = vpop.eup %3466  ;;  %v1436_v52 = vmul.f32 %v3465_v28, %v1372_v35  ;;  %3478 = vpow2.f32 %v1410_v43 }
 0x4b0   : > { %v1429_v14 = vmul.f32 %v3467_v50, %v1365_v22  ;;  %v3469_v60 = vpop.eup %3468  ;;  %3480 = vpow2.f32 %v1408_v16  ;;  %v1424_v50 = vmul.f32 1.442695, %v5939_v21 }
 0x4b1   : > { %v3471_v10 = vpop.eup %3470 }
 0x4b2   : > { %1600 = vadd.xlane.f32.xlu2 %v3457_v56  ;;  %v1373_v56 = vld [vmem:[#allocation5 + $0x48] sm:$0xff]  ;;  %v3473_v1 = vpop.eup %3472  ;;  %v1433_v45 = vmul.f32 %v3471_v10, %v1369_v19 }
 0x4b3   : > { %v1437_v51 = vmul.f32 %v3469_v60, %v1373_v56  ;;  %v1438_v48 = vmul.f32 %v3473_v1, %v1374_v59  ;;  %v1378_v60 = vld [vmem:[#allocation5 + $0x70] sm:$0xff] }
 0x4ec   : > { %v1573_v7 = vpop.xlane.xlu2 %1572 }
 0x4ed   : > { %v1604_v32 = vadd.f32 %v1573_v7, %v1428_v2  ;;  %v3475_v7 = vpop.eup %3474 }
 0x4ee   : > { %v3477_v42 = vpop.eup %3476  ;;  %v1430_v18 = vmul.f32 %v3475_v7, %v1366_v40 }
 0x4ef   : > { %1621 = vst.msk [vmem:[#allocation5] sm:$0xff] %vm1620_vm4, %v1604_v32  ;;  %v5935_v32 = vsub.f32 %v4747_v3, %v4752_v11  ;;  %v3479_v57 = vpop.eup %3478  ;;  %v1431_v33 = vmul.f32 %v3477_v42, %v1367_v17  ;;  %v5936_v3 = vsub.f32 %v4837_v44, %v4843_v25 }
 0x4f0   : > { %v3481_v6 = vpop.eup %3480 }
 0x4f1   : > { %v1422_v31 = vmul.f32 1.442695, %v5935_v32  ;;  %v1426_v11 = vmul.f32 1.442695, %v5936_v3  ;;  %v1434_v44 = vmul.f32 %v3481_v6, %v1370_v49 }
 0x4f3   : > { %3482 = vpow2.f32 %v1422_v31 }
 0x4f4   : > { %v1597_v55 = vpop.xlane.xlu0 %1596  ;;  %3484 = vpow2.f32 %v1426_v11 }
 0x4f5   : > { %v1616_v15 = vadd.f32 %v1597_v55, %v1440_v36  ;;  %v1581_v38 = vpop.xlane.xlu1 %1580  ;;  %v1435_v55 = vmul.f32 %v3479_v57, %v1371_v30 }
 0x4f6   : > { %v1608_v37 = vadd.f32 %v1581_v38, %v1432_v54 }
 0x4f7   : > { %1633 = vst.msk [vmem:[#allocation5 + $0x60] sm:$0xff] %vm1620_vm4, %v1616_v15  ;;  %v1418_v15 = vmul.f32 1.442695, %v5937_v5 }
 0x4f8   : > { %1625 = vst.msk [vmem:[#allocation5 + $0x20] sm:$0xff] %vm1620_vm4, %v1608_v37 }
 0x4f9   : > { %v3483_v37 = vpop.eup %3482  ;;  %3486 = vpow2.f32 %v1418_v15 }
 0x4fa   : > { %v1441_v28 = vmul.f32 %v3483_v37, %v1377_v13  ;;  %3488 = vpow2.f32 %v1424_v50 }
 0x4fd   : > { %v1589_v20 = vpop.xlane.xlu2 %1588 }
 0x4fe   : > { %v1612_v39 = vadd.f32 %v1589_v20, %v1436_v52  ;;  %v1575_v61 = vpop.xlane.xlu1 %1574  ;;  %v3485_v52 = vpop.eup %3484  ;;  %v1379_v20 = vld [vmem:[#allocation5 + $0x78] sm:$0xff] }
 0x4ff   : > { %v1605_v23 = vadd.f32 %v1575_v61, %v1429_v14  ;;  %v3487_v14 = vpop.eup %3486  ;;  %v1443_v29 = vmul.f32 %v3485_v52, %v1379_v20 }
 0x500   : > { %1629 = vst.msk [vmem:[#allocation5 + $0x40] sm:$0xff] %vm1620_vm4, %v1612_v39  ;;  %v1439_v61 = vmul.f32 %v3487_v14, %v1375_v26  ;;  %v3489_v12 = vpop.eup %3488 }
 0x501   : > { %1622 = vst.msk [vmem:[#allocation5 + $0x8] sm:$0xff] %vm1620_vm4, %v1605_v23  ;;  %v1442_v24 = vmul.f32 %v3489_v12, %v1378_v60 }
 0x504   : > { %v1591_v63 = vpop.xlane.xlu0 %1590 }
 0x505   : > { %v1613_v27 = vadd.f32 %v1591_v63, %v1437_v51  ;;  %v1583_v53 = vpop.xlane.xlu2 %1582 }
 0x506   : > { %v1609_v46 = vadd.f32 %v1583_v53, %v1433_v45  ;;  %v1593_v62 = vpop.xlane.xlu1 %1592 }
 0x507   : > { %1630 = vst.msk [vmem:[#allocation5 + $0x48] sm:$0xff] %vm1620_vm4, %v1613_v27  ;;  %v1614_v2 = vadd.f32 %v1593_v62, %v1438_v48 }
 0x508   : > { %1626 = vst.msk [vmem:[#allocation5 + $0x28] sm:$0xff] %vm1620_vm4, %v1609_v46 }
 0x509   : > { %1631 = vst.msk [vmem:[#allocation5 + $0x50] sm:$0xff] %vm1620_vm4, %v1614_v2 }
 0x50c   : > { %v1577_v34 = vpop.xlane.xlu0 %1576 }
 0x50d   : > { %v1606_v4 = vadd.f32 %v1577_v34, %v1430_v18  ;;  %v1579_v36 = vpop.xlane.xlu2 %1578 }
 0x50e   : > { %v1607_v54 = vadd.f32 %v1579_v36, %v1431_v33  ;;  %v1587_v0 = vpop.xlane.xlu1 %1586 }
 0x50f   : > { %1623 = vst.msk [vmem:[#allocation5 + $0x10] sm:$0xff] %vm1620_vm4, %v1606_v4  ;;  %v1611_v38 = vadd.f32 %v1587_v0, %v1435_v55 }
 0x510   : > { %1624 = vst.msk [vmem:[#allocation5 + $0x18] sm:$0xff] %vm1620_vm4, %v1607_v54 }
 0x511   : > { %1628 = vst.msk [vmem:[#allocation5 + $0x38] sm:$0xff] %vm1620_vm4, %v1611_v38 }
 0x514   : > { %v1585_v25 = vpop.xlane.xlu0 %1584 }
 0x515   : > { %v1610_v58 = vadd.f32 %v1585_v25, %v1434_v44 }
 0x516   : > { %v1599_v35 = vpop.xlane.xlu1 %1598 }
 0x517   : > { %1627 = vst.msk [vmem:[#allocation5 + $0x30] sm:$0xff] %vm1620_vm4, %v1610_v58  ;;  %v1617_v22 = vadd.f32 %v1599_v35, %v1441_v28 }
 0x519   : > { %1634 = vst.msk [vmem:[#allocation5 + $0x68] sm:$0xff] %vm1620_vm4, %v1617_v22 }
 0x51c   : > { %v1603_v39 = vpop.xlane.xlu0 %1602 }
 0x51d   : > { %v1619_v41 = vadd.f32 %v1603_v39, %v1443_v29  ;;  %v1595_v8 = vpop.xlane.xlu2 %1594 }
 0x51e   : > { %v1615_v23 = vadd.f32 %v1595_v8, %v1439_v61 }
 0x51f   : > { %1636 = vst.msk [vmem:[#allocation5 + $0x78] sm:$0xff] %vm1620_vm4, %v1619_v41 }
 0x520   : > { %1632 = vst.msk [vmem:[#allocation5 + $0x58] sm:$0xff] %vm1620_vm4, %v1615_v23 }
 0x525   : > { %v1601_v43 = vpop.xlane.xlu2 %1600 }
 0x526   : > { %v1618_v56 = vadd.f32 %v1601_v43, %v1442_v24 }
 0x528   : > { %1635 = vst.msk [vmem:[#allocation5 + $0x70] sm:$0xff] %vm1620_vm4, %v1618_v56 }
 0x529 PF: > { %p3158_p10 = scmp.ne.s32.totalorder %s3997_s22, 4 }
 0x52b   : > { %1656 = sbr.rel (%p3158_p10) target bundleno = 1911 (0x777), region = 68 }
 0x530   : > { %v4955_v10 = vld [vmem:[%s5893_s4] sm:$0xff]  ;;  %vm2255_vm5 = vcmask 523264   ;;  %v2193_v63 = vld [vmem:[%s5893_s4 + $0x10] sm:$0xff]  ;;  %v4974_v53 = vld [vmem:[%s5893_s4 + $0x8] sm:$0xff]  ;;  %vm1881_vm6 = vcmask 7168   ;;  %vm1923_vm7 = vcmask 0  }
 0x531   : > { %v2644_v19 = vld [vmem:[%s5896_s7] sm:$0xff]  ;;  %v2566_v45 = vld [vmem:[%s5895_s6 + $0x10] sm:$0xff]  ;;  %v2645_v48 = vld [vmem:[%s5896_s7 + $0x8] sm:$0xff] }
 0x532   : > { %v2564_v1 = vld [vmem:[%s5895_s6] sm:$0xff]  ;;  %v2660_v59 = vmul.f32 %v2644_v19, %v4955_v10  ;;  %v2582_v27 = vmul.f32 %v2566_v45, %v2193_v63  ;;  %v2565_v9 = vld [vmem:[%s5895_s6 + $0x8] sm:$0xff]  ;;  %v2194_v62 = vld [vmem:[%s5893_s4 + $0x18] sm:$0xff]  ;;  %v2661_v32 = vmul.f32 %v2645_v48, %v4974_v53 }
 0x533   : > { %v2580_v51 = vmul.f32 %v2564_v1, %v4955_v10  ;;  %v2647_v2 = vld [vmem:[%s5896_s7 + $0x18] sm:$0xff]  ;;  %v2581_v31 = vmul.f32 %v2565_v9, %v4974_v53  ;;  %v2646_v18 = vld [vmem:[%s5896_s7 + $0x10] sm:$0xff]  ;;  %v2196_v34 = vld [vmem:[%s5893_s4 + $0x28] sm:$0xff] }
 0x534   : > { %v2676_v16 = vsel %vm2255_vm5, %v2660_v59, 0.0  ;;  %v2602_v7 = vsel %vm2255_vm5, %v2582_v27, 0.0  ;;  %v2663_v40 = vmul.f32 %v2647_v2, %v2194_v62  ;;  %v2679_v42 = vsel %vm2255_vm5, %v2661_v32, 0.0  ;;  %v2567_v30 = vld [vmem:[%s5895_s6 + $0x18] sm:$0xff]  ;;  %v2569_v33 = vld [vmem:[%s5895_s6 + $0x28] sm:$0xff]  ;;  %v1673_v3 = vld [vmem:[#allocation3] sm:$0xff] }
 0x535   : > { %v2596_v46 = vsel %vm2255_vm5, %v2580_v51, 0.0  ;;  %2677 = vadd.xlane.f32.xlu2 %v2676_v16  ;;  %2603 = vadd.xlane.f32.xlu0 %v2602_v7  ;;  %v2599_v17 = vsel %vm2255_vm5, %v2581_v31, 0.0  ;;  %v2583_v4 = vmul.f32 %v2567_v30, %v2194_v62  ;;  %v2662_v36 = vmul.f32 %v2646_v18, %v2193_v63  ;;  %v1674_v11 = vld [vmem:[#allocation3 + $0x8] sm:$0xff]  ;;  %v1675_v54 = vld [vmem:[#allocation3 + $0x10] sm:$0xff]  ;;  %v2195_v0 = vld [vmem:[%s5893_s4 + $0x20] sm:$0xff] }
 0x536   : > { %2597 = vadd.xlane.f32.xlu1 %v2596_v46  ;;  %v2685_v57 = vsel %vm2255_vm5, %v2663_v40, 0.0  ;;  %v2585_v55 = vmul.f32 %v2569_v33, %v2196_v34  ;;  %v1676_v5 = vld [vmem:[#allocation3 + $0x18] sm:$0xff]  ;;  %3490 = vlog2.f32 %v1673_v3  ;;  %v2648_v6 = vld [vmem:[%s5896_s7 + $0x20] sm:$0xff]  ;;  %v2197_v44 = vld [vmem:[%s5893_s4 + $0x30] sm:$0xff] }
 0x537   : > { %v2605_v15 = vsel %vm2255_vm5, %v2583_v4, 0.0  ;;  %v2682_v38 = vsel %vm2255_vm5, %v2662_v36, 0.0  ;;  %v2568_v49 = vld [vmem:[%s5895_s6 + $0x20] sm:$0xff]  ;;  %3492 = vlog2.f32 %v1674_v11  ;;  %v2650_v25 = vld [vmem:[%s5896_s7 + $0x30] sm:$0xff]  ;;  %v1678_v58 = vld [vmem:[#allocation3 + $0x28] sm:$0xff]  ;;  %v2664_v52 = vmul.f32 %v2648_v6, %v2195_v0 }
 0x538   : > { %v1677_v37 = vld [vmem:[#allocation3 + $0x20] sm:$0xff]  ;;  %v2611_v13 = vsel %vm2255_vm5, %v2585_v55, 0.0  ;;  %3494 = vlog2.f32 %v1675_v54  ;;  %v2570_v28 = vld [vmem:[%s5895_s6 + $0x30] sm:$0xff]  ;;  %v2649_v35 = vld [vmem:[%s5896_s7 + $0x28] sm:$0xff]  ;;  %v2584_v20 = vmul.f32 %v2568_v49, %v2195_v0  ;;  %v2666_v29 = vmul.f32 %v2650_v25, %v2197_v44 }
 0x539   : > { %v1679_v47 = vld [vmem:[#allocation3 + $0x30] sm:$0xff]  ;;  %3496 = vlog2.f32 %v1676_v5  ;;  %v5035_v21 = vld [vmem:[%s5893_s4 + $0x40] sm:$0xff]  ;;  %v1680_v22 = vld [vmem:[#allocation3 + $0x38] sm:$0xff]  ;;  %v2586_v39 = vmul.f32 %v2570_v28, %v2197_v44  ;;  %v2665_v8 = vmul.f32 %v2649_v35, %v2196_v34  ;;  %v2688_v59 = vsel %vm2255_vm5, %v2664_v52, 0.0 }
 0x53a   : > { %v2572_v50 = vld [vmem:[%s5895_s6 + $0x40] sm:$0xff]  ;;  %3498 = vlog2.f32 %v1677_v37  ;;  %v1682_v61 = vld [vmem:[#allocation3 + $0x48] sm:$0xff]  ;;  %v2198_v12 = vld [vmem:[%s5893_s4 + $0x38] sm:$0xff]  ;;  %v2608_v51 = vsel %vm2255_vm5, %v2584_v20, 0.0  ;;  %v2694_v9 = vsel %vm2255_vm5, %v2666_v29, 0.0 }
 0x53b   : > { %v1681_v14 = vld [vmem:[#allocation3 + $0x40] sm:$0xff]  ;;  %3500 = vlog2.f32 %v1678_v58  ;;  %v2588_v23 = vmul.f32 %v2572_v50, %v5035_v21  ;;  %v2651_v60 = vld [vmem:[%s5896_s7 + $0x38] sm:$0xff]  ;;  %v1683_v24 = vld [vmem:[#allocation3 + $0x50] sm:$0xff]  ;;  %v5060_v16 = vsel %vm2255_vm5, %v2586_v39, 0.0  ;;  %v5066_v32 = vsel %vm2255_vm5, %v2665_v8, 0.0 }
 0x53c   : > { %v3491_v26 = vpop.eup %3490  ;;  %3502 = vlog2.f32 %v1679_v47  ;;  %v2571_v56 = vld [vmem:[%s5895_s6 + $0x38] sm:$0xff]  ;;  %v2200_v63 = vld [vmem:[%s5893_s4 + $0x48] sm:$0xff]  ;;  %v1685_v27 = vld [vmem:[#allocation3 + $0x60] sm:$0xff]  ;;  %v2667_v46 = vmul.f32 %v2651_v60, %v2198_v12 }
 0x53d   : > { %2680 = vadd.xlane.f32.xlu2 %v2679_v42  ;;  %2686 = vadd.xlane.f32.xlu0 %v2685_v57  ;;  %v3493_v41 = vpop.eup %3492  ;;  %3504 = vlog2.f32 %v1680_v22  ;;  %v1684_v19 = vld [vmem:[#allocation3 + $0x58] sm:$0xff]  ;;  %v2653_v45 = vld [vmem:[%s5896_s7 + $0x48] sm:$0xff]  ;;  %v5069_v31 = vsel %vm2255_vm5, %v2588_v23, 0.0  ;;  %v2587_v40 = vmul.f32 %v2571_v56, %v2198_v12  ;;  %v2652_v42 = vld [vmem:[%s5896_s7 + $0x40] sm:$0xff]  ;;  %v1690_v4 = vmul.f32 0.6931472, %v3491_v26 }
 0x53e   : > { %2600 = vadd.xlane.f32.xlu1 %v2599_v17  ;;  %v3495_v43 = vpop.eup %3494  ;;  %3506 = vlog2.f32 %v1681_v14  ;;  %v2573_v62 = vld [vmem:[%s5895_s6 + $0x48] sm:$0xff]  ;;  %v1687_v17 = vld [vmem:[#allocation3 + $0x70] sm:$0xff]  ;;  %v1688_v57 = vld [vmem:[#allocation3 + $0x78] sm:$0xff]  ;;  %v2669_v18 = vmul.f32 %v2653_v45, %v2200_v63  ;;  %v1692_v36 = vmul.f32 0.6931472, %v3493_v41  ;;  %v2668_v6 = vmul.f32 %v2652_v42, %v5035_v21 }
 0x53f   : > { %v3497_v1 = vpop.eup %3496  ;;  %3508 = vlog2.f32 %v1682_v61  ;;  %v1686_v2 = vld [vmem:[#allocation3 + $0x68] sm:$0xff]  ;;  %v5077_v34 = vld [vmem:[%s5893_s4 + $0x58] sm:$0xff]  ;;  %v2589_v3 = vmul.f32 %v2573_v62, %v2200_v63  ;;  %v1657_v11 = vld [vmem:[#allocation2] sm:$0xff]  ;;  %v1694_v0 = vmul.f32 0.6931472, %v3495_v43  ;;  %v5087_v25 = vsel %vm2255_vm5, %v2587_v40, 0.0 }
 0x540   : > { %v3499_v48 = vpop.eup %3498  ;;  %3510 = vlog2.f32 %v1683_v24  ;;  %v2575_v33 = vld [vmem:[%s5895_s6 + $0x58] sm:$0xff]  ;;  %v1658_v54 = vld [vmem:[#allocation2 + $0x8] sm:$0xff]  ;;  %v1696_v5 = vmul.f32 0.6931472, %v3497_v1  ;;  %v1659_v49 = vld [vmem:[#allocation2 + $0x10] sm:$0xff]  ;;  %v5097_v22 = vsel %vm2255_vm5, %v2669_v18, 0.0  ;;  %v5102_v26 = vadd.f32 %v1690_v4, %v1657_v11 }
 0x541   : > { %v3501_v7 = vpop.eup %3500  ;;  %3512 = vlog2.f32 %v1684_v19  ;;  %v1660_v37 = vld [vmem:[#allocation2 + $0x18] sm:$0xff]  ;;  %v2201_v58 = vld [vmem:[%s5893_s4 + $0x50] sm:$0xff]  ;;  %v2591_v35 = vmul.f32 %v2575_v33, %v5077_v34  ;;  %v1661_v47 = vld [vmem:[#allocation2 + $0x20] sm:$0xff]  ;;  %v5104_v29 = vadd.f32 %v1692_v36, %v1658_v54  ;;  %v5107_v61 = vsel %vm2255_vm5, %v2589_v3, 0.0 }
 0x542   : > { %v3503_v30 = vpop.eup %3502  ;;  %3514 = vlog2.f32 %v1685_v27  ;;  %v2654_v28 = vld [vmem:[%s5896_s7 + $0x50] sm:$0xff]  ;;  %v1700_v21 = vmul.f32 0.6931472, %v3501_v7  ;;  %v1662_v20 = vld [vmem:[#allocation2 + $0x28] sm:$0xff]  ;;  %v5109_v23 = vadd.f32 %v1694_v0, %v1659_v49  ;;  %v5111_v12 = vadd.f32 %v1696_v5, %v1660_v37  ;;  %v1664_v56 = vld [vmem:[#allocation2 + $0x38] sm:$0xff] }
 0x543   : > { %v3505_v55 = vpop.eup %3504  ;;  %3516 = vlog2.f32 %v1686_v2  ;;  %v2574_v52 = vld [vmem:[%s5895_s6 + $0x50] sm:$0xff]  ;;  %v1702_v14 = vmul.f32 0.6931472, %v3503_v30  ;;  %v5114_v24 = vsel %vm2255_vm5, %v2668_v6, 0.0  ;;  %v5116_v43 = vmul.f32 %v2654_v28, %v2201_v58  ;;  %v1665_v45 = vld [vmem:[#allocation2 + $0x40] sm:$0xff]  ;;  %v1666_v27 = vld [vmem:[#allocation2 + $0x48] sm:$0xff] }
 0x544   : > { %3518 = vlog2.f32 %v1687_v17  ;;  %v1663_v41 = vld [vmem:[#allocation2 + $0x30] sm:$0xff]  ;;  %v1704_v8 = vmul.f32 0.6931472, %v3505_v55  ;;  %v5123_v63 = vsel %vm2255_vm5, %v2591_v35, 0.0  ;;  %v1668_v2 = vld [vmem:[#allocation2 + $0x58] sm:$0xff]  ;;  %v1669_v30 = vld [vmem:[#allocation2 + $0x60] sm:$0xff] }
 0x545   : > { %2606 = vadd.xlane.f32.xlu2 %v2605_v15  ;;  %2612 = vadd.xlane.f32.xlu0 %v2611_v13  ;;  %v3507_v15 = vpop.eup %3506  ;;  %v1698_v13 = vmul.f32 0.6931472, %v3499_v48  ;;  %3520 = vlog2.f32 %v1688_v57  ;;  %v1667_v48 = vld [vmem:[#allocation2 + $0x50] sm:$0xff]  ;;  %v5129_v40 = vadd.f32 %v1702_v14, %v1663_v41  ;;  %v1737_v42 = vmax.f32 %v5102_v26, -18.420681  ;;  %v1670_v18 = vld [vmem:[#allocation2 + $0x68] sm:$0xff] }
 0x546   : > { %2683 = vadd.xlane.f32.xlu1 %v2682_v38  ;;  %v5083_v38 = vsel %vm2255_vm5, %v2667_v46, 0.0  ;;  %v3509_v44 = vpop.eup %3508  ;;  %v1706_v19 = vmul.f32 0.6931472, %v3507_v15  ;;  %v5125_v46 = vadd.f32 %v1700_v21, %v1662_v20  ;;  %v1738_v17 = vmax.f32 %v5104_v29, -18.420681  ;;  %v1671_v36 = vld [vmem:[#allocation2 + $0x70] sm:$0xff] }
 0x547   : > { %v3511_v50 = vpop.eup %3510  ;;  %v5118_v1 = vadd.f32 %v1698_v13, %v1661_v47  ;;  %v5134_v4 = vadd.f32 %v1704_v8, %v1664_v56  ;;  %v1672_v55 = vld [vmem:[#allocation2 + $0x78] sm:$0xff]  ;;  %v1743_v37 = vmax.f32 %v5129_v40, -18.420681  ;;  %v1753_v13 = vmin.f32 %v5102_v26, -18.420681 }
 0x548   : > { %v3513_v39 = vpop.eup %3512  ;;  %v1710_v7 = vmul.f32 0.6931472, %v3511_v50  ;;  %v5138_v54 = vadd.f32 %v1706_v19, %v1665_v45  ;;  %v1742_v6 = vmax.f32 %v5125_v46, -18.420681  ;;  %v1755_v35 = vmin.f32 %v5109_v23, -18.420681 }
 0x549   : > { %v3515_v60 = vpop.eup %3514  ;;  %v1712_v33 = vmul.f32 0.6931472, %v3513_v39  ;;  %v1741_v0 = vmax.f32 %v5118_v1, -18.420681  ;;  %v1744_v28 = vmax.f32 %v5134_v4, -18.420681  ;;  %v1769_v19 = vsub.f32 %v1753_v13, %v1737_v42 }
 0x54a   : > { %v1714_v3 = vmul.f32 0.6931472, %v3515_v60  ;;  %v5144_v49 = vadd.f32 %v1710_v7, %v1667_v48  ;;  %v1756_v47 = vmin.f32 %v5111_v12, -18.420681  ;;  %v1757_v20 = vmin.f32 %v5118_v1, -18.420681 }
 0x54b   : > { %v1758_v8 = vmin.f32 %v5125_v46, -18.420681  ;;  %v1759_v56 = vmin.f32 %v5129_v40, -18.420681 }
 0x54c   : > { %v5154_v21 = vadd.f32 %v1714_v3, %v1669_v30  ;;  %v1747_v60 = vmax.f32 %v5144_v49, -18.420681 }
 0x54d   : > { %2689 = vadd.xlane.f32.xlu2 %v2688_v59  ;;  %2695 = vadd.xlane.f32.xlu0 %v2694_v9  ;;  %v3517_v59 = vpop.eup %3516  ;;  %v1708_v9 = vmul.f32 0.6931472, %v3509_v44  ;;  %v1754_v44 = vmin.f32 %v5104_v29, -18.420681  ;;  %v1774_v30 = vsub.f32 %v1758_v8, %v1742_v6 }
 0x54e   : > { %2609 = vadd.xlane.f32.xlu1 %v2608_v51  ;;  %v5120_v51 = vmul.f32 %v2574_v52, %v2201_v58  ;;  %v3519_v62 = vpop.eup %3518  ;;  %v1716_v11 = vmul.f32 0.6931472, %v3517_v59  ;;  %v5149_v58 = vadd.f32 %v1712_v33, %v1668_v2  ;;  %v1745_v52 = vmax.f32 %v5138_v54, -18.420681 }
 0x54f   : > { %v3521_v57 = vpop.eup %3520  ;;  %v1718_v5 = vmul.f32 0.6931472, %v3519_v62  ;;  %v1770_v59 = vsub.f32 %v1754_v44, %v1738_v17  ;;  %v1749_v48 = vmax.f32 %v5154_v21, -18.420681  ;;  %v1761_v62 = vmin.f32 %v5138_v54, -18.420681 }
 0x550   : > { %v1720_v15 = vmul.f32 0.6931472, %v3521_v57  ;;  %v5156_v50 = vadd.f32 %v1716_v11, %v1670_v18  ;;  %v1748_v45 = vmax.f32 %v5149_v58, -18.420681  ;;  %v1773_v2 = vsub.f32 %v1757_v20, %v1741_v0 }
 0x551   : > { %v5160_v14 = vadd.f32 %v1718_v5, %v1671_v36  ;;  %v1763_v18 = vmin.f32 %v5144_v49, -18.420681  ;;  %v1775_v33 = vsub.f32 %v1759_v56, %v1743_v37  ;;  %v1785_v36 = vmul.f32 1.442695, %v1769_v19 }
 0x552   : > { %v5162_v39 = vadd.f32 %v1720_v15, %v1672_v55  ;;  %v1787_v55 = vmul.f32 1.442695, %v1770_v59  ;;  %v1764_v3 = vmin.f32 %v5149_v58, -18.420681  ;;  %v1765_v13 = vmin.f32 %v5154_v21, -18.420681 }
 0x553   : > { %v1777_v44 = vsub.f32 %v1761_v62, %v1745_v52  ;;  %3522 = vpow2.f32 %v1785_v36  ;;  %v1795_v8 = vmul.f32 1.442695, %v1774_v30  ;;  %v1767_v56 = vmin.f32 %v5160_v14, -18.420681  ;;  %v1952_v21 = vld [vmem:[#allocation5 + $0x58] sm:$0xff] }
 0x554   : > { %v1752_v7 = vmax.f32 %v5162_v39, -18.420681  ;;  %3524 = vpow2.f32 %v1787_v55  ;;  %v1779_v19 = vsub.f32 %v1763_v18, %v1747_v60  ;;  %v1797_v59 = vmul.f32 1.442695, %v1775_v33 }
 0x555   : > { %2615 = vadd.xlane.f32.xlu2 %v5060_v16  ;;  %2621 = vadd.xlane.f32.xlu0 %v5069_v31  ;;  %v1739_v16 = vmax.f32 %v5109_v23, -18.420681  ;;  %v5141_v31 = vadd.f32 %v1708_v9, %v1666_v27  ;;  %v1760_v27 = vmin.f32 %v5134_v4, -18.420681  ;;  %v1750_v9 = vmax.f32 %v5156_v50, -18.420681 }
 0x556   : > { %2692 = vadd.xlane.f32.xlu1 %v5066_v32  ;;  %v1740_v32 = vmax.f32 %v5111_v12, -18.420681  ;;  %v1805_v18 = vmul.f32 1.442695, %v1779_v19  ;;  %v2626_v36 = vsel %vm2255_vm5, %v5120_v51, 0.0 }
 0x557   : > { %v1746_v41 = vmax.f32 %v5141_v31, -18.420681  ;;  %v1762_v57 = vmin.f32 %v5141_v31, -18.420681  ;;  %v1776_v11 = vsub.f32 %v1760_v27, %v1744_v28  ;;  %v1768_v27 = vmin.f32 %v5162_v39, -18.420681 }
 0x559   : > { %v1778_v20 = vsub.f32 %v1762_v57, %v1746_v41  ;;  %v3523_v57 = vpop.eup %3522  ;;  %v1784_v55 = vsub.f32 %v1768_v27, %v1752_v7 }
 0x55a   : > { %v3525_v33 = vpop.eup %3524  ;;  %v1817_v27 = vadd.f32 1.0, %v3523_v57 }
 0x55b   : > { %v1815_v19 = vmul.f32 1.442695, %v1784_v55 }
 0x55d   : > { %2698 = vadd.xlane.f32.xlu2 %v5083_v38  ;;  %2704 = vadd.xlane.f32.xlu0 %v5097_v22  ;;  %v1771_v38 = vsub.f32 %v1755_v35, %v1739_v16  ;;  %v1751_v22 = vmax.f32 %v5160_v14, -18.420681  ;;  %v1793_v35 = vmul.f32 1.442695, %v1773_v2  ;;  %v1803_v2 = vmul.f32 1.442695, %v1778_v20 }
 0x55e   : > { %2618 = vadd.xlane.f32.xlu1 %v5087_v25  ;;  %v1772_v25 = vsub.f32 %v1756_v47, %v1740_v32  ;;  %v1766_v47 = vmin.f32 %v5156_v50, -18.420681 }
 0x55f   : > { %v1789_v5 = vmul.f32 1.442695, %v1771_v38  ;;  %v1780_v38 = vsub.f32 %v1764_v3, %v1748_v45  ;;  %v1783_v30 = vsub.f32 %v1767_v56, %v1751_v22 }
 0x560   : > { %v1791_v15 = vmul.f32 1.442695, %v1772_v25  ;;  %v1799_v25 = vmul.f32 1.442695, %v1776_v11  ;;  %v1782_v62 = vsub.f32 %v1766_v47, %v1750_v9 }
 0x561   : > { %3526 = vpow2.f32 %v1789_v5  ;;  %v1807_v3 = vmul.f32 1.442695, %v1780_v38  ;;  %v5227_v5 = vld [vmem:[%s5893_s4 + $0x60] sm:$0xff]  ;;  %v1813_v47 = vmul.f32 1.442695, %v1783_v30 }
 0x562   : > { %3528 = vpow2.f32 %v1791_v15  ;;  %v2655_v15 = vld [vmem:[%s5896_s7 + $0x58] sm:$0xff] }
 0x563   : > { %3530 = vpow2.f32 %v1793_v35  ;;  %v2671_v56 = vmul.f32 %v2655_v15, %v5077_v34 }
 0x564   : > { %3532 = vpow2.f32 %v1795_v8 }
 0x565   : > { %2624 = vadd.xlane.f32.xlu2 %v5107_v61  ;;  %2630 = vadd.xlane.f32.xlu0 %v5123_v63  ;;  %v1781_v61 = vsub.f32 %v1765_v13, %v1749_v48  ;;  %v2706_v63 = vsel %vm2255_vm5, %v5116_v43, 0.0  ;;  %3534 = vpow2.f32 %v1797_v59  ;;  %v2576_v43 = vld [vmem:[%s5895_s6 + $0x60] sm:$0xff] }
 0x566   : > { %2701 = vadd.xlane.f32.xlu1 %v5114_v24  ;;  %v1801_v24 = vmul.f32 1.442695, %v1777_v44  ;;  %3536 = vpow2.f32 %v1799_v25  ;;  %v1811_v44 = vmul.f32 1.442695, %v1782_v62  ;;  %v2592_v8 = vmul.f32 %v2576_v43, %v5227_v5 }
 0x567   : > { %v3527_v11 = vpop.eup %3526  ;;  %v1809_v51 = vmul.f32 1.442695, %v1781_v61  ;;  %v1818_v25 = vadd.f32 1.0, %v3525_v33 }
 0x568   : > { %3538 = vpow2.f32 %v1801_v24  ;;  %v3529_v13 = vpop.eup %3528  ;;  %v1819_v24 = vadd.f32 1.0, %v3527_v11 }
 0x569   : > { %3540 = vpow2.f32 %v1803_v2  ;;  %v3531_v35 = vpop.eup %3530  ;;  %v2632_v2 = vsel %vm2255_vm5, %v2592_v8, 0.0  ;;  %v1820_v30 = vadd.f32 1.0, %v3529_v13  ;;  %v1941_v8 = vld [vmem:[#allocation5] sm:$0xff] }
 0x56a   : > { %3542 = vpow2.f32 %v1805_v18  ;;  %v3533_v20 = vpop.eup %3532  ;;  %v1821_v34 = vadd.f32 1.0, %v3531_v35 }
 0x56b   : > { %3544 = vpow2.f32 %v1807_v3  ;;  %v3535_v59 = vpop.eup %3534  ;;  %v1822_v55 = vadd.f32 1.0, %v3533_v20 }
 0x56c   : > { %3546 = vpow2.f32 %v1809_v51  ;;  %v3537_v38 = vpop.eup %3536  ;;  %v1823_v33 = vadd.f32 1.0, %v3535_v59 }
 0x56d   : > { %2707 = vadd.xlane.f32.xlu2 %v2706_v63  ;;  %3548 = vpow2.f32 %v1811_v44  ;;  %v2709_v63 = vsel %vm2255_vm5, %v2671_v56, 0.0  ;;  %v1824_v11 = vadd.f32 1.0, %v3537_v38 }
 0x56e   : > { %2627 = vadd.xlane.f32.xlu1 %v2626_v36  ;;  %v3539_v61 = vpop.eup %3538  ;;  %3550 = vpow2.f32 %v1813_v47 }
 0x56f   : > { %v3541_v62 = vpop.eup %3540  ;;  %3552 = vpow2.f32 %v1815_v19  ;;  %v1825_v15 = vadd.f32 1.0, %v3539_v61 }
 0x570   : > { %v3543_v18 = vpop.eup %3542  ;;  %3554 = vlog2.f32 %v1817_v27  ;;  %v1826_v44 = vadd.f32 1.0, %v3541_v62 }
 0x571   : > { %v3545_v36 = vpop.eup %3544  ;;  %3556 = vlog2.f32 %v1818_v25  ;;  %v1827_v47 = vadd.f32 1.0, %v3543_v18 }
 0x572   : > { %v3547_v57 = vpop.eup %3546  ;;  %3558 = vlog2.f32 %v1819_v24  ;;  %v1828_v27 = vadd.f32 1.0, %v3545_v36  ;;  %v1942_v36 = vld [vmem:[#allocation5 + $0x8] sm:$0xff] }
 0x573   : > { %v3549_v3 = vpop.eup %3548  ;;  %3560 = vlog2.f32 %v1820_v30  ;;  %v1829_v24 = vadd.f32 1.0, %v3547_v57 }
 0x574   : > { %v3551_v43 = vpop.eup %3550  ;;  %3562 = vlog2.f32 %v1821_v34 }
 0x575   : > { %2633 = vadd.xlane.f32.xlu2 %v2632_v2  ;;  %v3553_v51 = vpop.eup %3552  ;;  %3564 = vlog2.f32 %v1822_v55  ;;  %v1831_v12 = vadd.f32 1.0, %v3551_v43 }
 0x576   : > { %2710 = vadd.xlane.f32.xlu1 %v2709_v63  ;;  %v3555_v13 = vpop.eup %3554  ;;  %3566 = vlog2.f32 %v1823_v33  ;;  %v1830_v33 = vadd.f32 1.0, %v3549_v3 }
 0x577   : > { %v3557_v35 = vpop.eup %3556  ;;  %v1834_v20 = vmul.f32 0.6931472, %v3555_v13  ;;  %3568 = vlog2.f32 %v1824_v11 }
 0x578   : > { %v3559_v56 = vpop.eup %3558  ;;  %v1836_v19 = vmul.f32 0.6931472, %v3557_v35  ;;  %3570 = vlog2.f32 %v1825_v15 }
 0x579   : > { %v3561_v59 = vpop.eup %3560  ;;  %v1838_v38 = vmul.f32 0.6931472, %v3559_v56  ;;  %3572 = vlog2.f32 %v1826_v44  ;;  %v1865_v25 = vadd.f32 %v1834_v20, %v1737_v42  ;;  %v1832_v56 = vadd.f32 1.0, %v3553_v51 }
 0x57a   : > { %v3563_v61 = vpop.eup %3562  ;;  %v1840_v62 = vmul.f32 0.6931472, %v3561_v59  ;;  %v1866_v2 = vadd.f32 %v1836_v19, %v1738_v17  ;;  %3574 = vlog2.f32 %v1941_v8 }
 0x57b   : > { %v3565_v63 = vpop.eup %3564  ;;  %v1842_v30 = vmul.f32 0.6931472, %v3563_v61  ;;  %3576 = vlog2.f32 %v1827_v47  ;;  %v1867_v18 = vadd.f32 %v1838_v38, %v1739_v16  ;;  %v1882_v34 = vsel %vm1881_vm6, %v1865_v25, 0.0 }
 0x57c   : > { %v3567_v55 = vpop.eup %3566  ;;  %v1844_v26 = vmul.f32 0.6931472, %v3565_v63  ;;  %v1868_v42 = vadd.f32 %v1840_v62, %v1740_v32  ;;  %v1883_v57 = vsel %vm1881_vm6, %v1866_v2, 0.0  ;;  %3578 = vlog2.f32 %v1828_v27  ;;  %v1943_v62 = vld [vmem:[#allocation5 + $0x10] sm:$0xff] }
 0x57d   : > { %v3569_v29 = vpop.eup %3568  ;;  %v1846_v17 = vmul.f32 0.6931472, %v3567_v55  ;;  %v1869_v11 = vadd.f32 %v1842_v30, %v1741_v0  ;;  %v1884_v15 = vadd.f32 %v1883_v57, %v1882_v34  ;;  %v1885_v3 = vsel %vm1881_vm6, %v1867_v18, 0.0  ;;  %v1925_v18 = vld [vmem:[#allocation4] sm:$0xff]  ;;  %v1944_v34 = vld [vmem:[#allocation5 + $0x18] sm:$0xff] }
 0x57e   : > { %v3571_v23 = vpop.eup %3570  ;;  %v1848_v16 = vmul.f32 0.6931472, %v3569_v29  ;;  %v1870_v44 = vadd.f32 %v1844_v26, %v1742_v6  ;;  %3580 = vlog2.f32 %v1942_v36  ;;  %v1887_v1 = vsel %vm1881_vm6, %v1868_v42, 0.0  ;;  %v2224_v6 = vld [vmem:[%s5891_s2 + $0x8] sm:$0xff] }
 0x57f   : > { %v3573_v13 = vpop.eup %3572  ;;  %3582 = vlog2.f32 %v1829_v24  ;;  %v1886_v32 = vadd.f32 %v1885_v3, %v1884_v15  ;;  %v1850_v47 = vmul.f32 0.6931472, %v3571_v23  ;;  %v1871_v20 = vadd.f32 %v1846_v17, %v1743_v37  ;;  %v2223_v24 = vld [vmem:[%s5891_s2] sm:$0xff]  ;;  %v1946_v29 = vld [vmem:[#allocation5 + $0x28] sm:$0xff]  ;;  %v1947_v23 = vld [vmem:[#allocation5 + $0x30] sm:$0xff] }
 0x580   : > { %v3575_v35 = vpop.eup %3574  ;;  %v1889_v0 = vsel %vm1881_vm6, %v1869_v11, 0.0  ;;  %3584 = vlog2.f32 %v1830_v33  ;;  %v1852_v43 = vmul.f32 0.6931472, %v3573_v13  ;;  %v1872_v19 = vadd.f32 %v1848_v16, %v1744_v28  ;;  %v1945_v33 = vld [vmem:[#allocation5 + $0x20] sm:$0xff] }
 0x581   : > { %v3577_v8 = vpop.eup %3576  ;;  %v1888_v46 = vadd.f32 %v1887_v1, %v1886_v32  ;;  %v1891_v59 = vsel %vm1881_vm6, %v1870_v44, 0.0  ;;  %3586 = vlog2.f32 %v1831_v12  ;;  %v1873_v51 = vadd.f32 %v1850_v47, %v1745_v52  ;;  %v1949_v12 = vld [vmem:[#allocation5 + $0x40] sm:$0xff]  ;;  %v1950_v1 = vld [vmem:[#allocation5 + $0x48] sm:$0xff] }
 0x582   : > { %v3579_v40 = vpop.eup %3578  ;;  %v1854_v38 = vmul.f32 0.6931472, %v3577_v8  ;;  %v1893_v25 = vsel %vm1881_vm6, %v1871_v20, 0.0  ;;  %v2240_v61 = vmul.f32 %v2224_v6, %v4974_v53  ;;  %3588 = vlog2.f32 %v1832_v56 }
 0x583   : > { %v1890_v37 = vadd.f32 %v1889_v0, %v1888_v46  ;;  %v1958_v2 = vmul.f32 0.6931472, %v3575_v35  ;;  %v1856_v63 = vmul.f32 0.6931472, %v3579_v40  ;;  %v1874_v30 = vadd.f32 %v1852_v43, %v1746_v41  ;;  %v1926_v41 = vld [vmem:[#allocation4 + $0x8] sm:$0xff] }
 0x584   : > { %v3581_v27 = vpop.eup %3580  ;;  %v1895_v54 = vsel %vm1881_vm6, %v1872_v19, 0.0  ;;  %v2259_v52 = vsel %vm2255_vm5, %v2240_v61, 0.0  ;;  %v2239_v55 = vmul.f32 %v2223_v24, %v4955_v10  ;;  %v1875_v57 = vadd.f32 %v1854_v38, %v1747_v60  ;;  %v1948_v60 = vld [vmem:[#allocation5 + $0x38] sm:$0xff]  ;;  %v1955_v61 = vld [vmem:[#allocation5 + $0x70] sm:$0xff] }
 0x585   : > { %v3583_v4 = vpop.eup %3582  ;;  %v1892_v28 = vadd.f32 %v1891_v59, %v1890_v37  ;;  %2260 = vadd.xlane.f32.xlu2 %v2259_v52  ;;  %v1960_v26 = vmul.f32 0.6931472, %v3581_v27  ;;  %v1897_v31 = vsel %vm1881_vm6, %v1873_v51, 0.0  ;;  %3590 = vlog2.f32 %v1943_v62  ;;  %v1953_v59 = vld [vmem:[#allocation5 + $0x60] sm:$0xff]  ;;  %v1954_v51 = vld [vmem:[#allocation5 + $0x68] sm:$0xff]  ;;  %v1928_v52 = vld [vmem:[#allocation4 + $0x18] sm:$0xff] }
 0x586   : > { %v3585_v53 = vpop.eup %3584  ;;  %v1858_v42 = vmul.f32 0.6931472, %v3583_v4  ;;  %v2256_v15 = vsel %vm2255_vm5, %v2239_v55, 0.0  ;;  %3592 = vlog2.f32 %v1944_v34  ;;  %v5280_v16 = vadd.f32 %v1958_v2, %v1925_v18  ;;  %v1956_v2 = vld [vmem:[#allocation5 + $0x78] sm:$0xff]  ;;  %v1929_v18 = vld [vmem:[#allocation4 + $0x20] sm:$0xff] }
 0x587   : > { %v1894_v36 = vadd.f32 %v1893_v25, %v1892_v28  ;;  %v3587_v17 = vpop.eup %3586  ;;  %v1860_v10 = vmul.f32 0.6931472, %v3585_v53  ;;  %v1876_v44 = vadd.f32 %v1856_v63, %v1748_v45  ;;  %v1899_v49 = vsel %vm1881_vm6, %v1874_v30, 0.0  ;;  %2257 = vadd.xlane.f32.xlu1 %v2256_v15  ;;  %v1951_v45 = vld [vmem:[#allocation5 + $0x50] sm:$0xff] }
 0x588   : > { %3594 = vlog2.f32 %v1945_v33  ;;  %v3589_v3 = vpop.eup %3588  ;;  %v5285_v32 = vadd.f32 %v1960_v26, %v1926_v41  ;;  %v1862_v35 = vmul.f32 0.6931472, %v3587_v17  ;;  %v1877_v47 = vadd.f32 %v1858_v42, %v1749_v48  ;;  %v1930_v33 = vld [vmem:[#allocation4 + $0x28] sm:$0xff] }
 0x589   : > { %v1896_v11 = vadd.f32 %v1895_v54, %v1894_v36  ;;  %3596 = vlog2.f32 %v1946_v29  ;;  %v1901_v20 = vsel %vm1881_vm6, %v1875_v57, 0.0  ;;  %v2005_v0 = vmax.f32 %v5280_v16, -18.420681  ;;  %v1931_v57 = vld [vmem:[#allocation4 + $0x30] sm:$0xff] }
 0x58a   : > { %3598 = vlog2.f32 %v1947_v23  ;;  %v2021_v8 = vmin.f32 %v5280_v16, -18.420681  ;;  %v1864_v46 = vmul.f32 0.6931472, %v3589_v3  ;;  %v1878_v6 = vadd.f32 %v1860_v10, %v1750_v9 }
 0x58b   : > { %v1898_v13 = vadd.f32 %v1897_v31, %v1896_v11  ;;  %3600 = vlog2.f32 %v1948_v60  ;;  %v3591_v56 = vpop.eup %3590  ;;  %v1903_v43 = vsel %vm1881_vm6, %v1876_v44, 0.0  ;;  %v2006_v40 = vmax.f32 %v5285_v32, -18.420681  ;;  %v1932_v31 = vld [vmem:[#allocation4 + $0x38] sm:$0xff]  ;;  %v1934_v60 = vld [vmem:[#allocation4 + $0x48] sm:$0xff] }
 0x58c   : > { %3602 = vlog2.f32 %v1949_v12  ;;  %v3593_v48 = vpop.eup %3592  ;;  %v1879_v27 = vadd.f32 %v1862_v35, %v1751_v22  ;;  %v1905_v38 = vsel %vm1881_vm6, %v1877_v47, 0.0  ;;  %v2022_v50 = vmin.f32 %v5285_v32, -18.420681  ;;  %v1927_v22 = vld [vmem:[#allocation4 + $0x10] sm:$0xff] }
 0x58d   : > { %v1900_v58 = vadd.f32 %v1899_v49, %v1898_v13  ;;  %3604 = vlog2.f32 %v1950_v1  ;;  %v1962_v24 = vmul.f32 0.6931472, %v3591_v56  ;;  %v2037_v4 = vsub.f32 %v2021_v8, %v2005_v0  ;;  %v1933_v49 = vld [vmem:[#allocation4 + $0x40] sm:$0xff]  ;;  %v1935_v47 = vld [vmem:[#allocation4 + $0x50] sm:$0xff] }
 0x58e   : > { %v3595_v37 = vpop.eup %3594  ;;  %3606 = vlog2.f32 %v1951_v45  ;;  %v1880_v62 = vadd.f32 %v1864_v46, %v1752_v7  ;;  %v1907_v14 = vsel %vm1881_vm6, %v1878_v6, 0.0  ;;  %v1964_v63 = vmul.f32 0.6931472, %v3593_v48  ;;  %v1937_v6 = vld [vmem:[#allocation4 + $0x60] sm:$0xff] }
 0x58f   : > { %v1902_v19 = vadd.f32 %v1901_v20, %v1900_v58  ;;  %v3597_v9 = vpop.eup %3596  ;;  %3608 = vlog2.f32 %v1952_v21  ;;  %v1966_v34 = vmul.f32 0.6931472, %v3595_v37  ;;  %v1909_v55 = vsel %vm1881_vm6, %v1879_v27, 0.0  ;;  %v1936_v20 = vld [vmem:[#allocation4 + $0x58] sm:$0xff]  ;;  %v1939_v37 = vld [vmem:[#allocation4 + $0x70] sm:$0xff] }
 0x590   : > { %v3599_v28 = vpop.eup %3598  ;;  %3610 = vlog2.f32 %v1953_v59  ;;  %v1968_v53 = vmul.f32 0.6931472, %v3597_v9  ;;  %v5306_v41 = vadd.f32 %v1962_v24, %v1927_v22  ;;  %v2038_v29 = vsub.f32 %v2022_v50, %v2006_v40  ;;  %v1940_v27 = vld [vmem:[#allocation4 + $0x78] sm:$0xff] }
 0x591   : > { %v1904_v25 = vadd.f32 %v1903_v43, %v1902_v19  ;;  %v3601_v30 = vpop.eup %3600  ;;  %3612 = vlog2.f32 %v1954_v51  ;;  %v1970_v26 = vmul.f32 0.6931472, %v3599_v28  ;;  %v1911_v11 = vsel %vm1881_vm6, %v1880_v62, 0.0  ;;  %v1938_v43 = vld [vmem:[#allocation4 + $0x68] sm:$0xff] }
 0x592   : > { %v3603_v36 = vpop.eup %3602  ;;  %v1972_v39 = vmul.f32 0.6931472, %v3601_v30  ;;  %3614 = vlog2.f32 %v1955_v61  ;;  %v5311_v23 = vadd.f32 %v1964_v63, %v1928_v52  ;;  %v5313_v13 = vadd.f32 %v1966_v34, %v1929_v18 }
 0x593   : > { %v1906_v54 = vadd.f32 %v1905_v38, %v1904_v25  ;;  %v3605_v7 = vpop.eup %3604  ;;  %3616 = vlog2.f32 %v1956_v2  ;;  %v1974_v15 = vmul.f32 0.6931472, %v3603_v36  ;;  %v5315_v12 = vadd.f32 %v1968_v53, %v1930_v33 }
 0x594   : > { %v3607_v17 = vpop.eup %3606  ;;  %v1976_v3 = vmul.f32 0.6931472, %v3605_v7  ;;  %v5317_v58 = vadd.f32 %v1970_v26, %v1931_v57  ;;  %v5319_v45 = vadd.f32 %v1972_v39, %v1932_v31  ;;  %v2053_v8 = vmul.f32 1.442695, %v2037_v4 }
 0x595   : > { %v1908_v42 = vadd.f32 %v1907_v14, %v1906_v54  ;;  %v3609_v10 = vpop.eup %3608  ;;  %v1978_v1 = vmul.f32 0.6931472, %v3607_v17  ;;  %v2007_v48 = vmax.f32 %v5306_v41, -18.420681  ;;  %v2055_v19 = vmul.f32 1.442695, %v2038_v29 }
 0x596   : > { %v3611_v35 = vpop.eup %3610  ;;  %v1980_v21 = vmul.f32 0.6931472, %v3609_v10  ;;  %v5322_v50 = vadd.f32 %v1974_v15, %v1933_v49  ;;  %v2008_v9 = vmax.f32 %v5311_v23, -18.420681  ;;  %v5325_v24 = vadd.f32 %v1976_v3, %v1934_v60 }
 0x597   : > { %v1910_v44 = vadd.f32 %v1909_v55, %v1908_v42  ;;  %v3613_v56 = vpop.eup %3612  ;;  %v1982_v38 = vmul.f32 0.6931472, %v3611_v35  ;;  %v2009_v4 = vmax.f32 %v5313_v13, -18.420681  ;;  %v2010_v28 = vmax.f32 %v5315_v12, -18.420681 }
 0x598   : > { %v3615_v59 = vpop.eup %3614  ;;  %v1984_v51 = vmul.f32 0.6931472, %v3613_v56  ;;  %v5329_v14 = vadd.f32 %v1978_v1, %v1935_v47  ;;  %v2011_v22 = vmax.f32 %v5317_v58, -18.420681  ;;  %v2012_v2 = vmax.f32 %v5319_v45, -18.420681 }
 0x599   : > { %v1912_v46 = vadd.f32 %v1911_v11, %v1910_v44  ;;  %v3617_v25 = vpop.eup %3616  ;;  %v1986_v61 = vmul.f32 0.6931472, %v3615_v59  ;;  %v5333_v63 = vadd.f32 %v1980_v21, %v1936_v20  ;;  %v2023_v30 = vmin.f32 %v5306_v41, -18.420681 }
 0x59a   : > { %v1988_v62 = vmul.f32 0.6931472, %v3617_v25  ;;  %v2024_v54 = vmin.f32 %v5311_v23, -18.420681  ;;  %v2025_v52 = vmin.f32 %v5313_v13, -18.420681  ;;  %v5338_v18 = vadd.f32 %v1982_v38, %v1937_v6 }
 0x59b   : > { %1913 = vadd.xlane.f32.xlu0 %v1912_v46  ;;  %v5340_v34 = vadd.f32 %v1984_v51, %v1938_v43  ;;  %v2013_v53 = vmax.f32 %v5322_v50, -18.420681  ;;  %v2026_v36 = vmin.f32 %v5315_v12, -18.420681  ;;  %v5344_v55 = vadd.f32 %v1986_v61, %v1939_v37  ;;  %v5415_v12 = vld [vmem:[%s5893_s4 + $0x68] sm:$0xff] }
 0x59c   : > { %v5346_v33 = vadd.f32 %v1988_v62, %v1940_v27  ;;  %v2014_v26 = vmax.f32 %v5325_v24, -18.420681  ;;  %v2027_v39 = vmin.f32 %v5317_v58, -18.420681  ;;  %v2015_v7 = vmax.f32 %v5329_v14, -18.420681 }
 0x59d   : > { %v2028_v42 = vmin.f32 %v5319_v45, -18.420681  ;;  %v2029_v57 = vmin.f32 %v5322_v50, -18.420681  ;;  %v2016_v31 = vmax.f32 %v5333_v63, -18.420681  ;;  %v2039_v29 = vsub.f32 %v2023_v30, %v2007_v48 }
 0x59e   : > { %v2040_v17 = vsub.f32 %v2024_v54, %v2008_v9  ;;  %v2041_v11 = vsub.f32 %v2025_v52, %v2009_v4  ;;  %v2017_v15 = vmax.f32 %v5338_v18, -18.420681  ;;  %v2018_v10 = vmax.f32 %v5340_v34, -18.420681  ;;  %v2353_v45 = vld [vmem:[%s5892_s3 + $0x8] sm:$0xff]  ;;  %v2209_v50 = vld [vmem:[%s5894_s5 + $0x10] sm:$0xff] }
 0x59f   : > { %v2030_v44 = vmin.f32 %v5325_v24, -18.420681  ;;  %v2042_v49 = vsub.f32 %v2026_v36, %v2010_v28  ;;  %v2019_v60 = vmax.f32 %v5344_v55, -18.420681  ;;  %v2020_v3 = vmax.f32 %v5346_v33, -18.420681 }
 0x5a0   : > { %v2031_v35 = vmin.f32 %v5329_v14, -18.420681  ;;  %v2043_v47 = vsub.f32 %v2027_v39, %v2011_v22  ;;  %v2032_v20 = vmin.f32 %v5333_v63, -18.420681  ;;  %v2033_v1 = vmin.f32 %v5338_v18, -18.420681 }
 0x5a1   : > { %v2044_v56 = vsub.f32 %v2028_v42, %v2012_v2  ;;  %v2045_v46 = vsub.f32 %v2029_v57, %v2013_v53  ;;  %3618 = vpow2.f32 %v2053_v8  ;;  %v2057_v6 = vmul.f32 1.442695, %v2039_v29  ;;  %v2225_v24 = vld [vmem:[%s5891_s2 + $0x10] sm:$0xff] }
 0x5a2   : > { %v2059_v43 = vmul.f32 1.442695, %v2040_v17  ;;  %v2061_v21 = vmul.f32 1.442695, %v2041_v11  ;;  %v2034_v59 = vmin.f32 %v5340_v34, -18.420681  ;;  %v2046_v37 = vsub.f32 %v2030_v44, %v2014_v26 }
 0x5a3   : > { %3620 = vpow2.f32 %v2055_v19  ;;  %v2063_v27 = vmul.f32 1.442695, %v2042_v49  ;;  %v2035_v38 = vmin.f32 %v5344_v55, -18.420681  ;;  %v2047_v51 = vsub.f32 %v2031_v35, %v2015_v7  ;;  %v5476_v34 = vld [vmem:[%s5893_s4 + $0x70] sm:$0xff] }
 0x5a4   : > { %3622 = vpow2.f32 %v2057_v6  ;;  %v2065_v25 = vmul.f32 1.442695, %v2043_v47  ;;  %v2036_v61 = vmin.f32 %v5346_v33, -18.420681  ;;  %v2048_v8 = vsub.f32 %v2032_v20, %v2016_v31  ;;  %v2659_v33 = vld [vmem:[%s5896_s7 + $0x78] sm:$0xff] }
 0x5a5   : > { %3624 = vpow2.f32 %v2059_v43  ;;  %v2067_v62 = vmul.f32 1.442695, %v2044_v56  ;;  %v2049_v30 = vsub.f32 %v2033_v1, %v2017_v15  ;;  %v2069_v19 = vmul.f32 1.442695, %v2045_v46 }
 0x5a6   : > { %3626 = vpow2.f32 %v2061_v21  ;;  %v2050_v54 = vsub.f32 %v2034_v59, %v2018_v10  ;;  %v2071_v52 = vmul.f32 1.442695, %v2046_v37  ;;  %v2051_v39 = vsub.f32 %v2035_v38, %v2019_v60 }
 0x5a7   : > { %3628 = vpow2.f32 %v2063_v27  ;;  %v3619_v36 = vpop.eup %3618  ;;  %v2073_v42 = vmul.f32 1.442695, %v2047_v51  ;;  %v2052_v29 = vsub.f32 %v2036_v61, %v2020_v3  ;;  %v2075_v17 = vmul.f32 1.442695, %v2048_v8 }
 0x5a8   : > { %3630 = vpow2.f32 %v2065_v25  ;;  %v2077_v44 = vmul.f32 1.442695, %v2049_v30  ;;  %v2079_v35 = vmul.f32 1.442695, %v2050_v54  ;;  %v2081_v20 = vmul.f32 1.442695, %v2051_v39 }
 0x5a9   : > { %v3621_v57 = vpop.eup %3620  ;;  %3632 = vpow2.f32 %v2067_v62  ;;  %v2083_v56 = vmul.f32 1.442695, %v2052_v29  ;;  %v2085_v6 = vadd.f32 1.0, %v3619_v36 }
 0x5aa   : > { %v3623_v11 = vpop.eup %3622  ;;  %3634 = vpow2.f32 %v2069_v19  ;;  %v2086_v21 = vadd.f32 1.0, %v3621_v57 }
 0x5ab   : > { %v3625_v49 = vpop.eup %3624  ;;  %3636 = vpow2.f32 %v2071_v52  ;;  %v2087_v37 = vadd.f32 1.0, %v3623_v11 }
 0x5ac   : > { %v3627_v47 = vpop.eup %3626  ;;  %3638 = vpow2.f32 %v2073_v42  ;;  %v2088_v38 = vadd.f32 1.0, %v3625_v49 }
 0x5ad   : > { %v3629_v1 = vpop.eup %3628  ;;  %3640 = vpow2.f32 %v2075_v17  ;;  %v2089_v25 = vadd.f32 1.0, %v3627_v47 }
 0x5ae   : > { %v3631_v46 = vpop.eup %3630  ;;  %3642 = vpow2.f32 %v2077_v44  ;;  %v2090_v8 = vadd.f32 1.0, %v3629_v1 }
 0x5af   : > { %v3633_v43 = vpop.eup %3632  ;;  %3644 = vpow2.f32 %v2079_v35  ;;  %v2091_v30 = vadd.f32 1.0, %v3631_v46 }
 0x5b0   : > { %v3635_v59 = vpop.eup %3634  ;;  %3646 = vpow2.f32 %v2081_v20  ;;  %v2092_v54 = vadd.f32 1.0, %v3633_v43 }
 0x5b1   : > { %v3637_v27 = vpop.eup %3636  ;;  %3648 = vpow2.f32 %v2083_v56  ;;  %v2093_v36 = vadd.f32 1.0, %v3635_v59 }
 0x5b2   : > { %v3639_v51 = vpop.eup %3638  ;;  %3650 = vlog2.f32 %v2085_v6  ;;  %v2094_v42 = vadd.f32 1.0, %v3637_v27 }
 0x5b3   : > { %v3641_v61 = vpop.eup %3640  ;;  %3652 = vlog2.f32 %v2086_v21  ;;  %v2095_v17 = vadd.f32 1.0, %v3639_v51 }
 0x5b4   : > { %v3643_v62 = vpop.eup %3642  ;;  %3654 = vlog2.f32 %v2087_v37  ;;  %v2096_v47 = vadd.f32 1.0, %v3641_v61 }
 0x5b5   : > { %v3645_v19 = vpop.eup %3644  ;;  %3656 = vlog2.f32 %v2088_v38  ;;  %v2097_v46 = vadd.f32 1.0, %v3643_v62 }
 0x5b6   : > { %v3647_v52 = vpop.eup %3646  ;;  %3658 = vlog2.f32 %v2089_v25  ;;  %v2098_v51 = vadd.f32 1.0, %v3645_v19 }
 0x5b7   : > { %v3649_v39 = vpop.eup %3648  ;;  %3660 = vlog2.f32 %v2090_v8 }
 0x5b8   : > { %v3651_v57 = vpop.eup %3650  ;;  %3662 = vlog2.f32 %v2091_v30 }
 0x5b9   : > { %v3653_v29 = vpop.eup %3652  ;;  %v2102_v11 = vmul.f32 0.6931472, %v3651_v57  ;;  %3664 = vlog2.f32 %v2092_v54  ;;  %v2099_v54 = vadd.f32 1.0, %v3647_v52  ;;  %v2100_v57 = vadd.f32 1.0, %v3649_v39 }
 0x5ba   : > { %v3655_v44 = vpop.eup %3654  ;;  %v2104_v49 = vmul.f32 0.6931472, %v3653_v29  ;;  %3666 = vlog2.f32 %v2093_v36 }
 0x5bb   : > { %v3657_v35 = vpop.eup %3656  ;;  %v2106_v20 = vmul.f32 0.6931472, %v3655_v44  ;;  %3668 = vlog2.f32 %v2094_v42  ;;  %v2133_v1 = vadd.f32 %v2102_v11, %v2005_v0 }
 0x5bc   : > { %v3659_v56 = vpop.eup %3658  ;;  %v2108_v6 = vmul.f32 0.6931472, %v3657_v35  ;;  %v2134_v43 = vadd.f32 %v2104_v49, %v2006_v40  ;;  %3670 = vlog2.f32 %v2095_v17 }
 0x5bd   : > { %v3661_v21 = vpop.eup %3660  ;;  %v2110_v59 = vmul.f32 0.6931472, %v3659_v56  ;;  %v2135_v37 = vadd.f32 %v2106_v20, %v2007_v48  ;;  %v2149_v27 = vsel %vm1881_vm6, %v2133_v1, 0.0  ;;  %3672 = vlog2.f32 %v2096_v47  ;;  %v2208_v47 = vld [vmem:[%s5894_s5 + $0x8] sm:$0xff] }
 0x5be   : > { %v3663_v38 = vpop.eup %3662  ;;  %v2112_v25 = vmul.f32 0.6931472, %v3661_v21  ;;  %v2136_v16 = vadd.f32 %v2108_v6, %v2008_v9  ;;  %v2150_v0 = vsel %vm1881_vm6, %v2134_v43, 0.0  ;;  %3674 = vlog2.f32 %v2097_v46 }
 0x5bf   : > { %v3665_v61 = vpop.eup %3664  ;;  %v2114_v8 = vmul.f32 0.6931472, %v3663_v38  ;;  %v2137_v32 = vadd.f32 %v2110_v59, %v2009_v4  ;;  %v2151_v40 = vadd.f32 %v2150_v0, %v2149_v27  ;;  %v2152_v30 = vsel %vm1881_vm6, %v2135_v37, 0.0 }
 0x5c0   : > { %v3667_v62 = vpop.eup %3666  ;;  %v2116_v41 = vmul.f32 0.6931472, %v3665_v61  ;;  %v2138_v48 = vadd.f32 %v2112_v25, %v2010_v28  ;;  %v2154_v42 = vsel %vm1881_vm6, %v2136_v16, 0.0  ;;  %3676 = vlog2.f32 %v2098_v51  ;;  %v2577_v28 = vld [vmem:[%s5895_s6 + $0x68] sm:$0xff] }
 0x5c1   : > { %v3669_v19 = vpop.eup %3668  ;;  %v2153_v23 = vadd.f32 %v2152_v30, %v2151_v40  ;;  %v2118_v9 = vmul.f32 0.6931472, %v3667_v62  ;;  %v2139_v36 = vadd.f32 %v2114_v8, %v2011_v22  ;;  %v2156_v13 = vsel %vm1881_vm6, %v2137_v32, 0.0  ;;  %v3746_v32 = vld [vmem:[%s5893_s4 + $0x10] sm:$0xff] }
 0x5c2   : > { %v3671_v4 = vpop.eup %3670  ;;  %v2120_v52 = vmul.f32 0.6931472, %v3669_v19  ;;  %v2140_v58 = vadd.f32 %v2116_v41, %v2012_v2  ;;  %v2158_v22 = vsel %vm1881_vm6, %v2138_v48, 0.0  ;;  %3678 = vlog2.f32 %v2099_v54 }
 0x5c3   : > { %v2155_v29 = vadd.f32 %v2154_v42, %v2153_v23  ;;  %v3673_v17 = vpop.eup %3672  ;;  %v2122_v11 = vmul.f32 0.6931472, %v3671_v4  ;;  %v2141_v44 = vadd.f32 %v2118_v9, %v2013_v53  ;;  %v2160_v49 = vsel %vm1881_vm6, %v2139_v36, 0.0  ;;  %v2354_v53 = vld [vmem:[%s5892_s3 + $0x10] sm:$0xff]  ;;  %v3747_v42 = vld [vmem:[%s5893_s4 + $0x18] sm:$0xff] }
 0x5c4   : > { %v2593_v35 = vmul.f32 %v2577_v28, %v5415_v12  ;;  %v3675_v2 = vpop.eup %3674  ;;  %3680 = vlog2.f32 %v2100_v57  ;;  %v2124_v1 = vmul.f32 0.6931472, %v3673_v17  ;;  %v2142_v56 = vadd.f32 %v2120_v52, %v2014_v26 }
 0x5c5   : > { %v2157_v39 = vadd.f32 %v2156_v13, %v2155_v29  ;;  %v2162_v46 = vsel %vm1881_vm6, %v2140_v58, 0.0  ;;  %v2369_v59 = vmul.f32 %v2353_v45, %v2208_v47  ;;  %v2126_v37 = vmul.f32 0.6931472, %v3675_v2 }
 0x5c6   : > { %v2635_v6 = vsel %vm2255_vm5, %v2593_v35, 0.0  ;;  %v3677_v43 = vpop.eup %3676  ;;  %v2143_v27 = vadd.f32 %v2122_v11, %v2015_v7  ;;  %v2164_v38 = vsel %vm1881_vm6, %v2141_v44, 0.0  ;;  %v2370_v51 = vmul.f32 %v2354_v53, %v2209_v50  ;;  %v2579_v44 = vld [vmem:[%s5895_s6 + $0x78] sm:$0xff]  ;;  %v2656_v35 = vld [vmem:[%s5896_s7 + $0x60] sm:$0xff] }
 0x5c7   : > { %v2159_v20 = vadd.f32 %v2158_v22, %v2157_v39  ;;  %2636 = vadd.xlane.f32.xlu2 %v2635_v6  ;;  %v2387_v16 = vsel %vm2255_vm5, %v2369_v59, 0.0  ;;  %v2128_v0 = vmul.f32 0.6931472, %v3677_v43  ;;  %v2144_v61 = vadd.f32 %v2124_v1, %v2016_v31  ;;  %v2226_v31 = vld [vmem:[%s5891_s2 + $0x18] sm:$0xff]  ;;  %v2207_v53 = vld [vmem:[%s5894_s5] sm:$0xff]  ;;  %v2598_v6 = vpop.xlane.xlu1 %2597 }
 0x5c8   : > { %v3679_v26 = vpop.eup %3678  ;;  %v2166_v8 = vsel %vm1881_vm6, %v2142_v56, 0.0  ;;  %2388 = vadd.xlane.f32.xlu1 %v2387_v16  ;;  %v2241_v40 = vmul.f32 %v3746_v32, %v2225_v24  ;;  %v2145_v41 = vadd.f32 %v2126_v37, %v2017_v15  ;;  %v2168_v48 = vsel %vm1881_vm6, %v2143_v27, 0.0  ;;  %v5490_v22 = vld [vmem:[%s5893_s4 + $0x78] sm:$0xff]  ;;  %v2352_v1 = vld [vmem:[%s5892_s3] sm:$0xff]  ;;  %v2657_v24 = vld [vmem:[%s5896_s7 + $0x68] sm:$0xff] }
 0x5c9   : > { %v2161_v21 = vadd.f32 %v2160_v49, %v2159_v20  ;;  %v2130_v62 = vmul.f32 0.6931472, %v3679_v26  ;;  %v2390_v30 = vsel %vm2255_vm5, %v2370_v51, 0.0  ;;  %v2146_v54 = vadd.f32 %v2128_v0, %v2018_v10  ;;  %v2658_v10 = vld [vmem:[%s5896_s7 + $0x70] sm:$0xff]  ;;  %v2211_v56 = vld [vmem:[%s5894_s5 + $0x20] sm:$0xff]  ;;  %v2228_v26 = vld [vmem:[%s5891_s2 + $0x28] sm:$0xff] }
 0x5ca   : > { %v3681_v14 = vpop.eup %3680  ;;  %v2170_v23 = vsel %vm1881_vm6, %v2144_v61, 0.0  ;;  %v2262_v18 = vsel %vm2255_vm5, %v2241_v40, 0.0  ;;  %v2172_v36 = vsel %vm1881_vm6, %v2145_v41, 0.0  ;;  %v2242_v13 = vmul.f32 %v3747_v42, %v2226_v31  ;;  %v3748_v16 = vld [vmem:[%s5893_s4 + $0x28] sm:$0xff]  ;;  %v2604_v61 = vpop.xlane.xlu0 %2603 }
 0x5cb   : > { %v2163_v25 = vadd.f32 %v2162_v46, %v2161_v21  ;;  %v2132_v19 = vmul.f32 0.6931472, %v3681_v14  ;;  %v2147_v15 = vadd.f32 %v2130_v62, %v2019_v60  ;;  %v2174_v60 = vsel %vm1881_vm6, %v2146_v54, 0.0  ;;  %v2678_v46 = vpop.xlane.xlu2 %2677  ;;  %v2229_v14 = vld [vmem:[%s5891_s2 + $0x30] sm:$0xff] }
 0x5cc   : > { %v2674_v29 = vmul.f32 %v2658_v10, %v5476_v34  ;;  %v2265_v52 = vsel %vm2255_vm5, %v2242_v13, 0.0  ;;  %v2675_v11 = vmul.f32 %v2659_v33, %v5490_v22  ;;  %v2595_v47 = vmul.f32 %v2579_v44, %v5490_v22  ;;  %v3749_v62 = vld [vmem:[%s5893_s4 + $0x30] sm:$0xff]  ;;  %v2214_v10 = vld [vmem:[%s5894_s5 + $0x38] sm:$0xff] }
 0x5cd   : > { %v2165_v7 = vadd.f32 %v2164_v38, %v2163_v25  ;;  %v2148_v55 = vadd.f32 %v2132_v19, %v2020_v3  ;;  %v2176_v28 = vsel %vm1881_vm6, %v2147_v15, 0.0  ;;  %v2672_v45 = vmul.f32 %v2656_v35, %v5227_v5  ;;  %v2356_v5 = vld [vmem:[%s5892_s3 + $0x20] sm:$0xff]  ;;  %v2578_v19 = vld [vmem:[%s5895_s6 + $0x70] sm:$0xff]  ;;  %v2210_v44 = vld [vmem:[%s5894_s5 + $0x18] sm:$0xff] }
 0x5ce   : > { %v2718_v39 = vsel %vm2255_vm5, %v2674_v29, 0.0  ;;  %v2721_v2 = vsel %vm2255_vm5, %v2675_v11, 0.0  ;;  %v2641_v20 = vsel %vm2255_vm5, %v2595_v47, 0.0  ;;  %v2372_v43 = vmul.f32 %v2356_v5, %v2211_v56  ;;  %v2231_v47 = vld [vmem:[%s5891_s2 + $0x40] sm:$0xff]  ;;  %v2232_v56 = vld [vmem:[%s5891_s2 + $0x48] sm:$0xff] }
 0x5cf   : > { %v2167_v63 = vadd.f32 %v2166_v8, %v2165_v7  ;;  %2391 = vadd.xlane.f32.xlu2 %v2390_v30  ;;  %v2178_v3 = vsel %vm1881_vm6, %v2148_v55, 0.0  ;;  %v2712_v50 = vsel %vm2255_vm5, %v2672_v45, 0.0  ;;  %v2368_v21 = vmul.f32 %v2352_v1, %v2207_v53  ;;  %v2601_v40 = vpop.xlane.xlu1 %2600 }
 0x5d0   : > { %2263 = vadd.xlane.f32.xlu1 %v2262_v18  ;;  %v5521_v59 = vsub.f32 %v2598_v6, %v2678_v46  ;;  %v2396_v27 = vsel %vm2255_vm5, %v2372_v43, 0.0  ;;  %v2244_v0 = vmul.f32 %v3748_v16, %v2228_v26  ;;  %v2673_v7 = vmul.f32 %v2657_v24, %v5415_v12  ;;  %v2227_v16 = vld [vmem:[%s5891_s2 + $0x20] sm:$0xff] }
 0x5d1   : > { %v2169_v9 = vadd.f32 %v2168_v48, %v2167_v63  ;;  %v2384_v38 = vsel %vm2255_vm5, %v2368_v21, 0.0  ;;  %v2245_v41 = vmul.f32 %v3749_v62, %v2229_v14  ;;  %v2594_v55 = vmul.f32 %v2578_v19, %v5476_v34  ;;  %v3751_v21 = vld [vmem:[%s5893_s4 + $0x48] sm:$0xff] }
 0x5d2   : > { %v2756_v37 = vand.u32 2147483647, %v5521_v59  ;;  %v2271_v32 = vsel %vm2255_vm5, %v2244_v0, 0.0  ;;  %v2715_v31 = vsel %vm2255_vm5, %v2673_v7, 0.0  ;;  %v2687_v42 = vpop.xlane.xlu0 %2686  ;;  %v2740_v62 = vmin.f32 %v5521_v59, 0.0 }
 0x5d3   : > { %v2171_v4 = vadd.f32 %v2170_v23, %v2169_v9  ;;  %v2681_v8 = vpop.xlane.xlu2 %2680  ;;  %v2274_v63 = vsel %vm2255_vm5, %v2245_v41, 0.0  ;;  %v2213_v23 = vld [vmem:[%s5894_s5 + $0x30] sm:$0xff]  ;;  %v3752_v41 = vld [vmem:[%s5893_s4 + $0x20] sm:$0xff] }
 0x5d4   : > { %v2772_v51 = vsub.f32 0.0, %v2756_v37  ;;  %v5543_v48 = vsub.f32 %v2601_v40, %v2681_v8  ;;  %v2358_v9 = vld [vmem:[%s5892_s3 + $0x30] sm:$0xff]  ;;  %v2248_v37 = vmul.f32 %v3751_v21, %v2232_v56  ;;  %v2361_v8 = vld [vmem:[%s5892_s3 + $0x48] sm:$0xff] }
 0x5d5   : > { %v2173_v57 = vadd.f32 %v2172_v36, %v2171_v4  ;;  %v2374_v15 = vmul.f32 %v2358_v9, %v2213_v23  ;;  %v2359_v4 = vld [vmem:[%s5892_s3 + $0x38] sm:$0xff]  ;;  %v2217_v23 = vld [vmem:[%s5894_s5 + $0x50] sm:$0xff] }
 0x5d6   : > { %v2788_v25 = vmul.f32 1.442695, %v2772_v51  ;;  %v2757_v30 = vand.u32 2147483647, %v5543_v48  ;;  %v2283_v26 = vsel %vm2255_vm5, %v2248_v37, 0.0  ;;  %v2362_v9 = vld [vmem:[%s5892_s3 + $0x50] sm:$0xff] }
 0x5d7   : > { %v2175_v58 = vadd.f32 %v2174_v60, %v2173_v57  ;;  %2266 = vadd.xlane.f32.xlu2 %v2265_v52  ;;  %v2402_v60 = vsel %vm2255_vm5, %v2374_v15, 0.0  ;;  %v2684_v29 = vpop.xlane.xlu1 %2683 }
 0x5d8   : > { %2719 = vadd.xlane.f32.xlu1 %v2718_v39  ;;  %3682 = vpow2.f32 %v2788_v25  ;;  %v2773_v54 = vsub.f32 0.0, %v2757_v30  ;;  %v2638_v39 = vsel %vm2255_vm5, %v2594_v55, 0.0  ;;  %v2243_v30 = vmul.f32 %v3752_v41, %v2227_v16  ;;  %v2219_v41 = vld [vmem:[%s5894_s5 + $0x60] sm:$0xff] }
 0x5d9   : > { %v2177_v17 = vadd.f32 %v2176_v28, %v2175_v58  ;;  %v2375_v28 = vmul.f32 %v2359_v4, %v2214_v10  ;;  %v5567_v58 = vsub.f32 %v2604_v61, %v2684_v29  ;;  %v2216_v61 = vld [vmem:[%s5894_s5 + $0x48] sm:$0xff]  ;;  %v2741_v10 = vmin.f32 %v5543_v48, 0.0 }
 0x5da   : > { %v2790_v36 = vmul.f32 1.442695, %v2773_v54  ;;  %v2613_v53 = vpop.xlane.xlu0 %2612  ;;  %v2212_v48 = vld [vmem:[%s5894_s5 + $0x28] sm:$0xff] }
 0x5db   : > { %v2179_v49 = vadd.f32 %v2178_v3, %v2177_v17  ;;  %v2607_v13 = vpop.xlane.xlu2 %2606  ;;  %v2758_v3 = vand.u32 2147483647, %v5567_v58  ;;  %v2405_v17 = vsel %vm2255_vm5, %v2375_v28, 0.0 }
 0x5dc   : > { %v5565_v57 = vsub.f32 %v2607_v13, %v2687_v42  ;;  %3684 = vpow2.f32 %v2790_v36  ;;  %v2378_v42 = vmul.f32 %v2362_v9, %v2217_v23  ;;  %v3755_v9 = vld [vmem:[%s5893_s4 + $0x38] sm:$0xff] }
 0x5dd   : > { %2180 = vadd.xlane.f32.xlu0 %v2179_v49  ;;  %v2355_v49 = vld [vmem:[%s5892_s3 + $0x18] sm:$0xff]  ;;  %v2774_v35 = vsub.f32 0.0, %v2758_v3 }
 0x5de   : > { %v3683_v18 = vpop.eup %3682  ;;  %v2759_v33 = vand.u32 2147483647, %v5565_v57  ;;  %v2371_v46 = vmul.f32 %v2355_v49, %v2210_v44  ;;  %v2234_v44 = vld [vmem:[%s5891_s2 + $0x58] sm:$0xff] }
 0x5df   : > { %2722 = vadd.xlane.f32.xlu2 %v2721_v2  ;;  %v2820_v52 = vadd.f32 1.0, %v3683_v18  ;;  %v3750_v2 = vld [vmem:[%s5893_s4 + $0x40] sm:$0xff]  ;;  %v2610_v43 = vpop.xlane.xlu1 %2609 }
 0x5e0   : > { %2642 = vadd.xlane.f32.xlu1 %v2641_v20  ;;  %v2775_v11 = vsub.f32 0.0, %v2759_v33  ;;  %v2247_v20 = vmul.f32 %v3750_v2, %v2231_v47  ;;  %v2393_v25 = vsel %vm2255_vm5, %v2371_v46, 0.0  ;;  %v2268_v33 = vsel %vm2255_vm5, %v2243_v30, 0.0  ;;  %v2364_v30 = vld [vmem:[%s5892_s3 + $0x60] sm:$0xff] }
 0x5e1   : > { %3686 = vlog2.f32 %v2820_v52  ;;  %v2414_v52 = vsel %vm2255_vm5, %v2378_v42, 0.0 }
 0x5e2   : > { %v2794_v45 = vmul.f32 1.442695, %v2775_v11  ;;  %v3685_v5 = vpop.eup %3684  ;;  %v2280_v6 = vsel %vm2255_vm5, %v2247_v20, 0.0  ;;  %v2696_v19 = vpop.xlane.xlu0 %2695 }
 0x5e3   : > { %v2690_v1 = vpop.xlane.xlu2 %2689 }
 0x5e4   : > { %3688 = vpow2.f32 %v2794_v45  ;;  %v3753_v45 = vld [vmem:[%s5893_s4 + $0x58] sm:$0xff] }
 0x5e5   : > { %2713 = vadd.xlane.f32.xlu0 %v2712_v50  ;;  %v2792_v50 = vmul.f32 1.442695, %v2774_v35  ;;  %v2250_v2 = vmul.f32 %v3753_v45, %v2234_v44  ;;  %v2360_v45 = vld [vmem:[%s5892_s3 + $0x40] sm:$0xff] }
 0x5e7   : > { %2272 = vadd.xlane.f32.xlu2 %v2271_v32  ;;  %3690 = vpow2.f32 %v2792_v50  ;;  %v3687_v51 = vpop.eup %3686  ;;  %v2377_v32 = vmul.f32 %v2361_v8, %v2216_v61  ;;  %v2693_v36 = vpop.xlane.xlu1 %2692  ;;  %v2289_v37 = vsel %vm2255_vm5, %v2250_v2, 0.0 }
 0x5e8   : > { %2397 = vadd.xlane.f32.xlu1 %v2396_v27  ;;  %v2821_v27 = vadd.f32 1.0, %v3685_v5  ;;  %v2837_v7 = vmul.f32 0.6931472, %v3687_v51  ;;  %v5620_v4 = vsub.f32 %v2613_v53, %v2693_v36  ;;  %v3754_v51 = vld [vmem:[%s5893_s4 + $0x60] sm:$0xff] }
 0x5e9   : > { %v2411_v59 = vsel %vm2255_vm5, %v2377_v32, 0.0 }
 0x5ea   : > { %3692 = vlog2.f32 %v2821_v27  ;;  %v3689_v14 = vpop.eup %3688  ;;  %v2868_v55 = vsub.f32 %v2740_v62, %v2837_v7  ;;  %v2761_v28 = vand.u32 2147483647, %v5620_v4  ;;  %v2622_v5 = vpop.xlane.xlu0 %2621 }
 0x5eb   : > { %v2616_v54 = vpop.xlane.xlu2 %2615 }
 0x5ec   : > { %v5617_v15 = vsub.f32 %v2616_v54, %v2696_v19  ;;  %v2777_v11 = vsub.f32 0.0, %v2761_v28  ;;  %v2884_v49 = vsel %vm1881_vm6, %v2868_v55, 0.0  ;;  %v2380_v19 = vmul.f32 %v2364_v30, %v2219_v41  ;;  %v2365_v55 = vld [vmem:[%s5892_s3 + $0x68] sm:$0xff]  ;;  %v2233_v30 = vld [vmem:[%s5891_s2 + $0x50] sm:$0xff] }
 0x5ed   : > { %2385 = vadd.xlane.f32.xlu0 %v2384_v38  ;;  %v5592_v38 = vsub.f32 %v2610_v43, %v2690_v1  ;;  %v3691_v40 = vpop.eup %3690  ;;  %v2743_v1 = vmin.f32 %v5565_v57, 0.0  ;;  %v2742_v57 = vmin.f32 %v5567_v58, 0.0 }
 0x5ee   : > { %v2822_v18 = vadd.f32 1.0, %v3691_v40  ;;  %v2762_v29 = vand.u32 2147483647, %v5617_v15  ;;  %v2798_v56 = vmul.f32 1.442695, %v2777_v11  ;;  %v2230_v40 = vld [vmem:[%s5891_s2 + $0x38] sm:$0xff] }
 0x5ef   : > { %2403 = vadd.xlane.f32.xlu2 %v2402_v60  ;;  %v2760_v24 = vand.u32 2147483647, %v5592_v38  ;;  %v2619_v27 = vpop.xlane.xlu1 %2618  ;;  %v2420_v28 = vsel %vm2255_vm5, %v2380_v19, 0.0  ;;  %v2744_v11 = vmin.f32 %v5592_v38, 0.0  ;;  %v2237_v38 = vld [vmem:[%s5891_s2 + $0x70] sm:$0xff] }
 0x5f0   : > { %2275 = vadd.xlane.f32.xlu1 %v2274_v63  ;;  %v2823_v63 = vadd.f32 1.0, %v3689_v14  ;;  %v3693_v13 = vpop.eup %3692 }
 0x5f1   : > { %v2776_v0 = vsub.f32 0.0, %v2760_v24  ;;  %v2839_v60 = vmul.f32 0.6931472, %v3693_v13 }
 0x5f2   : > { %3694 = vlog2.f32 %v2823_v63  ;;  %v2705_v42 = vpop.xlane.xlu0 %2704 }
 0x5f3   : > { %3696 = vlog2.f32 %v2822_v18  ;;  %v2869_v3 = vsub.f32 %v2741_v10, %v2839_v60  ;;  %v2699_v46 = vpop.xlane.xlu2 %2698  ;;  %v2246_v18 = vmul.f32 %v3755_v9, %v2230_v40  ;;  %v2220_v10 = vld [vmem:[%s5894_s5 + $0x68] sm:$0xff] }
 0x5f4   : > { %v5649_v16 = vsub.f32 %v2619_v27, %v2699_v46  ;;  %v2238_v27 = vld [vmem:[%s5891_s2 + $0x78] sm:$0xff] }
 0x5f5   : > { %2716 = vadd.xlane.f32.xlu0 %v2715_v31  ;;  %v2796_v31 = vmul.f32 1.442695, %v2776_v0  ;;  %v2885_v35 = vsel %vm1881_vm6, %v2869_v3, 0.0 }
 0x5f6   : > { %v2886_v50 = vadd.f32 %v2885_v35, %v2884_v49  ;;  %v2763_v14 = vand.u32 2147483647, %v5649_v16  ;;  %v2277_v35 = vsel %vm2255_vm5, %v2246_v18, 0.0 }
 0x5f7   : > { %2281 = vadd.xlane.f32.xlu2 %v2280_v6  ;;  %3698 = vpow2.f32 %v2796_v31  ;;  %v2235_v6 = vld [vmem:[%s5891_s2 + $0x60] sm:$0xff] }
 0x5f8   : > { %2406 = vadd.xlane.f32.xlu1 %v2405_v17  ;;  %v2357_v17 = vld [vmem:[%s5892_s3 + $0x28] sm:$0xff]  ;;  %v3695_v20 = vpop.eup %3694  ;;  %v2251_v24 = vmul.f32 %v3754_v51, %v2235_v6  ;;  %v2779_v62 = vsub.f32 0.0, %v2763_v14  ;;  %v2746_v6 = vmin.f32 %v5617_v15, 0.0 }
 0x5f9   : > { %v2373_v53 = vmul.f32 %v2357_v17, %v2212_v48  ;;  %v3697_v43 = vpop.eup %3696  ;;  %v2843_v21 = vmul.f32 0.6931472, %v3695_v20  ;;  %v2381_v48 = vmul.f32 %v2365_v55, %v2220_v10 }
 0x5fa   : > { %v2292_v7 = vsel %vm2255_vm5, %v2251_v24, 0.0  ;;  %v2802_v36 = vmul.f32 1.442695, %v2779_v62 }
 0x5fb   : > { %v2871_v61 = vsub.f32 %v2743_v1, %v2843_v21  ;;  %v2399_v32 = vsel %vm2255_vm5, %v2373_v53, 0.0  ;;  %v2625_v13 = vpop.xlane.xlu2 %2624  ;;  %v2423_v20 = vsel %vm2255_vm5, %v2381_v48, 0.0 }
 0x5fd   : > { %2639 = vadd.xlane.f32.xlu0 %v2638_v39  ;;  %v2778_v39 = vsub.f32 0.0, %v2762_v29  ;;  %v2889_v23 = vsel %vm1881_vm6, %v2871_v61, 0.0 }
 0x5ff   : > { %2412 = vadd.xlane.f32.xlu2 %v2411_v59  ;;  %v2800_v47 = vmul.f32 1.442695, %v2778_v39 }
 0x600   : > { %2284 = vadd.xlane.f32.xlu1 %v2283_v26  ;;  %v3699_v26 = vpop.eup %3698 }
 0x601   : > { %3700 = vpow2.f32 %v2800_v47  ;;  %v2824_v0 = vadd.f32 1.0, %v3699_v26  ;;  %v2215_v47 = vld [vmem:[%s5894_s5 + $0x40] sm:$0xff] }
 0x602   : > { %3702 = vpow2.f32 %v2798_v56  ;;  %v2253_v56 = vmul.f32 %v2237_v38, %v5476_v34  ;;  %v2376_v46 = vmul.f32 %v2360_v45, %v2215_v47  ;;  %v2218_v47 = vld [vmem:[%s5894_s5 + $0x58] sm:$0xff] }
 0x603   : > { %3704 = vlog2.f32 %v2824_v0  ;;  %v2363_v45 = vld [vmem:[%s5892_s3 + $0x58] sm:$0xff] }
 0x604   : > { %v2298_v34 = vsel %vm2255_vm5, %v2253_v56, 0.0  ;;  %v2408_v62 = vsel %vm2255_vm5, %v2376_v46, 0.0 }
 0x605   : > { %2394 = vadd.xlane.f32.xlu0 %v2393_v25  ;;  %v2841_v25 = vmul.f32 0.6931472, %v3697_v43  ;;  %v2745_v43 = vmin.f32 %v5620_v4, 0.0  ;;  %v2254_v4 = vmul.f32 %v2238_v27, %v5490_v22  ;;  %v2222_v22 = vld [vmem:[%s5894_s5 + $0x78] sm:$0xff] }
 0x607   : > { %2290 = vadd.xlane.f32.xlu2 %v2289_v37  ;;  %v2870_v8 = vsub.f32 %v2742_v57, %v2841_v25  ;;  %v3701_v63 = vpop.eup %3700  ;;  %v2708_v37 = vpop.xlane.xlu2 %2707  ;;  %v2301_v40 = vsel %vm2255_vm5, %v2254_v4, 0.0 }
 0x608   : > { %2415 = vadd.xlane.f32.xlu1 %v2414_v52  ;;  %v3703_v54 = vpop.eup %3702  ;;  %v2826_v59 = vadd.f32 1.0, %v3701_v63  ;;  %v5675_v52 = vsub.f32 %v2625_v13, %v2705_v42  ;;  %v2631_v25 = vpop.xlane.xlu0 %2630  ;;  %v3756_v13 = vld [vmem:[%s5893_s4 + $0x50] sm:$0xff] }
 0x609   : > { %v2887_v58 = vsel %vm1881_vm6, %v2870_v8, 0.0  ;;  %v2825_v29 = vadd.f32 1.0, %v3703_v54  ;;  %v3705_v17 = vpop.eup %3704  ;;  %v2249_v10 = vmul.f32 %v3756_v13, %v2233_v30  ;;  %v2366_v13 = vld [vmem:[%s5892_s3 + $0x70] sm:$0xff] }
 0x60a   : > { %v2888_v31 = vadd.f32 %v2887_v58, %v2886_v50  ;;  %3706 = vlog2.f32 %v2826_v59  ;;  %v2765_v39 = vand.u32 2147483647, %v5675_v52  ;;  %v2845_v44 = vmul.f32 0.6931472, %v3705_v17 }
 0x60b   : > { %3708 = vlog2.f32 %v2825_v29 }
 0x60c   : > { %v2890_v60 = vadd.f32 %v2889_v23, %v2888_v31  ;;  %3710 = vpow2.f32 %v2802_v36  ;;  %v2781_v2 = vsub.f32 0.0, %v2765_v39  ;;  %v2872_v50 = vsub.f32 %v2744_v11, %v2845_v44  ;;  %v2367_v31 = vld [vmem:[%s5892_s3 + $0x78] sm:$0xff] }
 0x60d   : > { %2269 = vadd.xlane.f32.xlu0 %v2268_v33  ;;  %v2702_v33 = vpop.xlane.xlu1 %2701  ;;  %v2383_v23 = vmul.f32 %v2367_v31, %v2222_v22  ;;  %v2747_v11 = vmin.f32 %v5649_v16, 0.0  ;;  %v2379_v16 = vmul.f32 %v2363_v45, %v2218_v47 }
 0x60e   : > { %v5677_v3 = vsub.f32 %v2622_v5, %v2702_v33  ;;  %v2806_v1 = vmul.f32 1.442695, %v2781_v2  ;;  %v2891_v24 = vsel %vm1881_vm6, %v2872_v50, 0.0 }
 0x60f   : > { %2421 = vadd.xlane.f32.xlu2 %v2420_v28  ;;  %v2892_v58 = vadd.f32 %v2891_v24, %v2890_v60  ;;  %v5718_v42 = vpop.xlane.xlu2 %2633  ;;  %v2429_v29 = vsel %vm2255_vm5, %v2383_v23, 0.0 }
 0x610   : > { %2293 = vadd.xlane.f32.xlu1 %v2292_v7  ;;  %v2764_v49 = vand.u32 2147483647, %v5677_v3  ;;  %v3707_v5 = vpop.eup %3706  ;;  %3712 = vpow2.f32 %v2806_v1  ;;  %v1914_v33 = vpop.xlane.xlu0 %1913  ;;  %v2749_v1 = vmin.f32 %v5675_v52, 0.0 }
 0x611   : > { %v3709_v51 = vpop.eup %3708  ;;  %v2849_v26 = vmul.f32 0.6931472, %v3707_v5  ;;  %v1915_v17 = vrot.slane %v1914_v33, 4 }
 0x612   : > { %v2780_v53 = vsub.f32 0.0, %v2764_v49  ;;  %v3711_v0 = vpop.eup %3710  ;;  %v2847_v61 = vmul.f32 0.6931472, %v3709_v51 }
 0x613   : > { %v2827_v8 = vadd.f32 1.0, %v3711_v0  ;;  %v2874_v14 = vsub.f32 %v2746_v6, %v2849_v26  ;;  %v1916_v2 = vadd.f32 %v1915_v17, %v1914_v33 }
 0x614   : > { %v2804_v21 = vmul.f32 1.442695, %v2780_v53  ;;  %v2873_v7 = vsub.f32 %v2745_v43, %v2847_v61 }
 0x615   : > { %2400 = vadd.xlane.f32.xlu0 %v2399_v32  ;;  %v2628_v57 = vpop.xlane.xlu1 %2627  ;;  %v2895_v18 = vsel %vm1881_vm6, %v2874_v14, 0.0  ;;  %v1917_v53 = vrot.slane %v1916_v2, 2  ;;  %v2417_v14 = vsel %vm2255_vm5, %v2379_v16, 0.0 }
 0x616   : > { %3714 = vpow2.f32 %v2804_v21  ;;  %v5701_v15 = vsub.f32 %v2628_v57, %v2708_v37  ;;  %v2893_v41 = vsel %vm1881_vm6, %v2873_v7, 0.0  ;;  %v3713_v19 = vpop.eup %3712  ;;  %v2748_v21 = vmin.f32 %v5677_v3, 0.0 }
 0x617   : > { %2299 = vadd.xlane.f32.xlu2 %v2298_v34  ;;  %3716 = vlog2.f32 %v2827_v8  ;;  %v2894_v54 = vadd.f32 %v2893_v41, %v2892_v58  ;;  %v2829_v59 = vadd.f32 1.0, %v3713_v19  ;;  %v2261_v5 = vpop.xlane.xlu2 %2260  ;;  %v1918_v34 = vadd.f32 %v1917_v53, %v1916_v2 }
 0x618   : > { %2424 = vadd.xlane.f32.xlu1 %v2423_v20  ;;  %v2766_v32 = vand.u32 2147483647, %v5701_v15  ;;  %v2305_v37 = vmul.f32 5.0, %v2261_v5  ;;  %v2750_v23 = vmin.f32 %v5701_v15, 0.0 }
 0x619   : > { %v2896_v55 = vadd.f32 %v2895_v18, %v2894_v54  ;;  %3718 = vlog2.f32 %v2829_v59  ;;  %v1919_v4 = vrot.slane %v1918_v34, 1 }
 0x61a   : > { %v2782_v63 = vsub.f32 0.0, %v2766_v32  ;;  %v2236_v32 = vld [vmem:[%s5891_s2 + $0x68] sm:$0xff] }
 0x61b   : > { %v1920_v58 = vadd.f32 %v1919_v4, %v1918_v34  ;;  %v2252_v22 = vmul.f32 %v2236_v32, %v5415_v12 }
 0x61c   : > { %v3715_v9 = vpop.eup %3714  ;;  %v2808_v36 = vmul.f32 1.442695, %v2782_v63 }
 0x61d   : > { %2278 = vadd.xlane.f32.xlu0 %v2277_v35  ;;  %v2828_v60 = vadd.f32 1.0, %v3715_v9  ;;  %v2711_v28 = vpop.xlane.xlu1 %2710  ;;  %v3717_v39 = vpop.eup %3716  ;;  %v2286_v35 = vsel %vm2255_vm5, %v2249_v10, 0.0  ;;  %3299 = vpush %v1920_v58  ;;  %v2295_v18 = vsel %vm2255_vm5, %v2252_v22, 0.0 }
 0x61e   : > { %v5724_v48 = vsub.f32 %v2631_v25, %v2711_v28  ;;  %v2851_v44 = vmul.f32 0.6931472, %v3717_v39  ;;  %v3160_v25 = vclamps-f32 %v2305_v37, 5.0 }
 0x61f   : > { %2430 = vadd.xlane.f32.xlu2 %v2429_v29  ;;  %3720 = vlog2.f32 %v2828_v60  ;;  %v3719_v38 = vpop.eup %3718 }
 0x620   : > { %2302 = vadd.xlane.f32.xlu1 %v2301_v40  ;;  %3722 = vpow2.f32 %v2808_v36  ;;  %v2767_v49 = vand.u32 2147483647, %v5724_v48  ;;  %v2875_v20 = vsub.f32 %v2747_v11, %v2851_v44  ;;  %v2855_v43 = vmul.f32 0.6931472, %v3719_v38  ;;  %v2221_v36 = vld [vmem:[%s5894_s5 + $0x70] sm:$0xff] }
 0x621   : > { %v2481_v7 = vsel %vm1881_vm6, %v3160_v25, 0.0  ;;  %v2382_v10 = vmul.f32 %v2366_v13, %v2221_v36  ;;  %v2751_v60 = vmin.f32 %v5724_v48, 0.0 }
 0x622   : > { %v2783_v50 = vsub.f32 0.0, %v2767_v49  ;;  %v2897_v6 = vsel %vm1881_vm6, %v2875_v20, 0.0  ;;  %v2877_v0 = vsub.f32 %v2749_v1, %v2855_v43 }
 0x623   : > { %v2898_v8 = vadd.f32 %v2897_v6, %v2896_v55  ;;  %v2426_v39 = vsel %vm2255_vm5, %v2382_v10, 0.0 }
 0x624   : > { %v2810_v56 = vmul.f32 1.442695, %v2783_v50  ;;  %v2901_v63 = vsel %vm1881_vm6, %v2877_v0, 0.0 }
 0x625   : > { %2409 = vadd.xlane.f32.xlu0 %v2408_v62  ;;  %v3721_v46 = vpop.eup %3720  ;;  %v2258_v27 = vpop.xlane.xlu1 %2257 }
 0x626   : > { %v3723_v51 = vpop.eup %3722  ;;  %v2853_v24 = vmul.f32 0.6931472, %v3721_v46  ;;  %3724 = vpow2.f32 %v2810_v56  ;;  %v2304_v26 = vmul.f32 5.0, %v2258_v27 }
 0x627   : > { %v2830_v57 = vadd.f32 1.0, %v3723_v51 }
 0x628   : > { %v2876_v61 = vsub.f32 %v2748_v21, %v2853_v24  ;;  %v3159_v52 = vclamps-f32 %v2304_v26, 5.0 }
 0x629   : > { %3726 = vlog2.f32 %v2830_v57 }
 0x62a   : > { %v2899_v3 = vsel %vm1881_vm6, %v2876_v61, 0.0  ;;  %v2480_v40 = vsel %vm1881_vm6, %v3159_v52, 0.0 }
 0x62b   : > { %v2900_v62 = vadd.f32 %v2899_v3, %v2898_v8  ;;  %v5745_v41 = vadd.f32 %v2481_v7, %v2480_v40 }
 0x62c   : > { %v3725_v30 = vpop.eup %3724 }
 0x62d   : > { %2287 = vadd.xlane.f32.xlu0 %v2286_v35  ;;  %v2902_v31 = vadd.f32 %v2901_v63, %v2900_v62  ;;  %v2831_v19 = vadd.f32 1.0, %v3725_v30 }
 0x62f   : > { %v3727_v54 = vpop.eup %3726  ;;  %3728 = vlog2.f32 %v2831_v19 }
 0x630   : > { %v2857_v9 = vmul.f32 0.6931472, %v3727_v54 }
 0x632   : > { %v2878_v59 = vsub.f32 %v2750_v23, %v2857_v9 }
 0x634   : > { %v2903_v55 = vsel %vm1881_vm6, %v2878_v59, 0.0 }
 0x635   : > { %2418 = vadd.xlane.f32.xlu0 %v2417_v14  ;;  %v3729_v12 = vpop.eup %3728  ;;  %v2904_v17 = vadd.f32 %v2903_v55, %v2902_v31 }
 0x636   : > { %v2859_v15 = vmul.f32 0.6931472, %v3729_v12 }
 0x638   : > { %v2879_v33 = vsub.f32 %v2751_v60, %v2859_v15 }
 0x63a   : > { %v2637_v29 = vpop.xlane.xlu2 %2636  ;;  %v2905_v11 = vsel %vm1881_vm6, %v2879_v33, 0.0 }
 0x63b   : > { %v5759_v28 = vpop.xlane.xlu1 %2388  ;;  %v5763_v44 = vadd.f32 %v2905_v11, %v2904_v17 }
 0x63d   : > { %2296 = vadd.xlane.f32.xlu0 %v2295_v18 }
 0x642   : > { %v5765_v49 = vpop.xlane.xlu2 %2391 }
 0x643   : > { %v5767_v35 = vpop.xlane.xlu1 %2263 }
 0x645   : > { %2427 = vadd.xlane.f32.xlu0 %v2426_v39 }
 0x64a   : > { %v5769_v2 = vpop.xlane.xlu2 %2266 }
 0x64b   : > { %v2720_v20 = vpop.xlane.xlu1 %2719 }
 0x64e   : > { %s3300_s27 = spop %3299 }
 0x64f   : > { %v1922_v24 = vstv %s3300_s27 }
 0x650   : > { %v2181_v47 = vpop.xlane.xlu0 %2180  ;;  %1924 = vst.msk [vmem:[#allocation6] sm:$0x1] %vm1923_vm7, %v1922_v24 }
 0x651   : > { %v2182_v45 = vrot.slane %v2181_v47, 4 }
 0x652   : > { %v2723_v46 = vpop.xlane.xlu2 %2722 }
 0x653   : > { %v2183_v48 = vadd.f32 %v2182_v45, %v2181_v47  ;;  %v2643_v6 = vpop.xlane.xlu1 %2642 }
 0x654   : > { %v5772_v21 = vsub.f32 %v2643_v6, %v2723_v46  ;;  %v2307_v6 = vmul.f32 5.0, %v5769_v2 }
 0x655   : > { %v2184_v50 = vrot.slane %v2183_v48, 2 }
 0x656   : > { %v2771_v27 = vand.u32 2147483647, %v5772_v21 }
 0x657   : > { %v2185_v53 = vadd.f32 %v2184_v50, %v2183_v48  ;;  %v2433_v48 = vmul.f32 5.0, %v5759_v28  ;;  %v2755_v50 = vmin.f32 %v5772_v21, 0.0  ;;  %v2434_v28 = vmul.f32 5.0, %v5765_v49 }
 0x658   : > { %v2714_v38 = vpop.xlane.xlu0 %2713  ;;  %v2787_v34 = vsub.f32 0.0, %v2771_v27 }
 0x659   : > { %v2736_v16 = vsub.f32 %v5718_v42, %v2714_v38  ;;  %v2186_v1 = vrot.slane %v2185_v53, 1 }
 0x65a   : > { %v2818_v0 = vmul.f32 1.442695, %v2787_v34  ;;  %v5778_v61 = vpop.xlane.xlu2 %2272 }
 0x65b   : > { %v2187_v56 = vadd.f32 %v2186_v1, %v2185_v53  ;;  %v2768_v5 = vand.u32 2147483647, %v2736_v16  ;;  %v5775_v57 = vpop.xlane.xlu1 %2397  ;;  %v2752_v55 = vmin.f32 %v2736_v16, 0.0 }
 0x65d   : > { %3301 = vpush %v2187_v56  ;;  %v2784_v37 = vsub.f32 0.0, %v2768_v5 }
 0x65f   : > { %v2812_v51 = vmul.f32 1.442695, %v2784_v37 }
 0x660   : > { %v2386_v43 = vpop.xlane.xlu0 %2385 }
 0x661   : > { %3730 = vpow2.f32 %v2812_v51  ;;  %v2432_v38 = vmul.f32 5.0, %v2386_v43  ;;  %v3176_v51 = vclamps-f32 %v2433_v48, 5.0 }
 0x662   : > { %3732 = vpow2.f32 %v2818_v0  ;;  %v5782_v30 = vpop.xlane.xlu2 %2403 }
 0x663   : > { %v5780_v7 = vpop.xlane.xlu1 %2275  ;;  %v3175_v21 = vclamps-f32 %v2432_v38, 5.0 }
 0x667   : > { %v3731_v4 = vpop.eup %3730 }
 0x668   : > { %v2717_v26 = vpop.xlane.xlu0 %2716  ;;  %v2832_v32 = vadd.f32 1.0, %v3731_v4  ;;  %v3733_v62 = vpop.eup %3732  ;;  %v3177_v4 = vclamps-f32 %v2434_v28, 5.0 }
 0x669   : > { %v2737_v42 = vsub.f32 %v2637_v29, %v2717_v26  ;;  %v2835_v54 = vadd.f32 1.0, %v3733_v62 }
 0x66a   : > { %v5786_v10 = vpop.xlane.xlu2 %2281 }
 0x66b   : > { %v2769_v25 = vand.u32 2147483647, %v2737_v42  ;;  %v5784_v23 = vpop.xlane.xlu1 %2406  ;;  %v2753_v29 = vmin.f32 %v2737_v42, 0.0  ;;  %v2312_v48 = vmul.f32 5.0, %v5786_v10 }
 0x66d   : > { %v2785_v52 = vsub.f32 0.0, %v2769_v25 }
 0x66f   : > { %v2814_v8 = vmul.f32 1.442695, %v2785_v52  ;;  %v2523_v52 = vsel %vm1881_vm6, %v3176_v51, 0.0 }
 0x670   : > { %v2640_v14 = vpop.xlane.xlu0 %2639 }
 0x671   : > { %3734 = vpow2.f32 %v2814_v8  ;;  %v2738_v3 = vsub.f32 %v2640_v14, %v2720_v20  ;;  %v2306_v20 = vmul.f32 5.0, %v5767_v35 }
 0x672   : > { %3736 = vlog2.f32 %v2832_v32  ;;  %v5796_v46 = vpop.xlane.xlu2 %2412 }
 0x673   : > { %v2770_v40 = vand.u32 2147483647, %v2738_v3  ;;  %v5788_v17 = vpop.xlane.xlu1 %2284  ;;  %v2754_v16 = vmin.f32 %v2738_v3, 0.0  ;;  %v3161_v24 = vclamps-f32 %v2306_v20, 5.0  ;;  %v2522_v3 = vsel %vm1881_vm6, %v3175_v21, 0.0 }
 0x675   : > { %v2786_v58 = vsub.f32 0.0, %v2770_v40  ;;  %v2483_v14 = vsel %vm1881_vm6, %v3161_v24, 0.0  ;;  %v2309_v40 = vmul.f32 5.0, %v5778_v61 }
 0x677   : > { %v3735_v63 = vpop.eup %3734  ;;  %v2816_v22 = vmul.f32 1.442695, %v2786_v58 }
 0x678   : > { %v2833_v31 = vadd.f32 1.0, %v3735_v63  ;;  %v2395_v19 = vpop.xlane.xlu0 %2394  ;;  %v3737_v9 = vpop.eup %3736  ;;  %v2436_v63 = vmul.f32 5.0, %v5775_v57 }
 0x679   : > { %3738 = vpow2.f32 %v2816_v22  ;;  %v2861_v59 = vmul.f32 0.6931472, %v3737_v9  ;;  %v2435_v25 = vmul.f32 5.0, %v2395_v19  ;;  %v2525_v22 = vsel %vm1881_vm6, %v3177_v4, 0.0 }
 0x67a   : > { %3740 = vlog2.f32 %v2833_v31  ;;  %v2484_v31 = vadd.f32 %v2483_v14, %v5745_v41  ;;  %v2524_v19 = vadd.f32 %v2523_v52, %v2522_v3 }
 0x67b   : > { %3742 = vlog2.f32 %v2835_v54  ;;  %v2880_v15 = vsub.f32 %v2752_v55, %v2861_v59  ;;  %v5801_v42 = vpop.xlane.xlu1 %2415  ;;  %v3178_v62 = vclamps-f32 %v2435_v25, 5.0  ;;  %v2291_v54 = vpop.xlane.xlu2 %2290  ;;  %v2310_v59 = vmul.f32 5.0, %v5780_v7 }
 0x67c   : > { %v2442_v14 = vmul.f32 5.0, %v5801_v42 }
 0x67d   : > { %v2907_v11 = vsel %vm1881_vm6, %v2880_v15, 0.0  ;;  %v2527_v61 = vsel %vm1881_vm6, %v3178_v62, 0.0  ;;  %v3165_v41 = vclamps-f32 %v2310_v59, 5.0 }
 0x67e   : > { %v2908_v5 = vadd.f32 %v2907_v11, %v5763_v44  ;;  %v3162_v44 = vclamps-f32 %v2307_v6, 5.0  ;;  %v2438_v11 = vmul.f32 5.0, %v5782_v30  ;;  %v3167_v6 = vclamps-f32 %v2312_v48, 5.0 }
 0x67f   : > { %v3739_v18 = vpop.eup %3738  ;;  %v2313_v30 = vmul.f32 5.0, %v5788_v17 }
 0x680   : > { %v3741_v36 = vpop.eup %3740  ;;  %v2834_v13 = vadd.f32 1.0, %v3739_v18  ;;  %v2270_v12 = vpop.xlane.xlu0 %2269  ;;  %v2485_v58 = vsel %vm1881_vm6, %v3162_v44, 0.0  ;;  %v3164_v18 = vclamps-f32 %v2309_v40, 5.0  ;;  %v3181_v38 = vclamps-f32 %v2438_v11, 5.0 }
 0x681   : > { %v2863_v60 = vmul.f32 0.6931472, %v3741_v36  ;;  %v3743_v33 = vpop.eup %3742  ;;  %v2308_v26 = vmul.f32 5.0, %v2270_v12  ;;  %v3179_v12 = vclamps-f32 %v2436_v63, 5.0  ;;  %v2441_v44 = vmul.f32 5.0, %v5796_v46 }
 0x682   : > { %3744 = vlog2.f32 %v2834_v13  ;;  %v2867_v47 = vmul.f32 0.6931472, %v3743_v33  ;;  %v2486_v13 = vadd.f32 %v2485_v58, %v2484_v31  ;;  %v2489_v33 = vsel %vm1881_vm6, %v3164_v18, 0.0 }
 0x683   : > { %v2881_v39 = vsub.f32 %v2753_v29, %v2863_v60  ;;  %v3163_v32 = vclamps-f32 %v2308_v26, 5.0  ;;  %v2526_v60 = vadd.f32 %v2525_v22, %v2524_v19  ;;  %v2294_v29 = vpop.xlane.xlu1 %2293  ;;  %v2533_v10 = vsel %vm1881_vm6, %v3181_v38, 0.0 }
 0x684   : > { %v2883_v27 = vsub.f32 %v2755_v50, %v2867_v47  ;;  %v2491_v50 = vsel %vm1881_vm6, %v3165_v41, 0.0 }
 0x685   : > { %v2909_v56 = vsel %vm1881_vm6, %v2881_v39, 0.0  ;;  %v2487_v9 = vsel %vm1881_vm6, %v3163_v32, 0.0  ;;  %v2528_v47 = vadd.f32 %v2527_v61, %v2526_v60  ;;  %v2316_v32 = vmul.f32 5.0, %v2294_v29 }
 0x686   : > { %v2910_v35 = vadd.f32 %v2909_v56, %v2908_v5  ;;  %v2913_v2 = vsel %vm1881_vm6, %v2883_v27, 0.0  ;;  %v2488_v15 = vadd.f32 %v2487_v9, %v2486_v13  ;;  %v2422_v56 = vpop.xlane.xlu2 %2421 }
 0x687   : > { %v3171_v18 = vclamps-f32 %v2316_v32, 5.0  ;;  %v2444_v59 = vmul.f32 5.0, %v2422_v56 }
 0x688   : > { %v3745_v45 = vpop.eup %3744  ;;  %v2401_v53 = vpop.xlane.xlu0 %2400  ;;  %v2490_v20 = vadd.f32 %v2489_v33, %v2488_v15 }
 0x689   : > { %v2865_v1 = vmul.f32 0.6931472, %v3745_v45  ;;  %v2437_v36 = vmul.f32 5.0, %v2401_v53  ;;  %v2529_v45 = vsel %vm1881_vm6, %v3179_v12, 0.0  ;;  %v3187_v29 = vclamps-f32 %v2444_v59, 5.0 }
 0x68a   : > { %v2492_v27 = vadd.f32 %v2491_v50, %v2490_v20 }
 0x68b   : > { %v2882_v37 = vsub.f32 %v2754_v16, %v2865_v1  ;;  %v3180_v39 = vclamps-f32 %v2437_v36, 5.0  ;;  %v2439_v16 = vmul.f32 5.0, %v5784_v23  ;;  %v2530_v1 = vadd.f32 %v2529_v45, %v2528_v47  ;;  %v2425_v26 = vpop.xlane.xlu1 %2424 }
 0x68c   : > { %v3168_v23 = vclamps-f32 %v2313_v30, 5.0  ;;  %v2545_v38 = vsel %vm1881_vm6, %v3187_v29, 0.0 }
 0x68d   : > { %v2911_v43 = vsel %vm1881_vm6, %v2882_v37, 0.0  ;;  %v2531_v53 = vsel %vm1881_vm6, %v3180_v39, 0.0  ;;  %v2445_v39 = vmul.f32 5.0, %v2425_v26 }
 0x68e   : > { %s3302_s28 = spop %3301  ;;  %v2912_v34 = vadd.f32 %v2911_v43, %v2910_v35  ;;  %v2532_v51 = vadd.f32 %v2531_v53, %v2530_v1  ;;  %v3182_v35 = vclamps-f32 %v2439_v16, 5.0  ;;  %v2495_v43 = vsel %vm1881_vm6, %v3167_v6, 0.0  ;;  %v2300_v58 = vpop.xlane.xlu2 %2299 }
 0x68f   : > { %v2189_v0 = vstv %s3302_s28  ;;  %v2497_v4 = vsel %vm1881_vm6, %v3168_v23, 0.0  ;;  %v2318_v61 = vmul.f32 5.0, %v2300_v58  ;;  %v3188_v16 = vclamps-f32 %v2445_v39, 5.0 }
 0x690   : > { %2190 = vst.msk [vmem:[#allocation8] sm:$0x1] %vm1923_vm7, %v2189_v0  ;;  %v2279_v49 = vpop.xlane.xlu0 %2278  ;;  %v2914_v8 = vadd.f32 %v2913_v2, %v2912_v34  ;;  %v2534_v25 = vadd.f32 %v2533_v10, %v2532_v51  ;;  %v2535_v0 = vsel %vm1881_vm6, %v3182_v35, 0.0  ;;  %v2315_v2 = vmul.f32 5.0, %v2291_v54 }
 0x691   : > { %v2311_v55 = vmul.f32 5.0, %v2279_v49  ;;  %v3185_v54 = vclamps-f32 %v2442_v14, 5.0  ;;  %v3173_v47 = vclamps-f32 %v2318_v61, 5.0 }
 0x692   : > { %2915 = vadd.xlane.f32.xlu2 %v2914_v8  ;;  %v3184_v8 = vclamps-f32 %v2441_v44, 5.0  ;;  %v2536_v3 = vadd.f32 %v2535_v0, %v2534_v25  ;;  %v3170_v46 = vclamps-f32 %v2315_v2, 5.0 }
 0x693   : > { %v3166_v7 = vclamps-f32 %v2311_v55, 5.0  ;;  %v2303_v36 = vpop.xlane.xlu1 %2302  ;;  %v2541_v55 = vsel %vm1881_vm6, %v3185_v54, 0.0  ;;  %v2507_v56 = vsel %vm1881_vm6, %v3173_v47, 0.0 }
 0x694   : > { %v2539_v19 = vsel %vm1881_vm6, %v3184_v8, 0.0  ;;  %v2501_v13 = vsel %vm1881_vm6, %v3170_v46, 0.0  ;;  %v2319_v60 = vmul.f32 5.0, %v2303_v36 }
 0x695   : > { %v2493_v5 = vsel %vm1881_vm6, %v3166_v7, 0.0 }
 0x696   : > { %v2494_v21 = vadd.f32 %v2493_v5, %v2492_v27  ;;  %v2431_v7 = vpop.xlane.xlu2 %2430  ;;  %v3174_v20 = vclamps-f32 %v2319_v60, 5.0 }
 0x697   : > { %v2447_v5 = vmul.f32 5.0, %v2431_v7 }
 0x698   : > { %v2410_v57 = vpop.xlane.xlu0 %2409  ;;  %v2496_v52 = vadd.f32 %v2495_v43, %v2494_v21  ;;  %v2509_v30 = vsel %vm1881_vm6, %v3174_v20, 0.0 }
 0x699   : > { %v2440_v37 = vmul.f32 5.0, %v2410_v57  ;;  %v2503_v57 = vsel %vm1881_vm6, %v3171_v18, 0.0  ;;  %v3190_v35 = vclamps-f32 %v2447_v5, 5.0 }
 0x69a   : > { %v2498_v22 = vadd.f32 %v2497_v4, %v2496_v52 }
 0x69b   : > { %v3183_v34 = vclamps-f32 %v2440_v37, 5.0  ;;  %v2551_v23 = vsel %vm1881_vm6, %v3190_v35, 0.0 }
 0x69d   : > { %v2537_v49 = vsel %vm1881_vm6, %v3183_v34, 0.0 }
 0x69e   : > { %v2538_v31 = vadd.f32 %v2537_v49, %v2536_v3 }
 0x6a0   : > { %v2288_v28 = vpop.xlane.xlu0 %2287  ;;  %v2540_v12 = vadd.f32 %v2539_v19, %v2538_v31 }
 0x6a1   : > { %v2314_v24 = vmul.f32 5.0, %v2288_v28  ;;  %v2547_v28 = vsel %vm1881_vm6, %v3188_v16, 0.0 }
 0x6a2   : > { %v2542_v45 = vadd.f32 %v2541_v55, %v2540_v12 }
 0x6a3   : > { %v3169_v17 = vclamps-f32 %v2314_v24, 5.0 }
 0x6a5   : > { %v2499_v62 = vsel %vm1881_vm6, %v3169_v17, 0.0 }
 0x6a6   : > { %v2500_v9 = vadd.f32 %v2499_v62, %v2498_v22 }
 0x6a8   : > { %v2419_v40 = vpop.xlane.xlu0 %2418  ;;  %v2502_v15 = vadd.f32 %v2501_v13, %v2500_v9 }
 0x6a9   : > { %v2443_v63 = vmul.f32 5.0, %v2419_v40 }
 0x6aa   : > { %v2504_v50 = vadd.f32 %v2503_v57, %v2502_v15 }
 0x6ab   : > { %v3186_v42 = vclamps-f32 %v2443_v63, 5.0 }
 0x6ad   : > { %v2543_v41 = vsel %vm1881_vm6, %v3186_v42, 0.0 }
 0x6ae   : > { %v2544_v53 = vadd.f32 %v2543_v41, %v2542_v45 }
 0x6b0   : > { %v2297_v33 = vpop.xlane.xlu0 %2296  ;;  %v2546_v37 = vadd.f32 %v2545_v38, %v2544_v53 }
 0x6b1   : > { %v2317_v11 = vmul.f32 5.0, %v2297_v33 }
 0x6b2   : > { %v2548_v26 = vadd.f32 %v2547_v28, %v2546_v37 }
 0x6b3   : > { %v3172_v48 = vclamps-f32 %v2317_v11, 5.0 }
 0x6b5   : > { %v2505_v1 = vsel %vm1881_vm6, %v3172_v48, 0.0 }
 0x6b6   : > { %v2506_v6 = vadd.f32 %v2505_v1, %v2504_v50 }
 0x6b8   : > { %v2428_v27 = vpop.xlane.xlu0 %2427  ;;  %v2508_v51 = vadd.f32 %v2507_v56, %v2506_v6 }
 0x6b9   : > { %v2446_v10 = vmul.f32 5.0, %v2428_v27 }
 0x6ba   : > { %v2510_v24 = vadd.f32 %v2509_v30, %v2508_v51 }
 0x6bb   : > { %v3189_v21 = vclamps-f32 %v2446_v10, 5.0 }
 0x6bc   : > { %2511 = vadd.xlane.f32.xlu0 %v2510_v24 }
 0x6bd   : > { %v2549_v43 = vsel %vm1881_vm6, %v3189_v21, 0.0 }
 0x6be   : > { %v2550_v34 = vadd.f32 %v2549_v43, %v2548_v26 }
 0x6c0   : > { %v2552_v44 = vadd.f32 %v2551_v23, %v2550_v34 }
 0x6c2   : > { %2553 = vadd.xlane.f32.xlu1 %v2552_v44 }
 0x705   : > { %v2916_v25 = vpop.xlane.xlu2 %2915 }
 0x706   : > { %v2917_v0 = vrot.slane %v2916_v25, 4 }
 0x708   : > { %v2918_v52 = vadd.f32 %v2917_v0, %v2916_v25 }
 0x70a   : > { %v2919_v8 = vrot.slane %v2918_v52, 2 }
 0x70c   : > { %v2920_v62 = vadd.f32 %v2919_v8, %v2918_v52 }
 0x70e   : > { %v2921_v31 = vrot.slane %v2920_v62, 1 }
 0x710   : > { %v2922_v9 = vadd.f32 %v2921_v31, %v2920_v62 }
 0x72f   : > { %v2512_v17 = vpop.xlane.xlu0 %2511 }
 0x730   : > { %v2513_v2 = vrot.slane %v2512_v17, 4 }
 0x732   : > { %v2514_v4 = vadd.f32 %v2513_v2, %v2512_v17 }
 0x734   : > { %v2515_v49 = vrot.slane %v2514_v4, 2 }
 0x735   : > { %v2554_v14 = vpop.xlane.xlu1 %2553 }
 0x736   : > { %v2516_v3 = vadd.f32 %v2515_v49, %v2514_v4  ;;  %v2555_v32 = vrot.slane %v2554_v14, 4 }
 0x738   : > { %v2556_v40 = vadd.f32 %v2555_v32, %v2554_v14  ;;  %v2517_v58 = vrot.slane %v2516_v3, 1 }
 0x73a   : > { %v2557_v46 = vrot.slane %v2556_v40, 2  ;;  %v2518_v63 = vadd.f32 %v2517_v58, %v2516_v3 }
 0x73c   : > { %v2558_v22 = vadd.f32 %v2557_v46, %v2556_v40  ;;  %3303 = vpush %v2518_v63 }
 0x73e   : > { %v2559_v19 = vrot.slane %v2558_v22, 1 }
 0x740   : > { %v2560_v54 = vadd.f32 %v2559_v19, %v2558_v22 }
 0x742   : > { %3305 = vpush %v2560_v54 }
 0x743   : > { %3307 = vpush %v2922_v9 }
 0x76d   : > { %s3304_s16 = spop %3303 }
 0x76e   : > { %v2520_v18 = vstv %s3304_s16 }
 0x76f   : > { %2521 = vst.msk [vmem:[#allocation10] sm:$0x1] %vm1923_vm7, %v2520_v18 }
 0x773   : > { %s3306_s29 = spop %3305 }
 0x774   : > { %v2562_v59 = vstv %s3306_s29  ;;  %s3308_s30 = spop %3307 }
 0x775   : > { %2563 = vst.msk [vmem:[#allocation11] sm:$0x1] %vm1923_vm7, %v2562_v59  ;;  %v2924_v36 = vstv %s3308_s30 }
 0x776   : > { %2925 = vst.msk [vmem:[#allocation13] sm:$0x1] %vm1923_vm7, %v2924_v36 }
 0x777 PF: > { %p3329_p11 = scmp.eq.s32.totalorder %s3997_s22, 4  ;;  %s3921_s13 = smov [#allocation8]  }
 0x778   : > { %s2944_s14 = sshll.u32 %s3921_s13, 4  ;;  %s2946_s18 = sshll.u32 %s5898_s9, 4  ;;  %s2945_s14 = int_to_ptr.vmem [resolvable:$true] %s2944_s14  ;;  %s2947_s18 = int_to_ptr.hbm [resolvable:$true] %s2946_s18 }
 0x779   : > { %3312 = dma.vmem_to_hbm [thread:$0]  (%p3329_p11), %s2945_s14, 16, %s2947_s18, [#allocation9]  }
 0x77a   : > { %s2970_s23 = sshll.u32 %s5900_s11, 4  ;;  %s3922_s24 = smov [#allocation11]   ;;  %s2971_s23 = int_to_ptr.hbm [resolvable:$true] %s2970_s23 }
 0x77b   : > { %s2968_s25 = sshll.u32 %s3922_s24, 4  ;;  %s3923_s26 = smov [#allocation6]   ;;  %s2969_s25 = int_to_ptr.vmem [resolvable:$true] %s2968_s25 }
 0x77c   : > { %3316 = dma.vmem_to_hbm [thread:$0]  (%p3329_p11), %s2969_s25, 16, %s2971_s23, [#allocation12]  }
 0x77d   : > { %s2932_s27 = sshll.u32 %s3923_s26, 4  ;;  %s2934_s29 = sshll.u32 %s5897_s8, 4  ;;  %s2933_s27 = int_to_ptr.vmem [resolvable:$true] %s2932_s27  ;;  %s2935_s29 = int_to_ptr.hbm [resolvable:$true] %s2934_s29 }
 0x77e   : > { %3310 = dma.vmem_to_hbm [thread:$0]  (%p3329_p11), %s2933_s27, 16, %s2935_s29, [#allocation7]  }
 0x77f   : > { %s2958_s14 = sshll.u32 %s5899_s10, 4  ;;  %s3924_s15 = smov [#allocation10]   ;;  %s2959_s14 = int_to_ptr.hbm [resolvable:$true] %s2958_s14 }
 0x780   : > { %s2956_s17 = sshll.u32 %s3924_s15, 4  ;;  %s3925_s18 = smov [#allocation13]   ;;  %s2957_s17 = int_to_ptr.vmem [resolvable:$true] %s2956_s17 }
 0x781   : > { %3314 = dma.vmem_to_hbm [thread:$0]  (%p3329_p11), %s2957_s17, 16, %s2959_s14, [#allocation9]  }
 0x782   : > { %s2980_s19 = sshll.u32 %s3925_s18, 4  ;;  %s2982_s24 = sshll.u32 %s5901_s12, 4  ;;  %s2981_s19 = int_to_ptr.vmem [resolvable:$true] %s2980_s19  ;;  %s2983_s24 = int_to_ptr.hbm [resolvable:$true] %s2982_s24 }
 0x783   : > { %3318 = dma.vmem_to_hbm [thread:$0]  (%p3329_p11), %s2981_s19, 16, %s2983_s24, [#allocation12]  }
 0x784   : > { %3902 = dma.done.wait (%p3329_p11), [#allocation7], 16  }
 0x785   : > { %3904 = vsyncadd (%p3329_p11), [#allocation7], 4294967280 }
 0x786   : > { %3906 = dma.done.wait (%p3329_p11), [#allocation9], 32  }
 0x787   : > { %3908 = vsyncadd (%p3329_p11), [#allocation9], 4294967264 }
 0x788   : > { %3910 = dma.done.wait (%p3329_p11), [#allocation12], 32  }
 0x789   : > { %3912 = vsyncadd (%p3329_p11), [#allocation12], 4294967264 }
 0x78a PF: > { %s26_s21 = sadd.s32 1, %s3915_s21  }
 0x78b   : > { %p23_p12 = scmp.ge.s32.totalorder %s26_s21, 7  }
 0x78d   :  { %25 = sbr.rel (!%p23_p12) target bundleno = 3 (0x3), region = 130 }
 0x792   :  { %3016 = vsyncpa [#allocation7], 1 }
 0x793   :  { %3018 = vsyncpa [#allocation7 + $0x1], 1 }
 0x794   :  { %3019 = vsyncpa [#allocation9], 1 }
 0x795   :  { %3020 = vsyncpa [#allocation12], 1 }

</bundles_post_ra>
